<compile_context>
chip_gen: v7x
topology: tpu7x:2x2x1
jax: 0.10.0
libtpu: 0.0.40
codegen_flags: <defaults>
</compile_context>

<pallas_src>
import functools

import numpy as np

import jax
import jax.numpy as jnp
from jax.experimental import pallas as pl
from jax.experimental.pallas import tpu as pltpu

KW = 4            # kernel_size
PADW = 2          # int(ceil((4 - 1) / 2))
BN_EPS = 1e-5
NEG_SLOPE = 0.2
OUT_LANES = 128   # lane-dense width of the final output slab


def _pad8(m):
    return ((m + 7) // 8) * 8


# ------------------------------ fused kernel ------------------------------ #
def _fused_disc_kernel(*refs, plan):
    """Single-launch forward pass of the whole discriminator.

    refs = [p0, w0, (s1, w1), (s2, w2), ..., aux, out]
      p0  : (M0_pad, KW*KW*Cin0)   host-im2col patches of the raw input
      wL  : (KW*KW*CinL, CoutL)    pre-reshaped conv weights
      sL  : (16, ML_pad, M(L-1)_pad) 0/1 per-tap row-selection matrices
      aux : (L, 8, 128)            rows: 0 = bias, 1 = gamma, 2 = beta
      out : (Mlast_pad, 128)       lane-dense final slab (channel in lane 0)
    """
    n_layers = len(plan)
    p0_ref, w0_ref = refs[0], refs[1]
    aux_ref = refs[2 + 2 * (n_layers - 1)]
    o_ref = refs[3 + 2 * (n_layers - 1)]

    def epilogue(x, l):
        cfg = plan[l]
        cout = cfg["cout"]
        aux = aux_ref[l]                      # (8, 128) -- single packed DMA
        if cfg["bn"]:
            # BatchNorm2d, training mode: biased stats over the true M rows
            # (== N*H*W).  Conv bias is dropped: BN cancels it exactly.
            gamma = aux[1:2, :cout]
            beta = aux[2:3, :cout]
            m_true = cfg["m_out_true"]
            inv_m = 1.0 / m_true
            # pad rows of x are exactly 0 (no bias), so the plain sum is the
            # true-row sum; the variance pass masks them explicitly.
            mean = jnp.sum(x, axis=0, keepdims=True) * inv_m
            diff = x - mean
            ridx = jax.lax.broadcasted_iota(jnp.int32, x.shape, 0)
            diff_m = jnp.where(ridx < m_true, diff, 0.0)
            var = jnp.sum(diff_m * diff_m, axis=0, keepdims=True) * inv_m
            x = diff * jax.lax.rsqrt(var + BN_EPS) * gamma + beta
        else:
            x = x + aux[0:1, :cout]           # conv bias (non-BN layers only)
        if cfg["act"]:
            x = jnp.where(x >= 0.0, x, NEG_SLOPE * x)   # LeakyReLU(0.2)
        return x

    # ---- layer 0: plain matmul on the host-built patch matrix (MXU) ----
    a = jnp.dot(p0_ref[...], w0_ref[...], preferred_element_type=jnp.float32)
    a = epilogue(a, 0)

    # ---- layers 1..L-1: in-VMEM im2col via per-tap selection matmuls ----
    for l in range(1, n_layers):
        cfg = plan[l]
        s_ref = refs[2 * l]
        w_ref = refs[2 * l + 1]
        cin = cfg["cin"]
        acc = None
        for t in range(KW * KW):
            # gather the input rows this tap needs (zero rows == conv padding)
            g = jnp.dot(s_ref[t], a, preferred_element_type=jnp.float32)
            ct = jnp.dot(g, w_ref[t * cin:(t + 1) * cin, :],
                         preferred_element_type=jnp.float32)
            acc = ct if acc is None else acc + ct
        a = epilogue(acc, l)

    # ---- lane-dense final store: channel 0 lives in lane 0 of a 128 slab ----
    col = jax.lax.broadcasted_iota(jnp.int32, o_ref.shape, 1)
    o_ref[...] = jnp.where(col < a.shape[1], a, 0.0)


# ----------------------- model definition / params ------------------------ #
def make_layer_configs(input_nc, ndf=64, n_layers=3):
    """Mirror NLayerDiscriminator.__init__ (use_sigmoid=False)."""
    cfgs = [dict(cin=input_nc, cout=ndf, stride=2, bn=False, act=True)]
    nf = ndf
    for _ in range(1, n_layers):
        nf_prev, nf = nf, min(nf * 2, 512)
        cfgs.append(dict(cin=nf_prev, cout=nf, stride=2, bn=True, act=True))
    nf_prev, nf = nf, min(nf * 2, 512)
    cfgs.append(dict(cin=nf_prev, cout=nf, stride=1, bn=True, act=True))
    cfgs.append(dict(cin=nf, cout=1, stride=1, bn=False, act=False))
    return cfgs


def init_params(key, cfgs):
    params = []
    for cfg in cfgs:
        key, kw_, kb_ = jax.random.split(key, 3)
        w = 0.02 * jax.random.normal(kw_, (cfg["cout"], cfg["cin"], KW, KW),
                                     jnp.float32)
        b = 0.01 * jax.random.normal(kb_, (cfg["cout"],), jnp.float32)
        gamma = jnp.ones((cfg["cout"],), jnp.float32)    # BN default init
        beta = jnp.zeros((cfg["cout"],), jnp.float32)
        params.append((w, b, gamma, beta))
    return params


def build_plan(cfgs, n, h, w):
    """Static per-layer metadata (spatial sizes, padded M extents)."""
    plan = []
    hh, ww = h, w
    for cfg in cfgs:
        ho = (hh + 2 * PADW - KW) // cfg["stride"] + 1
        wo = (ww + 2 * PADW - KW) // cfg["stride"] + 1
        m_out_true = n * ho * wo
        plan.append(dict(cfg, n=n, h_in=hh, w_in=ww, ho=ho, wo=wo,
                         m_out_true=m_out_true, m_out_pad=_pad8(m_out_true)))
        hh, ww = ho, wo
    return tuple(plan)


# ----------------------- constant operand preparation ---------------------- #
def _build_selection_matrices(plan):
    """Per-tap 0/1 row-selection matrices (numpy, init-time only).

    S[t][rr, r] = 1 iff output row rr reads input row r for kernel tap t.
    Zero rows encode the conv's spatial zero-padding; zero columns drop the
    previous layer's M-padding rows.
    """
    s_list = []
    for l in range(1, len(plan)):
        p, prev = plan[l], plan[l - 1]
        m_in_pad = prev["m_out_pad"]
        h, w, s = p["h_in"], p["w_in"], p["stride"]
        sel = np.zeros((KW * KW, p["m_out_pad"], m_in_pad), np.float32)
        for t in range(KW * KW):
            i, j = divmod(t, KW)
            for nn in range(p["n"]):
                for oh in range(p["ho"]):
                    hi = s * oh - PADW + i
                    if not (0 <= hi < h):
                        continue
                    for ow in range(p["wo"]):
                        wi = s * ow - PADW + j
                        if 0 <= wi < w:
                            sel[t,
                                nn * p["ho"] * p["wo"] + oh * p["wo"] + ow,
                                nn * h * w + hi * w + wi] = 1.0
        s_list.append(jnp.asarray(sel))
    return s_list


def build_operands(plan, params):
    """Pre-reshape weights, build selection matrices, pack bias/gamma/beta."""
    # weights: (Cout, Cin, kh, kw) -> (kh*kw*Cin, Cout), tap-major rows.
    w_mats = []
    for (w, _, _, _), cfg in zip(params, plan):
        w_mats.append(jnp.transpose(w, (2, 3, 1, 0))
                      .reshape(KW * KW * cfg["cin"], cfg["cout"]))

    s_mats = _build_selection_matrices(plan)

    # single packed per-channel operand: rows 0=bias, 1=gamma, 2=beta.
    aux = np.zeros((len(plan), 8, OUT_LANES), np.float32)
    for l, ((_, b, g, be), cfg) in enumerate(zip(params, plan)):
        c = cfg["cout"]
        aux[l, 0, :c] = np.asarray(b)
        aux[l, 1, :c] = np.asarray(g)
        aux[l, 2, :c] = np.asarray(be)
    aux = jnp.asarray(aux)

    ops = [w_mats[0]]
    for l in range(1, len(plan)):
        ops += [s_mats[l - 1], w_mats[l]]
    ops.append(aux)
    return ops


# ------------------------------ host wrapper ------------------------------- #
def _im2col_first(x, p0cfg):
    """Host-side im2col for the first layer only (raw input, ~40 KB).
    Column order is tap-major (kh, kw, c), matching the weight reshape."""
    n, c, h, w = x.shape
    s, ho, wo = p0cfg["stride"], p0cfg["ho"], p0cfg["wo"]
    xp = jnp.pad(x, ((0, 0), (0, 0), (PADW, PADW), (PADW, PADW)))
    cols = [xp[:, :, i:i + s * ho:s, j:j + s * wo:s]
            for i in range(KW) for j in range(KW)]
    p = jnp.stack(cols, axis=1)                          # (N, 16, C, Ho, Wo)
    p = p.transpose(0, 3, 4, 1, 2).reshape(n * ho * wo, KW * KW * c)
    pad_rows = p0cfg["m_out_pad"] - p0cfg["m_out_true"]
    if pad_rows:
        p = jnp.concatenate(
            [p, jnp.zeros((pad_rows, p.shape[1]), p.dtype)], axis=0)
    return p


def make_forward(plan, operands):
    assert plan[-1]["cout"] == 1          # module always ends in Conv(nf, 1)
    n_layers = len(plan)
    n_inputs = 3 + 2 * (n_layers - 1)     # p0, w0, (s,w)*... , aux
    m_final_pad = plan[-1]["m_out_pad"]

    call = pl.pallas_call(
        functools.partial(_fused_disc_kernel, plan=plan),
        out_shape=jax.ShapeDtypeStruct((m_final_pad, OUT_LANES), jnp.float32),
        # Tiny problem: whole net's operands + activations fit in VMEM, no grid.
        in_specs=[pl.BlockSpec(memory_space=pltpu.MemorySpace.VMEM)] * n_inputs,
        out_specs=pl.BlockSpec(memory_space=pltpu.MemorySpace.VMEM),
    )

    @jax.jit
    def forward(x):
        p0 = _im2col_first(x, plan[0])
        out = call(p0, *operands)                        # single TPU launch
        last = plan[-1]
        y = out[:last["m_out_true"], 0].reshape(x.shape[0],
                                                last["ho"], last["wo"])
        return y[:, None, :, :]                          # back to NCHW
    return forward


# --------------------------- pure-JAX reference ---------------------------- #
def reference_forward(x, cfgs, params):
    for cfg, (w, b, g, be) in zip(cfgs, params):
        y = jax.lax.conv_general_dilated(
            x, w, window_strides=(cfg["stride"], cfg["stride"]),
            padding=[(PADW, PADW), (PADW, PADW)],
            dimension_numbers=("NCHW", "OIHW", "NCHW"))
        y = y + b[None, :, None, None]
        if cfg["bn"]:
            mean = jnp.mean(y, axis=(0, 2, 3), keepdims=True)
            var = jnp.mean((y - mean) ** 2, axis=(0, 2, 3), keepdims=True)
            y = (y - mean) * jax.lax.rsqrt(var + BN_EPS)
            y = y * g[None, :, None, None] + be[None, :, None, None]
        if cfg["act"]:
            y = jnp.where(y >= 0.0, y, NEG_SLOPE * y)
        x = y
    return x


# --------------------------------- main ------------------------------------ #
if __name__ == "__main__":
    key = jax.random.PRNGKey(0)
    k_in, k_par = jax.random.split(key)

    # Small, module-consistent shapes: batch=2, input_nc=4, spatial 16x16,
    # ndf=8, n_layers=3 -> channels 4 -> 8 -> 16 -> 32 -> 64 -> 1.
    input_nc, ndf, n_layers = 4, 8, 3
    x = jax.random.normal(k_in, (2, input_nc, 16, 16), jnp.float32)

    cfgs = make_layer_configs(input_nc, ndf=ndf, n_layers=n_layers)
    params = init_params(k_par, cfgs)

    plan = build_plan(cfgs, n=x.shape[0], h=x.shape[2], w=x.shape[3])
    operands = build_operands(plan, params)
    forward = make_forward(plan, operands)

    out = jax.block_until_ready(forward(x))

    # 16x16 -> 9 -> 5 -> 3 -> 4 -> 5 spatial; final channels = 1.
    assert out.shape == (2, 1, 5, 5), out.shape
    assert bool(jnp.all(jnp.isfinite(out)))

    ref = jax.block_until_ready(reference_forward(x, cfgs, params))
    assert jnp.allclose(out, ref, atol=5e-2, rtol=5e-2), (
        float(jnp.max(jnp.abs(out - ref))))

    print("KERNEL_OK")
</pallas_src>

<mosaic_0001>
module attributes {stable_mosaic.version = 11 : i64} {
  func.func @_fused_disc_kernel(%arg0: memref<168x64xf32, #tpu.memory_space<vmem>>, %arg1: memref<64x8xf32, #tpu.memory_space<vmem>>, %arg2: memref<16x56x168xf32, #tpu.memory_space<vmem>>, %arg3: memref<128x16xf32, #tpu.memory_space<vmem>>, %arg4: memref<16x24x56xf32, #tpu.memory_space<vmem>>, %arg5: memref<256x32xf32, #tpu.memory_space<vmem>>, %arg6: memref<16x32x24xf32, #tpu.memory_space<vmem>>, %arg7: memref<512x64xf32, #tpu.memory_space<vmem>>, %arg8: memref<16x56x32xf32, #tpu.memory_space<vmem>>, %arg9: memref<1024x1xf32, #tpu.memory_space<vmem>>, %arg10: memref<5x8x128xf32, #tpu.memory_space<vmem>>, %arg11: memref<56x128xf32, #tpu.memory_space<vmem>>) attributes {dimension_semantics = [], scalar_prefetch = 0 : i64, scratch_operands = 0 : i64, tpu.core_type = #tpu.core_type<tc>} {
    %c0 = arith.constant 0 : index
    %c0_0 = arith.constant 0 : index
    %0 = vector.load %arg0[%c0, %c0_0] : memref<168x64xf32, #tpu.memory_space<vmem>>, vector<168x64xf32>
    %c0_1 = arith.constant 0 : index
    %c0_2 = arith.constant 0 : index
    %1 = vector.load %arg1[%c0_1, %c0_2] : memref<64x8xf32, #tpu.memory_space<vmem>>, vector<64x8xf32>
    %cst = arith.constant dense<0.000000e+00> : vector<168x8xf32>
    %2 = tpu.matmul %0, %1, %cst {dimension_numbers = #tpu.dot_dimension_numbers<[1], [0], [0], [1], [0, 0, 1, 1], [], []>} : vector<168x64xf32>, vector<64x8xf32>, vector<168x8xf32> -> vector<168x8xf32>
    %c0_3 = arith.constant 0 : index
    %c0_4 = arith.constant 0 : index
    %c0_5 = arith.constant 0 : index
    %3 = vector.load %arg10[%c0_3, %c0_4, %c0_5] : memref<5x8x128xf32, #tpu.memory_space<vmem>>, vector<1x8x128xf32>
    %4 = vector.shape_cast %3 : vector<1x8x128xf32> to vector<8x128xf32>
    %5 = vector.extract_strided_slice %4 {offsets = [0, 0], sizes = [1, 8], strides = [1, 1]} : vector<8x128xf32> to vector<1x8xf32>
    %6 = vector.broadcast %5 : vector<1x8xf32> to vector<168x8xf32>
    %7 = arith.addf %2, %6 : vector<168x8xf32>
    %cst_6 = arith.constant 0.000000e+00 : f32
    %8 = vector.broadcast %cst_6 : f32 to vector<168x8xf32>
    %9 = arith.cmpf oge, %7, %8 : vector<168x8xf32>
    %cst_7 = arith.constant 2.000000e-01 : f32
    %10 = vector.broadcast %cst_7 : f32 to vector<168x8xf32>
    %11 = arith.mulf %10, %7 : vector<168x8xf32>
    %12 = arith.select %9, %7, %11 : vector<168x8xi1>, vector<168x8xf32>
    %c0_8 = arith.constant 0 : index
    %c0_9 = arith.constant 0 : index
    %c0_10 = arith.constant 0 : index
    %13 = vector.load %arg2[%c0_8, %c0_9, %c0_10] : memref<16x56x168xf32, #tpu.memory_space<vmem>>, vector<1x56x168xf32>
    %14 = vector.shape_cast %13 : vector<1x56x168xf32> to vector<56x168xf32>
    %cst_11 = arith.constant dense<0.000000e+00> : vector<56x8xf32>
    %15 = tpu.matmul %14, %12, %cst_11 {dimension_numbers = #tpu.dot_dimension_numbers<[1], [0], [0], [1], [0, 0, 1, 1], [], []>} : vector<56x168xf32>, vector<168x8xf32>, vector<56x8xf32> -> vector<56x8xf32>
    %c0_12 = arith.constant 0 : index
    %c0_13 = arith.constant 0 : index
    %16 = vector.load %arg3[%c0_12, %c0_13] : memref<128x16xf32, #tpu.memory_space<vmem>>, vector<8x16xf32>
    %cst_14 = arith.constant dense<0.000000e+00> : vector<56x16xf32>
    %17 = tpu.matmul %15, %16, %cst_14 {dimension_numbers = #tpu.dot_dimension_numbers<[1], [0], [0], [1], [0, 0, 1, 1], [], []>} : vector<56x8xf32>, vector<8x16xf32>, vector<56x16xf32> -> vector<56x16xf32>
    %c1 = arith.constant 1 : index
    %c0_15 = arith.constant 0 : index
    %c0_16 = arith.constant 0 : index
    %18 = vector.load %arg2[%c1, %c0_15, %c0_16] : memref<16x56x168xf32, #tpu.memory_space<vmem>>, vector<1x56x168xf32>
    %19 = vector.shape_cast %18 : vector<1x56x168xf32> to vector<56x168xf32>
    %cst_17 = arith.constant dense<0.000000e+00> : vector<56x8xf32>
    %20 = tpu.matmul %19, %12, %cst_17 {dimension_numbers = #tpu.dot_dimension_numbers<[1], [0], [0], [1], [0, 0, 1, 1], [], []>} : vector<56x168xf32>, vector<168x8xf32>, vector<56x8xf32> -> vector<56x8xf32>
    %c8 = arith.constant 8 : index
    %c0_18 = arith.constant 0 : index
    %21 = vector.load %arg3[%c8, %c0_18] : memref<128x16xf32, #tpu.memory_space<vmem>>, vector<8x16xf32>
    %cst_19 = arith.constant dense<0.000000e+00> : vector<56x16xf32>
    %22 = tpu.matmul %20, %21, %cst_19 {dimension_numbers = #tpu.dot_dimension_numbers<[1], [0], [0], [1], [0, 0, 1, 1], [], []>} : vector<56x8xf32>, vector<8x16xf32>, vector<56x16xf32> -> vector<56x16xf32>
    %23 = arith.addf %17, %22 : vector<56x16xf32>
    %c2 = arith.constant 2 : index
    %c0_20 = arith.constant 0 : index
    %c0_21 = arith.constant 0 : index
    %24 = vector.load %arg2[%c2, %c0_20, %c0_21] : memref<16x56x168xf32, #tpu.memory_space<vmem>>, vector<1x56x168xf32>
    %25 = vector.shape_cast %24 : vector<1x56x168xf32> to vector<56x168xf32>
    %cst_22 = arith.constant dense<0.000000e+00> : vector<56x8xf32>
    %26 = tpu.matmul %25, %12, %cst_22 {dimension_numbers = #tpu.dot_dimension_numbers<[1], [0], [0], [1], [0, 0, 1, 1], [], []>} : vector<56x168xf32>, vector<168x8xf32>, vector<56x8xf32> -> vector<56x8xf32>
    %c16 = arith.constant 16 : index
    %c0_23 = arith.constant 0 : index
    %27 = vector.load %arg3[%c16, %c0_23] : memref<128x16xf32, #tpu.memory_space<vmem>>, vector<8x16xf32>
    %cst_24 = arith.constant dense<0.000000e+00> : vector<56x16xf32>
    %28 = tpu.matmul %26, %27, %cst_24 {dimension_numbers = #tpu.dot_dimension_numbers<[1], [0], [0], [1], [0, 0, 1, 1], [], []>} : vector<56x8xf32>, vector<8x16xf32>, vector<56x16xf32> -> vector<56x16xf32>
    %29 = arith.addf %23, %28 : vector<56x16xf32>
    %c3 = arith.constant 3 : index
    %c0_25 = arith.constant 0 : index
    %c0_26 = arith.constant 0 : index
    %30 = vector.load %arg2[%c3, %c0_25, %c0_26] : memref<16x56x168xf32, #tpu.memory_space<vmem>>, vector<1x56x168xf32>
    %31 = vector.shape_cast %30 : vector<1x56x168xf32> to vector<56x168xf32>
    %cst_27 = arith.constant dense<0.000000e+00> : vector<56x8xf32>
    %32 = tpu.matmul %31, %12, %cst_27 {dimension_numbers = #tpu.dot_dimension_numbers<[1], [0], [0], [1], [0, 0, 1, 1], [], []>} : vector<56x168xf32>, vector<168x8xf32>, vector<56x8xf32> -> vector<56x8xf32>
    %c24 = arith.constant 24 : index
    %c0_28 = arith.constant 0 : index
    %33 = vector.load %arg3[%c24, %c0_28] : memref<128x16xf32, #tpu.memory_space<vmem>>, vector<8x16xf32>
    %cst_29 = arith.constant dense<0.000000e+00> : vector<56x16xf32>
    %34 = tpu.matmul %32, %33, %cst_29 {dimension_numbers = #tpu.dot_dimension_numbers<[1], [0], [0], [1], [0, 0, 1, 1], [], []>} : vector<56x8xf32>, vector<8x16xf32>, vector<56x16xf32> -> vector<56x16xf32>
    %35 = arith.addf %29, %34 : vector<56x16xf32>
    %c4 = arith.constant 4 : index
    %c0_30 = arith.constant 0 : index
    %c0_31 = arith.constant 0 : index
    %36 = vector.load %arg2[%c4, %c0_30, %c0_31] : memref<16x56x168xf32, #tpu.memory_space<vmem>>, vector<1x56x168xf32>
    %37 = vector.shape_cast %36 : vector<1x56x168xf32> to vector<56x168xf32>
    %cst_32 = arith.constant dense<0.000000e+00> : vector<56x8xf32>
    %38 = tpu.matmul %37, %12, %cst_32 {dimension_numbers = #tpu.dot_dimension_numbers<[1], [0], [0], [1], [0, 0, 1, 1], [], []>} : vector<56x168xf32>, vector<168x8xf32>, vector<56x8xf32> -> vector<56x8xf32>
    %c32 = arith.constant 32 : index
    %c0_33 = arith.constant 0 : index
    %39 = vector.load %arg3[%c32, %c0_33] : memref<128x16xf32, #tpu.memory_space<vmem>>, vector<8x16xf32>
    %cst_34 = arith.constant dense<0.000000e+00> : vector<56x16xf32>
    %40 = tpu.matmul %38, %39, %cst_34 {dimension_numbers = #tpu.dot_dimension_numbers<[1], [0], [0], [1], [0, 0, 1, 1], [], []>} : vector<56x8xf32>, vector<8x16xf32>, vector<56x16xf32> -> vector<56x16xf32>
    %41 = arith.addf %35, %40 : vector<56x16xf32>
    %c5 = arith.constant 5 : index
    %c0_35 = arith.constant 0 : index
    %c0_36 = arith.constant 0 : index
    %42 = vector.load %arg2[%c5, %c0_35, %c0_36] : memref<16x56x168xf32, #tpu.memory_space<vmem>>, vector<1x56x168xf32>
    %43 = vector.shape_cast %42 : vector<1x56x168xf32> to vector<56x168xf32>
    %cst_37 = arith.constant dense<0.000000e+00> : vector<56x8xf32>
    %44 = tpu.matmul %43, %12, %cst_37 {dimension_numbers = #tpu.dot_dimension_numbers<[1], [0], [0], [1], [0, 0, 1, 1], [], []>} : vector<56x168xf32>, vector<168x8xf32>, vector<56x8xf32> -> vector<56x8xf32>
    %c40 = arith.constant 40 : index
    %c0_38 = arith.constant 0 : index
    %45 = vector.load %arg3[%c40, %c0_38] : memref<128x16xf32, #tpu.memory_space<vmem>>, vector<8x16xf32>
    %cst_39 = arith.constant dense<0.000000e+00> : vector<56x16xf32>
    %46 = tpu.matmul %44, %45, %cst_39 {dimension_numbers = #tpu.dot_dimension_numbers<[1], [0], [0], [1], [0, 0, 1, 1], [], []>} : vector<56x8xf32>, vector<8x16xf32>, vector<56x16xf32> -> vector<56x16xf32>
    %47 = arith.addf %41, %46 : vector<56x16xf32>
    %c6 = arith.constant 6 : index
    %c0_40 = arith.constant 0 : index
    %c0_41 = arith.constant 0 : index
    %48 = vector.load %arg2[%c6, %c0_40, %c0_41] : memref<16x56x168xf32, #tpu.memory_space<vmem>>, vector<1x56x168xf32>
    %49 = vector.shape_cast %48 : vector<1x56x168xf32> to vector<56x168xf32>
    %cst_42 = arith.constant dense<0.000000e+00> : vector<56x8xf32>
    %50 = tpu.matmul %49, %12, %cst_42 {dimension_numbers = #tpu.dot_dimension_numbers<[1], [0], [0], [1], [0, 0, 1, 1], [], []>} : vector<56x168xf32>, vector<168x8xf32>, vector<56x8xf32> -> vector<56x8xf32>
    %c48 = arith.constant 48 : index
    %c0_43 = arith.constant 0 : index
    %51 = vector.load %arg3[%c48, %c0_43] : memref<128x16xf32, #tpu.memory_space<vmem>>, vector<8x16xf32>
    %cst_44 = arith.constant dense<0.000000e+00> : vector<56x16xf32>
    %52 = tpu.matmul %50, %51, %cst_44 {dimension_numbers = #tpu.dot_dimension_numbers<[1], [0], [0], [1], [0, 0, 1, 1], [], []>} : vector<56x8xf32>, vector<8x16xf32>, vector<56x16xf32> -> vector<56x16xf32>
    %53 = arith.addf %47, %52 : vector<56x16xf32>
    %c7 = arith.constant 7 : index
    %c0_45 = arith.constant 0 : index
    %c0_46 = arith.constant 0 : index
    %54 = vector.load %arg2[%c7, %c0_45, %c0_46] : memref<16x56x168xf32, #tpu.memory_space<vmem>>, vector<1x56x168xf32>
    %55 = vector.shape_cast %54 : vector<1x56x168xf32> to vector<56x168xf32>
    %cst_47 = arith.constant dense<0.000000e+00> : vector<56x8xf32>
    %56 = tpu.matmul %55, %12, %cst_47 {dimension_numbers = #tpu.dot_dimension_numbers<[1], [0], [0], [1], [0, 0, 1, 1], [], []>} : vector<56x168xf32>, vector<168x8xf32>, vector<56x8xf32> -> vector<56x8xf32>
    %c56 = arith.constant 56 : index
    %c0_48 = arith.constant 0 : index
    %57 = vector.load %arg3[%c56, %c0_48] : memref<128x16xf32, #tpu.memory_space<vmem>>, vector<8x16xf32>
    %cst_49 = arith.constant dense<0.000000e+00> : vector<56x16xf32>
    %58 = tpu.matmul %56, %57, %cst_49 {dimension_numbers = #tpu.dot_dimension_numbers<[1], [0], [0], [1], [0, 0, 1, 1], [], []>} : vector<56x8xf32>, vector<8x16xf32>, vector<56x16xf32> -> vector<56x16xf32>
    %59 = arith.addf %53, %58 : vector<56x16xf32>
    %c8_50 = arith.constant 8 : index
    %c0_51 = arith.constant 0 : index
    %c0_52 = arith.constant 0 : index
    %60 = vector.load %arg2[%c8_50, %c0_51, %c0_52] : memref<16x56x168xf32, #tpu.memory_space<vmem>>, vector<1x56x168xf32>
    %61 = vector.shape_cast %60 : vector<1x56x168xf32> to vector<56x168xf32>
    %cst_53 = arith.constant dense<0.000000e+00> : vector<56x8xf32>
    %62 = tpu.matmul %61, %12, %cst_53 {dimension_numbers = #tpu.dot_dimension_numbers<[1], [0], [0], [1], [0, 0, 1, 1], [], []>} : vector<56x168xf32>, vector<168x8xf32>, vector<56x8xf32> -> vector<56x8xf32>
    %c64 = arith.constant 64 : index
    %c0_54 = arith.constant 0 : index
    %63 = vector.load %arg3[%c64, %c0_54] : memref<128x16xf32, #tpu.memory_space<vmem>>, vector<8x16xf32>
    %cst_55 = arith.constant dense<0.000000e+00> : vector<56x16xf32>
    %64 = tpu.matmul %62, %63, %cst_55 {dimension_numbers = #tpu.dot_dimension_numbers<[1], [0], [0], [1], [0, 0, 1, 1], [], []>} : vector<56x8xf32>, vector<8x16xf32>, vector<56x16xf32> -> vector<56x16xf32>
    %65 = arith.addf %59, %64 : vector<56x16xf32>
    %c9 = arith.constant 9 : index
    %c0_56 = arith.constant 0 : index
    %c0_57 = arith.constant 0 : index
    %66 = vector.load %arg2[%c9, %c0_56, %c0_57] : memref<16x56x168xf32, #tpu.memory_space<vmem>>, vector<1x56x168xf32>
    %67 = vector.shape_cast %66 : vector<1x56x168xf32> to vector<56x168xf32>
    %cst_58 = arith.constant dense<0.000000e+00> : vector<56x8xf32>
    %68 = tpu.matmul %67, %12, %cst_58 {dimension_numbers = #tpu.dot_dimension_numbers<[1], [0], [0], [1], [0, 0, 1, 1], [], []>} : vector<56x168xf32>, vector<168x8xf32>, vector<56x8xf32> -> vector<56x8xf32>
    %c72 = arith.constant 72 : index
    %c0_59 = arith.constant 0 : index
    %69 = vector.load %arg3[%c72, %c0_59] : memref<128x16xf32, #tpu.memory_space<vmem>>, vector<8x16xf32>
    %cst_60 = arith.constant dense<0.000000e+00> : vector<56x16xf32>
    %70 = tpu.matmul %68, %69, %cst_60 {dimension_numbers = #tpu.dot_dimension_numbers<[1], [0], [0], [1], [0, 0, 1, 1], [], []>} : vector<56x8xf32>, vector<8x16xf32>, vector<56x16xf32> -> vector<56x16xf32>
    %71 = arith.addf %65, %70 : vector<56x16xf32>
    %c10 = arith.constant 10 : index
    %c0_61 = arith.constant 0 : index
    %c0_62 = arith.constant 0 : index
    %72 = vector.load %arg2[%c10, %c0_61, %c0_62] : memref<16x56x168xf32, #tpu.memory_space<vmem>>, vector<1x56x168xf32>
    %73 = vector.shape_cast %72 : vector<1x56x168xf32> to vector<56x168xf32>
    %cst_63 = arith.constant dense<0.000000e+00> : vector<56x8xf32>
    %74 = tpu.matmul %73, %12, %cst_63 {dimension_numbers = #tpu.dot_dimension_numbers<[1], [0], [0], [1], [0, 0, 1, 1], [], []>} : vector<56x168xf32>, vector<168x8xf32>, vector<56x8xf32> -> vector<56x8xf32>
    %c80 = arith.constant 80 : index
    %c0_64 = arith.constant 0 : index
    %75 = vector.load %arg3[%c80, %c0_64] : memref<128x16xf32, #tpu.memory_space<vmem>>, vector<8x16xf32>
    %cst_65 = arith.constant dense<0.000000e+00> : vector<56x16xf32>
    %76 = tpu.matmul %74, %75, %cst_65 {dimension_numbers = #tpu.dot_dimension_numbers<[1], [0], [0], [1], [0, 0, 1, 1], [], []>} : vector<56x8xf32>, vector<8x16xf32>, vector<56x16xf32> -> vector<56x16xf32>
    %77 = arith.addf %71, %76 : vector<56x16xf32>
    %c11 = arith.constant 11 : index
    %c0_66 = arith.constant 0 : index
    %c0_67 = arith.constant 0 : index
    %78 = vector.load %arg2[%c11, %c0_66, %c0_67] : memref<16x56x168xf32, #tpu.memory_space<vmem>>, vector<1x56x168xf32>
    %79 = vector.shape_cast %78 : vector<1x56x168xf32> to vector<56x168xf32>
    %cst_68 = arith.constant dense<0.000000e+00> : vector<56x8xf32>
    %80 = tpu.matmul %79, %12, %cst_68 {dimension_numbers = #tpu.dot_dimension_numbers<[1], [0], [0], [1], [0, 0, 1, 1], [], []>} : vector<56x168xf32>, vector<168x8xf32>, vector<56x8xf32> -> vector<56x8xf32>
    %c88 = arith.constant 88 : index
    %c0_69 = arith.constant 0 : index
    %81 = vector.load %arg3[%c88, %c0_69] : memref<128x16xf32, #tpu.memory_space<vmem>>, vector<8x16xf32>
    %cst_70 = arith.constant dense<0.000000e+00> : vector<56x16xf32>
    %82 = tpu.matmul %80, %81, %cst_70 {dimension_numbers = #tpu.dot_dimension_numbers<[1], [0], [0], [1], [0, 0, 1, 1], [], []>} : vector<56x8xf32>, vector<8x16xf32>, vector<56x16xf32> -> vector<56x16xf32>
    %83 = arith.addf %77, %82 : vector<56x16xf32>
    %c12 = arith.constant 12 : index
    %c0_71 = arith.constant 0 : index
    %c0_72 = arith.constant 0 : index
    %84 = vector.load %arg2[%c12, %c0_71, %c0_72] : memref<16x56x168xf32, #tpu.memory_space<vmem>>, vector<1x56x168xf32>
    %85 = vector.shape_cast %84 : vector<1x56x168xf32> to vector<56x168xf32>
    %cst_73 = arith.constant dense<0.000000e+00> : vector<56x8xf32>
    %86 = tpu.matmul %85, %12, %cst_73 {dimension_numbers = #tpu.dot_dimension_numbers<[1], [0], [0], [1], [0, 0, 1, 1], [], []>} : vector<56x168xf32>, vector<168x8xf32>, vector<56x8xf32> -> vector<56x8xf32>
    %c96 = arith.constant 96 : index
    %c0_74 = arith.constant 0 : index
    %87 = vector.load %arg3[%c96, %c0_74] : memref<128x16xf32, #tpu.memory_space<vmem>>, vector<8x16xf32>
    %cst_75 = arith.constant dense<0.000000e+00> : vector<56x16xf32>
    %88 = tpu.matmul %86, %87, %cst_75 {dimension_numbers = #tpu.dot_dimension_numbers<[1], [0], [0], [1], [0, 0, 1, 1], [], []>} : vector<56x8xf32>, vector<8x16xf32>, vector<56x16xf32> -> vector<56x16xf32>
    %89 = arith.addf %83, %88 : vector<56x16xf32>
    %c13 = arith.constant 13 : index
    %c0_76 = arith.constant 0 : index
    %c0_77 = arith.constant 0 : index
    %90 = vector.load %arg2[%c13, %c0_76, %c0_77] : memref<16x56x168xf32, #tpu.memory_space<vmem>>, vector<1x56x168xf32>
    %91 = vector.shape_cast %90 : vector<1x56x168xf32> to vector<56x168xf32>
    %cst_78 = arith.constant dense<0.000000e+00> : vector<56x8xf32>
    %92 = tpu.matmul %91, %12, %cst_78 {dimension_numbers = #tpu.dot_dimension_numbers<[1], [0], [0], [1], [0, 0, 1, 1], [], []>} : vector<56x168xf32>, vector<168x8xf32>, vector<56x8xf32> -> vector<56x8xf32>
    %c104 = arith.constant 104 : index
    %c0_79 = arith.constant 0 : index
    %93 = vector.load %arg3[%c104, %c0_79] : memref<128x16xf32, #tpu.memory_space<vmem>>, vector<8x16xf32>
    %cst_80 = arith.constant dense<0.000000e+00> : vector<56x16xf32>
    %94 = tpu.matmul %92, %93, %cst_80 {dimension_numbers = #tpu.dot_dimension_numbers<[1], [0], [0], [1], [0, 0, 1, 1], [], []>} : vector<56x8xf32>, vector<8x16xf32>, vector<56x16xf32> -> vector<56x16xf32>
    %95 = arith.addf %89, %94 : vector<56x16xf32>
    %c14 = arith.constant 14 : index
    %c0_81 = arith.constant 0 : index
    %c0_82 = arith.constant 0 : index
    %96 = vector.load %arg2[%c14, %c0_81, %c0_82] : memref<16x56x168xf32, #tpu.memory_space<vmem>>, vector<1x56x168xf32>
    %97 = vector.shape_cast %96 : vector<1x56x168xf32> to vector<56x168xf32>
    %cst_83 = arith.constant dense<0.000000e+00> : vector<56x8xf32>
    %98 = tpu.matmul %97, %12, %cst_83 {dimension_numbers = #tpu.dot_dimension_numbers<[1], [0], [0], [1], [0, 0, 1, 1], [], []>} : vector<56x168xf32>, vector<168x8xf32>, vector<56x8xf32> -> vector<56x8xf32>
    %c112 = arith.constant 112 : index
    %c0_84 = arith.constant 0 : index
    %99 = vector.load %arg3[%c112, %c0_84] : memref<128x16xf32, #tpu.memory_space<vmem>>, vector<8x16xf32>
    %cst_85 = arith.constant dense<0.000000e+00> : vector<56x16xf32>
    %100 = tpu.matmul %98, %99, %cst_85 {dimension_numbers = #tpu.dot_dimension_numbers<[1], [0], [0], [1], [0, 0, 1, 1], [], []>} : vector<56x8xf32>, vector<8x16xf32>, vector<56x16xf32> -> vector<56x16xf32>
    %101 = arith.addf %95, %100 : vector<56x16xf32>
    %c15 = arith.constant 15 : index
    %c0_86 = arith.constant 0 : index
    %c0_87 = arith.constant 0 : index
    %102 = vector.load %arg2[%c15, %c0_86, %c0_87] : memref<16x56x168xf32, #tpu.memory_space<vmem>>, vector<1x56x168xf32>
    %103 = vector.shape_cast %102 : vector<1x56x168xf32> to vector<56x168xf32>
    %cst_88 = arith.constant dense<0.000000e+00> : vector<56x8xf32>
    %104 = tpu.matmul %103, %12, %cst_88 {dimension_numbers = #tpu.dot_dimension_numbers<[1], [0], [0], [1], [0, 0, 1, 1], [], []>} : vector<56x168xf32>, vector<168x8xf32>, vector<56x8xf32> -> vector<56x8xf32>
    %c120 = arith.constant 120 : index
    %c0_89 = arith.constant 0 : index
    %105 = vector.load %arg3[%c120, %c0_89] : memref<128x16xf32, #tpu.memory_space<vmem>>, vector<8x16xf32>
    %cst_90 = arith.constant dense<0.000000e+00> : vector<56x16xf32>
    %106 = tpu.matmul %104, %105, %cst_90 {dimension_numbers = #tpu.dot_dimension_numbers<[1], [0], [0], [1], [0, 0, 1, 1], [], []>} : vector<56x8xf32>, vector<8x16xf32>, vector<56x16xf32> -> vector<56x16xf32>
    %107 = arith.addf %101, %106 : vector<56x16xf32>
    %c1_91 = arith.constant 1 : index
    %c0_92 = arith.constant 0 : index
    %c0_93 = arith.constant 0 : index
    %108 = vector.load %arg10[%c1_91, %c0_92, %c0_93] : memref<5x8x128xf32, #tpu.memory_space<vmem>>, vector<1x8x128xf32>
    %109 = vector.shape_cast %108 : vector<1x8x128xf32> to vector<8x128xf32>
    %110 = vector.extract_strided_slice %109 {offsets = [1, 0], sizes = [1, 16], strides = [1, 1]} : vector<8x128xf32> to vector<1x16xf32>
    %111 = vector.extract_strided_slice %109 {offsets = [2, 0], sizes = [1, 16], strides = [1, 1]} : vector<8x128xf32> to vector<1x16xf32>
    %cst_94 = arith.constant dense<0.000000e+00> : vector<16xf32>
    %112 = vector.multi_reduction <add>, %107, %cst_94 [0] : vector<56x16xf32> to vector<16xf32>
    %113 = vector.shape_cast %112 : vector<16xf32> to vector<1x16xf32>
    %cst_95 = arith.constant 2.000000e-02 : f32
    %114 = vector.broadcast %cst_95 : f32 to vector<1x16xf32>
    %115 = arith.mulf %113, %114 : vector<1x16xf32>
    %116 = vector.broadcast %115 : vector<1x16xf32> to vector<56x16xf32>
    %117 = arith.subf %107, %116 : vector<56x16xf32>
    %118 = tpu.iota {dimensions = array<i32: 0>} : vector<56x16xi32>
    %c50_i32 = arith.constant 50 : i32
    %119 = vector.broadcast %c50_i32 : i32 to vector<56x16xi32>
    %120 = arith.cmpi slt, %118, %119 : vector<56x16xi32>
    %cst_96 = arith.constant 0.000000e+00 : f32
    %121 = vector.broadcast %cst_96 : f32 to vector<56x16xf32>
    %122 = arith.select %120, %117, %121 : vector<56x16xi1>, vector<56x16xf32>
    %123 = arith.mulf %122, %122 : vector<56x16xf32>
    %cst_97 = arith.constant dense<0.000000e+00> : vector<16xf32>
    %124 = vector.multi_reduction <add>, %123, %cst_97 [0] : vector<56x16xf32> to vector<16xf32>
    %125 = vector.shape_cast %124 : vector<16xf32> to vector<1x16xf32>
    %cst_98 = arith.constant 2.000000e-02 : f32
    %126 = vector.broadcast %cst_98 : f32 to vector<1x16xf32>
    %127 = arith.mulf %125, %126 : vector<1x16xf32>
    %cst_99 = arith.constant 9.99999974E-6 : f32
    %128 = vector.broadcast %cst_99 : f32 to vector<1x16xf32>
    %129 = arith.addf %127, %128 : vector<1x16xf32>
    %130 = math.rsqrt %129 : vector<1x16xf32>
    %131 = vector.broadcast %130 : vector<1x16xf32> to vector<56x16xf32>
    %132 = arith.mulf %117, %131 : vector<56x16xf32>
    %133 = vector.broadcast %110 : vector<1x16xf32> to vector<56x16xf32>
    %134 = arith.mulf %132, %133 : vector<56x16xf32>
    %135 = vector.broadcast %111 : vector<1x16xf32> to vector<56x16xf32>
    %136 = arith.addf %134, %135 : vector<56x16xf32>
    %cst_100 = arith.constant 0.000000e+00 : f32
    %137 = vector.broadcast %cst_100 : f32 to vector<56x16xf32>
    %138 = arith.cmpf oge, %136, %137 : vector<56x16xf32>
    %cst_101 = arith.constant 2.000000e-01 : f32
    %139 = vector.broadcast %cst_101 : f32 to vector<56x16xf32>
    %140 = arith.mulf %139, %136 : vector<56x16xf32>
    %141 = arith.select %138, %136, %140 : vector<56x16xi1>, vector<56x16xf32>
    %c0_102 = arith.constant 0 : index
    %c0_103 = arith.constant 0 : index
    %c0_104 = arith.constant 0 : index
    %142 = vector.load %arg4[%c0_102, %c0_103, %c0_104] : memref<16x24x56xf32, #tpu.memory_space<vmem>>, vector<1x24x56xf32>
    %143 = vector.shape_cast %142 : vector<1x24x56xf32> to vector<24x56xf32>
    %cst_105 = arith.constant dense<0.000000e+00> : vector<24x16xf32>
    %144 = tpu.matmul %143, %141, %cst_105 {dimension_numbers = #tpu.dot_dimension_numbers<[1], [0], [0], [1], [0, 0, 1, 1], [], []>} : vector<24x56xf32>, vector<56x16xf32>, vector<24x16xf32> -> vector<24x16xf32>
    %c0_106 = arith.constant 0 : index
    %c0_107 = arith.constant 0 : index
    %145 = vector.load %arg5[%c0_106, %c0_107] : memref<256x32xf32, #tpu.memory_space<vmem>>, vector<16x32xf32>
    %cst_108 = arith.constant dense<0.000000e+00> : vector<24x32xf32>
    %146 = tpu.matmul %144, %145, %cst_108 {dimension_numbers = #tpu.dot_dimension_numbers<[1], [0], [0], [1], [0, 0, 1, 1], [], []>} : vector<24x16xf32>, vector<16x32xf32>, vector<24x32xf32> -> vector<24x32xf32>
    %c1_109 = arith.constant 1 : index
    %c0_110 = arith.constant 0 : index
    %c0_111 = arith.constant 0 : index
    %147 = vector.load %arg4[%c1_109, %c0_110, %c0_111] : memref<16x24x56xf32, #tpu.memory_space<vmem>>, vector<1x24x56xf32>
    %148 = vector.shape_cast %147 : vector<1x24x56xf32> to vector<24x56xf32>
    %cst_112 = arith.constant dense<0.000000e+00> : vector<24x16xf32>
    %149 = tpu.matmul %148, %141, %cst_112 {dimension_numbers = #tpu.dot_dimension_numbers<[1], [0], [0], [1], [0, 0, 1, 1], [], []>} : vector<24x56xf32>, vector<56x16xf32>, vector<24x16xf32> -> vector<24x16xf32>
    %c16_113 = arith.constant 16 : index
    %c0_114 = arith.constant 0 : index
    %150 = vector.load %arg5[%c16_113, %c0_114] : memref<256x32xf32, #tpu.memory_space<vmem>>, vector<16x32xf32>
    %cst_115 = arith.constant dense<0.000000e+00> : vector<24x32xf32>
    %151 = tpu.matmul %149, %150, %cst_115 {dimension_numbers = #tpu.dot_dimension_numbers<[1], [0], [0], [1], [0, 0, 1, 1], [], []>} : vector<24x16xf32>, vector<16x32xf32>, vector<24x32xf32> -> vector<24x32xf32>
    %152 = arith.addf %146, %151 : vector<24x32xf32>
    %c2_116 = arith.constant 2 : index
    %c0_117 = arith.constant 0 : index
    %c0_118 = arith.constant 0 : index
    %153 = vector.load %arg4[%c2_116, %c0_117, %c0_118] : memref<16x24x56xf32, #tpu.memory_space<vmem>>, vector<1x24x56xf32>
    %154 = vector.shape_cast %153 : vector<1x24x56xf32> to vector<24x56xf32>
    %cst_119 = arith.constant dense<0.000000e+00> : vector<24x16xf32>
    %155 = tpu.matmul %154, %141, %cst_119 {dimension_numbers = #tpu.dot_dimension_numbers<[1], [0], [0], [1], [0, 0, 1, 1], [], []>} : vector<24x56xf32>, vector<56x16xf32>, vector<24x16xf32> -> vector<24x16xf32>
    %c32_120 = arith.constant 32 : index
    %c0_121 = arith.constant 0 : index
    %156 = vector.load %arg5[%c32_120, %c0_121] : memref<256x32xf32, #tpu.memory_space<vmem>>, vector<16x32xf32>
    %cst_122 = arith.constant dense<0.000000e+00> : vector<24x32xf32>
    %157 = tpu.matmul %155, %156, %cst_122 {dimension_numbers = #tpu.dot_dimension_numbers<[1], [0], [0], [1], [0, 0, 1, 1], [], []>} : vector<24x16xf32>, vector<16x32xf32>, vector<24x32xf32> -> vector<24x32xf32>
    %158 = arith.addf %152, %157 : vector<24x32xf32>
    %c3_123 = arith.constant 3 : index
    %c0_124 = arith.constant 0 : index
    %c0_125 = arith.constant 0 : index
    %159 = vector.load %arg4[%c3_123, %c0_124, %c0_125] : memref<16x24x56xf32, #tpu.memory_space<vmem>>, vector<1x24x56xf32>
    %160 = vector.shape_cast %159 : vector<1x24x56xf32> to vector<24x56xf32>
    %cst_126 = arith.constant dense<0.000000e+00> : vector<24x16xf32>
    %161 = tpu.matmul %160, %141, %cst_126 {dimension_numbers = #tpu.dot_dimension_numbers<[1], [0], [0], [1], [0, 0, 1, 1], [], []>} : vector<24x56xf32>, vector<56x16xf32>, vector<24x16xf32> -> vector<24x16xf32>
    %c48_127 = arith.constant 48 : index
    %c0_128 = arith.constant 0 : index
    %162 = vector.load %arg5[%c48_127, %c0_128] : memref<256x32xf32, #tpu.memory_space<vmem>>, vector<16x32xf32>
    %cst_129 = arith.constant dense<0.000000e+00> : vector<24x32xf32>
    %163 = tpu.matmul %161, %162, %cst_129 {dimension_numbers = #tpu.dot_dimension_numbers<[1], [0], [0], [1], [0, 0, 1, 1], [], []>} : vector<24x16xf32>, vector<16x32xf32>, vector<24x32xf32> -> vector<24x32xf32>
    %164 = arith.addf %158, %163 : vector<24x32xf32>
    %c4_130 = arith.constant 4 : index
    %c0_131 = arith.constant 0 : index
    %c0_132 = arith.constant 0 : index
    %165 = vector.load %arg4[%c4_130, %c0_131, %c0_132] : memref<16x24x56xf32, #tpu.memory_space<vmem>>, vector<1x24x56xf32>
    %166 = vector.shape_cast %165 : vector<1x24x56xf32> to vector<24x56xf32>
    %cst_133 = arith.constant dense<0.000000e+00> : vector<24x16xf32>
    %167 = tpu.matmul %166, %141, %cst_133 {dimension_numbers = #tpu.dot_dimension_numbers<[1], [0], [0], [1], [0, 0, 1, 1], [], []>} : vector<24x56xf32>, vector<56x16xf32>, vector<24x16xf32> -> vector<24x16xf32>
    %c64_134 = arith.constant 64 : index
    %c0_135 = arith.constant 0 : index
    %168 = vector.load %arg5[%c64_134, %c0_135] : memref<256x32xf32, #tpu.memory_space<vmem>>, vector<16x32xf32>
    %cst_136 = arith.constant dense<0.000000e+00> : vector<24x32xf32>
    %169 = tpu.matmul %167, %168, %cst_136 {dimension_numbers = #tpu.dot_dimension_numbers<[1], [0], [0], [1], [0, 0, 1, 1], [], []>} : vector<24x16xf32>, vector<16x32xf32>, vector<24x32xf32> -> vector<24x32xf32>
    %170 = arith.addf %164, %169 : vector<24x32xf32>
    %c5_137 = arith.constant 5 : index
    %c0_138 = arith.constant 0 : index
    %c0_139 = arith.constant 0 : index
    %171 = vector.load %arg4[%c5_137, %c0_138, %c0_139] : memref<16x24x56xf32, #tpu.memory_space<vmem>>, vector<1x24x56xf32>
    %172 = vector.shape_cast %171 : vector<1x24x56xf32> to vector<24x56xf32>
    %cst_140 = arith.constant dense<0.000000e+00> : vector<24x16xf32>
    %173 = tpu.matmul %172, %141, %cst_140 {dimension_numbers = #tpu.dot_dimension_numbers<[1], [0], [0], [1], [0, 0, 1, 1], [], []>} : vector<24x56xf32>, vector<56x16xf32>, vector<24x16xf32> -> vector<24x16xf32>
    %c80_141 = arith.constant 80 : index
    %c0_142 = arith.constant 0 : index
    %174 = vector.load %arg5[%c80_141, %c0_142] : memref<256x32xf32, #tpu.memory_space<vmem>>, vector<16x32xf32>
    %cst_143 = arith.constant dense<0.000000e+00> : vector<24x32xf32>
    %175 = tpu.matmul %173, %174, %cst_143 {dimension_numbers = #tpu.dot_dimension_numbers<[1], [0], [0], [1], [0, 0, 1, 1], [], []>} : vector<24x16xf32>, vector<16x32xf32>, vector<24x32xf32> -> vector<24x32xf32>
    %176 = arith.addf %170, %175 : vector<24x32xf32>
    %c6_144 = arith.constant 6 : index
    %c0_145 = arith.constant 0 : index
    %c0_146 = arith.constant 0 : index
    %177 = vector.load %arg4[%c6_144, %c0_145, %c0_146] : memref<16x24x56xf32, #tpu.memory_space<vmem>>, vector<1x24x56xf32>
    %178 = vector.shape_cast %177 : vector<1x24x56xf32> to vector<24x56xf32>
    %cst_147 = arith.constant dense<0.000000e+00> : vector<24x16xf32>
    %179 = tpu.matmul %178, %141, %cst_147 {dimension_numbers = #tpu.dot_dimension_numbers<[1], [0], [0], [1], [0, 0, 1, 1], [], []>} : vector<24x56xf32>, vector<56x16xf32>, vector<24x16xf32> -> vector<24x16xf32>
    %c96_148 = arith.constant 96 : index
    %c0_149 = arith.constant 0 : index
    %180 = vector.load %arg5[%c96_148, %c0_149] : memref<256x32xf32, #tpu.memory_space<vmem>>, vector<16x32xf32>
    %cst_150 = arith.constant dense<0.000000e+00> : vector<24x32xf32>
    %181 = tpu.matmul %179, %180, %cst_150 {dimension_numbers = #tpu.dot_dimension_numbers<[1], [0], [0], [1], [0, 0, 1, 1], [], []>} : vector<24x16xf32>, vector<16x32xf32>, vector<24x32xf32> -> vector<24x32xf32>
    %182 = arith.addf %176, %181 : vector<24x32xf32>
    %c7_151 = arith.constant 7 : index
    %c0_152 = arith.constant 0 : index
    %c0_153 = arith.constant 0 : index
    %183 = vector.load %arg4[%c7_151, %c0_152, %c0_153] : memref<16x24x56xf32, #tpu.memory_space<vmem>>, vector<1x24x56xf32>
    %184 = vector.shape_cast %183 : vector<1x24x56xf32> to vector<24x56xf32>
    %cst_154 = arith.constant dense<0.000000e+00> : vector<24x16xf32>
    %185 = tpu.matmul %184, %141, %cst_154 {dimension_numbers = #tpu.dot_dimension_numbers<[1], [0], [0], [1], [0, 0, 1, 1], [], []>} : vector<24x56xf32>, vector<56x16xf32>, vector<24x16xf32> -> vector<24x16xf32>
    %c112_155 = arith.constant 112 : index
    %c0_156 = arith.constant 0 : index
    %186 = vector.load %arg5[%c112_155, %c0_156] : memref<256x32xf32, #tpu.memory_space<vmem>>, vector<16x32xf32>
    %cst_157 = arith.constant dense<0.000000e+00> : vector<24x32xf32>
    %187 = tpu.matmul %185, %186, %cst_157 {dimension_numbers = #tpu.dot_dimension_numbers<[1], [0], [0], [1], [0, 0, 1, 1], [], []>} : vector<24x16xf32>, vector<16x32xf32>, vector<24x32xf32> -> vector<24x32xf32>
    %188 = arith.addf %182, %187 : vector<24x32xf32>
    %c8_158 = arith.constant 8 : index
    %c0_159 = arith.constant 0 : index
    %c0_160 = arith.constant 0 : index
    %189 = vector.load %arg4[%c8_158, %c0_159, %c0_160] : memref<16x24x56xf32, #tpu.memory_space<vmem>>, vector<1x24x56xf32>
    %190 = vector.shape_cast %189 : vector<1x24x56xf32> to vector<24x56xf32>
    %cst_161 = arith.constant dense<0.000000e+00> : vector<24x16xf32>
    %191 = tpu.matmul %190, %141, %cst_161 {dimension_numbers = #tpu.dot_dimension_numbers<[1], [0], [0], [1], [0, 0, 1, 1], [], []>} : vector<24x56xf32>, vector<56x16xf32>, vector<24x16xf32> -> vector<24x16xf32>
    %c128 = arith.constant 128 : index
    %c0_162 = arith.constant 0 : index
    %192 = vector.load %arg5[%c128, %c0_162] : memref<256x32xf32, #tpu.memory_space<vmem>>, vector<16x32xf32>
    %cst_163 = arith.constant dense<0.000000e+00> : vector<24x32xf32>
    %193 = tpu.matmul %191, %192, %cst_163 {dimension_numbers = #tpu.dot_dimension_numbers<[1], [0], [0], [1], [0, 0, 1, 1], [], []>} : vector<24x16xf32>, vector<16x32xf32>, vector<24x32xf32> -> vector<24x32xf32>
    %194 = arith.addf %188, %193 : vector<24x32xf32>
    %c9_164 = arith.constant 9 : index
    %c0_165 = arith.constant 0 : index
    %c0_166 = arith.constant 0 : index
    %195 = vector.load %arg4[%c9_164, %c0_165, %c0_166] : memref<16x24x56xf32, #tpu.memory_space<vmem>>, vector<1x24x56xf32>
    %196 = vector.shape_cast %195 : vector<1x24x56xf32> to vector<24x56xf32>
    %cst_167 = arith.constant dense<0.000000e+00> : vector<24x16xf32>
    %197 = tpu.matmul %196, %141, %cst_167 {dimension_numbers = #tpu.dot_dimension_numbers<[1], [0], [0], [1], [0, 0, 1, 1], [], []>} : vector<24x56xf32>, vector<56x16xf32>, vector<24x16xf32> -> vector<24x16xf32>
    %c144 = arith.constant 144 : index
    %c0_168 = arith.constant 0 : index
    %198 = vector.load %arg5[%c144, %c0_168] : memref<256x32xf32, #tpu.memory_space<vmem>>, vector<16x32xf32>
    %cst_169 = arith.constant dense<0.000000e+00> : vector<24x32xf32>
    %199 = tpu.matmul %197, %198, %cst_169 {dimension_numbers = #tpu.dot_dimension_numbers<[1], [0], [0], [1], [0, 0, 1, 1], [], []>} : vector<24x16xf32>, vector<16x32xf32>, vector<24x32xf32> -> vector<24x32xf32>
    %200 = arith.addf %194, %199 : vector<24x32xf32>
    %c10_170 = arith.constant 10 : index
    %c0_171 = arith.constant 0 : index
    %c0_172 = arith.constant 0 : index
    %201 = vector.load %arg4[%c10_170, %c0_171, %c0_172] : memref<16x24x56xf32, #tpu.memory_space<vmem>>, vector<1x24x56xf32>
    %202 = vector.shape_cast %201 : vector<1x24x56xf32> to vector<24x56xf32>
    %cst_173 = arith.constant dense<0.000000e+00> : vector<24x16xf32>
    %203 = tpu.matmul %202, %141, %cst_173 {dimension_numbers = #tpu.dot_dimension_numbers<[1], [0], [0], [1], [0, 0, 1, 1], [], []>} : vector<24x56xf32>, vector<56x16xf32>, vector<24x16xf32> -> vector<24x16xf32>
    %c160 = arith.constant 160 : index
    %c0_174 = arith.constant 0 : index
    %204 = vector.load %arg5[%c160, %c0_174] : memref<256x32xf32, #tpu.memory_space<vmem>>, vector<16x32xf32>
    %cst_175 = arith.constant dense<0.000000e+00> : vector<24x32xf32>
    %205 = tpu.matmul %203, %204, %cst_175 {dimension_numbers = #tpu.dot_dimension_numbers<[1], [0], [0], [1], [0, 0, 1, 1], [], []>} : vector<24x16xf32>, vector<16x32xf32>, vector<24x32xf32> -> vector<24x32xf32>
    %206 = arith.addf %200, %205 : vector<24x32xf32>
    %c11_176 = arith.constant 11 : index
    %c0_177 = arith.constant 0 : index
    %c0_178 = arith.constant 0 : index
    %207 = vector.load %arg4[%c11_176, %c0_177, %c0_178] : memref<16x24x56xf32, #tpu.memory_space<vmem>>, vector<1x24x56xf32>
    %208 = vector.shape_cast %207 : vector<1x24x56xf32> to vector<24x56xf32>
    %cst_179 = arith.constant dense<0.000000e+00> : vector<24x16xf32>
    %209 = tpu.matmul %208, %141, %cst_179 {dimension_numbers = #tpu.dot_dimension_numbers<[1], [0], [0], [1], [0, 0, 1, 1], [], []>} : vector<24x56xf32>, vector<56x16xf32>, vector<24x16xf32> -> vector<24x16xf32>
    %c176 = arith.constant 176 : index
    %c0_180 = arith.constant 0 : index
    %210 = vector.load %arg5[%c176, %c0_180] : memref<256x32xf32, #tpu.memory_space<vmem>>, vector<16x32xf32>
    %cst_181 = arith.constant dense<0.000000e+00> : vector<24x32xf32>
    %211 = tpu.matmul %209, %210, %cst_181 {dimension_numbers = #tpu.dot_dimension_numbers<[1], [0], [0], [1], [0, 0, 1, 1], [], []>} : vector<24x16xf32>, vector<16x32xf32>, vector<24x32xf32> -> vector<24x32xf32>
    %212 = arith.addf %206, %211 : vector<24x32xf32>
    %c12_182 = arith.constant 12 : index
    %c0_183 = arith.constant 0 : index
    %c0_184 = arith.constant 0 : index
    %213 = vector.load %arg4[%c12_182, %c0_183, %c0_184] : memref<16x24x56xf32, #tpu.memory_space<vmem>>, vector<1x24x56xf32>
    %214 = vector.shape_cast %213 : vector<1x24x56xf32> to vector<24x56xf32>
    %cst_185 = arith.constant dense<0.000000e+00> : vector<24x16xf32>
    %215 = tpu.matmul %214, %141, %cst_185 {dimension_numbers = #tpu.dot_dimension_numbers<[1], [0], [0], [1], [0, 0, 1, 1], [], []>} : vector<24x56xf32>, vector<56x16xf32>, vector<24x16xf32> -> vector<24x16xf32>
    %c192 = arith.constant 192 : index
    %c0_186 = arith.constant 0 : index
    %216 = vector.load %arg5[%c192, %c0_186] : memref<256x32xf32, #tpu.memory_space<vmem>>, vector<16x32xf32>
    %cst_187 = arith.constant dense<0.000000e+00> : vector<24x32xf32>
    %217 = tpu.matmul %215, %216, %cst_187 {dimension_numbers = #tpu.dot_dimension_numbers<[1], [0], [0], [1], [0, 0, 1, 1], [], []>} : vector<24x16xf32>, vector<16x32xf32>, vector<24x32xf32> -> vector<24x32xf32>
    %218 = arith.addf %212, %217 : vector<24x32xf32>
    %c13_188 = arith.constant 13 : index
    %c0_189 = arith.constant 0 : index
    %c0_190 = arith.constant 0 : index
    %219 = vector.load %arg4[%c13_188, %c0_189, %c0_190] : memref<16x24x56xf32, #tpu.memory_space<vmem>>, vector<1x24x56xf32>
    %220 = vector.shape_cast %219 : vector<1x24x56xf32> to vector<24x56xf32>
    %cst_191 = arith.constant dense<0.000000e+00> : vector<24x16xf32>
    %221 = tpu.matmul %220, %141, %cst_191 {dimension_numbers = #tpu.dot_dimension_numbers<[1], [0], [0], [1], [0, 0, 1, 1], [], []>} : vector<24x56xf32>, vector<56x16xf32>, vector<24x16xf32> -> vector<24x16xf32>
    %c208 = arith.constant 208 : index
    %c0_192 = arith.constant 0 : index
    %222 = vector.load %arg5[%c208, %c0_192] : memref<256x32xf32, #tpu.memory_space<vmem>>, vector<16x32xf32>
    %cst_193 = arith.constant dense<0.000000e+00> : vector<24x32xf32>
    %223 = tpu.matmul %221, %222, %cst_193 {dimension_numbers = #tpu.dot_dimension_numbers<[1], [0], [0], [1], [0, 0, 1, 1], [], []>} : vector<24x16xf32>, vector<16x32xf32>, vector<24x32xf32> -> vector<24x32xf32>
    %224 = arith.addf %218, %223 : vector<24x32xf32>
    %c14_194 = arith.constant 14 : index
    %c0_195 = arith.constant 0 : index
    %c0_196 = arith.constant 0 : index
    %225 = vector.load %arg4[%c14_194, %c0_195, %c0_196] : memref<16x24x56xf32, #tpu.memory_space<vmem>>, vector<1x24x56xf32>
    %226 = vector.shape_cast %225 : vector<1x24x56xf32> to vector<24x56xf32>
    %cst_197 = arith.constant dense<0.000000e+00> : vector<24x16xf32>
    %227 = tpu.matmul %226, %141, %cst_197 {dimension_numbers = #tpu.dot_dimension_numbers<[1], [0], [0], [1], [0, 0, 1, 1], [], []>} : vector<24x56xf32>, vector<56x16xf32>, vector<24x16xf32> -> vector<24x16xf32>
    %c224 = arith.constant 224 : index
    %c0_198 = arith.constant 0 : index
    %228 = vector.load %arg5[%c224, %c0_198] : memref<256x32xf32, #tpu.memory_space<vmem>>, vector<16x32xf32>
    %cst_199 = arith.constant dense<0.000000e+00> : vector<24x32xf32>
    %229 = tpu.matmul %227, %228, %cst_199 {dimension_numbers = #tpu.dot_dimension_numbers<[1], [0], [0], [1], [0, 0, 1, 1], [], []>} : vector<24x16xf32>, vector<16x32xf32>, vector<24x32xf32> -> vector<24x32xf32>
    %230 = arith.addf %224, %229 : vector<24x32xf32>
    %c15_200 = arith.constant 15 : index
    %c0_201 = arith.constant 0 : index
    %c0_202 = arith.constant 0 : index
    %231 = vector.load %arg4[%c15_200, %c0_201, %c0_202] : memref<16x24x56xf32, #tpu.memory_space<vmem>>, vector<1x24x56xf32>
    %232 = vector.shape_cast %231 : vector<1x24x56xf32> to vector<24x56xf32>
    %cst_203 = arith.constant dense<0.000000e+00> : vector<24x16xf32>
    %233 = tpu.matmul %232, %141, %cst_203 {dimension_numbers = #tpu.dot_dimension_numbers<[1], [0], [0], [1], [0, 0, 1, 1], [], []>} : vector<24x56xf32>, vector<56x16xf32>, vector<24x16xf32> -> vector<24x16xf32>
    %c240 = arith.constant 240 : index
    %c0_204 = arith.constant 0 : index
    %234 = vector.load %arg5[%c240, %c0_204] : memref<256x32xf32, #tpu.memory_space<vmem>>, vector<16x32xf32>
    %cst_205 = arith.constant dense<0.000000e+00> : vector<24x32xf32>
    %235 = tpu.matmul %233, %234, %cst_205 {dimension_numbers = #tpu.dot_dimension_numbers<[1], [0], [0], [1], [0, 0, 1, 1], [], []>} : vector<24x16xf32>, vector<16x32xf32>, vector<24x32xf32> -> vector<24x32xf32>
    %236 = arith.addf %230, %235 : vector<24x32xf32>
    %c2_206 = arith.constant 2 : index
    %c0_207 = arith.constant 0 : index
    %c0_208 = arith.constant 0 : index
    %237 = vector.load %arg10[%c2_206, %c0_207, %c0_208] : memref<5x8x128xf32, #tpu.memory_space<vmem>>, vector<1x8x128xf32>
    %238 = vector.shape_cast %237 : vector<1x8x128xf32> to vector<8x128xf32>
    %239 = vector.extract_strided_slice %238 {offsets = [1, 0], sizes = [1, 32], strides = [1, 1]} : vector<8x128xf32> to vector<1x32xf32>
    %240 = vector.extract_strided_slice %238 {offsets = [2, 0], sizes = [1, 32], strides = [1, 1]} : vector<8x128xf32> to vector<1x32xf32>
    %cst_209 = arith.constant dense<0.000000e+00> : vector<32xf32>
    %241 = vector.multi_reduction <add>, %236, %cst_209 [0] : vector<24x32xf32> to vector<32xf32>
    %242 = vector.shape_cast %241 : vector<32xf32> to vector<1x32xf32>
    %cst_210 = arith.constant 0.055555556 : f32
    %243 = vector.broadcast %cst_210 : f32 to vector<1x32xf32>
    %244 = arith.mulf %242, %243 : vector<1x32xf32>
    %245 = vector.broadcast %244 : vector<1x32xf32> to vector<24x32xf32>
    %246 = arith.subf %236, %245 : vector<24x32xf32>
    %247 = tpu.iota {dimensions = array<i32: 0>} : vector<24x32xi32>
    %c18_i32 = arith.constant 18 : i32
    %248 = vector.broadcast %c18_i32 : i32 to vector<24x32xi32>
    %249 = arith.cmpi slt, %247, %248 : vector<24x32xi32>
    %cst_211 = arith.constant 0.000000e+00 : f32
    %250 = vector.broadcast %cst_211 : f32 to vector<24x32xf32>
    %251 = arith.select %249, %246, %250 : vector<24x32xi1>, vector<24x32xf32>
    %252 = arith.mulf %251, %251 : vector<24x32xf32>
    %cst_212 = arith.constant dense<0.000000e+00> : vector<32xf32>
    %253 = vector.multi_reduction <add>, %252, %cst_212 [0] : vector<24x32xf32> to vector<32xf32>
    %254 = vector.shape_cast %253 : vector<32xf32> to vector<1x32xf32>
    %cst_213 = arith.constant 0.055555556 : f32
    %255 = vector.broadcast %cst_213 : f32 to vector<1x32xf32>
    %256 = arith.mulf %254, %255 : vector<1x32xf32>
    %cst_214 = arith.constant 9.99999974E-6 : f32
    %257 = vector.broadcast %cst_214 : f32 to vector<1x32xf32>
    %258 = arith.addf %256, %257 : vector<1x32xf32>
    %259 = math.rsqrt %258 : vector<1x32xf32>
    %260 = vector.broadcast %259 : vector<1x32xf32> to vector<24x32xf32>
    %261 = arith.mulf %246, %260 : vector<24x32xf32>
    %262 = vector.broadcast %239 : vector<1x32xf32> to vector<24x32xf32>
    %263 = arith.mulf %261, %262 : vector<24x32xf32>
    %264 = vector.broadcast %240 : vector<1x32xf32> to vector<24x32xf32>
    %265 = arith.addf %263, %264 : vector<24x32xf32>
    %cst_215 = arith.constant 0.000000e+00 : f32
    %266 = vector.broadcast %cst_215 : f32 to vector<24x32xf32>
    %267 = arith.cmpf oge, %265, %266 : vector<24x32xf32>
    %cst_216 = arith.constant 2.000000e-01 : f32
    %268 = vector.broadcast %cst_216 : f32 to vector<24x32xf32>
    %269 = arith.mulf %268, %265 : vector<24x32xf32>
    %270 = arith.select %267, %265, %269 : vector<24x32xi1>, vector<24x32xf32>
    %c0_217 = arith.constant 0 : index
    %c0_218 = arith.constant 0 : index
    %c0_219 = arith.constant 0 : index
    %271 = vector.load %arg6[%c0_217, %c0_218, %c0_219] : memref<16x32x24xf32, #tpu.memory_space<vmem>>, vector<1x32x24xf32>
    %272 = vector.shape_cast %271 : vector<1x32x24xf32> to vector<32x24xf32>
    %cst_220 = arith.constant dense<0.000000e+00> : vector<32x32xf32>
    %273 = tpu.matmul %272, %270, %cst_220 {dimension_numbers = #tpu.dot_dimension_numbers<[1], [0], [0], [1], [0, 0, 1, 1], [], []>} : vector<32x24xf32>, vector<24x32xf32>, vector<32x32xf32> -> vector<32x32xf32>
    %c0_221 = arith.constant 0 : index
    %c0_222 = arith.constant 0 : index
    %274 = vector.load %arg7[%c0_221, %c0_222] : memref<512x64xf32, #tpu.memory_space<vmem>>, vector<32x64xf32>
    %cst_223 = arith.constant dense<0.000000e+00> : vector<32x64xf32>
    %275 = tpu.matmul %273, %274, %cst_223 {dimension_numbers = #tpu.dot_dimension_numbers<[1], [0], [0], [1], [0, 0, 1, 1], [], []>} : vector<32x32xf32>, vector<32x64xf32>, vector<32x64xf32> -> vector<32x64xf32>
    %c1_224 = arith.constant 1 : index
    %c0_225 = arith.constant 0 : index
    %c0_226 = arith.constant 0 : index
    %276 = vector.load %arg6[%c1_224, %c0_225, %c0_226] : memref<16x32x24xf32, #tpu.memory_space<vmem>>, vector<1x32x24xf32>
    %277 = vector.shape_cast %276 : vector<1x32x24xf32> to vector<32x24xf32>
    %cst_227 = arith.constant dense<0.000000e+00> : vector<32x32xf32>
    %278 = tpu.matmul %277, %270, %cst_227 {dimension_numbers = #tpu.dot_dimension_numbers<[1], [0], [0], [1], [0, 0, 1, 1], [], []>} : vector<32x24xf32>, vector<24x32xf32>, vector<32x32xf32> -> vector<32x32xf32>
    %c32_228 = arith.constant 32 : index
    %c0_229 = arith.constant 0 : index
    %279 = vector.load %arg7[%c32_228, %c0_229] : memref<512x64xf32, #tpu.memory_space<vmem>>, vector<32x64xf32>
    %cst_230 = arith.constant dense<0.000000e+00> : vector<32x64xf32>
    %280 = tpu.matmul %278, %279, %cst_230 {dimension_numbers = #tpu.dot_dimension_numbers<[1], [0], [0], [1], [0, 0, 1, 1], [], []>} : vector<32x32xf32>, vector<32x64xf32>, vector<32x64xf32> -> vector<32x64xf32>
    %281 = arith.addf %275, %280 : vector<32x64xf32>
    %c2_231 = arith.constant 2 : index
    %c0_232 = arith.constant 0 : index
    %c0_233 = arith.constant 0 : index
    %282 = vector.load %arg6[%c2_231, %c0_232, %c0_233] : memref<16x32x24xf32, #tpu.memory_space<vmem>>, vector<1x32x24xf32>
    %283 = vector.shape_cast %282 : vector<1x32x24xf32> to vector<32x24xf32>
    %cst_234 = arith.constant dense<0.000000e+00> : vector<32x32xf32>
    %284 = tpu.matmul %283, %270, %cst_234 {dimension_numbers = #tpu.dot_dimension_numbers<[1], [0], [0], [1], [0, 0, 1, 1], [], []>} : vector<32x24xf32>, vector<24x32xf32>, vector<32x32xf32> -> vector<32x32xf32>
    %c64_235 = arith.constant 64 : index
    %c0_236 = arith.constant 0 : index
    %285 = vector.load %arg7[%c64_235, %c0_236] : memref<512x64xf32, #tpu.memory_space<vmem>>, vector<32x64xf32>
    %cst_237 = arith.constant dense<0.000000e+00> : vector<32x64xf32>
    %286 = tpu.matmul %284, %285, %cst_237 {dimension_numbers = #tpu.dot_dimension_numbers<[1], [0], [0], [1], [0, 0, 1, 1], [], []>} : vector<32x32xf32>, vector<32x64xf32>, vector<32x64xf32> -> vector<32x64xf32>
    %287 = arith.addf %281, %286 : vector<32x64xf32>
    %c3_238 = arith.constant 3 : index
    %c0_239 = arith.constant 0 : index
    %c0_240 = arith.constant 0 : index
    %288 = vector.load %arg6[%c3_238, %c0_239, %c0_240] : memref<16x32x24xf32, #tpu.memory_space<vmem>>, vector<1x32x24xf32>
    %289 = vector.shape_cast %288 : vector<1x32x24xf32> to vector<32x24xf32>
    %cst_241 = arith.constant dense<0.000000e+00> : vector<32x32xf32>
    %290 = tpu.matmul %289, %270, %cst_241 {dimension_numbers = #tpu.dot_dimension_numbers<[1], [0], [0], [1], [0, 0, 1, 1], [], []>} : vector<32x24xf32>, vector<24x32xf32>, vector<32x32xf32> -> vector<32x32xf32>
    %c96_242 = arith.constant 96 : index
    %c0_243 = arith.constant 0 : index
    %291 = vector.load %arg7[%c96_242, %c0_243] : memref<512x64xf32, #tpu.memory_space<vmem>>, vector<32x64xf32>
    %cst_244 = arith.constant dense<0.000000e+00> : vector<32x64xf32>
    %292 = tpu.matmul %290, %291, %cst_244 {dimension_numbers = #tpu.dot_dimension_numbers<[1], [0], [0], [1], [0, 0, 1, 1], [], []>} : vector<32x32xf32>, vector<32x64xf32>, vector<32x64xf32> -> vector<32x64xf32>
    %293 = arith.addf %287, %292 : vector<32x64xf32>
    %c4_245 = arith.constant 4 : index
    %c0_246 = arith.constant 0 : index
    %c0_247 = arith.constant 0 : index
    %294 = vector.load %arg6[%c4_245, %c0_246, %c0_247] : memref<16x32x24xf32, #tpu.memory_space<vmem>>, vector<1x32x24xf32>
    %295 = vector.shape_cast %294 : vector<1x32x24xf32> to vector<32x24xf32>
    %cst_248 = arith.constant dense<0.000000e+00> : vector<32x32xf32>
    %296 = tpu.matmul %295, %270, %cst_248 {dimension_numbers = #tpu.dot_dimension_numbers<[1], [0], [0], [1], [0, 0, 1, 1], [], []>} : vector<32x24xf32>, vector<24x32xf32>, vector<32x32xf32> -> vector<32x32xf32>
    %c128_249 = arith.constant 128 : index
    %c0_250 = arith.constant 0 : index
    %297 = vector.load %arg7[%c128_249, %c0_250] : memref<512x64xf32, #tpu.memory_space<vmem>>, vector<32x64xf32>
    %cst_251 = arith.constant dense<0.000000e+00> : vector<32x64xf32>
    %298 = tpu.matmul %296, %297, %cst_251 {dimension_numbers = #tpu.dot_dimension_numbers<[1], [0], [0], [1], [0, 0, 1, 1], [], []>} : vector<32x32xf32>, vector<32x64xf32>, vector<32x64xf32> -> vector<32x64xf32>
    %299 = arith.addf %293, %298 : vector<32x64xf32>
    %c5_252 = arith.constant 5 : index
    %c0_253 = arith.constant 0 : index
    %c0_254 = arith.constant 0 : index
    %300 = vector.load %arg6[%c5_252, %c0_253, %c0_254] : memref<16x32x24xf32, #tpu.memory_space<vmem>>, vector<1x32x24xf32>
    %301 = vector.shape_cast %300 : vector<1x32x24xf32> to vector<32x24xf32>
    %cst_255 = arith.constant dense<0.000000e+00> : vector<32x32xf32>
    %302 = tpu.matmul %301, %270, %cst_255 {dimension_numbers = #tpu.dot_dimension_numbers<[1], [0], [0], [1], [0, 0, 1, 1], [], []>} : vector<32x24xf32>, vector<24x32xf32>, vector<32x32xf32> -> vector<32x32xf32>
    %c160_256 = arith.constant 160 : index
    %c0_257 = arith.constant 0 : index
    %303 = vector.load %arg7[%c160_256, %c0_257] : memref<512x64xf32, #tpu.memory_space<vmem>>, vector<32x64xf32>
    %cst_258 = arith.constant dense<0.000000e+00> : vector<32x64xf32>
    %304 = tpu.matmul %302, %303, %cst_258 {dimension_numbers = #tpu.dot_dimension_numbers<[1], [0], [0], [1], [0, 0, 1, 1], [], []>} : vector<32x32xf32>, vector<32x64xf32>, vector<32x64xf32> -> vector<32x64xf32>
    %305 = arith.addf %299, %304 : vector<32x64xf32>
    %c6_259 = arith.constant 6 : index
    %c0_260 = arith.constant 0 : index
    %c0_261 = arith.constant 0 : index
    %306 = vector.load %arg6[%c6_259, %c0_260, %c0_261] : memref<16x32x24xf32, #tpu.memory_space<vmem>>, vector<1x32x24xf32>
    %307 = vector.shape_cast %306 : vector<1x32x24xf32> to vector<32x24xf32>
    %cst_262 = arith.constant dense<0.000000e+00> : vector<32x32xf32>
    %308 = tpu.matmul %307, %270, %cst_262 {dimension_numbers = #tpu.dot_dimension_numbers<[1], [0], [0], [1], [0, 0, 1, 1], [], []>} : vector<32x24xf32>, vector<24x32xf32>, vector<32x32xf32> -> vector<32x32xf32>
    %c192_263 = arith.constant 192 : index
    %c0_264 = arith.constant 0 : index
    %309 = vector.load %arg7[%c192_263, %c0_264] : memref<512x64xf32, #tpu.memory_space<vmem>>, vector<32x64xf32>
    %cst_265 = arith.constant dense<0.000000e+00> : vector<32x64xf32>
    %310 = tpu.matmul %308, %309, %cst_265 {dimension_numbers = #tpu.dot_dimension_numbers<[1], [0], [0], [1], [0, 0, 1, 1], [], []>} : vector<32x32xf32>, vector<32x64xf32>, vector<32x64xf32> -> vector<32x64xf32>
    %311 = arith.addf %305, %310 : vector<32x64xf32>
    %c7_266 = arith.constant 7 : index
    %c0_267 = arith.constant 0 : index
    %c0_268 = arith.constant 0 : index
    %312 = vector.load %arg6[%c7_266, %c0_267, %c0_268] : memref<16x32x24xf32, #tpu.memory_space<vmem>>, vector<1x32x24xf32>
    %313 = vector.shape_cast %312 : vector<1x32x24xf32> to vector<32x24xf32>
    %cst_269 = arith.constant dense<0.000000e+00> : vector<32x32xf32>
    %314 = tpu.matmul %313, %270, %cst_269 {dimension_numbers = #tpu.dot_dimension_numbers<[1], [0], [0], [1], [0, 0, 1, 1], [], []>} : vector<32x24xf32>, vector<24x32xf32>, vector<32x32xf32> -> vector<32x32xf32>
    %c224_270 = arith.constant 224 : index
    %c0_271 = arith.constant 0 : index
    %315 = vector.load %arg7[%c224_270, %c0_271] : memref<512x64xf32, #tpu.memory_space<vmem>>, vector<32x64xf32>
    %cst_272 = arith.constant dense<0.000000e+00> : vector<32x64xf32>
    %316 = tpu.matmul %314, %315, %cst_272 {dimension_numbers = #tpu.dot_dimension_numbers<[1], [0], [0], [1], [0, 0, 1, 1], [], []>} : vector<32x32xf32>, vector<32x64xf32>, vector<32x64xf32> -> vector<32x64xf32>
    %317 = arith.addf %311, %316 : vector<32x64xf32>
    %c8_273 = arith.constant 8 : index
    %c0_274 = arith.constant 0 : index
    %c0_275 = arith.constant 0 : index
    %318 = vector.load %arg6[%c8_273, %c0_274, %c0_275] : memref<16x32x24xf32, #tpu.memory_space<vmem>>, vector<1x32x24xf32>
    %319 = vector.shape_cast %318 : vector<1x32x24xf32> to vector<32x24xf32>
    %cst_276 = arith.constant dense<0.000000e+00> : vector<32x32xf32>
    %320 = tpu.matmul %319, %270, %cst_276 {dimension_numbers = #tpu.dot_dimension_numbers<[1], [0], [0], [1], [0, 0, 1, 1], [], []>} : vector<32x24xf32>, vector<24x32xf32>, vector<32x32xf32> -> vector<32x32xf32>
    %c256 = arith.constant 256 : index
    %c0_277 = arith.constant 0 : index
    %321 = vector.load %arg7[%c256, %c0_277] : memref<512x64xf32, #tpu.memory_space<vmem>>, vector<32x64xf32>
    %cst_278 = arith.constant dense<0.000000e+00> : vector<32x64xf32>
    %322 = tpu.matmul %320, %321, %cst_278 {dimension_numbers = #tpu.dot_dimension_numbers<[1], [0], [0], [1], [0, 0, 1, 1], [], []>} : vector<32x32xf32>, vector<32x64xf32>, vector<32x64xf32> -> vector<32x64xf32>
    %323 = arith.addf %317, %322 : vector<32x64xf32>
    %c9_279 = arith.constant 9 : index
    %c0_280 = arith.constant 0 : index
    %c0_281 = arith.constant 0 : index
    %324 = vector.load %arg6[%c9_279, %c0_280, %c0_281] : memref<16x32x24xf32, #tpu.memory_space<vmem>>, vector<1x32x24xf32>
    %325 = vector.shape_cast %324 : vector<1x32x24xf32> to vector<32x24xf32>
    %cst_282 = arith.constant dense<0.000000e+00> : vector<32x32xf32>
    %326 = tpu.matmul %325, %270, %cst_282 {dimension_numbers = #tpu.dot_dimension_numbers<[1], [0], [0], [1], [0, 0, 1, 1], [], []>} : vector<32x24xf32>, vector<24x32xf32>, vector<32x32xf32> -> vector<32x32xf32>
    %c288 = arith.constant 288 : index
    %c0_283 = arith.constant 0 : index
    %327 = vector.load %arg7[%c288, %c0_283] : memref<512x64xf32, #tpu.memory_space<vmem>>, vector<32x64xf32>
    %cst_284 = arith.constant dense<0.000000e+00> : vector<32x64xf32>
    %328 = tpu.matmul %326, %327, %cst_284 {dimension_numbers = #tpu.dot_dimension_numbers<[1], [0], [0], [1], [0, 0, 1, 1], [], []>} : vector<32x32xf32>, vector<32x64xf32>, vector<32x64xf32> -> vector<32x64xf32>
    %329 = arith.addf %323, %328 : vector<32x64xf32>
    %c10_285 = arith.constant 10 : index
    %c0_286 = arith.constant 0 : index
    %c0_287 = arith.constant 0 : index
    %330 = vector.load %arg6[%c10_285, %c0_286, %c0_287] : memref<16x32x24xf32, #tpu.memory_space<vmem>>, vector<1x32x24xf32>
    %331 = vector.shape_cast %330 : vector<1x32x24xf32> to vector<32x24xf32>
    %cst_288 = arith.constant dense<0.000000e+00> : vector<32x32xf32>
    %332 = tpu.matmul %331, %270, %cst_288 {dimension_numbers = #tpu.dot_dimension_numbers<[1], [0], [0], [1], [0, 0, 1, 1], [], []>} : vector<32x24xf32>, vector<24x32xf32>, vector<32x32xf32> -> vector<32x32xf32>
    %c320 = arith.constant 320 : index
    %c0_289 = arith.constant 0 : index
    %333 = vector.load %arg7[%c320, %c0_289] : memref<512x64xf32, #tpu.memory_space<vmem>>, vector<32x64xf32>
    %cst_290 = arith.constant dense<0.000000e+00> : vector<32x64xf32>
    %334 = tpu.matmul %332, %333, %cst_290 {dimension_numbers = #tpu.dot_dimension_numbers<[1], [0], [0], [1], [0, 0, 1, 1], [], []>} : vector<32x32xf32>, vector<32x64xf32>, vector<32x64xf32> -> vector<32x64xf32>
    %335 = arith.addf %329, %334 : vector<32x64xf32>
    %c11_291 = arith.constant 11 : index
    %c0_292 = arith.constant 0 : index
    %c0_293 = arith.constant 0 : index
    %336 = vector.load %arg6[%c11_291, %c0_292, %c0_293] : memref<16x32x24xf32, #tpu.memory_space<vmem>>, vector<1x32x24xf32>
    %337 = vector.shape_cast %336 : vector<1x32x24xf32> to vector<32x24xf32>
    %cst_294 = arith.constant dense<0.000000e+00> : vector<32x32xf32>
    %338 = tpu.matmul %337, %270, %cst_294 {dimension_numbers = #tpu.dot_dimension_numbers<[1], [0], [0], [1], [0, 0, 1, 1], [], []>} : vector<32x24xf32>, vector<24x32xf32>, vector<32x32xf32> -> vector<32x32xf32>
    %c352 = arith.constant 352 : index
    %c0_295 = arith.constant 0 : index
    %339 = vector.load %arg7[%c352, %c0_295] : memref<512x64xf32, #tpu.memory_space<vmem>>, vector<32x64xf32>
    %cst_296 = arith.constant dense<0.000000e+00> : vector<32x64xf32>
    %340 = tpu.matmul %338, %339, %cst_296 {dimension_numbers = #tpu.dot_dimension_numbers<[1], [0], [0], [1], [0, 0, 1, 1], [], []>} : vector<32x32xf32>, vector<32x64xf32>, vector<32x64xf32> -> vector<32x64xf32>
    %341 = arith.addf %335, %340 : vector<32x64xf32>
    %c12_297 = arith.constant 12 : index
    %c0_298 = arith.constant 0 : index
    %c0_299 = arith.constant 0 : index
    %342 = vector.load %arg6[%c12_297, %c0_298, %c0_299] : memref<16x32x24xf32, #tpu.memory_space<vmem>>, vector<1x32x24xf32>
    %343 = vector.shape_cast %342 : vector<1x32x24xf32> to vector<32x24xf32>
    %cst_300 = arith.constant dense<0.000000e+00> : vector<32x32xf32>
    %344 = tpu.matmul %343, %270, %cst_300 {dimension_numbers = #tpu.dot_dimension_numbers<[1], [0], [0], [1], [0, 0, 1, 1], [], []>} : vector<32x24xf32>, vector<24x32xf32>, vector<32x32xf32> -> vector<32x32xf32>
    %c384 = arith.constant 384 : index
    %c0_301 = arith.constant 0 : index
    %345 = vector.load %arg7[%c384, %c0_301] : memref<512x64xf32, #tpu.memory_space<vmem>>, vector<32x64xf32>
    %cst_302 = arith.constant dense<0.000000e+00> : vector<32x64xf32>
    %346 = tpu.matmul %344, %345, %cst_302 {dimension_numbers = #tpu.dot_dimension_numbers<[1], [0], [0], [1], [0, 0, 1, 1], [], []>} : vector<32x32xf32>, vector<32x64xf32>, vector<32x64xf32> -> vector<32x64xf32>
    %347 = arith.addf %341, %346 : vector<32x64xf32>
    %c13_303 = arith.constant 13 : index
    %c0_304 = arith.constant 0 : index
    %c0_305 = arith.constant 0 : index
    %348 = vector.load %arg6[%c13_303, %c0_304, %c0_305] : memref<16x32x24xf32, #tpu.memory_space<vmem>>, vector<1x32x24xf32>
    %349 = vector.shape_cast %348 : vector<1x32x24xf32> to vector<32x24xf32>
    %cst_306 = arith.constant dense<0.000000e+00> : vector<32x32xf32>
    %350 = tpu.matmul %349, %270, %cst_306 {dimension_numbers = #tpu.dot_dimension_numbers<[1], [0], [0], [1], [0, 0, 1, 1], [], []>} : vector<32x24xf32>, vector<24x32xf32>, vector<32x32xf32> -> vector<32x32xf32>
    %c416 = arith.constant 416 : index
    %c0_307 = arith.constant 0 : index
    %351 = vector.load %arg7[%c416, %c0_307] : memref<512x64xf32, #tpu.memory_space<vmem>>, vector<32x64xf32>
    %cst_308 = arith.constant dense<0.000000e+00> : vector<32x64xf32>
    %352 = tpu.matmul %350, %351, %cst_308 {dimension_numbers = #tpu.dot_dimension_numbers<[1], [0], [0], [1], [0, 0, 1, 1], [], []>} : vector<32x32xf32>, vector<32x64xf32>, vector<32x64xf32> -> vector<32x64xf32>
    %353 = arith.addf %347, %352 : vector<32x64xf32>
    %c14_309 = arith.constant 14 : index
    %c0_310 = arith.constant 0 : index
    %c0_311 = arith.constant 0 : index
    %354 = vector.load %arg6[%c14_309, %c0_310, %c0_311] : memref<16x32x24xf32, #tpu.memory_space<vmem>>, vector<1x32x24xf32>
    %355 = vector.shape_cast %354 : vector<1x32x24xf32> to vector<32x24xf32>
    %cst_312 = arith.constant dense<0.000000e+00> : vector<32x32xf32>
    %356 = tpu.matmul %355, %270, %cst_312 {dimension_numbers = #tpu.dot_dimension_numbers<[1], [0], [0], [1], [0, 0, 1, 1], [], []>} : vector<32x24xf32>, vector<24x32xf32>, vector<32x32xf32> -> vector<32x32xf32>
    %c448 = arith.constant 448 : index
    %c0_313 = arith.constant 0 : index
    %357 = vector.load %arg7[%c448, %c0_313] : memref<512x64xf32, #tpu.memory_space<vmem>>, vector<32x64xf32>
    %cst_314 = arith.constant dense<0.000000e+00> : vector<32x64xf32>
    %358 = tpu.matmul %356, %357, %cst_314 {dimension_numbers = #tpu.dot_dimension_numbers<[1], [0], [0], [1], [0, 0, 1, 1], [], []>} : vector<32x32xf32>, vector<32x64xf32>, vector<32x64xf32> -> vector<32x64xf32>
    %359 = arith.addf %353, %358 : vector<32x64xf32>
    %c15_315 = arith.constant 15 : index
    %c0_316 = arith.constant 0 : index
    %c0_317 = arith.constant 0 : index
    %360 = vector.load %arg6[%c15_315, %c0_316, %c0_317] : memref<16x32x24xf32, #tpu.memory_space<vmem>>, vector<1x32x24xf32>
    %361 = vector.shape_cast %360 : vector<1x32x24xf32> to vector<32x24xf32>
    %cst_318 = arith.constant dense<0.000000e+00> : vector<32x32xf32>
    %362 = tpu.matmul %361, %270, %cst_318 {dimension_numbers = #tpu.dot_dimension_numbers<[1], [0], [0], [1], [0, 0, 1, 1], [], []>} : vector<32x24xf32>, vector<24x32xf32>, vector<32x32xf32> -> vector<32x32xf32>
    %c480 = arith.constant 480 : index
    %c0_319 = arith.constant 0 : index
    %363 = vector.load %arg7[%c480, %c0_319] : memref<512x64xf32, #tpu.memory_space<vmem>>, vector<32x64xf32>
    %cst_320 = arith.constant dense<0.000000e+00> : vector<32x64xf32>
    %364 = tpu.matmul %362, %363, %cst_320 {dimension_numbers = #tpu.dot_dimension_numbers<[1], [0], [0], [1], [0, 0, 1, 1], [], []>} : vector<32x32xf32>, vector<32x64xf32>, vector<32x64xf32> -> vector<32x64xf32>
    %365 = arith.addf %359, %364 : vector<32x64xf32>
    %c3_321 = arith.constant 3 : index
    %c0_322 = arith.constant 0 : index
    %c0_323 = arith.constant 0 : index
    %366 = vector.load %arg10[%c3_321, %c0_322, %c0_323] : memref<5x8x128xf32, #tpu.memory_space<vmem>>, vector<1x8x128xf32>
    %367 = vector.shape_cast %366 : vector<1x8x128xf32> to vector<8x128xf32>
    %368 = vector.extract_strided_slice %367 {offsets = [1, 0], sizes = [1, 64], strides = [1, 1]} : vector<8x128xf32> to vector<1x64xf32>
    %369 = vector.extract_strided_slice %367 {offsets = [2, 0], sizes = [1, 64], strides = [1, 1]} : vector<8x128xf32> to vector<1x64xf32>
    %cst_324 = arith.constant dense<0.000000e+00> : vector<64xf32>
    %370 = vector.multi_reduction <add>, %365, %cst_324 [0] : vector<32x64xf32> to vector<64xf32>
    %371 = vector.shape_cast %370 : vector<64xf32> to vector<1x64xf32>
    %cst_325 = arith.constant 3.125000e-02 : f32
    %372 = vector.broadcast %cst_325 : f32 to vector<1x64xf32>
    %373 = arith.mulf %371, %372 : vector<1x64xf32>
    %374 = vector.broadcast %373 : vector<1x64xf32> to vector<32x64xf32>
    %375 = arith.subf %365, %374 : vector<32x64xf32>
    %376 = tpu.iota {dimensions = array<i32: 0>} : vector<32x64xi32>
    %c32_i32 = arith.constant 32 : i32
    %377 = vector.broadcast %c32_i32 : i32 to vector<32x64xi32>
    %378 = arith.cmpi slt, %376, %377 : vector<32x64xi32>
    %cst_326 = arith.constant 0.000000e+00 : f32
    %379 = vector.broadcast %cst_326 : f32 to vector<32x64xf32>
    %380 = arith.select %378, %375, %379 : vector<32x64xi1>, vector<32x64xf32>
    %381 = arith.mulf %380, %380 : vector<32x64xf32>
    %cst_327 = arith.constant dense<0.000000e+00> : vector<64xf32>
    %382 = vector.multi_reduction <add>, %381, %cst_327 [0] : vector<32x64xf32> to vector<64xf32>
    %383 = vector.shape_cast %382 : vector<64xf32> to vector<1x64xf32>
    %cst_328 = arith.constant 3.125000e-02 : f32
    %384 = vector.broadcast %cst_328 : f32 to vector<1x64xf32>
    %385 = arith.mulf %383, %384 : vector<1x64xf32>
    %cst_329 = arith.constant 9.99999974E-6 : f32
    %386 = vector.broadcast %cst_329 : f32 to vector<1x64xf32>
    %387 = arith.addf %385, %386 : vector<1x64xf32>
    %388 = math.rsqrt %387 : vector<1x64xf32>
    %389 = vector.broadcast %388 : vector<1x64xf32> to vector<32x64xf32>
    %390 = arith.mulf %375, %389 : vector<32x64xf32>
    %391 = vector.broadcast %368 : vector<1x64xf32> to vector<32x64xf32>
    %392 = arith.mulf %390, %391 : vector<32x64xf32>
    %393 = vector.broadcast %369 : vector<1x64xf32> to vector<32x64xf32>
    %394 = arith.addf %392, %393 : vector<32x64xf32>
    %cst_330 = arith.constant 0.000000e+00 : f32
    %395 = vector.broadcast %cst_330 : f32 to vector<32x64xf32>
    %396 = arith.cmpf oge, %394, %395 : vector<32x64xf32>
    %cst_331 = arith.constant 2.000000e-01 : f32
    %397 = vector.broadcast %cst_331 : f32 to vector<32x64xf32>
    %398 = arith.mulf %397, %394 : vector<32x64xf32>
    %399 = arith.select %396, %394, %398 : vector<32x64xi1>, vector<32x64xf32>
    %c0_332 = arith.constant 0 : index
    %c0_333 = arith.constant 0 : index
    %c0_334 = arith.constant 0 : index
    %400 = vector.load %arg8[%c0_332, %c0_333, %c0_334] : memref<16x56x32xf32, #tpu.memory_space<vmem>>, vector<1x56x32xf32>
    %401 = vector.shape_cast %400 : vector<1x56x32xf32> to vector<56x32xf32>
    %cst_335 = arith.constant dense<0.000000e+00> : vector<56x64xf32>
    %402 = tpu.matmul %401, %399, %cst_335 {dimension_numbers = #tpu.dot_dimension_numbers<[1], [0], [0], [1], [0, 0, 1, 1], [], []>} : vector<56x32xf32>, vector<32x64xf32>, vector<56x64xf32> -> vector<56x64xf32>
    %c0_336 = arith.constant 0 : index
    %c0_337 = arith.constant 0 : index
    %403 = vector.load %arg9[%c0_336, %c0_337] : memref<1024x1xf32, #tpu.memory_space<vmem>>, vector<64x1xf32>
    %cst_338 = arith.constant dense<0.000000e+00> : vector<56x1xf32>
    %404 = tpu.matmul %402, %403, %cst_338 {dimension_numbers = #tpu.dot_dimension_numbers<[1], [0], [0], [1], [0, 0, 1, 1], [], []>} : vector<56x64xf32>, vector<64x1xf32>, vector<56x1xf32> -> vector<56x1xf32>
    %c1_339 = arith.constant 1 : index
    %c0_340 = arith.constant 0 : index
    %c0_341 = arith.constant 0 : index
    %405 = vector.load %arg8[%c1_339, %c0_340, %c0_341] : memref<16x56x32xf32, #tpu.memory_space<vmem>>, vector<1x56x32xf32>
    %406 = vector.shape_cast %405 : vector<1x56x32xf32> to vector<56x32xf32>
    %cst_342 = arith.constant dense<0.000000e+00> : vector<56x64xf32>
    %407 = tpu.matmul %406, %399, %cst_342 {dimension_numbers = #tpu.dot_dimension_numbers<[1], [0], [0], [1], [0, 0, 1, 1], [], []>} : vector<56x32xf32>, vector<32x64xf32>, vector<56x64xf32> -> vector<56x64xf32>
    %c64_343 = arith.constant 64 : index
    %c0_344 = arith.constant 0 : index
    %408 = vector.load %arg9[%c64_343, %c0_344] : memref<1024x1xf32, #tpu.memory_space<vmem>>, vector<64x1xf32>
    %cst_345 = arith.constant dense<0.000000e+00> : vector<56x1xf32>
    %409 = tpu.matmul %407, %408, %cst_345 {dimension_numbers = #tpu.dot_dimension_numbers<[1], [0], [0], [1], [0, 0, 1, 1], [], []>} : vector<56x64xf32>, vector<64x1xf32>, vector<56x1xf32> -> vector<56x1xf32>
    %410 = arith.addf %404, %409 : vector<56x1xf32>
    %c2_346 = arith.constant 2 : index
    %c0_347 = arith.constant 0 : index
    %c0_348 = arith.constant 0 : index
    %411 = vector.load %arg8[%c2_346, %c0_347, %c0_348] : memref<16x56x32xf32, #tpu.memory_space<vmem>>, vector<1x56x32xf32>
    %412 = vector.shape_cast %411 : vector<1x56x32xf32> to vector<56x32xf32>
    %cst_349 = arith.constant dense<0.000000e+00> : vector<56x64xf32>
    %413 = tpu.matmul %412, %399, %cst_349 {dimension_numbers = #tpu.dot_dimension_numbers<[1], [0], [0], [1], [0, 0, 1, 1], [], []>} : vector<56x32xf32>, vector<32x64xf32>, vector<56x64xf32> -> vector<56x64xf32>
    %c128_350 = arith.constant 128 : index
    %c0_351 = arith.constant 0 : index
    %414 = vector.load %arg9[%c128_350, %c0_351] : memref<1024x1xf32, #tpu.memory_space<vmem>>, vector<64x1xf32>
    %cst_352 = arith.constant dense<0.000000e+00> : vector<56x1xf32>
    %415 = tpu.matmul %413, %414, %cst_352 {dimension_numbers = #tpu.dot_dimension_numbers<[1], [0], [0], [1], [0, 0, 1, 1], [], []>} : vector<56x64xf32>, vector<64x1xf32>, vector<56x1xf32> -> vector<56x1xf32>
    %416 = arith.addf %410, %415 : vector<56x1xf32>
    %c3_353 = arith.constant 3 : index
    %c0_354 = arith.constant 0 : index
    %c0_355 = arith.constant 0 : index
    %417 = vector.load %arg8[%c3_353, %c0_354, %c0_355] : memref<16x56x32xf32, #tpu.memory_space<vmem>>, vector<1x56x32xf32>
    %418 = vector.shape_cast %417 : vector<1x56x32xf32> to vector<56x32xf32>
    %cst_356 = arith.constant dense<0.000000e+00> : vector<56x64xf32>
    %419 = tpu.matmul %418, %399, %cst_356 {dimension_numbers = #tpu.dot_dimension_numbers<[1], [0], [0], [1], [0, 0, 1, 1], [], []>} : vector<56x32xf32>, vector<32x64xf32>, vector<56x64xf32> -> vector<56x64xf32>
    %c192_357 = arith.constant 192 : index
    %c0_358 = arith.constant 0 : index
    %420 = vector.load %arg9[%c192_357, %c0_358] : memref<1024x1xf32, #tpu.memory_space<vmem>>, vector<64x1xf32>
    %cst_359 = arith.constant dense<0.000000e+00> : vector<56x1xf32>
    %421 = tpu.matmul %419, %420, %cst_359 {dimension_numbers = #tpu.dot_dimension_numbers<[1], [0], [0], [1], [0, 0, 1, 1], [], []>} : vector<56x64xf32>, vector<64x1xf32>, vector<56x1xf32> -> vector<56x1xf32>
    %422 = arith.addf %416, %421 : vector<56x1xf32>
    %c4_360 = arith.constant 4 : index
    %c0_361 = arith.constant 0 : index
    %c0_362 = arith.constant 0 : index
    %423 = vector.load %arg8[%c4_360, %c0_361, %c0_362] : memref<16x56x32xf32, #tpu.memory_space<vmem>>, vector<1x56x32xf32>
    %424 = vector.shape_cast %423 : vector<1x56x32xf32> to vector<56x32xf32>
    %cst_363 = arith.constant dense<0.000000e+00> : vector<56x64xf32>
    %425 = tpu.matmul %424, %399, %cst_363 {dimension_numbers = #tpu.dot_dimension_numbers<[1], [0], [0], [1], [0, 0, 1, 1], [], []>} : vector<56x32xf32>, vector<32x64xf32>, vector<56x64xf32> -> vector<56x64xf32>
    %c256_364 = arith.constant 256 : index
    %c0_365 = arith.constant 0 : index
    %426 = vector.load %arg9[%c256_364, %c0_365] : memref<1024x1xf32, #tpu.memory_space<vmem>>, vector<64x1xf32>
    %cst_366 = arith.constant dense<0.000000e+00> : vector<56x1xf32>
    %427 = tpu.matmul %425, %426, %cst_366 {dimension_numbers = #tpu.dot_dimension_numbers<[1], [0], [0], [1], [0, 0, 1, 1], [], []>} : vector<56x64xf32>, vector<64x1xf32>, vector<56x1xf32> -> vector<56x1xf32>
    %428 = arith.addf %422, %427 : vector<56x1xf32>
    %c5_367 = arith.constant 5 : index
    %c0_368 = arith.constant 0 : index
    %c0_369 = arith.constant 0 : index
    %429 = vector.load %arg8[%c5_367, %c0_368, %c0_369] : memref<16x56x32xf32, #tpu.memory_space<vmem>>, vector<1x56x32xf32>
    %430 = vector.shape_cast %429 : vector<1x56x32xf32> to vector<56x32xf32>
    %cst_370 = arith.constant dense<0.000000e+00> : vector<56x64xf32>
    %431 = tpu.matmul %430, %399, %cst_370 {dimension_numbers = #tpu.dot_dimension_numbers<[1], [0], [0], [1], [0, 0, 1, 1], [], []>} : vector<56x32xf32>, vector<32x64xf32>, vector<56x64xf32> -> vector<56x64xf32>
    %c320_371 = arith.constant 320 : index
    %c0_372 = arith.constant 0 : index
    %432 = vector.load %arg9[%c320_371, %c0_372] : memref<1024x1xf32, #tpu.memory_space<vmem>>, vector<64x1xf32>
    %cst_373 = arith.constant dense<0.000000e+00> : vector<56x1xf32>
    %433 = tpu.matmul %431, %432, %cst_373 {dimension_numbers = #tpu.dot_dimension_numbers<[1], [0], [0], [1], [0, 0, 1, 1], [], []>} : vector<56x64xf32>, vector<64x1xf32>, vector<56x1xf32> -> vector<56x1xf32>
    %434 = arith.addf %428, %433 : vector<56x1xf32>
    %c6_374 = arith.constant 6 : index
    %c0_375 = arith.constant 0 : index
    %c0_376 = arith.constant 0 : index
    %435 = vector.load %arg8[%c6_374, %c0_375, %c0_376] : memref<16x56x32xf32, #tpu.memory_space<vmem>>, vector<1x56x32xf32>
    %436 = vector.shape_cast %435 : vector<1x56x32xf32> to vector<56x32xf32>
    %cst_377 = arith.constant dense<0.000000e+00> : vector<56x64xf32>
    %437 = tpu.matmul %436, %399, %cst_377 {dimension_numbers = #tpu.dot_dimension_numbers<[1], [0], [0], [1], [0, 0, 1, 1], [], []>} : vector<56x32xf32>, vector<32x64xf32>, vector<56x64xf32> -> vector<56x64xf32>
    %c384_378 = arith.constant 384 : index
    %c0_379 = arith.constant 0 : index
    %438 = vector.load %arg9[%c384_378, %c0_379] : memref<1024x1xf32, #tpu.memory_space<vmem>>, vector<64x1xf32>
    %cst_380 = arith.constant dense<0.000000e+00> : vector<56x1xf32>
    %439 = tpu.matmul %437, %438, %cst_380 {dimension_numbers = #tpu.dot_dimension_numbers<[1], [0], [0], [1], [0, 0, 1, 1], [], []>} : vector<56x64xf32>, vector<64x1xf32>, vector<56x1xf32> -> vector<56x1xf32>
    %440 = arith.addf %434, %439 : vector<56x1xf32>
    %c7_381 = arith.constant 7 : index
    %c0_382 = arith.constant 0 : index
    %c0_383 = arith.constant 0 : index
    %441 = vector.load %arg8[%c7_381, %c0_382, %c0_383] : memref<16x56x32xf32, #tpu.memory_space<vmem>>, vector<1x56x32xf32>
    %442 = vector.shape_cast %441 : vector<1x56x32xf32> to vector<56x32xf32>
    %cst_384 = arith.constant dense<0.000000e+00> : vector<56x64xf32>
    %443 = tpu.matmul %442, %399, %cst_384 {dimension_numbers = #tpu.dot_dimension_numbers<[1], [0], [0], [1], [0, 0, 1, 1], [], []>} : vector<56x32xf32>, vector<32x64xf32>, vector<56x64xf32> -> vector<56x64xf32>
    %c448_385 = arith.constant 448 : index
    %c0_386 = arith.constant 0 : index
    %444 = vector.load %arg9[%c448_385, %c0_386] : memref<1024x1xf32, #tpu.memory_space<vmem>>, vector<64x1xf32>
    %cst_387 = arith.constant dense<0.000000e+00> : vector<56x1xf32>
    %445 = tpu.matmul %443, %444, %cst_387 {dimension_numbers = #tpu.dot_dimension_numbers<[1], [0], [0], [1], [0, 0, 1, 1], [], []>} : vector<56x64xf32>, vector<64x1xf32>, vector<56x1xf32> -> vector<56x1xf32>
    %446 = arith.addf %440, %445 : vector<56x1xf32>
    %c8_388 = arith.constant 8 : index
    %c0_389 = arith.constant 0 : index
    %c0_390 = arith.constant 0 : index
    %447 = vector.load %arg8[%c8_388, %c0_389, %c0_390] : memref<16x56x32xf32, #tpu.memory_space<vmem>>, vector<1x56x32xf32>
    %448 = vector.shape_cast %447 : vector<1x56x32xf32> to vector<56x32xf32>
    %cst_391 = arith.constant dense<0.000000e+00> : vector<56x64xf32>
    %449 = tpu.matmul %448, %399, %cst_391 {dimension_numbers = #tpu.dot_dimension_numbers<[1], [0], [0], [1], [0, 0, 1, 1], [], []>} : vector<56x32xf32>, vector<32x64xf32>, vector<56x64xf32> -> vector<56x64xf32>
    %c512 = arith.constant 512 : index
    %c0_392 = arith.constant 0 : index
    %450 = vector.load %arg9[%c512, %c0_392] : memref<1024x1xf32, #tpu.memory_space<vmem>>, vector<64x1xf32>
    %cst_393 = arith.constant dense<0.000000e+00> : vector<56x1xf32>
    %451 = tpu.matmul %449, %450, %cst_393 {dimension_numbers = #tpu.dot_dimension_numbers<[1], [0], [0], [1], [0, 0, 1, 1], [], []>} : vector<56x64xf32>, vector<64x1xf32>, vector<56x1xf32> -> vector<56x1xf32>
    %452 = arith.addf %446, %451 : vector<56x1xf32>
    %c9_394 = arith.constant 9 : index
    %c0_395 = arith.constant 0 : index
    %c0_396 = arith.constant 0 : index
    %453 = vector.load %arg8[%c9_394, %c0_395, %c0_396] : memref<16x56x32xf32, #tpu.memory_space<vmem>>, vector<1x56x32xf32>
    %454 = vector.shape_cast %453 : vector<1x56x32xf32> to vector<56x32xf32>
    %cst_397 = arith.constant dense<0.000000e+00> : vector<56x64xf32>
    %455 = tpu.matmul %454, %399, %cst_397 {dimension_numbers = #tpu.dot_dimension_numbers<[1], [0], [0], [1], [0, 0, 1, 1], [], []>} : vector<56x32xf32>, vector<32x64xf32>, vector<56x64xf32> -> vector<56x64xf32>
    %c576 = arith.constant 576 : index
    %c0_398 = arith.constant 0 : index
    %456 = vector.load %arg9[%c576, %c0_398] : memref<1024x1xf32, #tpu.memory_space<vmem>>, vector<64x1xf32>
    %cst_399 = arith.constant dense<0.000000e+00> : vector<56x1xf32>
    %457 = tpu.matmul %455, %456, %cst_399 {dimension_numbers = #tpu.dot_dimension_numbers<[1], [0], [0], [1], [0, 0, 1, 1], [], []>} : vector<56x64xf32>, vector<64x1xf32>, vector<56x1xf32> -> vector<56x1xf32>
    %458 = arith.addf %452, %457 : vector<56x1xf32>
    %c10_400 = arith.constant 10 : index
    %c0_401 = arith.constant 0 : index
    %c0_402 = arith.constant 0 : index
    %459 = vector.load %arg8[%c10_400, %c0_401, %c0_402] : memref<16x56x32xf32, #tpu.memory_space<vmem>>, vector<1x56x32xf32>
    %460 = vector.shape_cast %459 : vector<1x56x32xf32> to vector<56x32xf32>
    %cst_403 = arith.constant dense<0.000000e+00> : vector<56x64xf32>
    %461 = tpu.matmul %460, %399, %cst_403 {dimension_numbers = #tpu.dot_dimension_numbers<[1], [0], [0], [1], [0, 0, 1, 1], [], []>} : vector<56x32xf32>, vector<32x64xf32>, vector<56x64xf32> -> vector<56x64xf32>
    %c640 = arith.constant 640 : index
    %c0_404 = arith.constant 0 : index
    %462 = vector.load %arg9[%c640, %c0_404] : memref<1024x1xf32, #tpu.memory_space<vmem>>, vector<64x1xf32>
    %cst_405 = arith.constant dense<0.000000e+00> : vector<56x1xf32>
    %463 = tpu.matmul %461, %462, %cst_405 {dimension_numbers = #tpu.dot_dimension_numbers<[1], [0], [0], [1], [0, 0, 1, 1], [], []>} : vector<56x64xf32>, vector<64x1xf32>, vector<56x1xf32> -> vector<56x1xf32>
    %464 = arith.addf %458, %463 : vector<56x1xf32>
    %c11_406 = arith.constant 11 : index
    %c0_407 = arith.constant 0 : index
    %c0_408 = arith.constant 0 : index
    %465 = vector.load %arg8[%c11_406, %c0_407, %c0_408] : memref<16x56x32xf32, #tpu.memory_space<vmem>>, vector<1x56x32xf32>
    %466 = vector.shape_cast %465 : vector<1x56x32xf32> to vector<56x32xf32>
    %cst_409 = arith.constant dense<0.000000e+00> : vector<56x64xf32>
    %467 = tpu.matmul %466, %399, %cst_409 {dimension_numbers = #tpu.dot_dimension_numbers<[1], [0], [0], [1], [0, 0, 1, 1], [], []>} : vector<56x32xf32>, vector<32x64xf32>, vector<56x64xf32> -> vector<56x64xf32>
    %c704 = arith.constant 704 : index
    %c0_410 = arith.constant 0 : index
    %468 = vector.load %arg9[%c704, %c0_410] : memref<1024x1xf32, #tpu.memory_space<vmem>>, vector<64x1xf32>
    %cst_411 = arith.constant dense<0.000000e+00> : vector<56x1xf32>
    %469 = tpu.matmul %467, %468, %cst_411 {dimension_numbers = #tpu.dot_dimension_numbers<[1], [0], [0], [1], [0, 0, 1, 1], [], []>} : vector<56x64xf32>, vector<64x1xf32>, vector<56x1xf32> -> vector<56x1xf32>
    %470 = arith.addf %464, %469 : vector<56x1xf32>
    %c12_412 = arith.constant 12 : index
    %c0_413 = arith.constant 0 : index
    %c0_414 = arith.constant 0 : index
    %471 = vector.load %arg8[%c12_412, %c0_413, %c0_414] : memref<16x56x32xf32, #tpu.memory_space<vmem>>, vector<1x56x32xf32>
    %472 = vector.shape_cast %471 : vector<1x56x32xf32> to vector<56x32xf32>
    %cst_415 = arith.constant dense<0.000000e+00> : vector<56x64xf32>
    %473 = tpu.matmul %472, %399, %cst_415 {dimension_numbers = #tpu.dot_dimension_numbers<[1], [0], [0], [1], [0, 0, 1, 1], [], []>} : vector<56x32xf32>, vector<32x64xf32>, vector<56x64xf32> -> vector<56x64xf32>
    %c768 = arith.constant 768 : index
    %c0_416 = arith.constant 0 : index
    %474 = vector.load %arg9[%c768, %c0_416] : memref<1024x1xf32, #tpu.memory_space<vmem>>, vector<64x1xf32>
    %cst_417 = arith.constant dense<0.000000e+00> : vector<56x1xf32>
    %475 = tpu.matmul %473, %474, %cst_417 {dimension_numbers = #tpu.dot_dimension_numbers<[1], [0], [0], [1], [0, 0, 1, 1], [], []>} : vector<56x64xf32>, vector<64x1xf32>, vector<56x1xf32> -> vector<56x1xf32>
    %476 = arith.addf %470, %475 : vector<56x1xf32>
    %c13_418 = arith.constant 13 : index
    %c0_419 = arith.constant 0 : index
    %c0_420 = arith.constant 0 : index
    %477 = vector.load %arg8[%c13_418, %c0_419, %c0_420] : memref<16x56x32xf32, #tpu.memory_space<vmem>>, vector<1x56x32xf32>
    %478 = vector.shape_cast %477 : vector<1x56x32xf32> to vector<56x32xf32>
    %cst_421 = arith.constant dense<0.000000e+00> : vector<56x64xf32>
    %479 = tpu.matmul %478, %399, %cst_421 {dimension_numbers = #tpu.dot_dimension_numbers<[1], [0], [0], [1], [0, 0, 1, 1], [], []>} : vector<56x32xf32>, vector<32x64xf32>, vector<56x64xf32> -> vector<56x64xf32>
    %c832 = arith.constant 832 : index
    %c0_422 = arith.constant 0 : index
    %480 = vector.load %arg9[%c832, %c0_422] : memref<1024x1xf32, #tpu.memory_space<vmem>>, vector<64x1xf32>
    %cst_423 = arith.constant dense<0.000000e+00> : vector<56x1xf32>
    %481 = tpu.matmul %479, %480, %cst_423 {dimension_numbers = #tpu.dot_dimension_numbers<[1], [0], [0], [1], [0, 0, 1, 1], [], []>} : vector<56x64xf32>, vector<64x1xf32>, vector<56x1xf32> -> vector<56x1xf32>
    %482 = arith.addf %476, %481 : vector<56x1xf32>
    %c14_424 = arith.constant 14 : index
    %c0_425 = arith.constant 0 : index
    %c0_426 = arith.constant 0 : index
    %483 = vector.load %arg8[%c14_424, %c0_425, %c0_426] : memref<16x56x32xf32, #tpu.memory_space<vmem>>, vector<1x56x32xf32>
    %484 = vector.shape_cast %483 : vector<1x56x32xf32> to vector<56x32xf32>
    %cst_427 = arith.constant dense<0.000000e+00> : vector<56x64xf32>
    %485 = tpu.matmul %484, %399, %cst_427 {dimension_numbers = #tpu.dot_dimension_numbers<[1], [0], [0], [1], [0, 0, 1, 1], [], []>} : vector<56x32xf32>, vector<32x64xf32>, vector<56x64xf32> -> vector<56x64xf32>
    %c896 = arith.constant 896 : index
    %c0_428 = arith.constant 0 : index
    %486 = vector.load %arg9[%c896, %c0_428] : memref<1024x1xf32, #tpu.memory_space<vmem>>, vector<64x1xf32>
    %cst_429 = arith.constant dense<0.000000e+00> : vector<56x1xf32>
    %487 = tpu.matmul %485, %486, %cst_429 {dimension_numbers = #tpu.dot_dimension_numbers<[1], [0], [0], [1], [0, 0, 1, 1], [], []>} : vector<56x64xf32>, vector<64x1xf32>, vector<56x1xf32> -> vector<56x1xf32>
    %488 = arith.addf %482, %487 : vector<56x1xf32>
    %c15_430 = arith.constant 15 : index
    %c0_431 = arith.constant 0 : index
    %c0_432 = arith.constant 0 : index
    %489 = vector.load %arg8[%c15_430, %c0_431, %c0_432] : memref<16x56x32xf32, #tpu.memory_space<vmem>>, vector<1x56x32xf32>
    %490 = vector.shape_cast %489 : vector<1x56x32xf32> to vector<56x32xf32>
    %cst_433 = arith.constant dense<0.000000e+00> : vector<56x64xf32>
    %491 = tpu.matmul %490, %399, %cst_433 {dimension_numbers = #tpu.dot_dimension_numbers<[1], [0], [0], [1], [0, 0, 1, 1], [], []>} : vector<56x32xf32>, vector<32x64xf32>, vector<56x64xf32> -> vector<56x64xf32>
    %c960 = arith.constant 960 : index
    %c0_434 = arith.constant 0 : index
    %492 = vector.load %arg9[%c960, %c0_434] : memref<1024x1xf32, #tpu.memory_space<vmem>>, vector<64x1xf32>
    %cst_435 = arith.constant dense<0.000000e+00> : vector<56x1xf32>
    %493 = tpu.matmul %491, %492, %cst_435 {dimension_numbers = #tpu.dot_dimension_numbers<[1], [0], [0], [1], [0, 0, 1, 1], [], []>} : vector<56x64xf32>, vector<64x1xf32>, vector<56x1xf32> -> vector<56x1xf32>
    %494 = arith.addf %488, %493 : vector<56x1xf32>
    %c4_436 = arith.constant 4 : index
    %c0_437 = arith.constant 0 : index
    %c0_438 = arith.constant 0 : index
    %495 = vector.load %arg10[%c4_436, %c0_437, %c0_438] : memref<5x8x128xf32, #tpu.memory_space<vmem>>, vector<1x8x128xf32>
    %496 = vector.shape_cast %495 : vector<1x8x128xf32> to vector<8x128xf32>
    %497 = vector.extract_strided_slice %496 {offsets = [0, 0], sizes = [1, 1], strides = [1, 1]} : vector<8x128xf32> to vector<1x1xf32>
    %498 = vector.broadcast %497 : vector<1x1xf32> to vector<56x1xf32>
    %499 = arith.addf %494, %498 : vector<56x1xf32>
    %500 = tpu.iota {dimensions = array<i32: 1>} : vector<56x128xi32>
    %c1_i32 = arith.constant 1 : i32
    %501 = vector.broadcast %c1_i32 : i32 to vector<56x128xi32>
    %502 = arith.cmpi slt, %500, %501 : vector<56x128xi32>
    %cst_439 = arith.constant 0.000000e+00 : f32
    %503 = vector.shape_cast %499 : vector<56x1xf32> to vector<56x1xf32>
    %504 = vector.broadcast %503 : vector<56x1xf32> to vector<56x128xf32>
    %505 = vector.broadcast %cst_439 : f32 to vector<56x128xf32>
    %506 = arith.select %502, %504, %505 : vector<56x128xi1>, vector<56x128xf32>
    %c0_440 = arith.constant 0 : index
    %c0_441 = arith.constant 0 : index
    %507 = vector.load %arg11[%c0_440, %c0_441] : memref<56x128xf32, #tpu.memory_space<vmem>>, vector<56x128xf32>
    tpu.vector_store %arg11[%c0_440, %c0_441], %506 {strides = array<i32>} : memref<56x128xf32, #tpu.memory_space<vmem>>, vector<56x128xf32>,
    return
  }
}

</mosaic_0001>

<bundles_post_ra>
// kernel: squeeze.0
= control target key start
LH: loop header
LB: loop body
LE: loop exit
PB: predicated region body
PF: predicated region fallthrough
CT: control target
= control target key end

     0   :  { %s220_s0 = inlined_call_operand.vmem [shape: f32[50], index: 0, kind: input, shape index: {}]   ;;  %s221_s1 = inlined_call_operand.hbm [shape: f32[2,1,5,5], index: 1, kind: output, shape index: {}]  }
   0x1   :  { %v5_v0 = vld [vmem:[%s220_s0] sm:$0x1] }
   0x2   :  { %6 = vst [vmem:[#allocation3] sm:$0x1] %v5_v0 }
   0x3   :  { %2 = vsyncpa [#allocation1], 0  ;;  %s175_s0 = smov 123   ;;  %s176_s8 = smov 113   ;;  %vm8_vm0 = vcmask 39936  }
   0x4   :  { %s177_s9 = smov 118   ;;  %s178_s10 = smov 108  }
   0x5   :  { %s179_s11 = smov 103   ;;  %s180_s12 = smov 98  }
   0x6   :  { %s181_s13 = smov 93   ;;  %s182_s14 = smov 88  }
   0x7   :  { %s183_s15 = smov 83   ;;  %s184_s16 = smov [#allocation0]  }
   0x8   :  { %s127_s17 = sshll.u32 %s184_s16, 4  ;;  %s128_s17 = int_to_ptr.vmem [resolvable:$true] %s127_s17 }
   0x9   :  { %v10_v1 = vld [vmem:[#allocation3] sm:$0x1]   ;;  %s151_s18 = scalar_lea.vmem %s128_s17, 160  ;;  %p156_p1 = scmp.lt.s32.totalorder %s128_s17, %s128_s17 }
   0xa   :  { %v22_v2 = vld [vmem:[#allocation3] sm:$0x1]   ;;  %11 = vrot.lane.b32.xlu0 %v10_v1, %s175_s0  ;;  %p152_p0 = scmp.ne.s32.totalorder %s128_s17, %s151_s18  ;;  %p157_p2 = scmp.lt.s32.totalorder %s151_s18, %s151_s18 }
   0xb   :  { %23 = vrot.lane.b32.xlu1 %v22_v2, %s176_s8  ;;  %v16_v3 = vld [vmem:[#allocation3] sm:$0x1]  }
   0xc   :  { %v28_v4 = vld [vmem:[#allocation3] sm:$0x1]   ;;  %p158_p3 = por %p157_p2, %p156_p1 }
   0xd   :  { %v7_v5 = vld [vmem:[#allocation3] sm:$0x1]  }
   0xe   :  { %9 = vst.msk [vmem:[#allocation2] sm:$0x1] %vm8_vm0, %v7_v5   ;;  %17 = vrot.lane.b32.xlu0 %v16_v3, %s177_s9  ;;  %v34_v6 = vld [vmem:[#allocation3] sm:$0x1]   ;;  %p159_p4 = pnand %p158_p3, %p152_p0 }
   0xf   :  { %29 = vrot.lane.b32.xlu1 %v28_v4, %s178_s10  ;;  %v40_v7 = vld [vmem:[#allocation3] sm:$0x1]  }
  0x10   :  { %v46_v8 = vld [vmem:[#allocation3] sm:$0x1]  }
  0x11   :  { %v52_v9 = vld [vmem:[#allocation3] sm:$0x1]  }
  0x12   :  { %35 = vrot.lane.b32.xlu0 %v34_v6, %s179_s11  ;;  %v58_v11 = vld [vmem:[#allocation3] sm:$0x1]  }
  0x13   :  { %41 = vrot.lane.b32.xlu1 %v40_v7, %s180_s12 }
  0x15   :  { %v67_v10 = vld [vmem:[#allocation2] sm:$0x1] }
  0x16   :  { %69 = vst [vmem:[#allocation0] sm:$0x1] %v67_v10  ;;  %47 = vrot.lane.b32.xlu0 %v46_v8, %s181_s13 }
  0x17   :  { %53 = vrot.lane.b32.xlu1 %v52_v9, %s182_s14 }
  0x1a   :  { %59 = vrot.lane.b32.xlu0 %v58_v11, %s183_s15 }
  0x7c   :  { %v12_v12 = vpop.permute.xlu0 %11  }
  0x7d   :  { %v24_v13 = vpop.permute.xlu1 %23   ;;  %15 = vst.msk [vmem:[#allocation2 + $0x8] sm:$0x1] %vm8_vm0, %v12_v12  }
  0x7e   :  { %27 = vst.msk [vmem:[#allocation2 + $0x18] sm:$0x1] %vm8_vm0, %v24_v13  }
  0x80   :  { %v18_v14 = vpop.permute.xlu0 %17  }
  0x81   :  { %v30_v15 = vpop.permute.xlu1 %29   ;;  %21 = vst.msk [vmem:[#allocation2 + $0x10] sm:$0x1] %vm8_vm0, %v18_v14  }
  0x82   :  { %33 = vst.msk [vmem:[#allocation2 + $0x20] sm:$0x1] %vm8_vm0, %v30_v15  }
  0x84   :  { %v71_v16 = vld [vmem:[#allocation2 + $0x8] sm:$0x1]  ;;  %v36_v18 = vpop.permute.xlu0 %35  }
  0x85   :  { %v82_v17 = vld [vmem:[#allocation2 + $0x18] sm:$0x1]  ;;  %v42_v19 = vpop.permute.xlu1 %41   ;;  %74 = vst [vmem:[#allocation0 + $0x1] sm:$0x1] %v71_v16  ;;  %39 = vst.msk [vmem:[#allocation2 + $0x28] sm:$0x1] %vm8_vm0, %v36_v18  }
  0x86   :  { %86 = vst [vmem:[#allocation0 + $0x3] sm:$0x1] %v82_v17  ;;  %45 = vst.msk [vmem:[#allocation2 + $0x30] sm:$0x1] %vm8_vm0, %v42_v19  }
  0x88   :  { %v76_v20 = vld [vmem:[#allocation2 + $0x10] sm:$0x1]  ;;  %v48_v22 = vpop.permute.xlu0 %47  }
  0x89   :  { %v88_v21 = vld [vmem:[#allocation2 + $0x20] sm:$0x1]  ;;  %v54_v23 = vpop.permute.xlu1 %53   ;;  %80 = vst [vmem:[#allocation0 + $0x2] sm:$0x1] %v76_v20  ;;  %51 = vst.msk [vmem:[#allocation2 + $0x38] sm:$0x1] %vm8_vm0, %v48_v22  }
  0x8a   :  { %92 = vst [vmem:[#allocation0 + $0x4] sm:$0x1] %v88_v21  ;;  %57 = vst.msk [vmem:[#allocation2 + $0x40] sm:$0x1] %vm8_vm0, %v54_v23  }
  0x8c   :  { %v94_v24 = vld [vmem:[#allocation2 + $0x28] sm:$0x1]  ;;  %v60_v26 = vpop.permute.xlu0 %59  }
  0x8d   :  { %v100_v25 = vld [vmem:[#allocation2 + $0x30] sm:$0x1]  ;;  %98 = vst [vmem:[#allocation0 + $0x5] sm:$0x1] %v94_v24  ;;  %63 = vst.msk [vmem:[#allocation2 + $0x48] sm:$0x1] %vm8_vm0, %v60_v26  }
  0x8e   :  { %104 = vst [vmem:[#allocation0 + $0x6] sm:$0x1] %v100_v25 }
  0x90   :  { %v106_v27 = vld [vmem:[#allocation2 + $0x38] sm:$0x1] }
  0x91   :  { %v112_v28 = vld [vmem:[#allocation2 + $0x40] sm:$0x1]  ;;  %110 = vst [vmem:[#allocation0 + $0x7] sm:$0x1] %v106_v27 }
  0x92   :  { %116 = vst [vmem:[#allocation0 + $0x8] sm:$0x1] %v112_v28 }
  0x94   :  { %v118_v29 = vld [vmem:[#allocation2 + $0x48] sm:$0x1] }
  0x95   :  { %122 = vst [vmem:[#allocation0 + $0x9] sm:$0x1] %v118_v29 }
  0x96   :  { %162 = shalt.err (!%p159_p4)
}
  0x97   :  { %s163_s21 = scalar_lea.hbm %s221_s1, 160 }
  0x98   :  { %p164_p5 = scmp.ne.s32.totalorder %s221_s1, %s163_s21  ;;  %p167_p6 = scmp.lt.u32.totalorder %s163_s21, %s221_s1 }
  0x9a   :  { %p169_p7 = pnand %p167_p6, %p164_p5 }
  0x9c   :  { %172 = shalt.err (!%p169_p7)
}
  0x9d   :  { %130 = dma.vmem_to_hbm [thread:$0]  %s128_s17, 160, %s221_s1, [#allocation1]  }
  0x9e   :  { %173 = dma.done.wait [#allocation1], 160  }
  0x9f   :  { %174 = vsyncadd [#allocation1], 4294967136 }
  0xa0   :  { %132 = vsyncpa [#allocation1], 1 }

// kernel: forward.1
= control target key start
LH: loop header
LB: loop body
LE: loop exit
PB: predicated region body
PF: predicated region fallthrough
CT: control target
= control target key end

     0   :  { %v21659_v0 = vmov 0.0|0.0   ;;  %vm21660_vm0 = vmmov 0   ;;  %v21661_v4 = vmov 0.0   ;;  %vm72_vm1 = vcmask 523264   ;;  %s26696_s1 = inlined_call_operand.vmem [shape: f32[64,8], index: 1, kind: input, shape index: {}]   ;;  %s26697_s0 = inlined_call_operand.vmem [shape: f32[168,64], index: 0, kind: input, shape index: {}]   ;;  %s26698_s2 = inlined_call_operand.vmem [shape: f32[16,56,168], index: 2, kind: input, shape index: {}]   ;;  %s26699_s10 = inlined_call_operand.vmem [shape: f32[5,8,128], index: 10, kind: input, shape index: {}]   ;;  %s26700_s3 = inlined_call_operand.vmem [shape: f32[128,16], index: 3, kind: input, shape index: {}]   ;;  %s26701_s4 = inlined_call_operand.vmem [shape: f32[16,24,56], index: 4, kind: input, shape index: {}]   ;;  %s26702_s5 = inlined_call_operand.vmem [shape: f32[256,32], index: 5, kind: input, shape index: {}]   ;;  %s26703_s6 = inlined_call_operand.vmem [shape: f32[16,32,24], index: 6, kind: input, shape index: {}]   ;;  %s26704_s7 = inlined_call_operand.vmem [shape: f32[512,64], index: 7, kind: input, shape index: {}]   ;;  %s26705_s9 = inlined_call_operand.vmem [shape: f32[1024,1], index: 9, kind: input, shape index: {}]   ;;  %s26706_s8 = inlined_call_operand.vmem [shape: f32[16,56,32], index: 8, kind: input, shape index: {}]   ;;  %s26707_s11 = inlined_call_operand.vmem [shape: f32[56,128], index: 11, kind: output, shape index: {}]  }
   0x1   :  { %20123 = vmatprep.subr.bf16.mxu0 %v21659_v0  ;;  %v59_v1 = vld [vmem:[%s26696_s1] sm:$0xff]  ;;  %v60_v2 = vld [vmem:[%s26696_s1 + $0x8] sm:$0xff]  ;;  %v61_v3 = vld [vmem:[%s26696_s1 + $0x10] sm:$0xff]  ;;  %17644 = vmatprep.mubr.msk.f32.mxu0 %vm21660_vm0, %v21661_v4  ;;  %vm383_vm2 = vcmask 326656   ;;  %v68_v36 = vlaneseq }
   0x2   :  { %v20124_v5 = vpack.c.bf16 %v60_v2, %v59_v1  ;;  %v62_v6 = vld [vmem:[%s26696_s1 + $0x18] sm:$0xff]  ;;  %20135 = vmatprep.subr.bf16.mxu1 %v21659_v0  ;;  %v63_v8 = vld [vmem:[%s26696_s1 + $0x20] sm:$0xff]  ;;  %v64_v9 = vld [vmem:[%s26696_s1 + $0x28] sm:$0xff] }
   0x3   :  { %v20127_v7 = vpack.c.bf16 %v62_v6, %v61_v3  ;;  %v20130_v10 = vpack.c.bf16 %v64_v9, %v63_v8  ;;  %v65_v11 = vld [vmem:[%s26696_s1 + $0x30] sm:$0xff]  ;;  %v66_v12 = vld [vmem:[%s26696_s1 + $0x38] sm:$0xff]  ;;  %v38_v14 = vld [vmem:[%s26697_s0] sm:$0xff]  ;;  %v21886_v37 = vshrl.u32 %v68_v36, 7 }
   0x4   :  { %20125 = vmatpush3.bf16.msra.mxu0 %v20124_v5  ;;  %v20133_v13 = vpack.c.bf16 %v66_v12, %v65_v11  ;;  %v39_v15 = vld [vmem:[%s26697_s0 + $0x8] sm:$0xff]  ;;  %v40_v16 = vld [vmem:[%s26697_s0 + $0x10] sm:$0xff]  ;;  %v41_v17 = vld [vmem:[%s26697_s0 + $0x18] sm:$0xff] }
   0x5   :  { %20126 = vmatprep.subr.bf16.mxu0 %v21659_v0  ;;  %v42_v18 = vld [vmem:[%s26697_s0 + $0x20] sm:$0xff]  ;;  %v43_v19 = vld [vmem:[%s26697_s0 + $0x28] sm:$0xff]  ;;  %v44_v20 = vld [vmem:[%s26697_s0 + $0x30] sm:$0xff]  ;;  %v70_v38 = vsub.s32 0, %v21886_v37 }
   0x6   :  { %v45_v21 = vld [vmem:[%s26697_s0 + $0x38] sm:$0xff]  ;;  %v46_v22 = vld [vmem:[%s26697_s0 + $0x40] sm:$0xff]  ;;  %v47_v23 = vld [vmem:[%s26697_s0 + $0x48] sm:$0xff] }
   0x7   :  { %v48_v24 = vld [vmem:[%s26697_s0 + $0x50] sm:$0xff]  ;;  %v49_v25 = vld [vmem:[%s26697_s0 + $0x58] sm:$0xff]  ;;  %v50_v26 = vld [vmem:[%s26697_s0 + $0x60] sm:$0xff] }
   0x8   :  { %20128 = vmatpush3.bf16.msra.mxu0 %v20127_v7  ;;  %v51_v27 = vld [vmem:[%s26697_s0 + $0x68] sm:$0xff]  ;;  %v52_v28 = vld [vmem:[%s26697_s0 + $0x70] sm:$0xff]  ;;  %v53_v29 = vld [vmem:[%s26697_s0 + $0x78] sm:$0xff] }
   0x9   :  { %20129 = vmatprep.subr.bf16.mxu0 %v21659_v0  ;;  %v54_v30 = vld [vmem:[%s26697_s0 + $0x80] sm:$0xff]  ;;  %v55_v31 = vld [vmem:[%s26697_s0 + $0x88] sm:$0xff]  ;;  %v56_v32 = vld [vmem:[%s26697_s0 + $0x90] sm:$0xff] }
   0xa   :  { %v57_v33 = vld [vmem:[%s26697_s0 + $0x98] sm:$0xff]  ;;  %v58_v34 = vld [vmem:[%s26697_s0 + $0xa0] sm:$0xff]  ;;  %v370_v35 = vld [vmem:[%s26698_s2 + $0x8] sm:$0xff] }
   0xb   :  { %15479 = vmatprep.mubr.msk.f32.mxu1 %vm383_vm2, %v370_v35  ;;  %v67_v39 = vld [vmem:[%s26699_s10] sm:$0xff] }
   0xc   :  { %20131 = vmatpush3.bf16.msra.mxu0 %v20130_v10  ;;  %v21894_v40 = vrot.slane %v67_v39, %v70_v38 }
   0xd   :  { %20132 = vmatprep.subr.bf16.mxu0 %v21659_v0 }
  0x10   :  { %20134 = vmatpush3.bf16.msra.mxu0 %v20133_v13 }
  0x11   :  { %17707 = vmatprep.subr.mxu0 %v21661_v4 }
  0x13   :  { %17645 = vmatmul.mubr.msk.f32.vlgmr.msra.gmra.mrb[0].mxu0 %vm72_vm1, %v38_v14 }
  0x14   :  { %17647 = vmatprep.mubr.msk.f32.mxu0 %vm21660_vm0, %v21661_v4 }
  0x17   :  { %17648 = vmatmul.mubr.msk.f32.gmra.mrb[2].mxu0 %vm72_vm1, %v39_v15 }
  0x18   :  { %17650 = vmatprep.mubr.msk.f32.mxu0 %vm21660_vm0, %v21661_v4 }
  0x1b   :  { %17651 = vmatmul.mubr.msk.f32.gmra.mrb[4].mxu0 %vm72_vm1, %v40_v16 }
  0x1c   :  { %17653 = vmatprep.mubr.msk.f32.mxu0 %vm21660_vm0, %v21661_v4 }
  0x1f   :  { %17654 = vmatmul.mubr.msk.f32.gmra.mrb[6].mxu0 %vm72_vm1, %v41_v17 }
  0x20   :  { %17656 = vmatprep.mubr.msk.f32.mxu0 %vm21660_vm0, %v21661_v4 }
  0x23   :  { %17657 = vmatmul.mubr.msk.f32.gmra.mrb[8].mxu0 %vm72_vm1, %v42_v18 }
  0x24   :  { %17659 = vmatprep.mubr.msk.f32.mxu0 %vm21660_vm0, %v21661_v4 }
  0x27   :  { %17660 = vmatmul.mubr.msk.f32.gmra.mrb[10].mxu0 %vm72_vm1, %v43_v19 }
  0x28   :  { %17662 = vmatprep.mubr.msk.f32.mxu0 %vm21660_vm0, %v21661_v4 }
  0x2b   :  { %17663 = vmatmul.mubr.msk.f32.gmra.mrb[12].mxu0 %vm72_vm1, %v44_v20 }
  0x2c   :  { %17665 = vmatprep.mubr.msk.f32.mxu0 %vm21660_vm0, %v21661_v4 }
  0x2f   :  { %17666 = vmatmul.mubr.msk.f32.gmra.mrb[14].mxu0 %vm72_vm1, %v45_v21 }
  0x30   :  { %17668 = vmatprep.mubr.msk.f32.mxu0 %vm21660_vm0, %v21661_v4 }
  0x33   :  { %17669 = vmatmul.mubr.msk.f32.gmra.mrb[16].mxu0 %vm72_vm1, %v46_v22 }
  0x34   :  { %17671 = vmatprep.mubr.msk.f32.mxu0 %vm21660_vm0, %v21661_v4 }
  0x37   :  { %17672 = vmatmul.mubr.msk.f32.gmra.mrb[18].mxu0 %vm72_vm1, %v47_v23 }
  0x38   :  { %17674 = vmatprep.mubr.msk.f32.mxu0 %vm21660_vm0, %v21661_v4 }
  0x3b   :  { %17675 = vmatmul.mubr.msk.f32.gmra.mrb[20].mxu0 %vm72_vm1, %v48_v24 }
  0x3c   :  { %17677 = vmatprep.mubr.msk.f32.mxu0 %vm21660_vm0, %v21661_v4 }
  0x3f   :  { %17678 = vmatmul.mubr.msk.f32.gmra.mrb[22].mxu0 %vm72_vm1, %v49_v25 }
  0x40   :  { %17680 = vmatprep.mubr.msk.f32.mxu0 %vm21660_vm0, %v21661_v4 }
  0x43   :  { %17681 = vmatmul.mubr.msk.f32.gmra.mrb[24].mxu0 %vm72_vm1, %v50_v26 }
  0x44   :  { %17683 = vmatprep.mubr.msk.f32.mxu0 %vm21660_vm0, %v21661_v4 }
  0x47   :  { %17684 = vmatmul.mubr.msk.f32.gmra.mrb[26].mxu0 %vm72_vm1, %v51_v27 }
  0x48   :  { %17686 = vmatprep.mubr.msk.f32.mxu0 %vm21660_vm0, %v21661_v4 }
  0x4b   :  { %17687 = vmatmul.mubr.msk.f32.gmra.mrb[28].mxu0 %vm72_vm1, %v52_v28 }
  0x4c   :  { %17689 = vmatprep.mubr.msk.f32.mxu0 %vm21660_vm0, %v21661_v4 }
  0x4f   :  { %17690 = vmatmul.mubr.msk.f32.gmra.mrb[30].mxu0 %vm72_vm1, %v53_v29 }
  0x50   :  { %17692 = vmatprep.mubr.msk.f32.mxu0 %vm21660_vm0, %v21661_v4 }
  0x53   :  { %17693 = vmatmul.mubr.msk.f32.gmra.mrb[32].mxu0 %vm72_vm1, %v54_v30 }
  0x54   :  { %17695 = vmatprep.mubr.msk.f32.mxu0 %vm21660_vm0, %v21661_v4 }
  0x57   :  { %17696 = vmatmul.mubr.msk.f32.gmra.mrb[34].mxu0 %vm72_vm1, %v55_v31 }
  0x58   :  { %17698 = vmatprep.mubr.msk.f32.mxu0 %vm21660_vm0, %v21661_v4 }
  0x5b   :  { %17699 = vmatmul.mubr.msk.f32.gmra.mrb[36].mxu0 %vm72_vm1, %v56_v32 }
  0x5c   :  { %17701 = vmatprep.mubr.msk.f32.mxu0 %vm21660_vm0, %v21661_v4 }
  0x5f   :  { %17702 = vmatmul.mubr.msk.f32.gmra.mrb[38].mxu0 %vm72_vm1, %v57_v33 }
  0x60   :  { %17704 = vmatprep.mubr.msk.f32.mxu0 %vm21660_vm0, %v21661_v4 }
  0x63   :  { %17705 = vmatmul.mubr.msk.f32.gmra.mrb[40].mxu0 %vm72_vm1, %v58_v34 }
  0x64   :  { %17709 = vmatprep.mubr.msk.f32.mxu0 %vm21660_vm0, %v21661_v4 }
  0xe6   :  { %v202_v41 = vpop.f32.mrb[0].mxu0 }
  0xe7   :  { %v203_v42 = vadd.f32 %v202_v41, %v21894_v40  ;;  %v17646_v43 = vpop.f32.mrb[1].mxu0 }
  0xe9   :  { %v327_v45 = vmul.f32 0.2, %v203_v42  ;;  %vm306_vm3 = vcmp.ge.f32.partialorder %v203_v42, 0.0 }
  0xea   :  { %v207_v44 = vpop.f32.mrb[2].mxu0 }
  0xeb   :  { %v208_v46 = vadd.f32 %v207_v44, %v21894_v40  ;;  %v17649_v47 = vpop.f32.mrb[3].mxu0  ;;  %v348_v50 = vsel %vm306_vm3, %v203_v42, %v327_v45 }
  0xed   :  { %vm307_vm4 = vcmp.ge.f32.partialorder %v208_v46, 0.0  ;;  %v328_v48 = vmul.f32 0.2, %v208_v46 }
  0xee   :  { %v212_v49 = vpop.f32.mrb[4].mxu0 }
  0xef   :  { %v349_v51 = vsel %vm307_vm4, %v208_v46, %v328_v48  ;;  %v213_v52 = vadd.f32 %v212_v49, %v21894_v40  ;;  %v17652_v53 = vpop.f32.mrb[5].mxu0 }
  0xf0   :  { %v21899_v54 = vpack.c.bf16 %v349_v51, %v348_v50 }
  0xf1   :  { %v329_v56 = vmul.f32 0.2, %v213_v52  ;;  %vm308_vm5 = vcmp.ge.f32.partialorder %v213_v52, 0.0 }
  0xf2   :  { %v217_v55 = vpop.f32.mrb[6].mxu0  ;;  %20137 = vmatpush1.bf16.msra.mxu1 %v21899_v54 }
  0xf3   :  { %v218_v57 = vadd.f32 %v217_v55, %v21894_v40  ;;  %v17655_v58 = vpop.f32.mrb[7].mxu0  ;;  %20138 = vmatprep.subr.bf16.mxu1 %v21659_v0  ;;  %v350_v61 = vsel %vm308_vm5, %v213_v52, %v329_v56 }
  0xf5   :  { %vm309_vm6 = vcmp.ge.f32.partialorder %v218_v57, 0.0  ;;  %v330_v59 = vmul.f32 0.2, %v218_v57 }
  0xf6   :  { %v222_v60 = vpop.f32.mrb[8].mxu0 }
  0xf7   :  { %v351_v62 = vsel %vm309_vm6, %v218_v57, %v330_v59  ;;  %v223_v63 = vadd.f32 %v222_v60, %v21894_v40  ;;  %v17658_v1 = vpop.f32.mrb[9].mxu0 }
  0xf8   :  { %v21905_v2 = vpack.c.bf16 %v351_v62, %v350_v61 }
  0xf9   :  { %v331_v5 = vmul.f32 0.2, %v223_v63  ;;  %vm310_vm7 = vcmp.ge.f32.partialorder %v223_v63, 0.0 }
  0xfa   :  { %v227_v3 = vpop.f32.mrb[10].mxu0  ;;  %20140 = vmatpush1.bf16.msra.mxu1 %v21905_v2 }
  0xfb   :  { %v228_v6 = vadd.f32 %v227_v3, %v21894_v40  ;;  %v17661_v7 = vpop.f32.mrb[11].mxu0  ;;  %20141 = vmatprep.subr.bf16.mxu1 %v21659_v0  ;;  %v352_v10 = vsel %vm310_vm7, %v223_v63, %v331_v5 }
  0xfd   :  { %vm311_vm8 = vcmp.ge.f32.partialorder %v228_v6, 0.0  ;;  %v332_v8 = vmul.f32 0.2, %v228_v6 }
  0xfe   :  { %v232_v9 = vpop.f32.mrb[12].mxu0 }
  0xff   :  { %v353_v11 = vsel %vm311_vm8, %v228_v6, %v332_v8  ;;  %v233_v12 = vadd.f32 %v232_v9, %v21894_v40  ;;  %v17664_v13 = vpop.f32.mrb[13].mxu0 }
 0x100   :  { %v21911_v14 = vpack.c.bf16 %v353_v11, %v352_v10 }
 0x101   :  { %v333_v16 = vmul.f32 0.2, %v233_v12  ;;  %vm312_vm9 = vcmp.ge.f32.partialorder %v233_v12, 0.0 }
 0x102   :  { %v237_v15 = vpop.f32.mrb[14].mxu0  ;;  %20143 = vmatpush1.bf16.msra.mxu1 %v21911_v14 }
 0x103   :  { %v238_v17 = vadd.f32 %v237_v15, %v21894_v40  ;;  %v17667_v18 = vpop.f32.mrb[15].mxu0  ;;  %20144 = vmatprep.subr.bf16.mxu1 %v21659_v0  ;;  %v354_v21 = vsel %vm312_vm9, %v233_v12, %v333_v16 }
 0x105   :  { %vm313_vm10 = vcmp.ge.f32.partialorder %v238_v17, 0.0  ;;  %v334_v19 = vmul.f32 0.2, %v238_v17 }
 0x106   :  { %v242_v20 = vpop.f32.mrb[16].mxu0 }
 0x107   :  { %v355_v22 = vsel %vm313_vm10, %v238_v17, %v334_v19  ;;  %v243_v23 = vadd.f32 %v242_v20, %v21894_v40  ;;  %v17670_v24 = vpop.f32.mrb[17].mxu0 }
 0x108   :  { %v21917_v25 = vpack.c.bf16 %v355_v22, %v354_v21 }
 0x109   :  { %v335_v27 = vmul.f32 0.2, %v243_v23  ;;  %vm314_vm11 = vcmp.ge.f32.partialorder %v243_v23, 0.0 }
 0x10a   :  { %v247_v26 = vpop.f32.mrb[18].mxu0  ;;  %20146 = vmatpush1.bf16.msra.mxu1 %v21917_v25 }
 0x10b   :  { %v248_v28 = vadd.f32 %v247_v26, %v21894_v40  ;;  %v17673_v29 = vpop.f32.mrb[19].mxu0  ;;  %20147 = vmatprep.subr.bf16.mxu1 %v21659_v0  ;;  %v356_v32 = vsel %vm314_vm11, %v243_v23, %v335_v27  ;;  %vm643_vm11 = vcmask 64512  }
 0x10d   :  { %vm315_vm12 = vcmp.ge.f32.partialorder %v248_v28, 0.0  ;;  %v336_v30 = vmul.f32 0.2, %v248_v28 }
 0x10e   :  { %v252_v31 = vpop.f32.mrb[20].mxu0 }
 0x10f   :  { %v357_v33 = vsel %vm315_vm12, %v248_v28, %v336_v30  ;;  %v253_v34 = vadd.f32 %v252_v31, %v21894_v40  ;;  %v17676_v35 = vpop.f32.mrb[21].mxu0 }
 0x110   :  { %v21923_v39 = vpack.c.bf16 %v357_v33, %v356_v32 }
 0x111   :  { %v337_v42 = vmul.f32 0.2, %v253_v34  ;;  %vm316_vm13 = vcmp.ge.f32.partialorder %v253_v34, 0.0 }
 0x112   :  { %v257_v41 = vpop.f32.mrb[22].mxu0  ;;  %20149 = vmatpush1.bf16.msra.mxu1 %v21923_v39 }
 0x113   :  { %v258_v43 = vadd.f32 %v257_v41, %v21894_v40  ;;  %v17679_v44 = vpop.f32.mrb[23].mxu0  ;;  %20150 = vmatprep.subr.bf16.mxu1 %v21659_v0  ;;  %v358_v47 = vsel %vm316_vm13, %v253_v34, %v337_v42 }
 0x114   :  { %v369_v44 = vld [vmem:[%s26698_s2] sm:$0xff] }
 0x115   :  { %vm317_vm14 = vcmp.ge.f32.partialorder %v258_v43, 0.0  ;;  %v338_v45 = vmul.f32 0.2, %v258_v43 }
 0x116   :  { %v262_v46 = vpop.f32.mrb[24].mxu0 }
 0x117   :  { %v359_v48 = vsel %vm317_vm14, %v258_v43, %v338_v45  ;;  %v263_v49 = vadd.f32 %v262_v46, %v21894_v40  ;;  %v17682_v50 = vpop.f32.mrb[25].mxu0  ;;  %v372_v46 = vld [vmem:[%s26698_s2 + $0x18] sm:$0xff] }
 0x118   :  { %v21929_v51 = vpack.c.bf16 %v359_v48, %v358_v47  ;;  %v374_v47 = vld [vmem:[%s26698_s2 + $0x28] sm:$0xff]  ;;  %v373_v48 = vld [vmem:[%s26698_s2 + $0x20] sm:$0xff]  ;;  %v375_v50 = vld [vmem:[%s26698_s2 + $0x30] sm:$0xff] }
 0x119   :  { %v339_v53 = vmul.f32 0.2, %v263_v49  ;;  %vm318_vm15 = vcmp.ge.f32.partialorder %v263_v49, 0.0 }
 0x11a   :  { %v267_v52 = vpop.f32.mrb[26].mxu0  ;;  %20152 = vmatpush1.bf16.msra.mxu1 %v21929_v51 }
 0x11b   :  { %v268_v55 = vadd.f32 %v267_v52, %v21894_v40  ;;  %v17685_v56 = vpop.f32.mrb[27].mxu0  ;;  %20153 = vmatprep.subr.bf16.mxu1 %v21659_v0  ;;  %v360_v59 = vsel %vm318_vm15, %v263_v49, %v339_v53  ;;  %v376_v49 = vld [vmem:[%s26698_s2 + $0x38] sm:$0xff]  ;;  %v378_v52 = vld [vmem:[%s26698_s2 + $0x48] sm:$0xff]  ;;  %v377_v53 = vld [vmem:[%s26698_s2 + $0x40] sm:$0xff] }
 0x11c   :  { %v379_v56 = vld [vmem:[%s26698_s2 + $0x50] sm:$0xff] }
 0x11d   :  { %vm319_vm3 = vcmp.ge.f32.partialorder %v268_v55, 0.0  ;;  %v340_v57 = vmul.f32 0.2, %v268_v55 }
 0x11e   :  { %v272_v58 = vpop.f32.mrb[28].mxu0 }
 0x11f   :  { %v361_v60 = vsel %vm319_vm3, %v268_v55, %v340_v57  ;;  %v273_v61 = vadd.f32 %v272_v58, %v21894_v40  ;;  %v17688_v62 = vpop.f32.mrb[29].mxu0  ;;  %v380_v55 = vld [vmem:[%s26698_s2 + $0x58] sm:$0xff]  ;;  %v382_v57 = vld [vmem:[%s26698_s2 + $0x68] sm:$0xff]  ;;  %v381_v58 = vld [vmem:[%s26698_s2 + $0x60] sm:$0xff] }
 0x120   :  { %v21935_v63 = vpack.c.bf16 %v361_v60, %v360_v59  ;;  %v15487_v59 = vld [vmem:[%s26698_s2 + $0x78] sm:$0xff]  ;;  %v15486_v60 = vld [vmem:[%s26698_s2 + $0x70] sm:$0xff]  ;;  %v15488_v62 = vld [vmem:[%s26698_s2 + $0x80] sm:$0xff] }
 0x121   :  { %v341_v3 = vmul.f32 0.2, %v273_v61  ;;  %vm320_vm4 = vcmp.ge.f32.partialorder %v273_v61, 0.0 }
 0x122   :  { %v277_v1 = vpop.f32.mrb[30].mxu0  ;;  %20155 = vmatpush1.bf16.msra.mxu1 %v21935_v63 }
 0x123   :  { %v278_v5 = vadd.f32 %v277_v1, %v21894_v40  ;;  %v17691_v6 = vpop.f32.mrb[31].mxu0  ;;  %20156 = vmatprep.subr.bf16.mxu1 %v21659_v0  ;;  %v362_v9 = vsel %vm320_vm4, %v273_v61, %v341_v3  ;;  %v15489_v61 = vld [vmem:[%s26698_s2 + $0x88] sm:$0xff]  ;;  %v15491_v1 = vld [vmem:[%s26698_s2 + $0x98] sm:$0xff]  ;;  %v15490_v3 = vld [vmem:[%s26698_s2 + $0x90] sm:$0xff] }
 0x124   :  { %v15492_v6 = vld [vmem:[%s26698_s2 + $0xa0] sm:$0xff] }
 0x125   :  { %vm321_vm5 = vcmp.ge.f32.partialorder %v278_v5, 0.0  ;;  %v342_v7 = vmul.f32 0.2, %v278_v5 }
 0x126   :  { %v282_v8 = vpop.f32.mrb[32].mxu0 }
 0x127   :  { %v363_v10 = vsel %vm321_vm5, %v278_v5, %v342_v7  ;;  %v283_v11 = vadd.f32 %v282_v8, %v21894_v40  ;;  %v17694_v12 = vpop.f32.mrb[33].mxu0  ;;  %v15493_v5 = vld [vmem:[%s26698_s2 + $0xa8] sm:$0xff]  ;;  %v15495_v7 = vld [vmem:[%s26698_s2 + $0xb8] sm:$0xff]  ;;  %v15494_v8 = vld [vmem:[%s26698_s2 + $0xb0] sm:$0xff] }
 0x128   :  { %v21941_v13 = vpack.c.bf16 %v363_v10, %v362_v9  ;;  %v15497_v9 = vld [vmem:[%s26698_s2 + $0xc8] sm:$0xff]  ;;  %v15496_v10 = vld [vmem:[%s26698_s2 + $0xc0] sm:$0xff]  ;;  %v15498_v12 = vld [vmem:[%s26698_s2 + $0xd0] sm:$0xff] }
 0x129   :  { %v343_v16 = vmul.f32 0.2, %v283_v11  ;;  %vm322_vm6 = vcmp.ge.f32.partialorder %v283_v11, 0.0 }
 0x12a   :  { %v287_v15 = vpop.f32.mrb[34].mxu0  ;;  %20158 = vmatpush1.bf16.msra.mxu1 %v21941_v13 }
 0x12b   :  { %v288_v17 = vadd.f32 %v287_v15, %v21894_v40  ;;  %v17697_v18 = vpop.f32.mrb[35].mxu0  ;;  %20159 = vmatprep.subr.bf16.mxu1 %v21659_v0  ;;  %v364_v21 = vsel %vm322_vm6, %v283_v11, %v343_v16  ;;  %v15499_v11 = vld [vmem:[%s26698_s2 + $0xd8] sm:$0xff]  ;;  %v15522_v15 = vld [vmem:[%s26698_s2 + $0xe8] sm:$0xff]  ;;  %v15521_v16 = vld [vmem:[%s26698_s2 + $0xe0] sm:$0xff] }
 0x12c   :  { %v15523_v18 = vld [vmem:[%s26698_s2 + $0xf0] sm:$0xff] }
 0x12d   :  { %vm323_vm7 = vcmp.ge.f32.partialorder %v288_v17, 0.0  ;;  %v344_v19 = vmul.f32 0.2, %v288_v17 }
 0x12e   :  { %v292_v20 = vpop.f32.mrb[36].mxu0 }
 0x12f   :  { %v365_v22 = vsel %vm323_vm7, %v288_v17, %v344_v19  ;;  %v293_v23 = vadd.f32 %v292_v20, %v21894_v40  ;;  %v17700_v24 = vpop.f32.mrb[37].mxu0  ;;  %v15524_v17 = vld [vmem:[%s26698_s2 + $0xf8] sm:$0xff]  ;;  %v642_v19 = vld [vmem:[%s26700_s3 + $0x8] sm:$0xff]  ;;  %vm4730_vm7 = vcmask 457728  }
 0x130   :  { %v21947_v26 = vpack.c.bf16 %v365_v22, %v364_v21  ;;  %v15526_v20 = vld [vmem:[%s26698_s2 + $0x108] sm:$0xff]  ;;  %17708 = vmatpush3.msra.mxu0 %v642_v19  ;;  %v15525_v21 = vld [vmem:[%s26698_s2 + $0x100] sm:$0xff]  ;;  %v15528_v22 = vld [vmem:[%s26698_s2 + $0x118] sm:$0xff] }
 0x131   :  { %v345_v28 = vmul.f32 0.2, %v293_v23  ;;  %vm324_vm8 = vcmp.ge.f32.partialorder %v293_v23, 0.0  ;;  %17730 = vmatprep.subr.mxu0 %v21661_v4  ;;  %v15530_v24 = vld [vmem:[%s26698_s2 + $0x128] sm:$0xff] }
 0x132   :  { %v297_v27 = vpop.f32.mrb[38].mxu0  ;;  %20161 = vmatpush1.bf16.msra.mxu1 %v21947_v26 }
 0x133   :  { %v298_v29 = vadd.f32 %v297_v27, %v21894_v40  ;;  %v17703_v30 = vpop.f32.mrb[39].mxu0  ;;  %20162 = vmatprep.subr.bf16.mxu1 %v21659_v0  ;;  %v366_v33 = vsel %vm324_vm8, %v293_v23, %v345_v28  ;;  %v15527_v23 = vld [vmem:[%s26698_s2 + $0x110] sm:$0xff]  ;;  %v15529_v27 = vld [vmem:[%s26698_s2 + $0x120] sm:$0xff]  ;;  %v15532_v28 = vld [vmem:[%s26698_s2 + $0x138] sm:$0xff]  ;;  %vm7784_vm8 = vcmask 195584  }
 0x134   :  { %v15534_v30 = vld [vmem:[%s26698_s2 + $0x148] sm:$0xff] }
 0x135   :  { %vm325_vm9 = vcmp.ge.f32.partialorder %v298_v29, 0.0  ;;  %v346_v31 = vmul.f32 0.2, %v298_v29 }
 0x136   :  { %v302_v32 = vpop.f32.mrb[40].mxu0 }
 0x137   :  { %v367_v34 = vsel %vm325_vm9, %v298_v29, %v346_v31  ;;  %v303_v35 = vadd.f32 %v302_v32, %v21894_v40  ;;  %v17706_v41 = vpop.f32.mrb[41].mxu0  ;;  %v371_v40 = vld [vmem:[%s26698_s2 + $0x10] sm:$0xff]  ;;  %v15533_v31 = vld [vmem:[%s26698_s2 + $0x140] sm:$0xff]  ;;  %v15550_v32 = vld [vmem:[%s26698_s2 + $0x158] sm:$0xff]  ;;  %vm7715_vm9 = vcmask 261120  }
 0x138   :  { %v21953_v42 = vpack.c.bf16 %v367_v34, %v366_v33  ;;  %v15531_v29 = vld [vmem:[%s26698_s2 + $0x130] sm:$0xff]  ;;  %v15552_v34 = vld [vmem:[%s26698_s2 + $0x168] sm:$0xff]  ;;  %v15554_v41 = vld [vmem:[%s26698_s2 + $0x178] sm:$0xff] }
 0x139   :  { %v347_v43 = vmul.f32 0.2, %v303_v35  ;;  %vm326_vm10 = vcmp.ge.f32.partialorder %v303_v35, 0.0  ;;  %v15549_v33 = vld [vmem:[%s26698_s2 + $0x150] sm:$0xff] }
 0x13a   :  { %20164 = vmatpush1.bf16.msra.mxu1 %v21953_v42 }
 0x13b   :  { %445 = vmatprep.subr.mxu1 %v21661_v4  ;;  %v21960_v45 = vsel %vm326_vm10, %v303_v35, %v347_v43  ;;  %v15551_v35 = vld [vmem:[%s26698_s2 + $0x160] sm:$0xff]  ;;  %v15553_v43 = vld [vmem:[%s26698_s2 + $0x170] sm:$0xff] }
 0x13e   :  { %446 = vmatpush1.msra.mxu1 %v21960_v45 }
 0x13f   :  { %470 = vmatmul.mubr.f32.vlgmr.msra.gmra.mrb[0].mxu1 %v369_v44  ;;  %20165 = vmatprep.subr.bf16.mxu1 %v21659_v0  ;;  %v15556_v44 = vld [vmem:[%s26698_s2 + $0x188] sm:$0xff] }
 0x140   :  { %20167 = vmatpush1.bf16.msra.mxu1 %v21899_v54  ;;  %15480 = vmatprep.mubr.msk.f32.mxu1 %vm383_vm2, %v372_v46  ;;  %v15555_v46 = vld [vmem:[%s26698_s2 + $0x180] sm:$0xff] }
 0x141   :  { %20168 = vmatprep.subr.bf16.mxu1 %v21659_v0 }
 0x143   :  { %475 = vmatmul.mubr.f32.gmra.mrb[2].mxu1 %v371_v40  ;;  %v15558_v40 = vld [vmem:[%s26698_s2 + $0x198] sm:$0xff] }
 0x144   :  { %20170 = vmatpush1.bf16.msra.mxu1 %v21905_v2  ;;  %15481 = vmatprep.mubr.msk.f32.mxu1 %vm383_vm2, %v374_v47  ;;  %v15557_v47 = vld [vmem:[%s26698_s2 + $0x190] sm:$0xff] }
 0x145   :  { %20171 = vmatprep.subr.bf16.mxu1 %v21659_v0 }
 0x147   :  { %480 = vmatmul.mubr.f32.gmra.mrb[4].mxu1 %v373_v48  ;;  %v15560_v48 = vld [vmem:[%s26698_s2 + $0x1a8] sm:$0xff] }
 0x148   :  { %20173 = vmatpush1.bf16.msra.mxu1 %v21911_v14  ;;  %15482 = vmatprep.mubr.msk.f32.mxu1 %vm383_vm2, %v376_v49  ;;  %v15559_v49 = vld [vmem:[%s26698_s2 + $0x1a0] sm:$0xff] }
 0x149   :  { %20174 = vmatprep.subr.bf16.mxu1 %v21659_v0 }
 0x14b   :  { %485 = vmatmul.mubr.f32.gmra.mrb[6].mxu1 %v375_v50  ;;  %v15562_v50 = vld [vmem:[%s26698_s2 + $0x1b8] sm:$0xff] }
 0x14c   :  { %20176 = vmatpush1.bf16.msra.mxu1 %v21917_v25  ;;  %15483 = vmatprep.mubr.msk.f32.mxu1 %vm383_vm2, %v378_v52  ;;  %v15561_v52 = vld [vmem:[%s26698_s2 + $0x1b0] sm:$0xff] }
 0x14d   :  { %20177 = vmatprep.subr.bf16.mxu1 %v21659_v0 }
 0x14f   :  { %490 = vmatmul.mubr.f32.gmra.mrb[8].mxu1 %v377_v53  ;;  %v15578_v53 = vld [vmem:[%s26698_s2 + $0x1c8] sm:$0xff] }
 0x150   :  { %20179 = vmatpush1.bf16.msra.mxu1 %v21923_v39  ;;  %15484 = vmatprep.mubr.msk.f32.mxu1 %vm383_vm2, %v380_v55  ;;  %v15577_v55 = vld [vmem:[%s26698_s2 + $0x1c0] sm:$0xff] }
 0x151   :  { %20180 = vmatprep.subr.bf16.mxu1 %v21659_v0 }
 0x153   :  { %495 = vmatmul.mubr.f32.gmra.mrb[10].mxu1 %v379_v56  ;;  %v15580_v56 = vld [vmem:[%s26698_s2 + $0x1d8] sm:$0xff] }
 0x154   :  { %20182 = vmatpush1.bf16.msra.mxu1 %v21929_v51  ;;  %15485 = vmatprep.mubr.msk.f32.mxu1 %vm383_vm2, %v382_v57  ;;  %v15579_v57 = vld [vmem:[%s26698_s2 + $0x1d0] sm:$0xff] }
 0x155   :  { %20183 = vmatprep.subr.bf16.mxu1 %v21659_v0 }
 0x157   :  { %500 = vmatmul.mubr.f32.gmra.mrb[12].mxu1 %v381_v58  ;;  %v15582_v58 = vld [vmem:[%s26698_s2 + $0x1e8] sm:$0xff] }
 0x158   :  { %20185 = vmatpush1.bf16.msra.mxu1 %v21935_v63  ;;  %15500 = vmatprep.mubr.msk.f32.mxu1 %vm383_vm2, %v15487_v59  ;;  %v15581_v59 = vld [vmem:[%s26698_s2 + $0x1e0] sm:$0xff] }
 0x159   :  { %20186 = vmatprep.subr.bf16.mxu1 %v21659_v0 }
 0x15c   :  { %20188 = vmatpush1.bf16.msra.mxu1 %v21941_v13 }
 0x15d   :  { %20189 = vmatprep.subr.bf16.mxu1 %v21659_v0 }
 0x160   :  { %20191 = vmatpush1.bf16.msra.mxu1 %v21947_v26 }
 0x161   :  { %20192 = vmatprep.subr.bf16.mxu1 %v21659_v0 }
 0x164   :  { %20194 = vmatpush1.bf16.msra.mxu1 %v21953_v42 }
 0x165   :  { %582 = vmatprep.subr.mxu1 %v21661_v4 }
 0x168   :  { %583 = vmatpush1.msra.mxu1 %v21960_v45 }
 0x169   :  { %607 = vmatmul.mubr.f32.vlgmr.msra.gmra.mrb[14].mxu1 %v15486_v60  ;;  %20195 = vmatprep.subr.bf16.mxu1 %v21659_v0  ;;  %v15584_v60 = vld [vmem:[%s26698_s2 + $0x1f8] sm:$0xff] }
 0x16a   :  { %20197 = vmatpush1.bf16.msra.mxu1 %v21899_v54  ;;  %15501 = vmatprep.mubr.msk.f32.mxu1 %vm383_vm2, %v15489_v61  ;;  %v15583_v61 = vld [vmem:[%s26698_s2 + $0x1f0] sm:$0xff] }
 0x16b   :  { %20198 = vmatprep.subr.bf16.mxu1 %v21659_v0 }
 0x16d   :  { %612 = vmatmul.mubr.f32.gmra.mrb[16].mxu1 %v15488_v62  ;;  %v15586_v62 = vld [vmem:[%s26698_s2 + $0x208] sm:$0xff] }
 0x16e   :  { %20200 = vmatpush1.bf16.msra.mxu1 %v21905_v2  ;;  %15502 = vmatprep.mubr.msk.f32.mxu1 %vm383_vm2, %v15491_v1  ;;  %v15585_v1 = vld [vmem:[%s26698_s2 + $0x200] sm:$0xff] }
 0x16f   :  { %20201 = vmatprep.subr.bf16.mxu1 %v21659_v0 }
 0x171   :  { %617 = vmatmul.mubr.f32.gmra.mrb[18].mxu1 %v15490_v3  ;;  %v15588_v3 = vld [vmem:[%s26698_s2 + $0x218] sm:$0xff] }
 0x172   :  { %20203 = vmatpush1.bf16.msra.mxu1 %v21911_v14  ;;  %15503 = vmatprep.mubr.msk.f32.mxu1 %vm383_vm2, %v15493_v5  ;;  %v15587_v5 = vld [vmem:[%s26698_s2 + $0x210] sm:$0xff] }
 0x173   :  { %20204 = vmatprep.subr.bf16.mxu1 %v21659_v0 }
 0x175   :  { %622 = vmatmul.mubr.f32.gmra.mrb[20].mxu1 %v15492_v6  ;;  %v15590_v6 = vld [vmem:[%s26698_s2 + $0x228] sm:$0xff] }
 0x176   :  { %20206 = vmatpush1.bf16.msra.mxu1 %v21917_v25  ;;  %15504 = vmatprep.mubr.msk.f32.mxu1 %vm383_vm2, %v15495_v7  ;;  %v15589_v7 = vld [vmem:[%s26698_s2 + $0x220] sm:$0xff] }
 0x177   :  { %20207 = vmatprep.subr.bf16.mxu1 %v21659_v0 }
 0x179   :  { %627 = vmatmul.mubr.f32.gmra.mrb[22].mxu1 %v15494_v8  ;;  %v15606_v8 = vld [vmem:[%s26698_s2 + $0x238] sm:$0xff] }
 0x17a   :  { %20209 = vmatpush1.bf16.msra.mxu1 %v21923_v39  ;;  %15505 = vmatprep.mubr.msk.f32.mxu1 %vm383_vm2, %v15497_v9  ;;  %v15605_v9 = vld [vmem:[%s26698_s2 + $0x230] sm:$0xff] }
 0x17b   :  { %20210 = vmatprep.subr.bf16.mxu1 %v21659_v0 }
 0x17d   :  { %632 = vmatmul.mubr.f32.gmra.mrb[24].mxu1 %v15496_v10  ;;  %v15608_v10 = vld [vmem:[%s26698_s2 + $0x248] sm:$0xff] }
 0x17e   :  { %20212 = vmatpush1.bf16.msra.mxu1 %v21929_v51  ;;  %15506 = vmatprep.mubr.msk.f32.mxu1 %vm383_vm2, %v15499_v11 }
 0x17f   :  { %20213 = vmatprep.subr.bf16.mxu1 %v21659_v0 }
 0x181   :  { %637 = vmatmul.mubr.f32.gmra.mrb[26].mxu1 %v15498_v12  ;;  %v15607_v12 = vld [vmem:[%s26698_s2 + $0x240] sm:$0xff] }
 0x182   :  { %20215 = vmatpush1.bf16.msra.mxu1 %v21935_v63  ;;  %15535 = vmatprep.mubr.msk.f32.mxu1 %vm383_vm2, %v15522_v15 }
 0x183   :  { %20216 = vmatprep.subr.bf16.mxu1 %v21659_v0 }
 0x186   :  { %20218 = vmatpush1.bf16.msra.mxu1 %v21941_v13 }
 0x187   :  { %20219 = vmatprep.subr.bf16.mxu1 %v21659_v0 }
 0x18a   :  { %20221 = vmatpush1.bf16.msra.mxu1 %v21947_v26 }
 0x18b   :  { %20222 = vmatprep.subr.bf16.mxu1 %v21659_v0 }
 0x18e   :  { %20224 = vmatpush1.bf16.msra.mxu1 %v21953_v42 }
 0x18f   :  { %962 = vmatprep.subr.mxu1 %v21661_v4 }
 0x192   :  { %963 = vmatpush1.msra.mxu1 %v21960_v45 }
 0x193   :  { %987 = vmatmul.mubr.f32.vlgmr.msra.gmra.mrb[28].mxu1 %v15521_v16  ;;  %20225 = vmatprep.subr.bf16.mxu1 %v21659_v0  ;;  %v15610_v16 = vld [vmem:[%s26698_s2 + $0x258] sm:$0xff] }
 0x194   :  { %20227 = vmatpush1.bf16.msra.mxu1 %v21899_v54  ;;  %15536 = vmatprep.mubr.msk.f32.mxu1 %vm383_vm2, %v15524_v17 }
 0x195   :  { %20228 = vmatprep.subr.bf16.mxu1 %v21659_v0 }
 0x197   :  { %992 = vmatmul.mubr.f32.gmra.mrb[30].mxu1 %v15523_v18  ;;  %v15609_v18 = vld [vmem:[%s26698_s2 + $0x250] sm:$0xff] }
 0x198   :  { %20230 = vmatpush1.bf16.msra.mxu1 %v21905_v2  ;;  %15537 = vmatprep.mubr.msk.f32.mxu1 %vm383_vm2, %v15526_v20  ;;  %v15612_v20 = vld [vmem:[%s26698_s2 + $0x268] sm:$0xff] }
 0x199   :  { %20231 = vmatprep.subr.bf16.mxu1 %v21659_v0 }
 0x19b   :  { %997 = vmatmul.mubr.f32.gmra.mrb[32].mxu1 %v15525_v21 }
 0x19c   :  { %20233 = vmatpush1.bf16.msra.mxu1 %v21911_v14  ;;  %15538 = vmatprep.mubr.msk.f32.mxu1 %vm383_vm2, %v15528_v22  ;;  %v15611_v22 = vld [vmem:[%s26698_s2 + $0x260] sm:$0xff] }
 0x19d   :  { %20234 = vmatprep.subr.bf16.mxu1 %v21659_v0 }
 0x19f   :  { %1002 = vmatmul.mubr.f32.gmra.mrb[34].mxu1 %v15527_v23 }
 0x1a0   :  { %20236 = vmatpush1.bf16.msra.mxu1 %v21917_v25  ;;  %15539 = vmatprep.mubr.msk.f32.mxu1 %vm383_vm2, %v15530_v24  ;;  %v15614_v24 = vld [vmem:[%s26698_s2 + $0x278] sm:$0xff] }
 0x1a1   :  { %20237 = vmatprep.subr.bf16.mxu1 %v21659_v0 }
 0x1a3   :  { %1007 = vmatmul.mubr.f32.gmra.mrb[36].mxu1 %v15529_v27 }
 0x1a4   :  { %20239 = vmatpush1.bf16.msra.mxu1 %v21923_v39  ;;  %15540 = vmatprep.mubr.msk.f32.mxu1 %vm383_vm2, %v15532_v28  ;;  %v15613_v28 = vld [vmem:[%s26698_s2 + $0x270] sm:$0xff] }
 0x1a5   :  { %20240 = vmatprep.subr.bf16.mxu1 %v21659_v0 }
 0x1a7   :  { %1012 = vmatmul.mubr.f32.gmra.mrb[38].mxu1 %v15531_v29 }
 0x1a8   :  { %20242 = vmatpush1.bf16.msra.mxu1 %v21929_v51  ;;  %15541 = vmatprep.mubr.msk.f32.mxu1 %vm383_vm2, %v15534_v30  ;;  %v15616_v30 = vld [vmem:[%s26698_s2 + $0x288] sm:$0xff] }
 0x1a9   :  { %20243 = vmatprep.subr.bf16.mxu1 %v21659_v0 }
 0x1ab   :  { %1017 = vmatmul.mubr.f32.gmra.mrb[40].mxu1 %v15533_v31 }
 0x1ac   :  { %20245 = vmatpush1.bf16.msra.mxu1 %v21935_v63  ;;  %15563 = vmatprep.mubr.msk.f32.mxu1 %vm383_vm2, %v15550_v32  ;;  %v15615_v32 = vld [vmem:[%s26698_s2 + $0x280] sm:$0xff] }
 0x1ad   :  { %20246 = vmatprep.subr.bf16.mxu1 %v21659_v0 }
 0x1b0   :  { %20248 = vmatpush1.bf16.msra.mxu1 %v21941_v13 }
 0x1b1   :  { %20249 = vmatprep.subr.bf16.mxu1 %v21659_v0 }
 0x1b4   :  { %20251 = vmatpush1.bf16.msra.mxu1 %v21947_v26 }
 0x1b5   :  { %20252 = vmatprep.subr.bf16.mxu1 %v21659_v0 }
 0x1b8   :  { %20254 = vmatpush1.bf16.msra.mxu1 %v21953_v42 }
 0x1b9   :  { %1227 = vmatprep.subr.mxu1 %v21661_v4 }
 0x1bc   :  { %1228 = vmatpush1.msra.mxu1 %v21960_v45 }
 0x1bd   :  { %1252 = vmatmul.mubr.f32.vlgmr.msra.gmra.mrb[42].mxu1 %v15549_v33  ;;  %20255 = vmatprep.subr.bf16.mxu1 %v21659_v0 }
 0x1be   :  { %20257 = vmatpush1.bf16.msra.mxu1 %v21899_v54  ;;  %15564 = vmatprep.mubr.msk.f32.mxu1 %vm383_vm2, %v15552_v34  ;;  %v15618_v34 = vld [vmem:[%s26698_s2 + $0x298] sm:$0xff] }
 0x1bf   :  { %20258 = vmatprep.subr.bf16.mxu1 %v21659_v0 }
 0x1c1   :  { %1257 = vmatmul.mubr.f32.gmra.mrb[44].mxu1 %v15551_v35 }
 0x1c2   :  { %20260 = vmatpush1.bf16.msra.mxu1 %v21905_v2  ;;  %15565 = vmatprep.mubr.msk.f32.mxu1 %vm383_vm2, %v15554_v41  ;;  %v15617_v41 = vld [vmem:[%s26698_s2 + $0x290] sm:$0xff] }
 0x1c3   :  { %20261 = vmatprep.subr.bf16.mxu1 %v21659_v0 }
 0x1c5   :  { %1262 = vmatmul.mubr.f32.gmra.mrb[46].mxu1 %v15553_v43 }
 0x1c6   :  { %20263 = vmatpush1.bf16.msra.mxu1 %v21911_v14  ;;  %15566 = vmatprep.mubr.msk.f32.mxu1 %vm383_vm2, %v15556_v44  ;;  %v15662_v44 = vld [vmem:[%s26698_s2 + $0x318] sm:$0xff] }
 0x1c7   :  { %20264 = vmatprep.subr.bf16.mxu1 %v21659_v0 }
 0x1c9   :  { %1267 = vmatmul.mubr.f32.gmra.mrb[48].mxu1 %v15555_v46 }
 0x1ca   :  { %20266 = vmatpush1.bf16.msra.mxu1 %v21917_v25  ;;  %15567 = vmatprep.mubr.msk.f32.mxu1 %vm383_vm2, %v15558_v40 }
 0x1cb   :  { %20267 = vmatprep.subr.bf16.mxu1 %v21659_v0 }
 0x1cd   :  { %1272 = vmatmul.mubr.f32.gmra.mrb[50].mxu1 %v15557_v47  ;;  %v15661_v47 = vld [vmem:[%s26698_s2 + $0x310] sm:$0xff] }
 0x1ce   :  { %20269 = vmatpush1.bf16.msra.mxu1 %v21923_v39  ;;  %15568 = vmatprep.mubr.msk.f32.mxu1 %vm383_vm2, %v15560_v48  ;;  %v15664_v48 = vld [vmem:[%s26698_s2 + $0x328] sm:$0xff] }
 0x1cf   :  { %20270 = vmatprep.subr.bf16.mxu1 %v21659_v0 }
 0x1d1   :  { %1277 = vmatmul.mubr.f32.gmra.mrb[52].mxu1 %v15559_v49  ;;  %v505_v49 = vld [vmem:[%s26700_s3] sm:$0xff] }
 0x1d2   :  { %20272 = vmatpush1.bf16.msra.mxu1 %v21929_v51  ;;  %15569 = vmatprep.mubr.msk.f32.mxu1 %vm383_vm2, %v15562_v50 }
 0x1d3   :  { %20273 = vmatprep.subr.bf16.mxu1 %v21659_v0 }
 0x1d5   :  { %1282 = vmatmul.mubr.f32.gmra.mrb[54].mxu1 %v15561_v52  ;;  %v15663_v52 = vld [vmem:[%s26698_s2 + $0x320] sm:$0xff] }
 0x1d6   :  { %20275 = vmatpush1.bf16.msra.mxu1 %v21935_v63  ;;  %15591 = vmatprep.mubr.msk.f32.mxu1 %vm383_vm2, %v15578_v53 }
 0x1d7   :  { %20276 = vmatprep.subr.bf16.mxu1 %v21659_v0 }
 0x1da   :  { %20278 = vmatpush1.bf16.msra.mxu1 %v21941_v13 }
 0x1db   :  { %20279 = vmatprep.subr.bf16.mxu1 %v21659_v0 }
 0x1de   :  { %20281 = vmatpush1.bf16.msra.mxu1 %v21947_v26 }
 0x1df   :  { %20282 = vmatprep.subr.bf16.mxu1 %v21659_v0 }
 0x1e2   :  { %20284 = vmatpush1.bf16.msra.mxu1 %v21953_v42 }
 0x1e3   :  { %1492 = vmatprep.subr.mxu1 %v21661_v4 }
 0x1e6   :  { %1493 = vmatpush1.msra.mxu1 %v21960_v45 }
 0x1e7   :  { %1517 = vmatmul.mubr.f32.vlgmr.msra.gmra.mrb[56].mxu1 %v15577_v55  ;;  %20285 = vmatprep.subr.bf16.mxu1 %v21659_v0  ;;  %v15666_v55 = vld [vmem:[%s26698_s2 + $0x338] sm:$0xff] }
 0x1e8   :  { %20287 = vmatpush1.bf16.msra.mxu1 %v21899_v54  ;;  %15592 = vmatprep.mubr.msk.f32.mxu1 %vm383_vm2, %v15580_v56 }
 0x1e9   :  { %20288 = vmatprep.subr.bf16.mxu1 %v21659_v0 }
 0x1eb   :  { %1522 = vmatmul.mubr.f32.gmra.mrb[58].mxu1 %v15579_v57  ;;  %v15665_v57 = vld [vmem:[%s26698_s2 + $0x330] sm:$0xff] }
 0x1ec   :  { %20290 = vmatpush1.bf16.msra.mxu1 %v21905_v2  ;;  %15593 = vmatprep.mubr.msk.f32.mxu1 %vm383_vm2, %v15582_v58 }
 0x1ed   :  { %20291 = vmatprep.subr.bf16.mxu1 %v21659_v0 }
 0x1ef   :  { %1527 = vmatmul.mubr.f32.gmra.mrb[60].mxu1 %v15581_v59  ;;  %v15668_v59 = vld [vmem:[%s26698_s2 + $0x348] sm:$0xff] }
 0x1f0   :  { %20293 = vmatpush1.bf16.msra.mxu1 %v21911_v14  ;;  %15594 = vmatprep.mubr.msk.f32.mxu1 %vm383_vm2, %v15584_v60 }
 0x1f1   :  { %20294 = vmatprep.subr.bf16.mxu1 %v21659_v0 }
 0x1f3   :  { %1532 = vmatmul.mubr.f32.gmra.mrb[62].mxu1 %v15583_v61  ;;  %v15667_v61 = vld [vmem:[%s26698_s2 + $0x340] sm:$0xff] }
 0x1f4   :  { %20296 = vmatpush1.bf16.msra.mxu1 %v21917_v25  ;;  %15595 = vmatprep.mubr.msk.f32.mxu1 %vm383_vm2, %v15586_v62 }
 0x1f5   :  { %20297 = vmatprep.subr.bf16.mxu1 %v21659_v0 }
 0x1f7   :  { %1537 = vmatmul.mubr.f32.gmra.mrb[64].mxu1 %v15585_v1  ;;  %v15670_v1 = vld [vmem:[%s26698_s2 + $0x358] sm:$0xff] }
 0x1f8   :  { %20299 = vmatpush1.bf16.msra.mxu1 %v21923_v39  ;;  %15596 = vmatprep.mubr.msk.f32.mxu1 %vm383_vm2, %v15588_v3 }
 0x1f9   :  { %20300 = vmatprep.subr.bf16.mxu1 %v21659_v0 }
 0x1fb   :  { %1542 = vmatmul.mubr.f32.gmra.mrb[66].mxu1 %v15587_v5  ;;  %v15669_v5 = vld [vmem:[%s26698_s2 + $0x350] sm:$0xff] }
 0x1fc   :  { %20302 = vmatpush1.bf16.msra.mxu1 %v21929_v51  ;;  %15597 = vmatprep.mubr.msk.f32.mxu1 %vm383_vm2, %v15590_v6 }
 0x1fd   :  { %20303 = vmatprep.subr.bf16.mxu1 %v21659_v0 }
 0x1ff   :  { %1547 = vmatmul.mubr.f32.gmra.mrb[68].mxu1 %v15589_v7  ;;  %v15672_v7 = vld [vmem:[%s26698_s2 + $0x368] sm:$0xff] }
 0x200   :  { %20305 = vmatpush1.bf16.msra.mxu1 %v21935_v63  ;;  %15619 = vmatprep.mubr.msk.f32.mxu1 %vm383_vm2, %v15606_v8 }
 0x201   :  { %20306 = vmatprep.subr.bf16.mxu1 %v21659_v0 }
 0x204   :  { %20308 = vmatpush1.bf16.msra.mxu1 %v21941_v13 }
 0x205   :  { %20309 = vmatprep.subr.bf16.mxu1 %v21659_v0 }
 0x208   :  { %20311 = vmatpush1.bf16.msra.mxu1 %v21947_v26 }
 0x209   :  { %20312 = vmatprep.subr.bf16.mxu1 %v21659_v0 }
 0x20c   :  { %20314 = vmatpush1.bf16.msra.mxu1 %v21953_v42 }
 0x20d   :  { %1757 = vmatprep.subr.mxu1 %v21661_v4 }
 0x210   :  { %1758 = vmatpush1.msra.mxu1 %v21960_v45 }
 0x211   :  { %1782 = vmatmul.mubr.f32.vlgmr.msra.gmra.mrb[70].mxu1 %v15605_v9  ;;  %20345 = vmatprep.subr.bf16.mxu1 %v21659_v0  ;;  %v15671_v9 = vld [vmem:[%s26698_s2 + $0x360] sm:$0xff] }
 0x212   :  { %v22326_v11 = vpop.f32.mrb[0].mxu1  ;;  %20347 = vmatpush1.bf16.msra.mxu1 %v21899_v54  ;;  %15620 = vmatprep.mubr.msk.f32.mxu1 %vm383_vm2, %v15608_v10 }
 0x213   :  { %v473_v15 = vpop.f32.mrb[1].mxu1  ;;  %20348 = vmatprep.subr.bf16.mxu1 %v21659_v0 }
 0x215   :  { %1787 = vmatmul.mubr.f32.gmra.mrb[72].mxu1 %v15607_v12  ;;  %v15674_v12 = vld [vmem:[%s26698_s2 + $0x378] sm:$0xff] }
 0x216   :  { %20350 = vmatpush1.bf16.msra.mxu1 %v21905_v2  ;;  %v22338_v17 = vpop.f32.mrb[2].mxu1  ;;  %15621 = vmatprep.mubr.msk.f32.mxu1 %vm383_vm2, %v15610_v16  ;;  %v15673_v16 = vld [vmem:[%s26698_s2 + $0x370] sm:$0xff] }
 0x217   :  { %20351 = vmatprep.subr.bf16.mxu1 %v21659_v0  ;;  %v478_v19 = vpop.f32.mrb[3].mxu1 }
 0x218   :  { %v15690_v19 = vld [vmem:[%s26698_s2 + $0x388] sm:$0xff] }
 0x219   :  { %1792 = vmatmul.mubr.f32.gmra.mrb[74].mxu1 %v15609_v18 }
 0x21a   :  { %20353 = vmatpush1.bf16.msra.mxu1 %v21911_v14  ;;  %v22349_v21 = vpop.f32.mrb[4].mxu1  ;;  %15622 = vmatprep.mubr.msk.f32.mxu1 %vm383_vm2, %v15612_v20 }
 0x21b   :  { %20354 = vmatprep.subr.bf16.mxu1 %v21659_v0  ;;  %v483_v23 = vpop.f32.mrb[5].mxu1 }
 0x21c   :  { %v1022_v23 = vld [vmem:[%s26700_s3 + $0x10] sm:$0xff] }
 0x21d   :  { %1797 = vmatmul.mubr.f32.gmra.mrb[76].mxu1 %v15611_v22 }
 0x21e   :  { %20356 = vmatpush1.bf16.msra.mxu1 %v21917_v25  ;;  %v22360_v27 = vpop.f32.mrb[6].mxu1  ;;  %15623 = vmatprep.mubr.msk.f32.mxu1 %vm383_vm2, %v15614_v24 }
 0x21f   :  { %20357 = vmatprep.subr.bf16.mxu1 %v21659_v0  ;;  %v488_v29 = vpop.f32.mrb[7].mxu1 }
 0x221   :  { %1802 = vmatmul.mubr.f32.gmra.mrb[78].mxu1 %v15613_v28  ;;  %v15691_v28 = vld [vmem:[%s26698_s2 + $0x390] sm:$0xff] }
 0x222   :  { %20359 = vmatpush1.bf16.msra.mxu1 %v21923_v39  ;;  %v22371_v31 = vpop.f32.mrb[8].mxu1  ;;  %15624 = vmatprep.mubr.msk.f32.mxu1 %vm383_vm2, %v15616_v30 }
 0x223   :  { %20360 = vmatprep.subr.bf16.mxu1 %v21659_v0  ;;  %v493_v33 = vpop.f32.mrb[9].mxu1 }
 0x225   :  { %1807 = vmatmul.mubr.f32.gmra.mrb[80].mxu1 %v15615_v32  ;;  %v15693_v32 = vld [vmem:[%s26698_s2 + $0x3a0] sm:$0xff] }
 0x226   :  { %20362 = vmatpush1.bf16.msra.mxu1 %v21929_v51  ;;  %v22382_v35 = vpop.f32.mrb[10].mxu1  ;;  %15625 = vmatprep.mubr.msk.f32.mxu1 %vm383_vm2, %v15618_v34 }
 0x227   :  { %20363 = vmatprep.subr.bf16.mxu1 %v21659_v0  ;;  %v498_v43 = vpop.f32.mrb[11].mxu1 }
 0x229   :  { %1812 = vmatmul.mubr.f32.gmra.mrb[82].mxu1 %v15617_v41  ;;  %v15695_v41 = vld [vmem:[%s26698_s2 + $0x3b0] sm:$0xff] }
 0x22a   :  { %20365 = vmatpush1.bf16.msra.mxu1 %v21935_v63  ;;  %v22393_v46 = vpop.f32.mrb[12].mxu1  ;;  %15675 = vmatprep.mubr.msk.f32.mxu1 %vm383_vm2, %v15662_v44 }
 0x22b   :  { %20366 = vmatprep.subr.bf16.mxu1 %v21659_v0  ;;  %v503_v40 = vpop.f32.mrb[13].mxu1 }
 0x22c   :  { %v15697_v40 = vld [vmem:[%s26698_s2 + $0x3c0] sm:$0xff] }
 0x22e   :  { %20368 = vmatpush1.bf16.msra.mxu1 %v21941_v13 }
 0x22f   :  { %20369 = vmatprep.subr.bf16.mxu1 %v21659_v0 }
 0x232   :  { %20371 = vmatpush1.bf16.msra.mxu1 %v21947_v26 }
 0x233   :  { %20372 = vmatprep.subr.bf16.mxu1 %v21659_v0 }
 0x236   :  { %20374 = vmatpush1.bf16.msra.mxu1 %v21953_v42 }
 0x237   :  { %2287 = vmatprep.subr.mxu1 %v21661_v4 }
 0x23a   :  { %2288 = vmatpush1.msra.mxu1 %v21960_v45 }
 0x23b   :  { %20375 = vmatprep.subr.bf16.mxu1 %v21659_v0  ;;  %2312 = vmatmul.mubr.f32.vlgmr.msra.gmra.mrb[84].mxu1 %v15661_v47  ;;  %v1287_v47 = vld [vmem:[%s26700_s3 + $0x18] sm:$0xff] }
 0x23c   :  { %v608_v50 = vpop.f32.mrb[14].mxu1  ;;  %20377 = vmatpush1.bf16.msra.mxu1 %v21899_v54  ;;  %15676 = vmatprep.mubr.msk.f32.mxu1 %vm383_vm2, %v15664_v48 }
 0x23d   :  { %v610_v53 = vpop.f32.mrb[15].mxu1  ;;  %17710 = vmatmul.mubr.msk.f32.vlgmr.msra.gmra.mrb[42].mxu0 %vm643_vm11, %v608_v50  ;;  %20378 = vmatprep.subr.bf16.mxu1 %v21659_v0  ;;  %v15699_v50 = vld [vmem:[%s26698_s2 + $0x3d0] sm:$0xff] }
 0x23e   :  { %17712 = vmatprep.mubr.msk.f32.mxu0 %vm21660_vm0, %v21661_v4  ;;  %17731 = vmatpush3.msra.mxu0 %v505_v49 }
 0x23f   :  { %2317 = vmatmul.mubr.f32.gmra.mrb[86].mxu1 %v15663_v52  ;;  %17753 = vmatprep.subr.mxu0 %v21661_v4  ;;  %v15702_v52 = vld [vmem:[%s26698_s2 + $0x3e8] sm:$0xff] }
 0x240   :  { %v613_v56 = vpop.f32.mrb[16].mxu1  ;;  %20380 = vmatpush1.bf16.msra.mxu1 %v21905_v2  ;;  %15677 = vmatprep.mubr.msk.f32.mxu1 %vm383_vm2, %v15666_v55 }
 0x241   :  { %17713 = vmatmul.mubr.msk.f32.gmra.mrb[44].mxu0 %vm643_vm11, %v613_v56  ;;  %v615_v58 = vpop.f32.mrb[17].mxu1  ;;  %20381 = vmatprep.subr.bf16.mxu1 %v21659_v0  ;;  %v15701_v56 = vld [vmem:[%s26698_s2 + $0x3e0] sm:$0xff] }
 0x242   :  { %17715 = vmatprep.mubr.msk.f32.mxu0 %vm21660_vm0, %v21661_v4 }
 0x243   :  { %2322 = vmatmul.mubr.f32.gmra.mrb[88].mxu1 %v15665_v57  ;;  %v15718_v57 = vld [vmem:[%s26698_s2 + $0x3f8] sm:$0xff] }
 0x244   :  { %v618_v60 = vpop.f32.mrb[18].mxu1  ;;  %20383 = vmatpush1.bf16.msra.mxu1 %v21911_v14  ;;  %15678 = vmatprep.mubr.msk.f32.mxu1 %vm383_vm2, %v15668_v59 }
 0x245   :  { %17716 = vmatmul.mubr.msk.f32.gmra.mrb[46].mxu0 %vm643_vm11, %v618_v60  ;;  %v620_v62 = vpop.f32.mrb[19].mxu1  ;;  %20384 = vmatprep.subr.bf16.mxu1 %v21659_v0  ;;  %v15717_v60 = vld [vmem:[%s26698_s2 + $0x3f0] sm:$0xff] }
 0x246   :  { %17718 = vmatprep.mubr.msk.f32.mxu0 %vm21660_vm0, %v21661_v4 }
 0x247   :  { %2327 = vmatmul.mubr.f32.gmra.mrb[90].mxu1 %v15667_v61  ;;  %v15720_v61 = vld [vmem:[%s26698_s2 + $0x408] sm:$0xff] }
 0x248   :  { %v623_v3 = vpop.f32.mrb[20].mxu1  ;;  %20386 = vmatpush1.bf16.msra.mxu1 %v21917_v25  ;;  %15679 = vmatprep.mubr.msk.f32.mxu1 %vm383_vm2, %v15670_v1  ;;  %v1552_v1 = vld [vmem:[%s26700_s3 + $0x20] sm:$0xff] }
 0x249   :  { %17719 = vmatmul.mubr.msk.f32.gmra.mrb[48].mxu0 %vm643_vm11, %v623_v3  ;;  %v625_v6 = vpop.f32.mrb[21].mxu1  ;;  %20387 = vmatprep.subr.bf16.mxu1 %v21659_v0 }
 0x24a   :  { %17721 = vmatprep.mubr.msk.f32.mxu0 %vm21660_vm0, %v21661_v4  ;;  %v15722_v6 = vld [vmem:[%s26698_s2 + $0x418] sm:$0xff] }
 0x24b   :  { %2332 = vmatmul.mubr.f32.gmra.mrb[92].mxu1 %v15669_v5  ;;  %v15719_v5 = vld [vmem:[%s26698_s2 + $0x400] sm:$0xff] }
 0x24c   :  { %v628_v8 = vpop.f32.mrb[22].mxu1  ;;  %20389 = vmatpush1.bf16.msra.mxu1 %v21923_v39  ;;  %15680 = vmatprep.mubr.msk.f32.mxu1 %vm383_vm2, %v15672_v7 }
 0x24d   :  { %17722 = vmatmul.mubr.msk.f32.gmra.mrb[50].mxu0 %vm643_vm11, %v628_v8  ;;  %v630_v10 = vpop.f32.mrb[23].mxu1  ;;  %20390 = vmatprep.subr.bf16.mxu1 %v21659_v0 }
 0x24e   :  { %17724 = vmatprep.mubr.msk.f32.mxu0 %vm21660_vm0, %v21661_v4  ;;  %v15724_v10 = vld [vmem:[%s26698_s2 + $0x428] sm:$0xff] }
 0x24f   :  { %2337 = vmatmul.mubr.f32.gmra.mrb[94].mxu1 %v15671_v9  ;;  %v15721_v9 = vld [vmem:[%s26698_s2 + $0x410] sm:$0xff] }
 0x250   :  { %v633_v15 = vpop.f32.mrb[24].mxu1  ;;  %20392 = vmatpush1.bf16.msra.mxu1 %v21929_v51  ;;  %15681 = vmatprep.mubr.msk.f32.mxu1 %vm383_vm2, %v15674_v12 }
 0x251   :  { %17725 = vmatmul.mubr.msk.f32.gmra.mrb[52].mxu0 %vm643_vm11, %v633_v15  ;;  %v635_v18 = vpop.f32.mrb[25].mxu1  ;;  %20393 = vmatprep.subr.bf16.mxu1 %v21659_v0 }
 0x252   :  { %17727 = vmatprep.mubr.msk.f32.mxu0 %vm21660_vm0, %v21661_v4  ;;  %v15726_v18 = vld [vmem:[%s26698_s2 + $0x438] sm:$0xff] }
 0x253   :  { %2342 = vmatmul.mubr.f32.gmra.mrb[96].mxu1 %v15673_v16  ;;  %v15723_v16 = vld [vmem:[%s26698_s2 + $0x420] sm:$0xff] }
 0x254   :  { %v638_v20 = vpop.f32.mrb[26].mxu1  ;;  %20395 = vmatpush1.bf16.msra.mxu1 %v21935_v63  ;;  %15703 = vmatprep.mubr.msk.f32.mxu1 %vm383_vm2, %v15690_v19 }
 0x255   :  { %17728 = vmatmul.mubr.msk.f32.gmra.mrb[54].mxu0 %vm643_vm11, %v638_v20  ;;  %20396 = vmatprep.subr.bf16.mxu1 %v21659_v0  ;;  %v640_v22 = vpop.f32.mrb[27].mxu1 }
 0x256   :  { %17732 = vmatprep.mubr.msk.f32.mxu0 %vm21660_vm0, %v21661_v4  ;;  %v15725_v22 = vld [vmem:[%s26698_s2 + $0x430] sm:$0xff] }
 0x258   :  { %20398 = vmatpush1.bf16.msra.mxu1 %v21941_v13 }
 0x259   :  { %17733 = vmatmul.mubr.msk.f32.vlgmr.msra.gmra.mrb[42].mxu0 %vm643_vm11, %v22326_v11  ;;  %20399 = vmatprep.subr.bf16.mxu1 %v21659_v0  ;;  %v15689_v11 = vld [vmem:[%s26698_s2 + $0x380] sm:$0xff] }
 0x25a   :  { %17735 = vmatprep.mubr.msk.f32.mxu0 %vm21660_vm0, %v21661_v4  ;;  %17754 = vmatpush3.msra.mxu0 %v1022_v23  ;;  %v15728_v23 = vld [vmem:[%s26698_s2 + $0x448] sm:$0xff] }
 0x25b   :  { %17776 = vmatprep.subr.mxu0 %v21661_v4 }
 0x25c   :  { %20401 = vmatpush1.bf16.msra.mxu1 %v21947_v26 }
 0x25d   :  { %17736 = vmatmul.mubr.msk.f32.gmra.mrb[44].mxu0 %vm643_vm11, %v22338_v17  ;;  %20402 = vmatprep.subr.bf16.mxu1 %v21659_v0  ;;  %v15692_v17 = vld [vmem:[%s26698_s2 + $0x398] sm:$0xff] }
 0x25e   :  { %17738 = vmatprep.mubr.msk.f32.mxu0 %vm21660_vm0, %v21661_v4 }
 0x260   :  { %20404 = vmatpush1.bf16.msra.mxu1 %v21953_v42 }
 0x261   :  { %17739 = vmatmul.mubr.msk.f32.gmra.mrb[46].mxu0 %vm643_vm11, %v22349_v21  ;;  %2552 = vmatprep.subr.mxu1 %v21661_v4 }
 0x262   :  { %17741 = vmatprep.mubr.msk.f32.mxu0 %vm21660_vm0, %v21661_v4 }
 0x264   :  { %2553 = vmatpush1.msra.mxu1 %v21960_v45 }
 0x265   :  { %17742 = vmatmul.mubr.msk.f32.gmra.mrb[48].mxu0 %vm643_vm11, %v22360_v27  ;;  %20405 = vmatprep.subr.bf16.mxu1 %v21659_v0  ;;  %v15694_v27 = vld [vmem:[%s26698_s2 + $0x3a8] sm:$0xff] }
 0x266   :  { %v988_v21 = vpop.f32.mrb[28].mxu1  ;;  %2577 = vmatmul.mubr.f32.vlgmr.msra.gmra.mrb[98].mxu1 %v15689_v11  ;;  %17744 = vmatprep.mubr.msk.f32.mxu0 %vm21660_vm0, %v21661_v4 }
 0x267   :  { %20407 = vmatpush1.bf16.msra.mxu1 %v21899_v54  ;;  %v990_v24 = vpop.f32.mrb[29].mxu1  ;;  %15704 = vmatprep.mubr.msk.f32.mxu1 %vm383_vm2, %v15692_v17 }
 0x268   :  { %20408 = vmatprep.subr.bf16.mxu1 %v21659_v0  ;;  %v15730_v24 = vld [vmem:[%s26698_s2 + $0x458] sm:$0xff] }
 0x269   :  { %17745 = vmatmul.mubr.msk.f32.gmra.mrb[50].mxu0 %vm643_vm11, %v22371_v31  ;;  %v15696_v31 = vld [vmem:[%s26698_s2 + $0x3b8] sm:$0xff] }
 0x26a   :  { %17747 = vmatprep.mubr.msk.f32.mxu0 %vm21660_vm0, %v21661_v4  ;;  %v993_v29 = vpop.f32.mrb[30].mxu1  ;;  %2582 = vmatmul.mubr.f32.gmra.mrb[100].mxu1 %v15691_v28 }
 0x26b   :  { %20410 = vmatpush1.bf16.msra.mxu1 %v21905_v2  ;;  %v995_v30 = vpop.f32.mrb[31].mxu1  ;;  %15705 = vmatprep.mubr.msk.f32.mxu1 %vm383_vm2, %v15694_v27 }
 0x26c   :  { %20411 = vmatprep.subr.bf16.mxu1 %v21659_v0  ;;  %v15746_v30 = vld [vmem:[%s26698_s2 + $0x468] sm:$0xff] }
 0x26d   :  { %17748 = vmatmul.mubr.msk.f32.gmra.mrb[52].mxu0 %vm643_vm11, %v22382_v35  ;;  %v15698_v35 = vld [vmem:[%s26698_s2 + $0x3c8] sm:$0xff] }
 0x26e   :  { %17750 = vmatprep.mubr.msk.f32.mxu0 %vm21660_vm0, %v21661_v4  ;;  %v998_v33 = vpop.f32.mrb[32].mxu1  ;;  %2587 = vmatmul.mubr.f32.gmra.mrb[102].mxu1 %v15693_v32 }
 0x26f   :  { %20413 = vmatpush1.bf16.msra.mxu1 %v21911_v14  ;;  %v1000_v34 = vpop.f32.mrb[33].mxu1  ;;  %15706 = vmatprep.mubr.msk.f32.mxu1 %vm383_vm2, %v15696_v31 }
 0x270   :  { %20414 = vmatprep.subr.bf16.mxu1 %v21659_v0  ;;  %v15748_v34 = vld [vmem:[%s26698_s2 + $0x478] sm:$0xff] }
 0x271   :  { %17751 = vmatmul.mubr.msk.f32.gmra.mrb[54].mxu0 %vm643_vm11, %v22393_v46  ;;  %v15700_v46 = vld [vmem:[%s26698_s2 + $0x3d8] sm:$0xff] }
 0x272   :  { %17755 = vmatprep.mubr.msk.f32.mxu0 %vm21660_vm0, %v21661_v4  ;;  %v1003_v43 = vpop.f32.mrb[34].mxu1  ;;  %2592 = vmatmul.mubr.f32.gmra.mrb[104].mxu1 %v15695_v41 }
 0x273   :  { %20416 = vmatpush1.bf16.msra.mxu1 %v21917_v25  ;;  %v1005_v44 = vpop.f32.mrb[35].mxu1  ;;  %15707 = vmatprep.mubr.msk.f32.mxu1 %vm383_vm2, %v15698_v35  ;;  %v1817_v35 = vld [vmem:[%s26700_s3 + $0x28] sm:$0xff] }
 0x274   :  { %20417 = vmatprep.subr.bf16.mxu1 %v21659_v0  ;;  %v15747_v44 = vld [vmem:[%s26698_s2 + $0x470] sm:$0xff] }
 0x275   :  { %17756 = vmatmul.mubr.msk.f32.vlgmr.msra.gmra.mrb[42].mxu0 %vm643_vm11, %v988_v21  ;;  %v15727_v21 = vld [vmem:[%s26698_s2 + $0x440] sm:$0xff] }
 0x276   :  { %17758 = vmatprep.mubr.msk.f32.mxu0 %vm21660_vm0, %v21661_v4  ;;  %v1008_v48 = vpop.f32.mrb[36].mxu1  ;;  %2597 = vmatmul.mubr.f32.gmra.mrb[106].mxu1 %v15697_v40  ;;  %v15750_v40 = vld [vmem:[%s26698_s2 + $0x488] sm:$0xff] }
 0x277   :  { %20419 = vmatpush1.bf16.msra.mxu1 %v21923_v39  ;;  %v1010_v49 = vpop.f32.mrb[37].mxu1  ;;  %15708 = vmatprep.mubr.msk.f32.mxu1 %vm383_vm2, %v15700_v46 }
 0x278   :  { %20420 = vmatprep.subr.bf16.mxu1 %v21659_v0  ;;  %17777 = vmatpush3.msra.mxu0 %v1287_v47  ;;  %v15752_v49 = vld [vmem:[%s26698_s2 + $0x498] sm:$0xff] }
 0x279   :  { %17759 = vmatmul.mubr.msk.f32.gmra.mrb[44].mxu0 %vm643_vm11, %v993_v29  ;;  %17799 = vmatprep.subr.mxu0 %v21661_v4  ;;  %v15729_v29 = vld [vmem:[%s26698_s2 + $0x450] sm:$0xff] }
 0x27a   :  { %17761 = vmatprep.mubr.msk.f32.mxu0 %vm21660_vm0, %v21661_v4  ;;  %v1013_v53 = vpop.f32.mrb[38].mxu1  ;;  %2602 = vmatmul.mubr.f32.gmra.mrb[108].mxu1 %v15699_v50 }
 0x27b   :  { %20422 = vmatpush1.bf16.msra.mxu1 %v21929_v51  ;;  %v1015_v55 = vpop.f32.mrb[39].mxu1  ;;  %15709 = vmatprep.mubr.msk.f32.mxu1 %vm383_vm2, %v15702_v52 }
 0x27c   :  { %20423 = vmatprep.subr.bf16.mxu1 %v21659_v0  ;;  %v15754_v55 = vld [vmem:[%s26698_s2 + $0x4a8] sm:$0xff] }
 0x27d   :  { %17762 = vmatmul.mubr.msk.f32.gmra.mrb[46].mxu0 %vm643_vm11, %v998_v33  ;;  %v15745_v33 = vld [vmem:[%s26698_s2 + $0x460] sm:$0xff] }
 0x27e   :  { %17764 = vmatprep.mubr.msk.f32.mxu0 %vm21660_vm0, %v21661_v4  ;;  %v1018_v58 = vpop.f32.mrb[40].mxu1  ;;  %2607 = vmatmul.mubr.f32.gmra.mrb[110].mxu1 %v15701_v56 }
 0x27f   :  { %20425 = vmatpush1.bf16.msra.mxu1 %v21935_v63  ;;  %v1020_v59 = vpop.f32.mrb[41].mxu1  ;;  %15731 = vmatprep.mubr.msk.f32.mxu1 %vm383_vm2, %v15718_v57 }
 0x280   :  { %20426 = vmatprep.subr.bf16.mxu1 %v21659_v0  ;;  %v15756_v59 = vld [vmem:[%s26698_s2 + $0x4b8] sm:$0xff] }
 0x281   :  { %17765 = vmatmul.mubr.msk.f32.gmra.mrb[48].mxu0 %vm643_vm11, %v1003_v43 }
 0x282   :  { %17767 = vmatprep.mubr.msk.f32.mxu0 %vm21660_vm0, %v21661_v4 }
 0x283   :  { %20428 = vmatpush1.bf16.msra.mxu1 %v21941_v13 }
 0x284   :  { %20429 = vmatprep.subr.bf16.mxu1 %v21659_v0 }
 0x285   :  { %17768 = vmatmul.mubr.msk.f32.gmra.mrb[50].mxu0 %vm643_vm11, %v1008_v48  ;;  %v15749_v48 = vld [vmem:[%s26698_s2 + $0x480] sm:$0xff] }
 0x286   :  { %17770 = vmatprep.mubr.msk.f32.mxu0 %vm21660_vm0, %v21661_v4 }
 0x287   :  { %20431 = vmatpush1.bf16.msra.mxu1 %v21947_v26 }
 0x288   :  { %20432 = vmatprep.subr.bf16.mxu1 %v21659_v0 }
 0x289   :  { %17771 = vmatmul.mubr.msk.f32.gmra.mrb[52].mxu0 %vm643_vm11, %v1013_v53  ;;  %v15751_v53 = vld [vmem:[%s26698_s2 + $0x490] sm:$0xff] }
 0x28a   :  { %17773 = vmatprep.mubr.msk.f32.mxu0 %vm21660_vm0, %v21661_v4 }
 0x28b   :  { %20434 = vmatpush1.bf16.msra.mxu1 %v21953_v42 }
 0x28c   :  { %2817 = vmatprep.subr.mxu1 %v21661_v4 }
 0x28d   :  { %17774 = vmatmul.mubr.msk.f32.gmra.mrb[54].mxu0 %vm643_vm11, %v1018_v58  ;;  %v15753_v58 = vld [vmem:[%s26698_s2 + $0x4a0] sm:$0xff] }
 0x28e   :  { %17778 = vmatprep.mubr.msk.f32.mxu0 %vm21660_vm0, %v21661_v4 }
 0x28f   :  { %2818 = vmatpush1.msra.mxu1 %v21960_v45 }
 0x290   :  { %20435 = vmatprep.subr.bf16.mxu1 %v21659_v0  ;;  %v1253_v62 = vpop.f32.mrb[42].mxu1  ;;  %2842 = vmatmul.mubr.f32.vlgmr.msra.gmra.mrb[112].mxu1 %v15717_v60 }
 0x291   :  { %20437 = vmatpush1.bf16.msra.mxu1 %v21899_v54  ;;  %v1255_v3 = vpop.f32.mrb[43].mxu1  ;;  %17779 = vmatmul.mubr.msk.f32.vlgmr.msra.gmra.mrb[42].mxu0 %vm643_vm11, %v1253_v62  ;;  %v15755_v62 = vld [vmem:[%s26698_s2 + $0x4b0] sm:$0xff] }
 0x292   :  { %20438 = vmatprep.subr.bf16.mxu1 %v21659_v0  ;;  %15732 = vmatprep.mubr.msk.f32.mxu1 %vm383_vm2, %v15720_v61 }
 0x293   :  { %17781 = vmatprep.mubr.msk.f32.mxu0 %vm21660_vm0, %v21661_v4  ;;  %17800 = vmatpush3.msra.mxu0 %v1552_v1  ;;  %v15758_v1 = vld [vmem:[%s26698_s2 + $0x4c8] sm:$0xff] }
 0x294   :  { %v1258_v7 = vpop.f32.mrb[44].mxu1  ;;  %2847 = vmatmul.mubr.f32.gmra.mrb[114].mxu1 %v15719_v5  ;;  %17822 = vmatprep.subr.mxu0 %v21661_v4 }
 0x295   :  { %20440 = vmatpush1.bf16.msra.mxu1 %v21905_v2  ;;  %v1260_v8 = vpop.f32.mrb[45].mxu1  ;;  %17782 = vmatmul.mubr.msk.f32.gmra.mrb[44].mxu0 %vm643_vm11, %v1258_v7  ;;  %v15774_v7 = vld [vmem:[%s26698_s2 + $0x4d8] sm:$0xff] }
 0x296   :  { %20441 = vmatprep.subr.bf16.mxu1 %v21659_v0  ;;  %15733 = vmatprep.mubr.msk.f32.mxu1 %vm383_vm2, %v15722_v6  ;;  %v15757_v6 = vld [vmem:[%s26698_s2 + $0x4c0] sm:$0xff] }
 0x297   :  { %17784 = vmatprep.mubr.msk.f32.mxu0 %vm21660_vm0, %v21661_v4 }
 0x298   :  { %v1263_v12 = vpop.f32.mrb[46].mxu1  ;;  %2852 = vmatmul.mubr.f32.gmra.mrb[116].mxu1 %v15721_v9 }
 0x299   :  { %20443 = vmatpush1.bf16.msra.mxu1 %v21911_v14  ;;  %v1265_v15 = vpop.f32.mrb[47].mxu1  ;;  %17785 = vmatmul.mubr.msk.f32.gmra.mrb[46].mxu0 %vm643_vm11, %v1263_v12 }
 0x29a   :  { %20444 = vmatprep.subr.bf16.mxu1 %v21659_v0  ;;  %15734 = vmatprep.mubr.msk.f32.mxu1 %vm383_vm2, %v15724_v10  ;;  %v15773_v10 = vld [vmem:[%s26698_s2 + $0x4d0] sm:$0xff] }
 0x29b   :  { %17787 = vmatprep.mubr.msk.f32.mxu0 %vm21660_vm0, %v21661_v4 }
 0x29c   :  { %v1268_v19 = vpop.f32.mrb[48].mxu1  ;;  %2857 = vmatmul.mubr.f32.gmra.mrb[118].mxu1 %v15723_v16  ;;  %v15776_v16 = vld [vmem:[%s26698_s2 + $0x4e8] sm:$0xff] }
 0x29d   :  { %20446 = vmatpush1.bf16.msra.mxu1 %v21917_v25  ;;  %v1270_v20 = vpop.f32.mrb[49].mxu1  ;;  %17788 = vmatmul.mubr.msk.f32.gmra.mrb[48].mxu0 %vm643_vm11, %v1268_v19  ;;  %v15775_v19 = vld [vmem:[%s26698_s2 + $0x4e0] sm:$0xff] }
 0x29e   :  { %20447 = vmatprep.subr.bf16.mxu1 %v21659_v0  ;;  %15735 = vmatprep.mubr.msk.f32.mxu1 %vm383_vm2, %v15726_v18 }
 0x29f   :  { %17790 = vmatprep.mubr.msk.f32.mxu0 %vm21660_vm0, %v21661_v4 }
 0x2a0   :  { %v1273_v11 = vpop.f32.mrb[50].mxu1  ;;  %2862 = vmatmul.mubr.f32.gmra.mrb[120].mxu1 %v15725_v22  ;;  %v15778_v22 = vld [vmem:[%s26698_s2 + $0x4f8] sm:$0xff] }
 0x2a1   :  { %20449 = vmatpush1.bf16.msra.mxu1 %v21923_v39  ;;  %v1275_v17 = vpop.f32.mrb[51].mxu1  ;;  %17791 = vmatmul.mubr.msk.f32.gmra.mrb[50].mxu0 %vm643_vm11, %v1273_v11  ;;  %v15777_v11 = vld [vmem:[%s26698_s2 + $0x4f0] sm:$0xff] }
 0x2a2   :  { %20450 = vmatprep.subr.bf16.mxu1 %v21659_v0  ;;  %15736 = vmatprep.mubr.msk.f32.mxu1 %vm383_vm2, %v15728_v23 }
 0x2a3   :  { %17793 = vmatprep.mubr.msk.f32.mxu0 %vm21660_vm0, %v21661_v4 }
 0x2a4   :  { %v1278_v28 = vpop.f32.mrb[52].mxu1  ;;  %2867 = vmatmul.mubr.f32.gmra.mrb[122].mxu1 %v15727_v21  ;;  %v15780_v21 = vld [vmem:[%s26698_s2 + $0x508] sm:$0xff] }
 0x2a5   :  { %20452 = vmatpush1.bf16.msra.mxu1 %v21929_v51  ;;  %v1280_v27 = vpop.f32.mrb[53].mxu1  ;;  %17794 = vmatmul.mubr.msk.f32.gmra.mrb[52].mxu0 %vm643_vm11, %v1278_v28  ;;  %v15779_v28 = vld [vmem:[%s26698_s2 + $0x500] sm:$0xff] }
 0x2a6   :  { %20453 = vmatprep.subr.bf16.mxu1 %v21659_v0  ;;  %15737 = vmatprep.mubr.msk.f32.mxu1 %vm383_vm2, %v15730_v24 }
 0x2a7   :  { %17796 = vmatprep.mubr.msk.f32.mxu0 %vm21660_vm0, %v21661_v4 }
 0x2a8   :  { %v1283_v32 = vpop.f32.mrb[54].mxu1  ;;  %2872 = vmatmul.mubr.f32.gmra.mrb[124].mxu1 %v15729_v29  ;;  %v15782_v29 = vld [vmem:[%s26698_s2 + $0x518] sm:$0xff] }
 0x2a9   :  { %20455 = vmatpush1.bf16.msra.mxu1 %v21935_v63  ;;  %v1285_v31 = vpop.f32.mrb[55].mxu1  ;;  %17797 = vmatmul.mubr.msk.f32.gmra.mrb[54].mxu0 %vm643_vm11, %v1283_v32  ;;  %v15781_v32 = vld [vmem:[%s26698_s2 + $0x510] sm:$0xff] }
 0x2aa   :  { %20456 = vmatprep.subr.bf16.mxu1 %v21659_v0  ;;  %15759 = vmatprep.mubr.msk.f32.mxu1 %vm383_vm2, %v15746_v30 }
 0x2ab   :  { %17801 = vmatprep.mubr.msk.f32.mxu0 %vm21660_vm0, %v21661_v4 }
 0x2ad   :  { %20458 = vmatpush1.bf16.msra.mxu1 %v21941_v13 }
 0x2ae   :  { %20459 = vmatprep.subr.bf16.mxu1 %v21659_v0 }
 0x2b1   :  { %20461 = vmatpush1.bf16.msra.mxu1 %v21947_v26 }
 0x2b2   :  { %20462 = vmatprep.subr.bf16.mxu1 %v21659_v0 }
 0x2b5   :  { %20464 = vmatpush1.bf16.msra.mxu1 %v21953_v42 }
 0x2b6   :  { %3082 = vmatprep.subr.mxu1 %v21661_v4 }
 0x2b9   :  { %3083 = vmatpush1.msra.mxu1 %v21960_v45 }
 0x2ba   :  { %20465 = vmatprep.subr.bf16.mxu1 %v21659_v0  ;;  %v1518_v41 = vpop.f32.mrb[56].mxu1  ;;  %3107 = vmatmul.mubr.f32.vlgmr.msra.gmra.mrb[126].mxu1 %v15745_v33  ;;  %v15784_v33 = vld [vmem:[%s26698_s2 + $0x528] sm:$0xff] }
 0x2bb   :  { %20467 = vmatpush1.bf16.msra.mxu1 %v21899_v54  ;;  %v1520_v43 = vpop.f32.mrb[57].mxu1  ;;  %17802 = vmatmul.mubr.msk.f32.vlgmr.msra.gmra.mrb[42].mxu0 %vm643_vm11, %v1518_v41  ;;  %v15783_v41 = vld [vmem:[%s26698_s2 + $0x520] sm:$0xff] }
 0x2bc   :  { %20468 = vmatprep.subr.bf16.mxu1 %v21659_v0  ;;  %15760 = vmatprep.mubr.msk.f32.mxu1 %vm383_vm2, %v15748_v34  ;;  %v15786_v43 = vld [vmem:[%s26698_s2 + $0x538] sm:$0xff] }
 0x2bd   :  { %17804 = vmatprep.mubr.msk.f32.mxu0 %vm21660_vm0, %v21661_v4  ;;  %17823 = vmatpush3.msra.mxu0 %v1817_v35 }
 0x2be   :  { %v1523_v46 = vpop.f32.mrb[58].mxu1  ;;  %3112 = vmatmul.mubr.f32.gmra.mrb[128].mxu1 %v15747_v44  ;;  %20315 = vmatprep.subr.bf16.mxu0 %v21659_v0 }
 0x2bf   :  { %20470 = vmatpush1.bf16.msra.mxu1 %v21905_v2  ;;  %v1525_v47 = vpop.f32.mrb[59].mxu1  ;;  %17805 = vmatmul.mubr.msk.f32.gmra.mrb[44].mxu0 %vm643_vm11, %v1523_v46 }
 0x2c0   :  { %20471 = vmatprep.subr.bf16.mxu1 %v21659_v0  ;;  %15761 = vmatprep.mubr.msk.f32.mxu1 %vm383_vm2, %v15750_v40  ;;  %v15785_v40 = vld [vmem:[%s26698_s2 + $0x530] sm:$0xff]  ;;  %v15634_v47 = vld [vmem:[%s26698_s2 + $0x2a8] sm:$0xff] }
 0x2c1   :  { %17807 = vmatprep.mubr.msk.f32.mxu0 %vm21660_vm0, %v21661_v4 }
 0x2c2   :  { %v1528_v50 = vpop.f32.mrb[60].mxu1  ;;  %3117 = vmatmul.mubr.f32.gmra.mrb[130].mxu1 %v15749_v48  ;;  %v15830_v48 = vld [vmem:[%s26698_s2 + $0x5b8] sm:$0xff] }
 0x2c3   :  { %20473 = vmatpush1.bf16.msra.mxu1 %v21911_v14  ;;  %v1530_v52 = vpop.f32.mrb[61].mxu1  ;;  %17808 = vmatmul.mubr.msk.f32.gmra.mrb[46].mxu0 %vm643_vm11, %v1528_v50  ;;  %v15829_v50 = vld [vmem:[%s26698_s2 + $0x5b0] sm:$0xff] }
 0x2c4   :  { %20474 = vmatprep.subr.bf16.mxu1 %v21659_v0  ;;  %15762 = vmatprep.mubr.msk.f32.mxu1 %vm383_vm2, %v15752_v49  ;;  %v15633_v49 = vld [vmem:[%s26698_s2 + $0x2a0] sm:$0xff]  ;;  %v15636_v52 = vld [vmem:[%s26698_s2 + $0x2b8] sm:$0xff] }
 0x2c5   :  { %17810 = vmatprep.mubr.msk.f32.mxu0 %vm21660_vm0, %v21661_v4 }
 0x2c6   :  { %v1533_v56 = vpop.f32.mrb[62].mxu1  ;;  %3122 = vmatmul.mubr.f32.gmra.mrb[132].mxu1 %v15751_v53  ;;  %v15832_v53 = vld [vmem:[%s26698_s2 + $0x5c8] sm:$0xff] }
 0x2c7   :  { %20476 = vmatpush1.bf16.msra.mxu1 %v21917_v25  ;;  %v1535_v57 = vpop.f32.mrb[63].mxu1  ;;  %17811 = vmatmul.mubr.msk.f32.gmra.mrb[48].mxu0 %vm643_vm11, %v1533_v56 }
 0x2c8   :  { %20477 = vmatprep.subr.bf16.mxu1 %v21659_v0  ;;  %15763 = vmatprep.mubr.msk.f32.mxu1 %vm383_vm2, %v15754_v55  ;;  %v15635_v57 = vld [vmem:[%s26698_s2 + $0x2b0] sm:$0xff] }
 0x2c9   :  { %17813 = vmatprep.mubr.msk.f32.mxu0 %vm21660_vm0, %v21661_v4 }
 0x2ca   :  { %v1538_v60 = vpop.f32.mrb[64].mxu1  ;;  %3127 = vmatmul.mubr.f32.gmra.mrb[134].mxu1 %v15753_v58  ;;  %v15831_v58 = vld [vmem:[%s26698_s2 + $0x5c0] sm:$0xff] }
 0x2cb   :  { %20479 = vmatpush1.bf16.msra.mxu1 %v21923_v39  ;;  %v1540_v61 = vpop.f32.mrb[65].mxu1  ;;  %17814 = vmatmul.mubr.msk.f32.gmra.mrb[50].mxu0 %vm643_vm11, %v1538_v60  ;;  %v15834_v60 = vld [vmem:[%s26698_s2 + $0x5d8] sm:$0xff] }
 0x2cc   :  { %20480 = vmatprep.subr.bf16.mxu1 %v21659_v0  ;;  %15764 = vmatprep.mubr.msk.f32.mxu1 %vm383_vm2, %v15756_v59  ;;  %v15638_v59 = vld [vmem:[%s26698_s2 + $0x2c8] sm:$0xff] }
 0x2cd   :  { %17816 = vmatprep.mubr.msk.f32.mxu0 %vm21660_vm0, %v21661_v4 }
 0x2ce   :  { %v1543_v3 = vpop.f32.mrb[66].mxu1  ;;  %3132 = vmatmul.mubr.f32.gmra.mrb[136].mxu1 %v15755_v62  ;;  %v2082_v62 = vld [vmem:[%s26700_s3 + $0x30] sm:$0xff] }
 0x2cf   :  { %20482 = vmatpush1.bf16.msra.mxu1 %v21929_v51  ;;  %v1545_v5 = vpop.f32.mrb[67].mxu1  ;;  %17817 = vmatmul.mubr.msk.f32.gmra.mrb[52].mxu0 %vm643_vm11, %v1543_v3  ;;  %v15637_v3 = vld [vmem:[%s26698_s2 + $0x2c0] sm:$0xff] }
 0x2d0   :  { %20483 = vmatprep.subr.bf16.mxu1 %v21659_v0  ;;  %15765 = vmatprep.mubr.msk.f32.mxu1 %vm383_vm2, %v15758_v1  ;;  %v15833_v5 = vld [vmem:[%s26698_s2 + $0x5d0] sm:$0xff] }
 0x2d1   :  { %17819 = vmatprep.mubr.msk.f32.mxu0 %vm21660_vm0, %v21661_v4 }
 0x2d2   :  { %v1548_v8 = vpop.f32.mrb[68].mxu1  ;;  %3137 = vmatmul.mubr.f32.gmra.mrb[138].mxu1 %v15757_v6  ;;  %v15640_v6 = vld [vmem:[%s26698_s2 + $0x2d8] sm:$0xff] }
 0x2d3   :  { %20485 = vmatpush1.bf16.msra.mxu1 %v21935_v63  ;;  %v1550_v9 = vpop.f32.mrb[69].mxu1  ;;  %17820 = vmatmul.mubr.msk.f32.gmra.mrb[54].mxu0 %vm643_vm11, %v1548_v8 }
 0x2d4   :  { %20486 = vmatprep.subr.bf16.mxu1 %v21659_v0  ;;  %15787 = vmatprep.mubr.msk.f32.mxu1 %vm383_vm2, %v15774_v7  ;;  %v15836_v7 = vld [vmem:[%s26698_s2 + $0x5e8] sm:$0xff] }
 0x2d5   :  { %17824 = vmatprep.mubr.msk.f32.mxu0 %vm21660_vm0, %v21661_v4 }
 0x2d7   :  { %20488 = vmatpush1.bf16.msra.mxu1 %v21941_v13 }
 0x2d8   :  { %20489 = vmatprep.subr.bf16.mxu1 %v21659_v0 }
 0x2db   :  { %20491 = vmatpush1.bf16.msra.mxu1 %v21947_v26 }
 0x2dc   :  { %20492 = vmatprep.subr.bf16.mxu1 %v21659_v0 }
 0x2df   :  { %20494 = vmatpush1.bf16.msra.mxu1 %v21953_v42 }
 0x2e0   :  { %3347 = vmatprep.subr.mxu1 %v21661_v4 }
 0x2e3   :  { %3348 = vmatpush1.msra.mxu1 %v21960_v45 }
 0x2e4   :  { %20525 = vmatprep.subr.bf16.mxu1 %v21659_v0  ;;  %v1783_v12 = vpop.f32.mrb[70].mxu1  ;;  %3372 = vmatmul.mubr.f32.vlgmr.msra.gmra.mrb[140].mxu1 %v15773_v10  ;;  %v15639_v10 = vld [vmem:[%s26698_s2 + $0x2d0] sm:$0xff] }
 0x2e5   :  { %20527 = vmatpush1.bf16.msra.mxu1 %v21899_v54  ;;  %v1785_v15 = vpop.f32.mrb[71].mxu1  ;;  %17825 = vmatmul.mubr.msk.f32.vlgmr.msra.gmra.mrb[42].mxu0 %vm643_vm11, %v1783_v12  ;;  %v15835_v12 = vld [vmem:[%s26698_s2 + $0x5e0] sm:$0xff] }
 0x2e6   :  { %20317 = vmatpush1.bf16.msra.mxu0 %v21899_v54  ;;  %20528 = vmatprep.subr.bf16.mxu1 %v21659_v0  ;;  %v15642_v15 = vld [vmem:[%s26698_s2 + $0x2e8] sm:$0xff] }
 0x2e7   :  { %20318 = vmatprep.subr.bf16.mxu0 %v21659_v0  ;;  %17827 = vmatprep.mubr.msk.f32.mxu0 %vm21660_vm0, %v21661_v4 }
 0x2e8   :  { %v1788_v18 = vpop.f32.mrb[72].mxu1  ;;  %15788 = vmatprep.mubr.msk.f32.mxu1 %vm383_vm2, %v15776_v16  ;;  %v15838_v16 = vld [vmem:[%s26698_s2 + $0x5f8] sm:$0xff] }
 0x2e9   :  { %20530 = vmatpush1.bf16.msra.mxu1 %v21905_v2  ;;  %v1790_v20 = vpop.f32.mrb[73].mxu1  ;;  %17828 = vmatmul.mubr.msk.f32.gmra.mrb[44].mxu0 %vm643_vm11, %v1788_v18 }
 0x2ea   :  { %20320 = vmatpush1.bf16.msra.mxu0 %v21905_v2  ;;  %20531 = vmatprep.subr.bf16.mxu1 %v21659_v0  ;;  %v15641_v20 = vld [vmem:[%s26698_s2 + $0x2e0] sm:$0xff] }
 0x2eb   :  { %20321 = vmatprep.subr.bf16.mxu0 %v21659_v0  ;;  %3377 = vmatmul.mubr.f32.gmra.mrb[142].mxu1 %v15775_v19 }
 0x2ec   :  { %v1793_v23 = vpop.f32.mrb[74].mxu1  ;;  %17830 = vmatprep.mubr.msk.f32.mxu0 %vm21660_vm0, %v21661_v4  ;;  %15789 = vmatprep.mubr.msk.f32.mxu1 %vm383_vm2, %v15778_v22  ;;  %v15837_v22 = vld [vmem:[%s26698_s2 + $0x5f0] sm:$0xff] }
 0x2ed   :  { %20533 = vmatpush1.bf16.msra.mxu1 %v21911_v14  ;;  %v1795_v17 = vpop.f32.mrb[75].mxu1  ;;  %17831 = vmatmul.mubr.msk.f32.gmra.mrb[46].mxu0 %vm643_vm11, %v1793_v23  ;;  %v15644_v23 = vld [vmem:[%s26698_s2 + $0x2f8] sm:$0xff] }
 0x2ee   :  { %20323 = vmatpush1.bf16.msra.mxu0 %v21911_v14  ;;  %20534 = vmatprep.subr.bf16.mxu1 %v21659_v0  ;;  %v15643_v17 = vld [vmem:[%s26698_s2 + $0x2f0] sm:$0xff] }
 0x2ef   :  { %20324 = vmatprep.subr.bf16.mxu0 %v21659_v0  ;;  %3382 = vmatmul.mubr.f32.gmra.mrb[144].mxu1 %v15777_v11  ;;  %v15840_v11 = vld [vmem:[%s26698_s2 + $0x608] sm:$0xff] }
 0x2f0   :  { %v1798_v24 = vpop.f32.mrb[76].mxu1  ;;  %17833 = vmatprep.mubr.msk.f32.mxu0 %vm21660_vm0, %v21661_v4  ;;  %15790 = vmatprep.mubr.msk.f32.mxu1 %vm383_vm2, %v15780_v21  ;;  %v15839_v21 = vld [vmem:[%s26698_s2 + $0x600] sm:$0xff] }
 0x2f1   :  { %20536 = vmatpush1.bf16.msra.mxu1 %v21917_v25  ;;  %v1800_v27 = vpop.f32.mrb[77].mxu1  ;;  %17834 = vmatmul.mubr.msk.f32.gmra.mrb[48].mxu0 %vm643_vm11, %v1798_v24  ;;  %v15646_v24 = vld [vmem:[%s26698_s2 + $0x308] sm:$0xff] }
 0x2f2   :  { %20326 = vmatpush1.bf16.msra.mxu0 %v21917_v25  ;;  %20537 = vmatprep.subr.bf16.mxu1 %v21659_v0  ;;  %v15645_v27 = vld [vmem:[%s26698_s2 + $0x300] sm:$0xff] }
 0x2f3   :  { %20327 = vmatprep.subr.bf16.mxu0 %v21659_v0  ;;  %3387 = vmatmul.mubr.f32.gmra.mrb[146].mxu1 %v15779_v28  ;;  %v15842_v28 = vld [vmem:[%s26698_s2 + $0x618] sm:$0xff] }
 0x2f4   :  { %v1803_v30 = vpop.f32.mrb[78].mxu1  ;;  %17836 = vmatprep.mubr.msk.f32.mxu0 %vm21660_vm0, %v21661_v4  ;;  %15791 = vmatprep.mubr.msk.f32.mxu1 %vm383_vm2, %v15782_v29  ;;  %v15841_v29 = vld [vmem:[%s26698_s2 + $0x610] sm:$0xff] }
 0x2f5   :  { %20539 = vmatpush1.bf16.msra.mxu1 %v21923_v39  ;;  %v1805_v31 = vpop.f32.mrb[79].mxu1  ;;  %17837 = vmatmul.mubr.msk.f32.gmra.mrb[50].mxu0 %vm643_vm11, %v1803_v30  ;;  %v15858_v30 = vld [vmem:[%s26698_s2 + $0x628] sm:$0xff] }
 0x2f6   :  { %20329 = vmatpush1.bf16.msra.mxu0 %v21923_v39  ;;  %20540 = vmatprep.subr.bf16.mxu1 %v21659_v0 }
 0x2f7   :  { %20330 = vmatprep.subr.bf16.mxu0 %v21659_v0  ;;  %3392 = vmatmul.mubr.f32.gmra.mrb[148].mxu1 %v15781_v32  ;;  %v15857_v32 = vld [vmem:[%s26698_s2 + $0x620] sm:$0xff] }
 0x2f8   :  { %v1808_v34 = vpop.f32.mrb[80].mxu1  ;;  %17839 = vmatprep.mubr.msk.f32.mxu0 %vm21660_vm0, %v21661_v4  ;;  %15792 = vmatprep.mubr.msk.f32.mxu1 %vm383_vm2, %v15784_v33 }
 0x2f9   :  { %20542 = vmatpush1.bf16.msra.mxu1 %v21929_v51  ;;  %v1810_v35 = vpop.f32.mrb[81].mxu1  ;;  %17840 = vmatmul.mubr.msk.f32.gmra.mrb[52].mxu0 %vm643_vm11, %v1808_v34 }
 0x2fa   :  { %20332 = vmatpush1.bf16.msra.mxu0 %v21929_v51  ;;  %20543 = vmatprep.subr.bf16.mxu1 %v21659_v0 }
 0x2fb   :  { %20333 = vmatprep.subr.bf16.mxu0 %v21659_v0  ;;  %3397 = vmatmul.mubr.f32.gmra.mrb[150].mxu1 %v15783_v41 }
 0x2fc   :  { %v1813_v44 = vpop.f32.mrb[82].mxu1  ;;  %17842 = vmatprep.mubr.msk.f32.mxu0 %vm21660_vm0, %v21661_v4  ;;  %15793 = vmatprep.mubr.msk.f32.mxu1 %vm383_vm2, %v15786_v43 }
 0x2fd   :  { %20545 = vmatpush1.bf16.msra.mxu1 %v21935_v63  ;;  %v1815_v46 = vpop.f32.mrb[83].mxu1  ;;  %17843 = vmatmul.mubr.msk.f32.gmra.mrb[54].mxu0 %vm643_vm11, %v1813_v44 }
 0x2fe   :  { %20335 = vmatpush1.bf16.msra.mxu0 %v21935_v63  ;;  %20546 = vmatprep.subr.bf16.mxu1 %v21659_v0 }
 0x2ff   :  { %20336 = vmatprep.subr.bf16.mxu0 %v21659_v0  ;;  %3402 = vmatmul.mubr.f32.gmra.mrb[152].mxu1 %v15785_v40 }
 0x300   :  { %15647 = vmatprep.mubr.msk.f32.mxu0 %vm383_vm2, %v15634_v47  ;;  %15843 = vmatprep.mubr.msk.f32.mxu1 %vm383_vm2, %v15830_v48 }
 0x301   :  { %20548 = vmatpush1.bf16.msra.mxu1 %v21941_v13 }
 0x302   :  { %20338 = vmatpush1.bf16.msra.mxu0 %v21941_v13  ;;  %20549 = vmatprep.subr.bf16.mxu1 %v21659_v0 }
 0x303   :  { %20339 = vmatprep.subr.bf16.mxu0 %v21659_v0 }
 0x305   :  { %20551 = vmatpush1.bf16.msra.mxu1 %v21947_v26 }
 0x306   :  { %20341 = vmatpush1.bf16.msra.mxu0 %v21947_v26  ;;  %20552 = vmatprep.subr.bf16.mxu1 %v21659_v0 }
 0x307   :  { %20342 = vmatprep.subr.bf16.mxu0 %v21659_v0 }
 0x309   :  { %20554 = vmatpush1.bf16.msra.mxu1 %v21953_v42 }
 0x30a   :  { %20344 = vmatpush1.bf16.msra.mxu0 %v21953_v42  ;;  %3877 = vmatprep.subr.mxu1 %v21661_v4 }
 0x30b   :  { %2022 = vmatprep.subr.mxu0 %v21661_v4 }
 0x30d   :  { %3878 = vmatpush1.msra.mxu1 %v21960_v45 }
 0x30e   :  { %2023 = vmatpush1.msra.mxu0 %v21960_v45  ;;  %20555 = vmatprep.subr.bf16.mxu1 %v21659_v0  ;;  %v22948_v55 = vpop.f32.mrb[84].mxu1 }
 0x30f   :  { %2047 = vmatmul.mubr.f32.vlgmr.msra.gmra.mrb[56].mxu0 %v15633_v49  ;;  %3902 = vmatmul.mubr.f32.vlgmr.msra.gmra.mrb[154].mxu1 %v15829_v50  ;;  %v2315_v56 = vpop.f32.mrb[85].mxu1 }
 0x310   :  { %20557 = vmatpush1.bf16.msra.mxu1 %v21899_v54  ;;  %15648 = vmatprep.mubr.msk.f32.mxu0 %vm383_vm2, %v15636_v52 }
 0x311   :  { %20558 = vmatprep.subr.bf16.mxu1 %v21659_v0  ;;  %15844 = vmatprep.mubr.msk.f32.mxu1 %vm383_vm2, %v15832_v53 }
 0x312   :  { %17845 = vmatprep.subr.mxu0 %v21661_v4  ;;  %v22967_v61 = vpop.f32.mrb[86].mxu1 }
 0x313   :  { %2052 = vmatmul.mubr.f32.gmra.mrb[58].mxu0 %v15635_v57  ;;  %3907 = vmatmul.mubr.f32.gmra.mrb[156].mxu1 %v15831_v58  ;;  %v2320_v1 = vpop.f32.mrb[87].mxu1 }
 0x314   :  { %20560 = vmatpush1.bf16.msra.mxu1 %v21905_v2  ;;  %15649 = vmatprep.mubr.msk.f32.mxu0 %vm383_vm2, %v15638_v59 }
 0x315   :  { %20561 = vmatprep.subr.bf16.mxu1 %v21659_v0  ;;  %15845 = vmatprep.mubr.msk.f32.mxu1 %vm383_vm2, %v15834_v60 }
 0x316   :  { %17846 = vmatpush3.msra.mxu0 %v2082_v62  ;;  %v22988_v8 = vpop.f32.mrb[88].mxu1 }
 0x317   :  { %2057 = vmatmul.mubr.f32.gmra.mrb[60].mxu0 %v15637_v3  ;;  %3912 = vmatmul.mubr.f32.gmra.mrb[158].mxu1 %v15833_v5  ;;  %v2325_v9 = vpop.f32.mrb[89].mxu1 }
 0x318   :  { %20563 = vmatpush1.bf16.msra.mxu1 %v21911_v14  ;;  %15650 = vmatprep.mubr.msk.f32.mxu0 %vm383_vm2, %v15640_v6 }
 0x319   :  { %20564 = vmatprep.subr.bf16.mxu1 %v21659_v0  ;;  %15846 = vmatprep.mubr.msk.f32.mxu1 %vm383_vm2, %v15836_v7 }
 0x31a   :  { %v23006_v18 = vpop.f32.mrb[90].mxu1  ;;  %17868 = vmatprep.subr.mxu0 %v21661_v4 }
 0x31b   :  { %2062 = vmatmul.mubr.f32.gmra.mrb[62].mxu0 %v15639_v10  ;;  %3917 = vmatmul.mubr.f32.gmra.mrb[160].mxu1 %v15835_v12  ;;  %v2330_v19 = vpop.f32.mrb[91].mxu1 }
 0x31c   :  { %20566 = vmatpush1.bf16.msra.mxu1 %v21917_v25  ;;  %15651 = vmatprep.mubr.msk.f32.mxu0 %vm383_vm2, %v15642_v15 }
 0x31d   :  { %20567 = vmatprep.subr.bf16.mxu1 %v21659_v0  ;;  %15847 = vmatprep.mubr.msk.f32.mxu1 %vm383_vm2, %v15838_v16 }
 0x31e   :  { %v23091_v31 = vpop.f32.mrb[92].mxu1 }
 0x31f   :  { %2067 = vmatmul.mubr.f32.gmra.mrb[64].mxu0 %v15641_v20  ;;  %3922 = vmatmul.mubr.f32.gmra.mrb[162].mxu1 %v15837_v22  ;;  %v2335_v33 = vpop.f32.mrb[93].mxu1 }
 0x320   :  { %20569 = vmatpush1.bf16.msra.mxu1 %v21923_v39  ;;  %15652 = vmatprep.mubr.msk.f32.mxu0 %vm383_vm2, %v15644_v23  ;;  %v2347_v33 = vld [vmem:[%s26700_s3 + $0x38] sm:$0xff] }
 0x321   :  { %20570 = vmatprep.subr.bf16.mxu1 %v21659_v0  ;;  %15848 = vmatprep.mubr.msk.f32.mxu1 %vm383_vm2, %v15840_v11 }
 0x322   :  { %v23094_v34 = vpop.f32.mrb[94].mxu1 }
 0x323   :  { %2072 = vmatmul.mubr.f32.gmra.mrb[66].mxu0 %v15643_v17  ;;  %3927 = vmatmul.mubr.f32.gmra.mrb[164].mxu1 %v15839_v21  ;;  %v2340_v41 = vpop.f32.mrb[95].mxu1 }
 0x324   :  { %20572 = vmatpush1.bf16.msra.mxu1 %v21929_v51  ;;  %15653 = vmatprep.mubr.msk.f32.mxu0 %vm383_vm2, %v15646_v24 }
 0x325   :  { %20573 = vmatprep.subr.bf16.mxu1 %v21659_v0  ;;  %15849 = vmatprep.mubr.msk.f32.mxu1 %vm383_vm2, %v15842_v28 }
 0x326   :  { %v23096_v35 = vpop.f32.mrb[96].mxu1 }
 0x327   :  { %2077 = vmatmul.mubr.f32.gmra.mrb[68].mxu0 %v15645_v27  ;;  %3932 = vmatmul.mubr.f32.gmra.mrb[166].mxu1 %v15841_v29  ;;  %v2345_v43 = vpop.f32.mrb[97].mxu1 }
 0x328   :  { %20575 = vmatpush1.bf16.msra.mxu1 %v21935_v63  ;;  %15871 = vmatprep.mubr.msk.f32.mxu1 %vm383_vm2, %v15858_v30 }
 0x329   :  { %20576 = vmatprep.subr.bf16.mxu1 %v21659_v0  ;;  %17847 = vmatprep.mubr.msk.f32.mxu0 %vm21660_vm0, %v21661_v4 }
 0x32c   :  { %20578 = vmatpush1.bf16.msra.mxu1 %v21941_v13 }
 0x32d   :  { %20579 = vmatprep.subr.bf16.mxu1 %v21659_v0 }
 0x330   :  { %20581 = vmatpush1.bf16.msra.mxu1 %v21947_v26 }
 0x331   :  { %20582 = vmatprep.subr.bf16.mxu1 %v21659_v0 }
 0x334   :  { %20584 = vmatpush1.bf16.msra.mxu1 %v21953_v42 }
 0x335   :  { %4142 = vmatprep.subr.mxu1 %v21661_v4 }
 0x338   :  { %4143 = vmatpush1.msra.mxu1 %v21960_v45 }
 0x339   :  { %20585 = vmatprep.subr.bf16.mxu1 %v21659_v0  ;;  %4167 = vmatmul.mubr.f32.vlgmr.msra.gmra.mrb[168].mxu1 %v15857_v32  ;;  %v23098_v44 = vpop.f32.mrb[98].mxu1 }
 0x33a   :  { %20587 = vmatpush1.bf16.msra.mxu1 %v21899_v54  ;;  %v2580_v40 = vpop.f32.mrb[99].mxu1 }
 0x33b   :  { %20588 = vmatprep.subr.bf16.mxu1 %v21659_v0 }
 0x33d   :  { %v23100_v46 = vpop.f32.mrb[100].mxu1 }
 0x33e   :  { %20590 = vmatpush1.bf16.msra.mxu1 %v21905_v2  ;;  %v2585_v47 = vpop.f32.mrb[101].mxu1 }
 0x33f   :  { %20591 = vmatprep.subr.bf16.mxu1 %v21659_v0 }
 0x341   :  { %v23102_v48 = vpop.f32.mrb[102].mxu1 }
 0x342   :  { %20593 = vmatpush1.bf16.msra.mxu1 %v21911_v14  ;;  %v2590_v49 = vpop.f32.mrb[103].mxu1 }
 0x343   :  { %20594 = vmatprep.subr.bf16.mxu1 %v21659_v0 }
 0x345   :  { %v23104_v50 = vpop.f32.mrb[104].mxu1 }
 0x346   :  { %20596 = vmatpush1.bf16.msra.mxu1 %v21917_v25  ;;  %v2595_v52 = vpop.f32.mrb[105].mxu1 }
 0x347   :  { %20597 = vmatprep.subr.bf16.mxu1 %v21659_v0 }
 0x349   :  { %v23106_v53 = vpop.f32.mrb[106].mxu1 }
 0x34a   :  { %20599 = vmatpush1.bf16.msra.mxu1 %v21923_v39  ;;  %v2600_v56 = vpop.f32.mrb[107].mxu1 }
 0x34b   :  { %20600 = vmatprep.subr.bf16.mxu1 %v21659_v0 }
 0x34d   :  { %v23108_v57 = vpop.f32.mrb[108].mxu1 }
 0x34e   :  { %20602 = vmatpush1.bf16.msra.mxu1 %v21929_v51  ;;  %v2605_v58 = vpop.f32.mrb[109].mxu1 }
 0x34f   :  { %20603 = vmatprep.subr.bf16.mxu1 %v21659_v0 }
 0x351   :  { %v23110_v59 = vpop.f32.mrb[110].mxu1 }
 0x352   :  { %20605 = vmatpush1.bf16.msra.mxu1 %v21935_v63  ;;  %v2610_v60 = vpop.f32.mrb[111].mxu1 }
 0x353   :  { %20606 = vmatprep.subr.bf16.mxu1 %v21659_v0 }
 0x356   :  { %20608 = vmatpush1.bf16.msra.mxu1 %v21941_v13 }
 0x357   :  { %20609 = vmatprep.subr.bf16.mxu1 %v21659_v0 }
 0x35a   :  { %20611 = vmatpush1.bf16.msra.mxu1 %v21947_v26 }
 0x35b   :  { %20612 = vmatprep.subr.bf16.mxu1 %v21659_v0 }
 0x35e   :  { %20614 = vmatpush1.bf16.msra.mxu1 %v21953_v42 }
 0x35f   :  { %4407 = vmatprep.subr.mxu1 %v21661_v4 }
 0x362   :  { %4408 = vmatpush1.msra.mxu1 %v21960_v45 }
 0x363   :  { %20615 = vmatprep.subr.bf16.mxu1 %v21659_v0  ;;  %v23112_v62 = vpop.f32.mrb[112].mxu1 }
 0x364   :  { %v2845_v1 = vpop.f32.mrb[113].mxu1 }
 0x367   :  { %v23114_v3 = vpop.f32.mrb[114].mxu1 }
 0x368   :  { %v2850_v5 = vpop.f32.mrb[115].mxu1 }
 0x36b   :  { %v23116_v6 = vpop.f32.mrb[116].mxu1 }
 0x36c   :  { %v2855_v7 = vpop.f32.mrb[117].mxu1 }
 0x36f   :  { %v23118_v9 = vpop.f32.mrb[118].mxu1 }
 0x370   :  { %v2860_v10 = vpop.f32.mrb[119].mxu1 }
 0x373   :  { %v23120_v12 = vpop.f32.mrb[120].mxu1 }
 0x374   :  { %v2865_v15 = vpop.f32.mrb[121].mxu1 }
 0x377   :  { %v23122_v16 = vpop.f32.mrb[122].mxu1 }
 0x378   :  { %v2870_v19 = vpop.f32.mrb[123].mxu1 }
 0x37b   :  { %v23124_v20 = vpop.f32.mrb[124].mxu1 }
 0x37c   :  { %v2875_v22 = vpop.f32.mrb[125].mxu1 }
 0x38d   :  { %v23126_v23 = vpop.f32.mrb[126].mxu1 }
 0x38e   :  { %v3110_v11 = vpop.f32.mrb[127].mxu1 }
 0x391   :  { %v23128_v17 = vpop.f32.mrb[128].mxu1 }
 0x392   :  { %v3115_v21 = vpop.f32.mrb[129].mxu1 }
 0x395   :  { %v23130_v24 = vpop.f32.mrb[130].mxu1 }
 0x396   :  { %v3120_v28 = vpop.f32.mrb[131].mxu1 }
 0x399   :  { %v23132_v27 = vpop.f32.mrb[132].mxu1 }
 0x39a   :  { %v3125_v29 = vpop.f32.mrb[133].mxu1 }
 0x39d   :  { %v23134_v30 = vpop.f32.mrb[134].mxu1 }
 0x39e   :  { %v3130_v32 = vpop.f32.mrb[135].mxu1 }
 0x3a1   :  { %v23140_v40 = vpop.f32.mrb[136].mxu1 }
 0x3a2   :  { %v3135_v47 = vpop.f32.mrb[137].mxu1 }
 0x3a5   :  { %v23146_v56 = vpop.f32.mrb[138].mxu1 }
 0x3a6   :  { %v3140_v58 = vpop.f32.mrb[139].mxu1 }
 0x3b7   :  { %v23151_v5 = vpop.f32.mrb[140].mxu1 }
 0x3b8   :  { %v3375_v7 = vpop.f32.mrb[141].mxu1 }
 0x3b9   :  { %v15886_v7 = vld [vmem:[%s26698_s2 + $0x698] sm:$0xff] }
 0x3be   :  { %v23167_v32 = vpop.f32.mrb[142].mxu1 }
 0x3e2   :  { %v2048_v41 = vpop.f32.mrb[56].mxu0 }
 0x3e3   :  { %v2050_v43 = vpop.f32.mrb[57].mxu0  ;;  %17848 = vmatmul.mubr.msk.f32.vlgmr.msra.gmra.mrb[42].mxu0 %vm643_vm11, %v2048_v41  ;;  %v3380_v41 = vpop.f32.mrb[143].mxu1 }
 0x3e4   :  { %17850 = vmatprep.mubr.msk.f32.mxu0 %vm21660_vm0, %v21661_v4  ;;  %17869 = vmatpush3.msra.mxu0 %v2347_v33  ;;  %v2612_v33 = vld [vmem:[%s26700_s3 + $0x40] sm:$0xff]  ;;  %v23176_v43 = vpop.f32.mrb[144].mxu1 }
 0x3e5   :  { %17891 = vmatprep.subr.mxu0 %v21661_v4  ;;  %v3385_v47 = vpop.f32.mrb[145].mxu1 }
 0x3e6   :  { %v2053_v49 = vpop.f32.mrb[58].mxu0 }
 0x3e7   :  { %v2055_v52 = vpop.f32.mrb[59].mxu0  ;;  %17851 = vmatmul.mubr.msk.f32.gmra.mrb[44].mxu0 %vm643_vm11, %v2053_v49  ;;  %v23183_v49 = vpop.f32.mrb[146].mxu1 }
 0x3e8   :  { %17853 = vmatprep.mubr.msk.f32.mxu0 %vm21660_vm0, %v21661_v4  ;;  %v3390_v52 = vpop.f32.mrb[147].mxu1 }
 0x3ea   :  { %v2058_v60 = vpop.f32.mrb[60].mxu0 }
 0x3eb   :  { %v2060_v1 = vpop.f32.mrb[61].mxu0  ;;  %17854 = vmatmul.mubr.msk.f32.gmra.mrb[46].mxu0 %vm643_vm11, %v2058_v60 }
 0x3ec   :  { %17856 = vmatprep.mubr.msk.f32.mxu0 %vm21660_vm0, %v21661_v4 }
 0x3ee   :  { %v2063_v10 = vpop.f32.mrb[62].mxu0 }
 0x3ef   :  { %v2065_v15 = vpop.f32.mrb[63].mxu0  ;;  %17857 = vmatmul.mubr.msk.f32.gmra.mrb[48].mxu0 %vm643_vm11, %v2063_v10  ;;  %v15888_v10 = vld [vmem:[%s26698_s2 + $0x6a8] sm:$0xff] }
 0x3f0   :  { %17859 = vmatprep.mubr.msk.f32.mxu0 %vm21660_vm0, %v21661_v4  ;;  %v15890_v15 = vld [vmem:[%s26698_s2 + $0x6b8] sm:$0xff] }
 0x3f2   :  { %v2068_v19 = vpop.f32.mrb[64].mxu0 }
 0x3f3   :  { %v2070_v22 = vpop.f32.mrb[65].mxu0  ;;  %17860 = vmatmul.mubr.msk.f32.gmra.mrb[50].mxu0 %vm643_vm11, %v2068_v19  ;;  %v3407_v19 = vld [vmem:[%s26700_s3 + $0x58] sm:$0xff] }
 0x3f4   :  { %17862 = vmatprep.mubr.msk.f32.mxu0 %vm21660_vm0, %v21661_v4  ;;  %v15892_v22 = vld [vmem:[%s26698_s2 + $0x6c8] sm:$0xff] }
 0x3f6   :  { %v2073_v11 = vpop.f32.mrb[66].mxu0 }
 0x3f7   :  { %v2075_v21 = vpop.f32.mrb[67].mxu0  ;;  %17863 = vmatmul.mubr.msk.f32.gmra.mrb[52].mxu0 %vm643_vm11, %v2073_v11  ;;  %v15894_v11 = vld [vmem:[%s26698_s2 + $0x6d8] sm:$0xff] }
 0x3f8   :  { %17865 = vmatprep.mubr.msk.f32.mxu0 %vm21660_vm0, %v21661_v4  ;;  %v15896_v21 = vld [vmem:[%s26698_s2 + $0x6e8] sm:$0xff] }
 0x3fa   :  { %v2078_v28 = vpop.f32.mrb[68].mxu0 }
 0x3fb   :  { %v2080_v29 = vpop.f32.mrb[69].mxu0  ;;  %17866 = vmatmul.mubr.msk.f32.gmra.mrb[54].mxu0 %vm643_vm11, %v2078_v28  ;;  %v15898_v28 = vld [vmem:[%s26698_s2 + $0x6f8] sm:$0xff] }
 0x3fc   :  { %17870 = vmatprep.mubr.msk.f32.mxu0 %vm21660_vm0, %v21661_v4 }
 0x3ff   :  { %17871 = vmatmul.mubr.msk.f32.vlgmr.msra.gmra.mrb[42].mxu0 %vm643_vm11, %v22948_v55  ;;  %v23189_v55 = vpop.f32.mrb[148].mxu1 }
 0x400   :  { %17873 = vmatprep.mubr.msk.f32.mxu0 %vm21660_vm0, %v21661_v4  ;;  %17892 = vmatpush3.msra.mxu0 %v2612_v33  ;;  %v3395_v58 = vpop.f32.mrb[149].mxu1 }
 0x401   :  { %17914 = vmatprep.subr.mxu0 %v21661_v4 }
 0x403   :  { %17874 = vmatmul.mubr.msk.f32.gmra.mrb[44].mxu0 %vm643_vm11, %v22967_v61  ;;  %v23195_v61 = vpop.f32.mrb[150].mxu1 }
 0x404   :  { %17876 = vmatprep.mubr.msk.f32.mxu0 %vm21660_vm0, %v21661_v4  ;;  %v3400_v60 = vpop.f32.mrb[151].mxu1 }
 0x407   :  { %17877 = vmatmul.mubr.msk.f32.gmra.mrb[46].mxu0 %vm643_vm11, %v22988_v8  ;;  %v23201_v8 = vpop.f32.mrb[152].mxu1 }
 0x408   :  { %17879 = vmatprep.mubr.msk.f32.mxu0 %vm21660_vm0, %v21661_v4  ;;  %v3405_v1 = vpop.f32.mrb[153].mxu1 }
 0x40b   :  { %17880 = vmatmul.mubr.msk.f32.gmra.mrb[48].mxu0 %vm643_vm11, %v23006_v18  ;;  %v2877_v18 = vld [vmem:[%s26700_s3 + $0x48] sm:$0xff] }
 0x40c   :  { %17882 = vmatprep.mubr.msk.f32.mxu0 %vm21660_vm0, %v21661_v4 }
 0x40f   :  { %17883 = vmatmul.mubr.msk.f32.gmra.mrb[50].mxu0 %vm643_vm11, %v23091_v31  ;;  %v15860_v31 = vld [vmem:[%s26698_s2 + $0x638] sm:$0xff] }
 0x410   :  { %17885 = vmatprep.mubr.msk.f32.mxu0 %vm21660_vm0, %v21661_v4  ;;  %15872 = vmatprep.mubr.msk.f32.mxu1 %vm383_vm2, %v15860_v31 }
 0x413   :  { %17886 = vmatmul.mubr.msk.f32.gmra.mrb[52].mxu0 %vm643_vm11, %v23094_v34  ;;  %v15859_v34 = vld [vmem:[%s26698_s2 + $0x630] sm:$0xff] }
 0x414   :  { %17888 = vmatprep.mubr.msk.f32.mxu0 %vm21660_vm0, %v21661_v4  ;;  %4172 = vmatmul.mubr.f32.gmra.mrb[170].mxu1 %v15859_v34 }
 0x417   :  { %17889 = vmatmul.mubr.msk.f32.gmra.mrb[54].mxu0 %vm643_vm11, %v23096_v35  ;;  %v15862_v35 = vld [vmem:[%s26698_s2 + $0x648] sm:$0xff] }
 0x418   :  { %17893 = vmatprep.mubr.msk.f32.mxu0 %vm21660_vm0, %v21661_v4  ;;  %15873 = vmatprep.mubr.msk.f32.mxu1 %vm383_vm2, %v15862_v35 }
 0x41b   :  { %17894 = vmatmul.mubr.msk.f32.vlgmr.msra.gmra.mrb[42].mxu0 %vm643_vm11, %v23098_v44  ;;  %v15861_v44 = vld [vmem:[%s26698_s2 + $0x640] sm:$0xff] }
 0x41c   :  { %17896 = vmatprep.mubr.msk.f32.mxu0 %vm21660_vm0, %v21661_v4  ;;  %17915 = vmatpush3.msra.mxu0 %v2877_v18 }
 0x41d   :  { %17937 = vmatprep.subr.mxu0 %v21661_v4  ;;  %4177 = vmatmul.mubr.f32.gmra.mrb[172].mxu1 %v15861_v44 }
 0x41f   :  { %17897 = vmatmul.mubr.msk.f32.gmra.mrb[44].mxu0 %vm643_vm11, %v23100_v46  ;;  %v3142_v46 = vld [vmem:[%s26700_s3 + $0x50] sm:$0xff] }
 0x420   :  { %17899 = vmatprep.mubr.msk.f32.mxu0 %vm21660_vm0, %v21661_v4 }
 0x423   :  { %17900 = vmatmul.mubr.msk.f32.gmra.mrb[46].mxu0 %vm643_vm11, %v23102_v48  ;;  %v15864_v48 = vld [vmem:[%s26698_s2 + $0x658] sm:$0xff] }
 0x424   :  { %17902 = vmatprep.mubr.msk.f32.mxu0 %vm21660_vm0, %v21661_v4  ;;  %15874 = vmatprep.mubr.msk.f32.mxu1 %vm383_vm2, %v15864_v48 }
 0x427   :  { %17903 = vmatmul.mubr.msk.f32.gmra.mrb[48].mxu0 %vm643_vm11, %v23104_v50  ;;  %v15863_v50 = vld [vmem:[%s26698_s2 + $0x650] sm:$0xff] }
 0x428   :  { %17905 = vmatprep.mubr.msk.f32.mxu0 %vm21660_vm0, %v21661_v4  ;;  %4182 = vmatmul.mubr.f32.gmra.mrb[174].mxu1 %v15863_v50 }
 0x42b   :  { %17906 = vmatmul.mubr.msk.f32.gmra.mrb[50].mxu0 %vm643_vm11, %v23106_v53  ;;  %v15866_v53 = vld [vmem:[%s26698_s2 + $0x668] sm:$0xff] }
 0x42c   :  { %17908 = vmatprep.mubr.msk.f32.mxu0 %vm21660_vm0, %v21661_v4  ;;  %15875 = vmatprep.mubr.msk.f32.mxu1 %vm383_vm2, %v15866_v53 }
 0x42f   :  { %17909 = vmatmul.mubr.msk.f32.gmra.mrb[52].mxu0 %vm643_vm11, %v23108_v57  ;;  %v15865_v57 = vld [vmem:[%s26698_s2 + $0x660] sm:$0xff] }
 0x430   :  { %17911 = vmatprep.mubr.msk.f32.mxu0 %vm21660_vm0, %v21661_v4  ;;  %4187 = vmatmul.mubr.f32.gmra.mrb[176].mxu1 %v15865_v57 }
 0x433   :  { %17912 = vmatmul.mubr.msk.f32.gmra.mrb[54].mxu0 %vm643_vm11, %v23110_v59  ;;  %v15868_v59 = vld [vmem:[%s26698_s2 + $0x678] sm:$0xff] }
 0x434   :  { %17916 = vmatprep.mubr.msk.f32.mxu0 %vm21660_vm0, %v21661_v4  ;;  %15876 = vmatprep.mubr.msk.f32.mxu1 %vm383_vm2, %v15868_v59 }
 0x437   :  { %17917 = vmatmul.mubr.msk.f32.vlgmr.msra.gmra.mrb[42].mxu0 %vm643_vm11, %v23112_v62  ;;  %v15867_v62 = vld [vmem:[%s26698_s2 + $0x670] sm:$0xff] }
 0x438   :  { %17919 = vmatprep.mubr.msk.f32.mxu0 %vm21660_vm0, %v21661_v4  ;;  %17938 = vmatpush3.msra.mxu0 %v3142_v46 }
 0x439   :  { %17960 = vmatprep.subr.mxu0 %v21661_v4  ;;  %4192 = vmatmul.mubr.f32.gmra.mrb[178].mxu1 %v15867_v62 }
 0x43b   :  { %17920 = vmatmul.mubr.msk.f32.gmra.mrb[44].mxu0 %vm643_vm11, %v23114_v3  ;;  %v15870_v3 = vld [vmem:[%s26698_s2 + $0x688] sm:$0xff] }
 0x43c   :  { %17922 = vmatprep.mubr.msk.f32.mxu0 %vm21660_vm0, %v21661_v4  ;;  %15877 = vmatprep.mubr.msk.f32.mxu1 %vm383_vm2, %v15870_v3 }
 0x43f   :  { %17923 = vmatmul.mubr.msk.f32.gmra.mrb[46].mxu0 %vm643_vm11, %v23116_v6  ;;  %v15869_v6 = vld [vmem:[%s26698_s2 + $0x680] sm:$0xff] }
 0x440   :  { %17925 = vmatprep.mubr.msk.f32.mxu0 %vm21660_vm0, %v21661_v4  ;;  %4197 = vmatmul.mubr.f32.gmra.mrb[180].mxu1 %v15869_v6 }
 0x441   :  { %15899 = vmatprep.mubr.msk.f32.mxu1 %vm383_vm2, %v15886_v7 }
 0x443   :  { %17926 = vmatmul.mubr.msk.f32.gmra.mrb[48].mxu0 %vm643_vm11, %v23118_v9  ;;  %v15885_v9 = vld [vmem:[%s26698_s2 + $0x690] sm:$0xff] }
 0x444   :  { %17928 = vmatprep.mubr.msk.f32.mxu0 %vm21660_vm0, %v21661_v4  ;;  %4432 = vmatmul.mubr.f32.vlgmr.msra.gmra.mrb[182].mxu1 %v15885_v9 }
 0x445   :  { %15900 = vmatprep.mubr.msk.f32.mxu1 %vm383_vm2, %v15888_v10 }
 0x447   :  { %17929 = vmatmul.mubr.msk.f32.gmra.mrb[50].mxu0 %vm643_vm11, %v23120_v12  ;;  %v15887_v12 = vld [vmem:[%s26698_s2 + $0x6a0] sm:$0xff] }
 0x448   :  { %17931 = vmatprep.mubr.msk.f32.mxu0 %vm21660_vm0, %v21661_v4  ;;  %4437 = vmatmul.mubr.f32.gmra.mrb[184].mxu1 %v15887_v12 }
 0x449   :  { %15901 = vmatprep.mubr.msk.f32.mxu1 %vm383_vm2, %v15890_v15 }
 0x44b   :  { %17932 = vmatmul.mubr.msk.f32.gmra.mrb[52].mxu0 %vm643_vm11, %v23122_v16  ;;  %v15889_v16 = vld [vmem:[%s26698_s2 + $0x6b0] sm:$0xff] }
 0x44c   :  { %17934 = vmatprep.mubr.msk.f32.mxu0 %vm21660_vm0, %v21661_v4  ;;  %4442 = vmatmul.mubr.f32.gmra.mrb[186].mxu1 %v15889_v16 }
 0x44d   :  { %15902 = vmatprep.mubr.msk.f32.mxu1 %vm383_vm2, %v15892_v22 }
 0x44f   :  { %17935 = vmatmul.mubr.msk.f32.gmra.mrb[54].mxu0 %vm643_vm11, %v23124_v20  ;;  %v15891_v20 = vld [vmem:[%s26698_s2 + $0x6c0] sm:$0xff] }
 0x450   :  { %17939 = vmatprep.mubr.msk.f32.mxu0 %vm21660_vm0, %v21661_v4  ;;  %4447 = vmatmul.mubr.f32.gmra.mrb[188].mxu1 %v15891_v20 }
 0x451   :  { %15903 = vmatprep.mubr.msk.f32.mxu1 %vm383_vm2, %v15894_v11 }
 0x453   :  { %17940 = vmatmul.mubr.msk.f32.vlgmr.msra.gmra.mrb[42].mxu0 %vm643_vm11, %v23126_v23  ;;  %v15893_v23 = vld [vmem:[%s26698_s2 + $0x6d0] sm:$0xff] }
 0x454   :  { %17942 = vmatprep.mubr.msk.f32.mxu0 %vm21660_vm0, %v21661_v4  ;;  %17961 = vmatpush3.msra.mxu0 %v3407_v19 }
 0x455   :  { %20495 = vmatprep.subr.bf16.mxu0 %v21659_v0  ;;  %4452 = vmatmul.mubr.f32.gmra.mrb[190].mxu1 %v15893_v23 }
 0x456   :  { %15904 = vmatprep.mubr.msk.f32.mxu1 %vm383_vm2, %v15896_v21 }
 0x457   :  { %17943 = vmatmul.mubr.msk.f32.gmra.mrb[44].mxu0 %vm643_vm11, %v23128_v17  ;;  %v15895_v17 = vld [vmem:[%s26698_s2 + $0x6e0] sm:$0xff] }
 0x458   :  { %17945 = vmatprep.mubr.msk.f32.mxu0 %vm21660_vm0, %v21661_v4 }
 0x459   :  { %4457 = vmatmul.mubr.f32.gmra.mrb[192].mxu1 %v15895_v17 }
 0x45a   :  { %15905 = vmatprep.mubr.msk.f32.mxu1 %vm383_vm2, %v15898_v28  ;;  %v3937_v28 = vld [vmem:[%s26700_s3 + $0x68] sm:$0xff] }
 0x45b   :  { %17946 = vmatmul.mubr.msk.f32.gmra.mrb[46].mxu0 %vm643_vm11, %v23130_v24  ;;  %v15897_v24 = vld [vmem:[%s26698_s2 + $0x6f0] sm:$0xff] }
 0x45c   :  { %17948 = vmatprep.mubr.msk.f32.mxu0 %vm21660_vm0, %v21661_v4 }
 0x45d   :  { %4462 = vmatmul.mubr.f32.gmra.mrb[194].mxu1 %v15897_v24 }
 0x45e   :  { %18089 = vmatprep.mubr.msk.f32.mxu1 %vm21660_vm0, %v21661_v4 }
 0x45f   :  { %17949 = vmatmul.mubr.msk.f32.gmra.mrb[48].mxu0 %vm643_vm11, %v23132_v27  ;;  %v15812_v27 = vld [vmem:[%s26698_s2 + $0x598] sm:$0xff] }
 0x460   :  { %17951 = vmatprep.mubr.msk.f32.mxu0 %vm21660_vm0, %v21661_v4 }
 0x463   :  { %17952 = vmatmul.mubr.msk.f32.gmra.mrb[50].mxu0 %vm643_vm11, %v23134_v30  ;;  %v15811_v30 = vld [vmem:[%s26698_s2 + $0x590] sm:$0xff] }
 0x464   :  { %17954 = vmatprep.mubr.msk.f32.mxu0 %vm21660_vm0, %v21661_v4 }
 0x467   :  { %17955 = vmatmul.mubr.msk.f32.gmra.mrb[52].mxu0 %vm643_vm11, %v23140_v40  ;;  %v15814_v40 = vld [vmem:[%s26698_s2 + $0x5a8] sm:$0xff] }
 0x468   :  { %17957 = vmatprep.mubr.msk.f32.mxu0 %vm21660_vm0, %v21661_v4 }
 0x46b   :  { %17958 = vmatmul.mubr.msk.f32.gmra.mrb[54].mxu0 %vm643_vm11, %v23146_v56  ;;  %v15813_v56 = vld [vmem:[%s26698_s2 + $0x5a0] sm:$0xff] }
 0x46c   :  { %17962 = vmatprep.mubr.msk.f32.mxu0 %vm21660_vm0, %v21661_v4 }
 0x46f   :  { %17963 = vmatmul.mubr.msk.f32.vlgmr.msra.gmra.mrb[42].mxu0 %vm643_vm11, %v23151_v5  ;;  %v23503_v5 = vpop.f32.mrb[154].mxu1 }
 0x470   :  { %20497 = vmatpush1.bf16.msra.mxu0 %v21899_v54  ;;  %17965 = vmatprep.mubr.msk.f32.mxu0 %vm21660_vm0, %v21661_v4  ;;  %v15802_v54 = vld [vmem:[%s26698_s2 + $0x548] sm:$0xff]  ;;  %v3905_v29 = vpop.f32.mrb[155].mxu1 }
 0x471   :  { %20498 = vmatprep.subr.bf16.mxu0 %v21659_v0 }
 0x473   :  { %17966 = vmatmul.mubr.msk.f32.gmra.mrb[44].mxu0 %vm643_vm11, %v23167_v32  ;;  %v23505_v32 = vpop.f32.mrb[156].mxu1 }
 0x474   :  { %20500 = vmatpush1.bf16.msra.mxu0 %v21905_v2  ;;  %17968 = vmatprep.mubr.msk.f32.mxu0 %vm21660_vm0, %v21661_v4  ;;  %v15801_v2 = vld [vmem:[%s26698_s2 + $0x540] sm:$0xff]  ;;  %v3910_v33 = vpop.f32.mrb[157].mxu1 }
 0x475   :  { %20501 = vmatprep.subr.bf16.mxu0 %v21659_v0  ;;  %v23507_v41 = vpop.f32.mrb[158].mxu1 }
 0x477   :  { %17969 = vmatmul.mubr.msk.f32.gmra.mrb[46].mxu0 %vm643_vm11, %v23176_v43  ;;  %v3915_v43 = vpop.f32.mrb[159].mxu1 }
 0x478   :  { %20503 = vmatpush1.bf16.msra.mxu0 %v21911_v14  ;;  %17971 = vmatprep.mubr.msk.f32.mxu0 %vm21660_vm0, %v21661_v4  ;;  %v15804_v14 = vld [vmem:[%s26698_s2 + $0x558] sm:$0xff]  ;;  %v23509_v47 = vpop.f32.mrb[160].mxu1 }
 0x479   :  { %20504 = vmatprep.subr.bf16.mxu0 %v21659_v0 }
 0x47b   :  { %17972 = vmatmul.mubr.msk.f32.gmra.mrb[48].mxu0 %vm643_vm11, %v23183_v49  ;;  %v3920_v49 = vpop.f32.mrb[161].mxu1 }
 0x47c   :  { %20506 = vmatpush1.bf16.msra.mxu0 %v21917_v25  ;;  %17974 = vmatprep.mubr.msk.f32.mxu0 %vm21660_vm0, %v21661_v4  ;;  %v3672_v25 = vld [vmem:[%s26700_s3 + $0x60] sm:$0xff]  ;;  %v23511_v52 = vpop.f32.mrb[162].mxu1 }
 0x47d   :  { %20507 = vmatprep.subr.bf16.mxu0 %v21659_v0 }
 0x47f   :  { %17975 = vmatmul.mubr.msk.f32.gmra.mrb[50].mxu0 %vm643_vm11, %v23189_v55  ;;  %v3925_v55 = vpop.f32.mrb[163].mxu1 }
 0x480   :  { %20509 = vmatpush1.bf16.msra.mxu0 %v21923_v39  ;;  %17977 = vmatprep.mubr.msk.f32.mxu0 %vm21660_vm0, %v21661_v4  ;;  %v15803_v39 = vld [vmem:[%s26698_s2 + $0x550] sm:$0xff]  ;;  %v23513_v58 = vpop.f32.mrb[164].mxu1 }
 0x481   :  { %20510 = vmatprep.subr.bf16.mxu0 %v21659_v0 }
 0x483   :  { %17978 = vmatmul.mubr.msk.f32.gmra.mrb[52].mxu0 %vm643_vm11, %v23195_v61  ;;  %v3930_v61 = vpop.f32.mrb[165].mxu1 }
 0x484   :  { %20512 = vmatpush1.bf16.msra.mxu0 %v21929_v51  ;;  %17980 = vmatprep.mubr.msk.f32.mxu0 %vm21660_vm0, %v21661_v4  ;;  %v15806_v51 = vld [vmem:[%s26698_s2 + $0x568] sm:$0xff]  ;;  %v23515_v60 = vpop.f32.mrb[166].mxu1 }
 0x485   :  { %20513 = vmatprep.subr.bf16.mxu0 %v21659_v0 }
 0x487   :  { %17981 = vmatmul.mubr.msk.f32.gmra.mrb[54].mxu0 %vm643_vm11, %v23201_v8  ;;  %v3935_v8 = vpop.f32.mrb[167].mxu1 }
 0x488   :  { %20515 = vmatpush1.bf16.msra.mxu0 %v21935_v63  ;;  %15815 = vmatprep.mubr.msk.f32.mxu0 %vm383_vm2, %v15802_v54  ;;  %v15805_v63 = vld [vmem:[%s26698_s2 + $0x560] sm:$0xff]  ;;  %v23517_v1 = vpop.f32.mrb[168].mxu1 }
 0x489   :  { %20516 = vmatprep.subr.bf16.mxu0 %v21659_v0  ;;  %v4170_v18 = vpop.f32.mrb[169].mxu1 }
 0x48c   :  { %20518 = vmatpush1.bf16.msra.mxu0 %v21941_v13  ;;  %v15808_v13 = vld [vmem:[%s26698_s2 + $0x578] sm:$0xff] }
 0x48d   :  { %20519 = vmatprep.subr.bf16.mxu0 %v21659_v0 }
 0x490   :  { %20521 = vmatpush1.bf16.msra.mxu0 %v21947_v26  ;;  %v15807_v26 = vld [vmem:[%s26698_s2 + $0x570] sm:$0xff] }
 0x491   :  { %20522 = vmatprep.subr.bf16.mxu0 %v21659_v0 }
 0x494   :  { %20524 = vmatpush1.bf16.msra.mxu0 %v21953_v42  ;;  %v15810_v42 = vld [vmem:[%s26698_s2 + $0x588] sm:$0xff] }
 0x495   :  { %3612 = vmatprep.subr.mxu0 %v21661_v4 }
 0x498   :  { %3613 = vmatpush1.msra.mxu0 %v21960_v45  ;;  %v15809_v45 = vld [vmem:[%s26698_s2 + $0x580] sm:$0xff] }
 0x499   :  { %3637 = vmatmul.mubr.f32.vlgmr.msra.gmra.mrb[70].mxu0 %v15801_v2  ;;  %17983 = vmatprep.subr.mxu0 %v21661_v4 }
 0x49a   :  { %15816 = vmatprep.mubr.msk.f32.mxu0 %vm383_vm2, %v15804_v14  ;;  %17984 = vmatpush3.msra.mxu0 %v3672_v25 }
 0x49b   :  { %18006 = vmatprep.subr.mxu0 %v21661_v4 }
 0x49d   :  { %3642 = vmatmul.mubr.f32.gmra.mrb[72].mxu0 %v15803_v39 }
 0x49e   :  { %15817 = vmatprep.mubr.msk.f32.mxu0 %vm383_vm2, %v15806_v51 }
 0x4a1   :  { %3647 = vmatmul.mubr.f32.gmra.mrb[74].mxu0 %v15805_v63 }
 0x4a2   :  { %15818 = vmatprep.mubr.msk.f32.mxu0 %vm383_vm2, %v15808_v13 }
 0x4a5   :  { %3652 = vmatmul.mubr.f32.gmra.mrb[76].mxu0 %v15807_v26 }
 0x4a6   :  { %15819 = vmatprep.mubr.msk.f32.mxu0 %vm383_vm2, %v15810_v42 }
 0x4a9   :  { %3657 = vmatmul.mubr.f32.gmra.mrb[78].mxu0 %v15809_v45 }
 0x4aa   :  { %15820 = vmatprep.mubr.msk.f32.mxu0 %vm383_vm2, %v15812_v27 }
 0x4ad   :  { %3662 = vmatmul.mubr.f32.gmra.mrb[80].mxu0 %v15811_v30 }
 0x4ae   :  { %15821 = vmatprep.mubr.msk.f32.mxu0 %vm383_vm2, %v15814_v40  ;;  %v4202_v40 = vld [vmem:[%s26700_s3 + $0x70] sm:$0xff]  ;;  %vm4598_vm2 = vcmask 130048  }
 0x4b1   :  { %3667 = vmatmul.mubr.f32.gmra.mrb[82].mxu0 %v15813_v56  ;;  %v4467_v56 = vld [vmem:[%s26700_s3 + $0x78] sm:$0xff] }
 0x4b2   :  { %17985 = vmatprep.mubr.msk.f32.mxu0 %vm21660_vm0, %v21661_v4 }
 0x4e7   :  { %v23519_v31 = vpop.f32.mrb[170].mxu1 }
 0x4e8   :  { %v4175_v34 = vpop.f32.mrb[171].mxu1 }
 0x4f0   :  { %v23521_v35 = vpop.f32.mrb[172].mxu1 }
 0x4f1   :  { %v4180_v44 = vpop.f32.mrb[173].mxu1 }
 0x4fb   :  { %v23523_v46 = vpop.f32.mrb[174].mxu1 }
 0x4fc   :  { %v4185_v48 = vpop.f32.mrb[175].mxu1 }
 0x503   :  { %v23525_v50 = vpop.f32.mrb[176].mxu1 }
 0x504   :  { %v4190_v53 = vpop.f32.mrb[177].mxu1 }
 0x50c   :  { %v23527_v57 = vpop.f32.mrb[178].mxu1 }
 0x50d   :  { %v4195_v59 = vpop.f32.mrb[179].mxu1 }
 0x513   :  { %v23529_v62 = vpop.f32.mrb[180].mxu1 }
 0x514   :  { %v4200_v3 = vpop.f32.mrb[181].mxu1 }
 0x517   :  { %v23531_v6 = vpop.f32.mrb[182].mxu1 }
 0x518   :  { %v4435_v7 = vpop.f32.mrb[183].mxu1 }
 0x51b   :  { %v23533_v9 = vpop.f32.mrb[184].mxu1 }
 0x51c   :  { %v4440_v10 = vpop.f32.mrb[185].mxu1 }
 0x51f   :  { %v23535_v12 = vpop.f32.mrb[186].mxu1 }
 0x520   :  { %v4445_v15 = vpop.f32.mrb[187].mxu1 }
 0x523   :  { %v23537_v16 = vpop.f32.mrb[188].mxu1 }
 0x524   :  { %v4450_v19 = vpop.f32.mrb[189].mxu1 }
 0x528   :  { %v23539_v22 = vpop.f32.mrb[190].mxu1 }
 0x529   :  { %v4455_v20 = vpop.f32.mrb[191].mxu1 }
 0x52c   :  { %v23541_v11 = vpop.f32.mrb[192].mxu1 }
 0x52d   :  { %v4460_v23 = vpop.f32.mrb[193].mxu1 }
 0x530   :  { %v23543_v21 = vpop.f32.mrb[194].mxu1 }
 0x531   :  { %v4465_v17 = vpop.f32.mrb[195].mxu1 }
 0x56c   :  { %v3638_v24 = vpop.f32.mrb[70].mxu0 }
 0x56d   :  { %v3640_v54 = vpop.f32.mrb[71].mxu0  ;;  %17986 = vmatmul.mubr.msk.f32.vlgmr.msra.gmra.mrb[42].mxu0 %vm643_vm11, %v3638_v24 }
 0x56e   :  { %17988 = vmatprep.mubr.msk.f32.mxu0 %vm21660_vm0, %v21661_v4  ;;  %18007 = vmatpush3.msra.mxu0 %v3937_v28 }
 0x56f   :  { %18029 = vmatprep.subr.mxu0 %v21661_v4 }
 0x570   :  { %v3643_v2 = vpop.f32.mrb[72].mxu0 }
 0x571   :  { %v3645_v14 = vpop.f32.mrb[73].mxu0  ;;  %17989 = vmatmul.mubr.msk.f32.gmra.mrb[44].mxu0 %vm643_vm11, %v3643_v2 }
 0x572   :  { %17991 = vmatprep.mubr.msk.f32.mxu0 %vm21660_vm0, %v21661_v4 }
 0x574   :  { %v3648_v25 = vpop.f32.mrb[74].mxu0 }
 0x575   :  { %v3650_v39 = vpop.f32.mrb[75].mxu0  ;;  %17992 = vmatmul.mubr.msk.f32.gmra.mrb[46].mxu0 %vm643_vm11, %v3648_v25 }
 0x576   :  { %17994 = vmatprep.mubr.msk.f32.mxu0 %vm21660_vm0, %v21661_v4 }
 0x578   :  { %v3653_v51 = vpop.f32.mrb[76].mxu0 }
 0x579   :  { %v3655_v63 = vpop.f32.mrb[77].mxu0  ;;  %17995 = vmatmul.mubr.msk.f32.gmra.mrb[48].mxu0 %vm643_vm11, %v3653_v51 }
 0x57a   :  { %17997 = vmatprep.mubr.msk.f32.mxu0 %vm21660_vm0, %v21661_v4 }
 0x57c   :  { %v3658_v13 = vpop.f32.mrb[78].mxu0 }
 0x57d   :  { %v3660_v26 = vpop.f32.mrb[79].mxu0  ;;  %17998 = vmatmul.mubr.msk.f32.gmra.mrb[50].mxu0 %vm643_vm11, %v3658_v13 }
 0x57e   :  { %18000 = vmatprep.mubr.msk.f32.mxu0 %vm21660_vm0, %v21661_v4 }
 0x580   :  { %v3663_v42 = vpop.f32.mrb[80].mxu0 }
 0x581   :  { %v3665_v45 = vpop.f32.mrb[81].mxu0  ;;  %18001 = vmatmul.mubr.msk.f32.gmra.mrb[52].mxu0 %vm643_vm11, %v3663_v42 }
 0x582   :  { %18003 = vmatprep.mubr.msk.f32.mxu0 %vm21660_vm0, %v21661_v4 }
 0x584   :  { %v3668_v27 = vpop.f32.mrb[82].mxu0 }
 0x585   :  { %v3670_v30 = vpop.f32.mrb[83].mxu0  ;;  %18004 = vmatmul.mubr.msk.f32.gmra.mrb[54].mxu0 %vm643_vm11, %v3668_v27 }
 0x586   :  { %18008 = vmatprep.mubr.msk.f32.mxu0 %vm21660_vm0, %v21661_v4 }
 0x589   :  { %18009 = vmatmul.mubr.msk.f32.vlgmr.msra.gmra.mrb[42].mxu0 %vm643_vm11, %v23503_v5 }
 0x58a   :  { %18011 = vmatprep.mubr.msk.f32.mxu0 %vm21660_vm0, %v21661_v4  ;;  %18030 = vmatpush3.msra.mxu0 %v4202_v40 }
 0x58b   :  { %18052 = vmatprep.subr.mxu0 %v21661_v4 }
 0x58d   :  { %18012 = vmatmul.mubr.msk.f32.gmra.mrb[44].mxu0 %vm643_vm11, %v23505_v32 }
 0x58e   :  { %18014 = vmatprep.mubr.msk.f32.mxu0 %vm21660_vm0, %v21661_v4 }
 0x591   :  { %18015 = vmatmul.mubr.msk.f32.gmra.mrb[46].mxu0 %vm643_vm11, %v23507_v41 }
 0x592   :  { %18017 = vmatprep.mubr.msk.f32.mxu0 %vm21660_vm0, %v21661_v4 }
 0x595   :  { %18018 = vmatmul.mubr.msk.f32.gmra.mrb[48].mxu0 %vm643_vm11, %v23509_v47 }
 0x596   :  { %18020 = vmatprep.mubr.msk.f32.mxu0 %vm21660_vm0, %v21661_v4 }
 0x599   :  { %18021 = vmatmul.mubr.msk.f32.gmra.mrb[50].mxu0 %vm643_vm11, %v23511_v52 }
 0x59a   :  { %18023 = vmatprep.mubr.msk.f32.mxu0 %vm21660_vm0, %v21661_v4 }
 0x59d   :  { %18024 = vmatmul.mubr.msk.f32.gmra.mrb[52].mxu0 %vm643_vm11, %v23513_v58 }
 0x59e   :  { %18026 = vmatprep.mubr.msk.f32.mxu0 %vm21660_vm0, %v21661_v4 }
 0x5a1   :  { %18027 = vmatmul.mubr.msk.f32.gmra.mrb[54].mxu0 %vm643_vm11, %v23515_v60 }
 0x5a2   :  { %18031 = vmatprep.mubr.msk.f32.mxu0 %vm21660_vm0, %v21661_v4 }
 0x5a5   :  { %18032 = vmatmul.mubr.msk.f32.vlgmr.msra.gmra.mrb[42].mxu0 %vm643_vm11, %v23517_v1 }
 0x5a6   :  { %18034 = vmatprep.mubr.msk.f32.mxu0 %vm21660_vm0, %v21661_v4  ;;  %18053 = vmatpush3.msra.mxu0 %v4467_v56 }
 0x5a7   :  { %20633 = vmatprep.subr.bf16.mxu0 %v21659_v0 }
 0x5a9   :  { %18035 = vmatmul.mubr.msk.f32.gmra.mrb[44].mxu0 %vm643_vm11, %v23519_v31 }
 0x5aa   :  { %18037 = vmatprep.mubr.msk.f32.mxu0 %vm21660_vm0, %v21661_v4 }
 0x5ad   :  { %18038 = vmatmul.mubr.msk.f32.gmra.mrb[46].mxu0 %vm643_vm11, %v23521_v35 }
 0x5ae   :  { %18040 = vmatprep.mubr.msk.f32.mxu0 %vm21660_vm0, %v21661_v4 }
 0x5b1   :  { %18041 = vmatmul.mubr.msk.f32.gmra.mrb[48].mxu0 %vm643_vm11, %v23523_v46 }
 0x5b2   :  { %18043 = vmatprep.mubr.msk.f32.mxu0 %vm21660_vm0, %v21661_v4 }
 0x5b5   :  { %18044 = vmatmul.mubr.msk.f32.gmra.mrb[50].mxu0 %vm643_vm11, %v23525_v50 }
 0x5b6   :  { %18046 = vmatprep.mubr.msk.f32.mxu0 %vm21660_vm0, %v21661_v4 }
 0x5b9   :  { %18047 = vmatmul.mubr.msk.f32.gmra.mrb[52].mxu0 %vm643_vm11, %v23527_v57 }
 0x5ba   :  { %18049 = vmatprep.mubr.msk.f32.mxu0 %vm21660_vm0, %v21661_v4 }
 0x5bd   :  { %18050 = vmatmul.mubr.msk.f32.gmra.mrb[54].mxu0 %vm643_vm11, %v23529_v62 }
 0x5be   :  { %18054 = vmatprep.mubr.msk.f32.mxu0 %vm21660_vm0, %v21661_v4 }
 0x5c1   :  { %18055 = vmatmul.mubr.msk.f32.vlgmr.msra.gmra.mrb[42].mxu0 %vm643_vm11, %v23531_v6 }
 0x5c2   :  { %18057 = vmatprep.mubr.msk.f32.mxu0 %vm21660_vm0, %v21661_v4 }
 0x5c5   :  { %18058 = vmatmul.mubr.msk.f32.gmra.mrb[44].mxu0 %vm643_vm11, %v23533_v9 }
 0x5c6   :  { %18060 = vmatprep.mubr.msk.f32.mxu0 %vm21660_vm0, %v21661_v4 }
 0x5c9   :  { %18061 = vmatmul.mubr.msk.f32.gmra.mrb[46].mxu0 %vm643_vm11, %v23535_v12 }
 0x5ca   :  { %18063 = vmatprep.mubr.msk.f32.mxu0 %vm21660_vm0, %v21661_v4 }
 0x5cd   :  { %18064 = vmatmul.mubr.msk.f32.gmra.mrb[48].mxu0 %vm643_vm11, %v23537_v16  ;;  %v4633_v16 = vadd.s32 48, %v21886_v37 }
 0x5ce   :  { %18066 = vmatprep.mubr.msk.f32.mxu0 %vm21660_vm0, %v21661_v4 }
 0x5cf   :  { %vm4640_vm12 = vcmp.lt.s32.totalorder %v4633_v16, 50 }
 0x5d1   :  { %18067 = vmatmul.mubr.msk.f32.gmra.mrb[50].mxu0 %vm643_vm11, %v23539_v22 }
 0x5d2   :  { %18069 = vmatprep.mubr.msk.f32.mxu0 %vm21660_vm0, %v21661_v4 }
 0x5d5   :  { %18070 = vmatmul.mubr.msk.f32.gmra.mrb[52].mxu0 %vm643_vm11, %v23541_v11 }
 0x5d6   :  { %18072 = vmatprep.mubr.msk.f32.mxu0 %vm21660_vm0, %v21661_v4 }
 0x5d9   :  { %18073 = vmatmul.mubr.msk.f32.gmra.mrb[54].mxu0 %vm643_vm11, %v23543_v21 }
 0x5da   :  { %18125 = vmatprep.mubr.msk.f32.mxu0 %vm21660_vm0, %v21661_v4 }
 0x694   :  { %v4555_v5 = vpop.f32.mrb[42].mxu0 }
 0x695   :  { %v18056_v29 = vpop.f32.mrb[43].mxu0  ;;  %v4599_v33 = vsel %vm4598_vm2, %v4555_v5, 0.0 }
 0x698   :  { %v4560_v32 = vpop.f32.mrb[44].mxu0 }
 0x699   :  { %v4600_v41 = vsel %vm4598_vm2, %v4560_v32, 0.0  ;;  %v18059_v43 = vpop.f32.mrb[45].mxu0 }
 0x69a   :  { %v4601_v47 = vadd.f32 %v4600_v41, %v4599_v33 }
 0x69c   :  { %v4565_v49 = vpop.f32.mrb[46].mxu0 }
 0x69d   :  { %v4602_v52 = vsel %vm4598_vm2, %v4565_v49, 0.0  ;;  %v18062_v55 = vpop.f32.mrb[47].mxu0 }
 0x69e   :  { %v4603_v58 = vadd.f32 %v4602_v52, %v4601_v47 }
 0x6a0   :  { %v4570_v61 = vpop.f32.mrb[48].mxu0 }
 0x6a1   :  { %v4604_v60 = vsel %vm4598_vm2, %v4570_v61, 0.0  ;;  %v18065_v8 = vpop.f32.mrb[49].mxu0 }
 0x6a2   :  { %v4605_v1 = vadd.f32 %v4604_v60, %v4603_v58  ;;  %v23678_v60 = vsub.s32 1, %v21886_v37  ;;  %v15913_v8 = vld [vmem:[%s26699_s10 + $0x8] sm:$0xff] }
 0x6a4   :  { %v4575_v18 = vpop.f32.mrb[50].mxu0 }
 0x6a5   :  { %v4606_v31 = vsel %vm4598_vm2, %v4575_v18, 0.0  ;;  %v18068_v34 = vpop.f32.mrb[51].mxu0 }
 0x6a6   :  { %v4607_v35 = vadd.f32 %v4606_v31, %v4605_v1  ;;  %v23684_v1 = vsub.s32 2, %v21886_v37 }
 0x6a8   :  { %v4580_v44 = vpop.f32.mrb[52].mxu0  ;;  %v4698_v34 = vrot.slane %v15913_v8, %v23684_v1 }
 0x6a9   :  { %v4608_v46 = vsel %vm4598_vm2, %v4580_v44, 0.0  ;;  %v18071_v48 = vpop.f32.mrb[53].mxu0 }
 0x6aa   :  { %v4609_v50 = vadd.f32 %v4608_v46, %v4607_v35 }
 0x6ac   :  { %v4585_v53 = vpop.f32.mrb[54].mxu0 }
 0x6ad   :  { %v4610_v57 = vsel %vm4598_vm2, %v4585_v53, 0.0  ;;  %v18074_v59 = vpop.f32.mrb[55].mxu0 }
 0x6ae   :  { %v4611_v62 = vadd.f32 %v4610_v57, %v4609_v50 }
 0x6b0   :  { %v4612_v3 = vrot.slane %v4611_v62, 4 }
 0x6b2   :  { %v4613_v6 = vadd.f32 %v4612_v3, %v4611_v62 }
 0x6b4   :  { %v4614_v7 = vrot.slane %v4613_v6, 2 }
 0x6b6   :  { %v4615_v9 = vadd.f32 %v4614_v7, %v4613_v6 }
 0x6b8   :  { %v4616_v10 = vrot.slane %v4615_v9, 1 }
 0x6ba   :  { %v4617_v12 = vadd.f32 %v4616_v10, %v4615_v9 }
 0x6bc   :  { %v4618_v15 = vmul.f32 0.02, %v4617_v12 }
 0x6be   :  { %v4619_v19 = vsub.f32 %v4555_v5, %v4618_v15  ;;  %v4620_v22 = vsub.f32 %v4560_v32, %v4618_v15  ;;  %v4621_v20 = vsub.f32 %v4565_v49, %v4618_v15  ;;  %v4622_v11 = vsub.f32 %v4570_v61, %v4618_v15 }
 0x6bf   :  { %v4623_v23 = vsub.f32 %v4575_v18, %v4618_v15  ;;  %v4624_v21 = vsub.f32 %v4580_v44, %v4618_v15  ;;  %v4625_v17 = vsub.f32 %v4585_v53, %v4618_v15  ;;  %v4687_v18 = vrot.slane %v15913_v8, %v23678_v60  ;;  %v15956_v8 = vld [vmem:[%s26701_s4 + $0x78] sm:$0xff] }
 0x6c0   :  { %v4648_v28 = vmul.f32 %v4619_v19, %v4619_v19  ;;  %v4649_v24 = vmul.f32 %v4620_v22, %v4620_v22  ;;  %v4650_v54 = vmul.f32 %v4621_v20, %v4621_v20  ;;  %v4651_v2 = vmul.f32 %v4622_v11, %v4622_v11 }
 0x6c1   :  { %v4652_v51 = vmul.f32 %v4623_v23, %v4623_v23  ;;  %v4647_v13 = vsel %vm4640_vm12, %v4625_v17, 0.0  ;;  %v4653_v42 = vmul.f32 %v4624_v21, %v4624_v21 }
 0x6c2   :  { %v4655_v14 = vsel %vm4598_vm2, %v4648_v28, 0.0  ;;  %v4656_v25 = vsel %vm4598_vm2, %v4649_v24, 0.0  ;;  %v4658_v63 = vsel %vm4598_vm2, %v4650_v54, 0.0  ;;  %v4660_v45 = vsel %vm4598_vm2, %v4651_v2, 0.0 }
 0x6c3   :  { %v4657_v39 = vadd.f32 %v4656_v25, %v4655_v14  ;;  %v4654_v30 = vmul.f32 %v4647_v13, %v4647_v13  ;;  %v4662_v40 = vsel %vm4598_vm2, %v4652_v51, 0.0  ;;  %v4664_v5 = vsel %vm4598_vm2, %v4653_v42, 0.0 }
 0x6c5   :  { %v4659_v26 = vadd.f32 %v4658_v63, %v4657_v39  ;;  %v4666_v32 = vsel %vm4598_vm2, %v4654_v30, 0.0 }
 0x6c7   :  { %v4661_v27 = vadd.f32 %v4660_v45, %v4659_v26 }
 0x6c9   :  { %v4663_v56 = vadd.f32 %v4662_v40, %v4661_v27  ;;  %v4727_v27 = vld [vmem:[%s26701_s4] sm:$0xff]  ;;  %v4728_v40 = vld [vmem:[%s26701_s4 + $0x8] sm:$0xff] }
 0x6cb   :  { %v4665_v29 = vadd.f32 %v4664_v5, %v4663_v56  ;;  %v4729_v56 = vld [vmem:[%s26701_s4 + $0x10] sm:$0xff]  ;;  %v15917_v5 = vld [vmem:[%s26701_s4 + $0x18] sm:$0xff] }
 0x6cd   :  { %v4667_v33 = vadd.f32 %v4666_v32, %v4665_v29  ;;  %v15918_v29 = vld [vmem:[%s26701_s4 + $0x20] sm:$0xff]  ;;  %v15919_v32 = vld [vmem:[%s26701_s4 + $0x28] sm:$0xff] }
 0x6cf   :  { %v4668_v41 = vrot.slane %v4667_v33, 4 }
 0x6d1   :  { %v4669_v43 = vadd.f32 %v4668_v41, %v4667_v33  ;;  %v15929_v33 = vld [vmem:[%s26701_s4 + $0x30] sm:$0xff]  ;;  %v15930_v41 = vld [vmem:[%s26701_s4 + $0x38] sm:$0xff] }
 0x6d3   :  { %v4670_v47 = vrot.slane %v4669_v43, 2 }
 0x6d5   :  { %v4671_v49 = vadd.f32 %v4670_v47, %v4669_v43  ;;  %v15931_v43 = vld [vmem:[%s26701_s4 + $0x40] sm:$0xff]  ;;  %v15938_v47 = vld [vmem:[%s26701_s4 + $0x48] sm:$0xff] }
 0x6d7   :  { %v4672_v52 = vrot.slane %v4671_v49, 1 }
 0x6d9   :  { %v4673_v55 = vadd.f32 %v4672_v52, %v4671_v49  ;;  %v15939_v49 = vld [vmem:[%s26701_s4 + $0x50] sm:$0xff]  ;;  %v15940_v52 = vld [vmem:[%s26701_s4 + $0x58] sm:$0xff] }
 0x6db   :  { %v4674_v58 = vmul.f32 0.02, %v4673_v55  ;;  %v15947_v55 = vld [vmem:[%s26701_s4 + $0x60] sm:$0xff] }
 0x6dd   :  { %v4675_v61 = vadd.f32 1e-05, %v4674_v58  ;;  %v15948_v58 = vld [vmem:[%s26701_s4 + $0x68] sm:$0xff] }
 0x6df   :  { %21653 = vrsqrt.f32 %v4675_v61  ;;  %v15949_v61 = vld [vmem:[%s26701_s4 + $0x70] sm:$0xff] }
 0x6e9   :  { %v21654_v31 = vpop.eup %21653 }
 0x6ea   :  { %v4677_v35 = vmul.f32 %v21654_v31, %v4619_v19  ;;  %v4678_v44 = vmul.f32 %v21654_v31, %v4620_v22  ;;  %v4679_v46 = vmul.f32 %v21654_v31, %v4621_v20  ;;  %v4680_v48 = vmul.f32 %v21654_v31, %v4622_v11 }
 0x6eb   :  { %v4681_v50 = vmul.f32 %v21654_v31, %v4623_v23  ;;  %v4682_v53 = vmul.f32 %v21654_v31, %v4624_v21  ;;  %v4683_v57 = vmul.f32 %v21654_v31, %v4625_v17  ;;  %v4916_v31 = vld [vmem:[%s26702_s5 + $0x18] sm:$0xff] }
 0x6ec   :  { %v4688_v59 = vmul.f32 %v4687_v18, %v4677_v35  ;;  %v4689_v62 = vmul.f32 %v4687_v18, %v4678_v44  ;;  %v4690_v3 = vmul.f32 %v4687_v18, %v4679_v46  ;;  %v4691_v6 = vmul.f32 %v4687_v18, %v4680_v48  ;;  %v15957_v35 = vld [vmem:[%s26701_s4 + $0x80] sm:$0xff]  ;;  %v15958_v44 = vld [vmem:[%s26701_s4 + $0x88] sm:$0xff]  ;;  %v15965_v46 = vld [vmem:[%s26701_s4 + $0x90] sm:$0xff] }
 0x6ed   :  { %v4692_v7 = vmul.f32 %v4687_v18, %v4681_v50  ;;  %v4693_v9 = vmul.f32 %v4687_v18, %v4682_v53  ;;  %v4694_v63 = vmul.f32 %v4687_v18, %v4683_v57  ;;  %v4915_v18 = vld [vmem:[%s26702_s5 + $0x10] sm:$0xff]  ;;  %v15966_v48 = vld [vmem:[%s26701_s4 + $0x98] sm:$0xff]  ;;  %v15967_v50 = vld [vmem:[%s26701_s4 + $0xa0] sm:$0xff] }
 0x6ee   :  { %v4699_v10 = vadd.f32 %v4698_v34, %v4688_v59  ;;  %v4700_v12 = vadd.f32 %v4698_v34, %v4689_v62  ;;  %v4701_v15 = vadd.f32 %v4698_v34, %v4690_v3  ;;  %v4702_v16 = vadd.f32 %v4698_v34, %v4691_v6  ;;  %v15974_v53 = vld [vmem:[%s26701_s4 + $0xa8] sm:$0xff]  ;;  %v15975_v57 = vld [vmem:[%s26701_s4 + $0xb0] sm:$0xff]  ;;  %v15976_v59 = vld [vmem:[%s26701_s4 + $0xb8] sm:$0xff] }
 0x6ef   :  { %v4703_v28 = vadd.f32 %v4698_v34, %v4692_v7  ;;  %v4704_v24 = vadd.f32 %v4698_v34, %v4693_v9  ;;  %v4705_v42 = vadd.f32 %v4698_v34, %v4694_v63  ;;  %v20634_v34 = vpack.c.bf16 %v4916_v31, %v4915_v18  ;;  %v15983_v62 = vld [vmem:[%s26701_s4 + $0xc0] sm:$0xff]  ;;  %v15984_v3 = vld [vmem:[%s26701_s4 + $0xc8] sm:$0xff]  ;;  %v15985_v6 = vld [vmem:[%s26701_s4 + $0xd0] sm:$0xff] }
 0x6f0   :  { %vm4706_vm13 = vcmp.ge.f32.partialorder %v4699_v10, 0.0  ;;  %vm4707_vm14 = vcmp.ge.f32.partialorder %v4700_v12, 0.0  ;;  %vm4708_vm15 = vcmp.ge.f32.partialorder %v4701_v15, 0.0  ;;  %vm4709_vm3 = vcmp.ge.f32.partialorder %v4702_v16, 0.0  ;;  %v16001_v7 = vld [vmem:[%s26701_s4 + $0xf0] sm:$0xff]  ;;  %v16002_v9 = vld [vmem:[%s26701_s4 + $0xf8] sm:$0xff] }
 0x6f1   :  { %vm4710_vm4 = vcmp.ge.f32.partialorder %v4703_v28, 0.0  ;;  %vm4711_vm5 = vcmp.ge.f32.partialorder %v4704_v24, 0.0  ;;  %v4713_v19 = vmul.f32 0.2, %v4699_v10  ;;  %v4714_v22 = vmul.f32 0.2, %v4700_v12  ;;  %20635 = vmatpush3.bf16.msra.mxu0 %v20634_v34 }
 0x6f2   :  { %v4715_v20 = vmul.f32 0.2, %v4701_v15  ;;  %v4716_v11 = vmul.f32 0.2, %v4702_v16  ;;  %v4717_v23 = vmul.f32 0.2, %v4703_v28  ;;  %20636 = vmatprep.subr.bf16.mxu0 %v21659_v0 }
 0x6f3   :  { %v4718_v21 = vmul.f32 0.2, %v4704_v24  ;;  %v4720_v17 = vsel %vm4706_vm13, %v4699_v10, %v4713_v19  ;;  %v4721_v54 = vsel %vm4707_vm14, %v4700_v12, %v4714_v22  ;;  %v4719_v45 = vmul.f32 0.2, %v4705_v42  ;;  %v16003_v10 = vld [vmem:[%s26701_s4 + $0x100] sm:$0xff]  ;;  %v16010_v12 = vld [vmem:[%s26701_s4 + $0x108] sm:$0xff] }
 0x6f4   :  { %v4722_v2 = vsel %vm4708_vm15, %v4701_v15, %v4715_v20  ;;  %v4723_v14 = vsel %vm4709_vm3, %v4702_v16, %v4716_v11  ;;  %v4724_v25 = vsel %vm4710_vm4, %v4703_v28, %v4717_v23  ;;  %v23688_v51 = vpack.c.bf16 %v4721_v54, %v4720_v17  ;;  %v16011_v15 = vld [vmem:[%s26701_s4 + $0x110] sm:$0xff]  ;;  %v16012_v16 = vld [vmem:[%s26701_s4 + $0x118] sm:$0xff]  ;;  %v16019_v28 = vld [vmem:[%s26701_s4 + $0x120] sm:$0xff] }
 0x6f5   :  { %v4725_v39 = vsel %vm4711_vm5, %v4704_v24, %v4718_v21  ;;  %v23690_v13 = vpack.c.bf16 %v4723_v14, %v4722_v2  ;;  %vm4712_vm6 = vcmp.ge.f32.partialorder %v4705_v42, 0.0  ;;  %v16020_v24 = vld [vmem:[%s26701_s4 + $0x128] sm:$0xff]  ;;  %v16021_v19 = vld [vmem:[%s26701_s4 + $0x130] sm:$0xff]  ;;  %v16028_v22 = vld [vmem:[%s26701_s4 + $0x138] sm:$0xff] }
 0x6f6   :  { %v23692_v26 = vpack.c.bf16 %v4725_v39, %v4724_v25  ;;  %20617 = vmatpush3.bf16.msra.mxu1 %v23688_v51  ;;  %v23703_v30 = vsel %vm4712_vm6, %v4705_v42, %v4719_v45  ;;  %v16029_v20 = vld [vmem:[%s26701_s4 + $0x140] sm:$0xff]  ;;  %v16030_v11 = vld [vmem:[%s26701_s4 + $0x148] sm:$0xff]  ;;  %v16037_v23 = vld [vmem:[%s26701_s4 + $0x150] sm:$0xff] }
 0x6f7   :  { %20618 = vmatprep.subr.bf16.mxu1 %v21659_v0  ;;  %v16038_v14 = vld [vmem:[%s26701_s4 + $0x158] sm:$0xff]  ;;  %v4820_v63 = vld [vmem:[%s26702_s5] sm:$0xff]  ;;  %v4821_v42 = vld [vmem:[%s26702_s5 + $0x8] sm:$0xff] }
 0x6f8   :  { %v16039_v45 = vld [vmem:[%s26701_s4 + $0x160] sm:$0xff]  ;;  %v5375_v31 = vld [vmem:[%s26702_s5 + $0x30] sm:$0xff]  ;;  %v5376_v34 = vld [vmem:[%s26702_s5 + $0x38] sm:$0xff] }
 0x6fa   :  { %20620 = vmatpush3.bf16.msra.mxu1 %v23690_v13 }
 0x6fb   :  { %20621 = vmatprep.subr.bf16.mxu1 %v21659_v0 }
 0x6fe   :  { %20623 = vmatpush3.bf16.msra.mxu1 %v23692_v26 }
 0x6ff   :  { %18087 = vmatprep.subr.mxu1 %v21661_v4 }
 0x702   :  { %18088 = vmatpush3.msra.mxu1 %v23703_v30 }
 0x703   :  { %20624 = vmatprep.subr.bf16.mxu1 %v21659_v0  ;;  %18090 = vmatmul.mubr.msk.f32.vlgmr.msra.gmra.mrb[196].mxu1 %vm4730_vm7, %v4727_v27  ;;  %v20637_v27 = vpack.c.bf16 %v4821_v42, %v4820_v63  ;;  %v6124_v63 = vld [vmem:[%s26702_s5 + $0x78] sm:$0xff] }
 0x704   :  { %20626 = vmatpush3.bf16.msra.mxu1 %v23688_v51  ;;  %18092 = vmatprep.mubr.msk.f32.mxu1 %vm21660_vm0, %v21661_v4 }
 0x705   :  { %20627 = vmatprep.subr.bf16.mxu1 %v21659_v0 }
 0x707   :  { %18093 = vmatmul.mubr.msk.f32.gmra.mrb[198].mxu1 %vm4730_vm7, %v4728_v40 }
 0x708   :  { %20629 = vmatpush3.bf16.msra.mxu1 %v23690_v13  ;;  %18095 = vmatprep.mubr.msk.f32.mxu1 %vm21660_vm0, %v21661_v4 }
 0x709   :  { %20630 = vmatprep.subr.bf16.mxu1 %v21659_v0 }
 0x70b   :  { %18096 = vmatmul.mubr.msk.f32.gmra.mrb[200].mxu1 %vm4730_vm7, %v4729_v56  ;;  %v16046_v56 = vld [vmem:[%s26701_s4 + $0x168] sm:$0xff] }
 0x70c   :  { %20632 = vmatpush3.bf16.msra.mxu1 %v23692_v26  ;;  %18112 = vmatprep.mubr.msk.f32.mxu1 %vm21660_vm0, %v21661_v4 }
 0x70d   :  { %18110 = vmatprep.subr.mxu1 %v21661_v4 }
 0x710   :  { %18111 = vmatpush3.msra.mxu1 %v23703_v30 }
 0x711   :  { %18113 = vmatmul.mubr.msk.f32.vlgmr.msra.gmra.mrb[202].mxu1 %vm4730_vm7, %v15917_v5  ;;  %20639 = vmatprep.subr.bf16.mxu1 %v21659_v0 }
 0x712   :  { %20641 = vmatpush3.bf16.msra.mxu1 %v23688_v51  ;;  %18115 = vmatprep.mubr.msk.f32.mxu1 %vm21660_vm0, %v21661_v4 }
 0x713   :  { %20642 = vmatprep.subr.bf16.mxu1 %v21659_v0 }
 0x715   :  { %18116 = vmatmul.mubr.msk.f32.gmra.mrb[204].mxu1 %vm4730_vm7, %v15918_v29 }
 0x716   :  { %20644 = vmatpush3.bf16.msra.mxu1 %v23690_v13  ;;  %18118 = vmatprep.mubr.msk.f32.mxu1 %vm21660_vm0, %v21661_v4 }
 0x717   :  { %20645 = vmatprep.subr.bf16.mxu1 %v21659_v0 }
 0x719   :  { %18119 = vmatmul.mubr.msk.f32.gmra.mrb[206].mxu1 %vm4730_vm7, %v15919_v32  ;;  %v16047_v32 = vld [vmem:[%s26701_s4 + $0x170] sm:$0xff] }
 0x71a   :  { %20647 = vmatpush3.bf16.msra.mxu1 %v23692_v26  ;;  %18161 = vmatprep.mubr.msk.f32.mxu1 %vm21660_vm0, %v21661_v4 }
 0x71b   :  { %18159 = vmatprep.subr.mxu1 %v21661_v4 }
 0x71e   :  { %18160 = vmatpush3.msra.mxu1 %v23703_v30 }
 0x71f   :  { %20651 = vmatprep.subr.bf16.mxu1 %v21659_v0  ;;  %18162 = vmatmul.mubr.msk.f32.vlgmr.msra.gmra.mrb[208].mxu1 %vm4730_vm7, %v15929_v33 }
 0x720   :  { %20653 = vmatpush3.bf16.msra.mxu1 %v23688_v51  ;;  %18164 = vmatprep.mubr.msk.f32.mxu1 %vm21660_vm0, %v21661_v4 }
 0x721   :  { %20654 = vmatprep.subr.bf16.mxu1 %v21659_v0 }
 0x723   :  { %18165 = vmatmul.mubr.msk.f32.gmra.mrb[210].mxu1 %vm4730_vm7, %v15930_v41  ;;  %v5188_v41 = vld [vmem:[%s26702_s5 + $0x20] sm:$0xff] }
 0x724   :  { %20656 = vmatpush3.bf16.msra.mxu1 %v23690_v13  ;;  %18167 = vmatprep.mubr.msk.f32.mxu1 %vm21660_vm0, %v21661_v4 }
 0x725   :  { %20657 = vmatprep.subr.bf16.mxu1 %v21659_v0 }
 0x727   :  { %18168 = vmatmul.mubr.msk.f32.gmra.mrb[212].mxu1 %vm4730_vm7, %v15931_v43  ;;  %v5189_v43 = vld [vmem:[%s26702_s5 + $0x28] sm:$0xff] }
 0x728   :  { %20659 = vmatpush3.bf16.msra.mxu1 %v23692_v26  ;;  %18197 = vmatprep.mubr.msk.f32.mxu1 %vm21660_vm0, %v21661_v4 }
 0x729   :  { %18195 = vmatprep.subr.mxu1 %v21661_v4 }
 0x72c   :  { %18196 = vmatpush3.msra.mxu1 %v23703_v30 }
 0x72d   :  { %20663 = vmatprep.subr.bf16.mxu1 %v21659_v0  ;;  %18198 = vmatmul.mubr.msk.f32.vlgmr.msra.gmra.mrb[214].mxu1 %vm4730_vm7, %v15938_v47 }
 0x72e   :  { %20665 = vmatpush3.bf16.msra.mxu1 %v23688_v51  ;;  %18200 = vmatprep.mubr.msk.f32.mxu1 %vm21660_vm0, %v21661_v4 }
 0x72f   :  { %20666 = vmatprep.subr.bf16.mxu1 %v21659_v0 }
 0x731   :  { %18201 = vmatmul.mubr.msk.f32.gmra.mrb[216].mxu1 %vm4730_vm7, %v15939_v49  ;;  %v16048_v49 = vld [vmem:[%s26701_s4 + $0x178] sm:$0xff] }
 0x732   :  { %20668 = vmatpush3.bf16.msra.mxu1 %v23690_v13  ;;  %18203 = vmatprep.mubr.msk.f32.mxu1 %vm21660_vm0, %v21661_v4 }
 0x733   :  { %20669 = vmatprep.subr.bf16.mxu1 %v21659_v0 }
 0x735   :  { %18204 = vmatmul.mubr.msk.f32.gmra.mrb[218].mxu1 %vm4730_vm7, %v15940_v52 }
 0x736   :  { %20671 = vmatpush3.bf16.msra.mxu1 %v23692_v26  ;;  %18233 = vmatprep.mubr.msk.f32.mxu1 %vm21660_vm0, %v21661_v4 }
 0x737   :  { %18231 = vmatprep.subr.mxu1 %v21661_v4 }
 0x73a   :  { %18232 = vmatpush3.msra.mxu1 %v23703_v30 }
 0x73b   :  { %20675 = vmatprep.subr.bf16.mxu1 %v21659_v0  ;;  %18234 = vmatmul.mubr.msk.f32.vlgmr.msra.gmra.mrb[220].mxu1 %vm4730_vm7, %v15947_v55  ;;  %v20649_v55 = vpack.c.bf16 %v5189_v43, %v5188_v41 }
 0x73c   :  { %20677 = vmatpush3.bf16.msra.mxu1 %v23688_v51  ;;  %18236 = vmatprep.mubr.msk.f32.mxu1 %vm21660_vm0, %v21661_v4 }
 0x73d   :  { %20678 = vmatprep.subr.bf16.mxu1 %v21659_v0 }
 0x73f   :  { %18237 = vmatmul.mubr.msk.f32.gmra.mrb[222].mxu1 %vm4730_vm7, %v15948_v58 }
 0x740   :  { %20680 = vmatpush3.bf16.msra.mxu1 %v23690_v13  ;;  %18239 = vmatprep.mubr.msk.f32.mxu1 %vm21660_vm0, %v21661_v4 }
 0x741   :  { %20681 = vmatprep.subr.bf16.mxu1 %v21659_v0 }
 0x743   :  { %18240 = vmatmul.mubr.msk.f32.gmra.mrb[224].mxu1 %vm4730_vm7, %v15949_v61 }
 0x744   :  { %20683 = vmatpush3.bf16.msra.mxu1 %v23692_v26  ;;  %18269 = vmatprep.mubr.msk.f32.mxu1 %vm21660_vm0, %v21661_v4 }
 0x745   :  { %18267 = vmatprep.subr.mxu1 %v21661_v4 }
 0x748   :  { %18268 = vmatpush3.msra.mxu1 %v23703_v30 }
 0x749   :  { %20687 = vmatprep.subr.bf16.mxu1 %v21659_v0  ;;  %18270 = vmatmul.mubr.msk.f32.vlgmr.msra.gmra.mrb[226].mxu1 %vm4730_vm7, %v15956_v8 }
 0x74a   :  { %20689 = vmatpush3.bf16.msra.mxu1 %v23688_v51  ;;  %18272 = vmatprep.mubr.msk.f32.mxu1 %vm21660_vm0, %v21661_v4 }
 0x74b   :  { %20690 = vmatprep.subr.bf16.mxu1 %v21659_v0 }
 0x74d   :  { %18273 = vmatmul.mubr.msk.f32.gmra.mrb[228].mxu1 %vm4730_vm7, %v15957_v35 }
 0x74e   :  { %20692 = vmatpush3.bf16.msra.mxu1 %v23690_v13  ;;  %18275 = vmatprep.mubr.msk.f32.mxu1 %vm21660_vm0, %v21661_v4 }
 0x74f   :  { %20693 = vmatprep.subr.bf16.mxu1 %v21659_v0 }
 0x751   :  { %18276 = vmatmul.mubr.msk.f32.gmra.mrb[230].mxu1 %vm4730_vm7, %v15958_v44  ;;  %v20661_v44 = vpack.c.bf16 %v5376_v34, %v5375_v31 }
 0x752   :  { %20695 = vmatpush3.bf16.msra.mxu1 %v23692_v26  ;;  %18305 = vmatprep.mubr.msk.f32.mxu1 %vm21660_vm0, %v21661_v4 }
 0x753   :  { %18303 = vmatprep.subr.mxu1 %v21661_v4 }
 0x756   :  { %18304 = vmatpush3.msra.mxu1 %v23703_v30 }
 0x757   :  { %20699 = vmatprep.subr.bf16.mxu1 %v21659_v0  ;;  %18306 = vmatmul.mubr.msk.f32.vlgmr.msra.gmra.mrb[232].mxu1 %vm4730_vm7, %v15965_v46 }
 0x758   :  { %20701 = vmatpush3.bf16.msra.mxu1 %v23688_v51  ;;  %18308 = vmatprep.mubr.msk.f32.mxu1 %vm21660_vm0, %v21661_v4 }
 0x759   :  { %20702 = vmatprep.subr.bf16.mxu1 %v21659_v0 }
 0x75b   :  { %18309 = vmatmul.mubr.msk.f32.gmra.mrb[234].mxu1 %vm4730_vm7, %v15966_v48 }
 0x75c   :  { %20704 = vmatpush3.bf16.msra.mxu1 %v23690_v13  ;;  %18311 = vmatprep.mubr.msk.f32.mxu1 %vm21660_vm0, %v21661_v4 }
 0x75d   :  { %20705 = vmatprep.subr.bf16.mxu1 %v21659_v0 }
 0x75f   :  { %18312 = vmatmul.mubr.msk.f32.gmra.mrb[236].mxu1 %vm4730_vm7, %v15967_v50 }
 0x760   :  { %20707 = vmatpush3.bf16.msra.mxu1 %v23692_v26  ;;  %18341 = vmatprep.mubr.msk.f32.mxu1 %vm21660_vm0, %v21661_v4 }
 0x761   :  { %18339 = vmatprep.subr.mxu1 %v21661_v4 }
 0x764   :  { %18340 = vmatpush3.msra.mxu1 %v23703_v30 }
 0x765   :  { %20711 = vmatprep.subr.bf16.mxu1 %v21659_v0  ;;  %18342 = vmatmul.mubr.msk.f32.vlgmr.msra.gmra.mrb[238].mxu1 %vm4730_vm7, %v15974_v53  ;;  %v5562_v53 = vld [vmem:[%s26702_s5 + $0x40] sm:$0xff] }
 0x766   :  { %20713 = vmatpush3.bf16.msra.mxu1 %v23688_v51  ;;  %18344 = vmatprep.mubr.msk.f32.mxu1 %vm21660_vm0, %v21661_v4 }
 0x767   :  { %20714 = vmatprep.subr.bf16.mxu1 %v21659_v0 }
 0x769   :  { %18345 = vmatmul.mubr.msk.f32.gmra.mrb[240].mxu1 %vm4730_vm7, %v15975_v57  ;;  %v5563_v57 = vld [vmem:[%s26702_s5 + $0x48] sm:$0xff] }
 0x76a   :  { %20716 = vmatpush3.bf16.msra.mxu1 %v23690_v13  ;;  %18347 = vmatprep.mubr.msk.f32.mxu1 %vm21660_vm0, %v21661_v4 }
 0x76b   :  { %20717 = vmatprep.subr.bf16.mxu1 %v21659_v0 }
 0x76d   :  { %18348 = vmatmul.mubr.msk.f32.gmra.mrb[242].mxu1 %vm4730_vm7, %v15976_v59 }
 0x76e   :  { %20719 = vmatpush3.bf16.msra.mxu1 %v23692_v26  ;;  %18377 = vmatprep.mubr.msk.f32.mxu1 %vm21660_vm0, %v21661_v4 }
 0x76f   :  { %18375 = vmatprep.subr.mxu1 %v21661_v4 }
 0x772   :  { %18376 = vmatpush3.msra.mxu1 %v23703_v30 }
 0x773   :  { %18378 = vmatmul.mubr.msk.f32.vlgmr.msra.gmra.mrb[244].mxu1 %vm4730_vm7, %v15983_v62  ;;  %20735 = vmatprep.subr.bf16.mxu1 %v21659_v0 }
 0x774   :  { %20737 = vmatpush3.bf16.msra.mxu1 %v23688_v51  ;;  %18380 = vmatprep.mubr.msk.f32.mxu1 %vm21660_vm0, %v21661_v4 }
 0x775   :  { %20738 = vmatprep.subr.bf16.mxu1 %v21659_v0 }
 0x777   :  { %18381 = vmatmul.mubr.msk.f32.gmra.mrb[246].mxu1 %vm4730_vm7, %v15984_v3  ;;  %v20673_v3 = vpack.c.bf16 %v5563_v57, %v5562_v53 }
 0x778   :  { %20740 = vmatpush3.bf16.msra.mxu1 %v23690_v13  ;;  %18383 = vmatprep.mubr.msk.f32.mxu1 %vm21660_vm0, %v21661_v4 }
 0x779   :  { %20741 = vmatprep.subr.bf16.mxu1 %v21659_v0 }
 0x77b   :  { %18384 = vmatmul.mubr.msk.f32.gmra.mrb[248].mxu1 %vm4730_vm7, %v15985_v6 }
 0x77c   :  { %20743 = vmatpush3.bf16.msra.mxu1 %v23692_v26  ;;  %18449 = vmatprep.mubr.msk.f32.mxu1 %vm21660_vm0, %v21661_v4 }
 0x77d   :  { %18447 = vmatprep.subr.mxu1 %v21661_v4 }
 0x780   :  { %18448 = vmatpush3.msra.mxu1 %v23703_v30 }
 0x781   :  { %20747 = vmatprep.subr.bf16.mxu1 %v21659_v0  ;;  %18450 = vmatmul.mubr.msk.f32.vlgmr.msra.gmra.mrb[250].mxu1 %vm4730_vm7, %v16001_v7 }
 0x782   :  { %20749 = vmatpush3.bf16.msra.mxu1 %v23688_v51  ;;  %18452 = vmatprep.mubr.msk.f32.mxu1 %vm21660_vm0, %v21661_v4 }
 0x783   :  { %20750 = vmatprep.subr.bf16.mxu1 %v21659_v0 }
 0x785   :  { %18453 = vmatmul.mubr.msk.f32.gmra.mrb[252].mxu1 %vm4730_vm7, %v16002_v9 }
 0x786   :  { %20752 = vmatpush3.bf16.msra.mxu1 %v23690_v13  ;;  %18455 = vmatprep.mubr.msk.f32.mxu1 %vm21660_vm0, %v21661_v4 }
 0x787   :  { %20753 = vmatprep.subr.bf16.mxu1 %v21659_v0 }
 0x789   :  { %18456 = vmatmul.mubr.msk.f32.gmra.mrb[254].mxu1 %vm4730_vm7, %v16003_v10 }
 0x78a   :  { %20755 = vmatpush3.bf16.msra.mxu1 %v23692_v26  ;;  %18485 = vmatprep.mubr.msk.f32.mxu1 %vm21660_vm0, %v21661_v4 }
 0x78b   :  { %18483 = vmatprep.subr.mxu1 %v21661_v4 }
 0x78e   :  { %18484 = vmatpush3.msra.mxu1 %v23703_v30 }
 0x78f   :  { %20759 = vmatprep.subr.bf16.mxu1 %v21659_v0  ;;  %18486 = vmatmul.mubr.msk.f32.vlgmr.msra.gmra.mrb[0].mxu1 %vm4730_vm7, %v16010_v12  ;;  %v5749_v12 = vld [vmem:[%s26702_s5 + $0x50] sm:$0xff] }
 0x790   :  { %20761 = vmatpush3.bf16.msra.mxu1 %v23688_v51  ;;  %18488 = vmatprep.mubr.msk.f32.mxu1 %vm21660_vm0, %v21661_v4 }
 0x791   :  { %20762 = vmatprep.subr.bf16.mxu1 %v21659_v0 }
 0x793   :  { %18489 = vmatmul.mubr.msk.f32.gmra.mrb[2].mxu1 %vm4730_vm7, %v16011_v15  ;;  %v5750_v15 = vld [vmem:[%s26702_s5 + $0x58] sm:$0xff] }
 0x794   :  { %20764 = vmatpush3.bf16.msra.mxu1 %v23690_v13  ;;  %18491 = vmatprep.mubr.msk.f32.mxu1 %vm21660_vm0, %v21661_v4 }
 0x795   :  { %20765 = vmatprep.subr.bf16.mxu1 %v21659_v0 }
 0x797   :  { %18492 = vmatmul.mubr.msk.f32.gmra.mrb[4].mxu1 %vm4730_vm7, %v16012_v16 }
 0x798   :  { %20767 = vmatpush3.bf16.msra.mxu1 %v23692_v26  ;;  %18521 = vmatprep.mubr.msk.f32.mxu1 %vm21660_vm0, %v21661_v4 }
 0x799   :  { %18519 = vmatprep.subr.mxu1 %v21661_v4 }
 0x79c   :  { %18520 = vmatpush3.msra.mxu1 %v23703_v30 }
 0x79d   :  { %20771 = vmatprep.subr.bf16.mxu1 %v21659_v0  ;;  %18522 = vmatmul.mubr.msk.f32.vlgmr.msra.gmra.mrb[6].mxu1 %vm4730_vm7, %v16019_v28  ;;  %v20685_v28 = vpack.c.bf16 %v5750_v15, %v5749_v12 }
 0x79e   :  { %20773 = vmatpush3.bf16.msra.mxu1 %v23688_v51  ;;  %18524 = vmatprep.mubr.msk.f32.mxu1 %vm21660_vm0, %v21661_v4 }
 0x79f   :  { %20774 = vmatprep.subr.bf16.mxu1 %v21659_v0 }
 0x7a1   :  { %18525 = vmatmul.mubr.msk.f32.gmra.mrb[8].mxu1 %vm4730_vm7, %v16020_v24 }
 0x7a2   :  { %20776 = vmatpush3.bf16.msra.mxu1 %v23690_v13  ;;  %18527 = vmatprep.mubr.msk.f32.mxu1 %vm21660_vm0, %v21661_v4 }
 0x7a3   :  { %20777 = vmatprep.subr.bf16.mxu1 %v21659_v0 }
 0x7a5   :  { %18528 = vmatmul.mubr.msk.f32.gmra.mrb[10].mxu1 %vm4730_vm7, %v16021_v19 }
 0x7a6   :  { %20779 = vmatpush3.bf16.msra.mxu1 %v23692_v26  ;;  %18557 = vmatprep.mubr.msk.f32.mxu1 %vm21660_vm0, %v21661_v4 }
 0x7a7   :  { %18555 = vmatprep.subr.mxu1 %v21661_v4 }
 0x7aa   :  { %18556 = vmatpush3.msra.mxu1 %v23703_v30 }
 0x7ab   :  { %20783 = vmatprep.subr.bf16.mxu1 %v21659_v0  ;;  %18558 = vmatmul.mubr.msk.f32.vlgmr.msra.gmra.mrb[12].mxu1 %vm4730_vm7, %v16028_v22 }
 0x7ac   :  { %20785 = vmatpush3.bf16.msra.mxu1 %v23688_v51  ;;  %18560 = vmatprep.mubr.msk.f32.mxu1 %vm21660_vm0, %v21661_v4 }
 0x7ad   :  { %20786 = vmatprep.subr.bf16.mxu1 %v21659_v0 }
 0x7af   :  { %18561 = vmatmul.mubr.msk.f32.gmra.mrb[14].mxu1 %vm4730_vm7, %v16029_v20  ;;  %v5936_v20 = vld [vmem:[%s26702_s5 + $0x60] sm:$0xff] }
 0x7b0   :  { %20788 = vmatpush3.bf16.msra.mxu1 %v23690_v13  ;;  %18563 = vmatprep.mubr.msk.f32.mxu1 %vm21660_vm0, %v21661_v4 }
 0x7b1   :  { %20789 = vmatprep.subr.bf16.mxu1 %v21659_v0 }
 0x7b3   :  { %18564 = vmatmul.mubr.msk.f32.gmra.mrb[16].mxu1 %vm4730_vm7, %v16030_v11  ;;  %v5937_v11 = vld [vmem:[%s26702_s5 + $0x68] sm:$0xff] }
 0x7b4   :  { %20791 = vmatpush3.bf16.msra.mxu1 %v23692_v26  ;;  %18593 = vmatprep.mubr.msk.f32.mxu1 %vm21660_vm0, %v21661_v4 }
 0x7b5   :  { %18591 = vmatprep.subr.mxu1 %v21661_v4 }
 0x7b8   :  { %18592 = vmatpush3.msra.mxu1 %v23703_v30 }
 0x7b9   :  { %20795 = vmatprep.subr.bf16.mxu1 %v21659_v0  ;;  %18594 = vmatmul.mubr.msk.f32.vlgmr.msra.gmra.mrb[18].mxu1 %vm4730_vm7, %v16037_v23 }
 0x7ba   :  { %20797 = vmatpush3.bf16.msra.mxu1 %v23688_v51  ;;  %18596 = vmatprep.mubr.msk.f32.mxu1 %vm21660_vm0, %v21661_v4 }
 0x7bb   :  { %20798 = vmatprep.subr.bf16.mxu1 %v21659_v0 }
 0x7bd   :  { %18597 = vmatmul.mubr.msk.f32.gmra.mrb[20].mxu1 %vm4730_vm7, %v16038_v14 }
 0x7be   :  { %20800 = vmatpush3.bf16.msra.mxu1 %v23690_v13  ;;  %18599 = vmatprep.mubr.msk.f32.mxu1 %vm21660_vm0, %v21661_v4 }
 0x7bf   :  { %20801 = vmatprep.subr.bf16.mxu1 %v21659_v0 }
 0x7c1   :  { %18600 = vmatmul.mubr.msk.f32.gmra.mrb[22].mxu1 %vm4730_vm7, %v16039_v45 }
 0x7c2   :  { %20803 = vmatpush3.bf16.msra.mxu1 %v23692_v26  ;;  %18629 = vmatprep.mubr.msk.f32.mxu1 %vm21660_vm0, %v21661_v4 }
 0x7c3   :  { %18627 = vmatprep.subr.mxu1 %v21661_v4 }
 0x7c6   :  { %18628 = vmatpush3.msra.mxu1 %v23703_v30 }
 0x7c7   :  { %18630 = vmatmul.mubr.msk.f32.vlgmr.msra.gmra.mrb[24].mxu1 %vm4730_vm7, %v16046_v56 }
 0x7c8   :  { %18632 = vmatprep.mubr.msk.f32.mxu1 %vm21660_vm0, %v21661_v4 }
 0x7cb   :  { %18633 = vmatmul.mubr.msk.f32.gmra.mrb[26].mxu1 %vm4730_vm7, %v16047_v32  ;;  %v6310_v32 = vld [vmem:[%s26702_s5 + $0x80] sm:$0xff] }
 0x7cc   :  { %18635 = vmatprep.mubr.msk.f32.mxu1 %vm21660_vm0, %v21661_v4 }
 0x7cf   :  { %18636 = vmatmul.mubr.msk.f32.gmra.mrb[28].mxu1 %vm4730_vm7, %v16048_v49 }
 0x7d6   :  { %v4806_v21 = vpop.f32.mrb[196].mxu1 }
 0x7d7   :  { %v18091_v17 = vpop.f32.mrb[197].mxu1 }
 0x7d8   :  { %v20697_v17 = vpack.c.bf16 %v5937_v11, %v5936_v20 }
 0x7da   :  { %v4811_v54 = vpop.f32.mrb[198].mxu1 }
 0x7db   :  { %v18094_v2 = vpop.f32.mrb[199].mxu1 }
 0x7de   :  { %v4816_v25 = vpop.f32.mrb[200].mxu1 }
 0x7df   :  { %v18097_v39 = vpop.f32.mrb[201].mxu1 }
 0x7e0   :  { %v6123_v39 = vld [vmem:[%s26702_s5 + $0x70] sm:$0xff] }
 0x7e1   :  { %v20709_v45 = vpack.c.bf16 %v6124_v63, %v6123_v39 }
 0x7e4   :  { %v4901_v40 = vpop.f32.mrb[202].mxu1 }
 0x7e5   :  { %18126 = vmatmul.mubr.msk.f32.vlgmr.msra.gmra.mrb[84].mxu0 %vm4598_vm2, %v4901_v40  ;;  %v18114_v5 = vpop.f32.mrb[203].mxu1 }
 0x7e6   :  { %18128 = vmatprep.mubr.msk.f32.mxu0 %vm21660_vm0, %v21661_v4  ;;  %20638 = vmatpush3.bf16.msra.mxu0 %v20637_v27 }
 0x7e7   :  { %20648 = vmatprep.subr.bf16.mxu0 %v21659_v0 }
 0x7e8   :  { %v4906_v29 = vpop.f32.mrb[204].mxu1 }
 0x7e9   :  { %18129 = vmatmul.mubr.msk.f32.gmra.mrb[86].mxu0 %vm4598_vm2, %v4906_v29  ;;  %v18117_v33 = vpop.f32.mrb[205].mxu1 }
 0x7ea   :  { %18131 = vmatprep.mubr.msk.f32.mxu0 %vm21660_vm0, %v21661_v4  ;;  %v6311_v33 = vld [vmem:[%s26702_s5 + $0x88] sm:$0xff] }
 0x7eb   :  { %v20721_v41 = vpack.c.bf16 %v6311_v33, %v6310_v32  ;;  %v6684_v32 = vld [vmem:[%s26702_s5 + $0xa0] sm:$0xff]  ;;  %v6685_v33 = vld [vmem:[%s26702_s5 + $0xa8] sm:$0xff] }
 0x7ec   :  { %v4911_v47 = vpop.f32.mrb[206].mxu1 }
 0x7ed   :  { %18132 = vmatmul.mubr.msk.f32.gmra.mrb[88].mxu0 %vm4598_vm2, %v4911_v47  ;;  %v18120_v52 = vpop.f32.mrb[207].mxu1 }
 0x7ee   :  { %18138 = vmatprep.mubr.msk.f32.mxu0 %vm21660_vm0, %v21661_v4 }
 0x7f1   :  { %18139 = vmatmul.mubr.msk.f32.vlgmr.msra.gmra.mrb[84].mxu0 %vm4598_vm2, %v4806_v21 }
 0x7f2   :  { %18141 = vmatprep.mubr.msk.f32.mxu0 %vm21660_vm0, %v21661_v4  ;;  %v5174_v58 = vpop.f32.mrb[208].mxu1  ;;  %20650 = vmatpush3.bf16.msra.mxu0 %v20649_v55 }
 0x7f3   :  { %v18163_v61 = vpop.f32.mrb[209].mxu1  ;;  %20660 = vmatprep.subr.bf16.mxu0 %v21659_v0 }
 0x7f5   :  { %18142 = vmatmul.mubr.msk.f32.gmra.mrb[86].mxu0 %vm4598_vm2, %v4811_v54 }
 0x7f6   :  { %18144 = vmatprep.mubr.msk.f32.mxu0 %vm21660_vm0, %v21661_v4  ;;  %v5179_v8 = vpop.f32.mrb[210].mxu1 }
 0x7f7   :  { %v18166_v18 = vpop.f32.mrb[211].mxu1 }
 0x7f9   :  { %18145 = vmatmul.mubr.msk.f32.gmra.mrb[88].mxu0 %vm4598_vm2, %v4816_v25 }
 0x7fa   :  { %18174 = vmatprep.mubr.msk.f32.mxu0 %vm21660_vm0, %v21661_v4  ;;  %v5184_v35 = vpop.f32.mrb[212].mxu1 }
 0x7fb   :  { %v18169_v46 = vpop.f32.mrb[213].mxu1 }
 0x7fd   :  { %18175 = vmatmul.mubr.msk.f32.vlgmr.msra.gmra.mrb[84].mxu0 %vm4598_vm2, %v5174_v58 }
 0x7fe   :  { %18177 = vmatprep.mubr.msk.f32.mxu0 %vm21660_vm0, %v21661_v4  ;;  %20662 = vmatpush3.bf16.msra.mxu0 %v20661_v44  ;;  %v6498_v44 = vld [vmem:[%s26702_s5 + $0x98] sm:$0xff] }
 0x7ff   :  { %20672 = vmatprep.subr.bf16.mxu0 %v21659_v0 }
 0x800   :  { %v5361_v48 = vpop.f32.mrb[214].mxu1 }
 0x801   :  { %18178 = vmatmul.mubr.msk.f32.gmra.mrb[86].mxu0 %vm4598_vm2, %v5179_v8  ;;  %v18199_v50 = vpop.f32.mrb[215].mxu1 }
 0x802   :  { %18180 = vmatprep.mubr.msk.f32.mxu0 %vm21660_vm0, %v21661_v4 }
 0x804   :  { %v5366_v59 = vpop.f32.mrb[216].mxu1 }
 0x805   :  { %18181 = vmatmul.mubr.msk.f32.gmra.mrb[88].mxu0 %vm4598_vm2, %v5184_v35  ;;  %v18202_v62 = vpop.f32.mrb[217].mxu1  ;;  %v6497_v35 = vld [vmem:[%s26702_s5 + $0x90] sm:$0xff] }
 0x806   :  { %18210 = vmatprep.mubr.msk.f32.mxu0 %vm21660_vm0, %v21661_v4  ;;  %v20733_v46 = vpack.c.bf16 %v6498_v44, %v6497_v35  ;;  %v7245_v35 = vld [vmem:[%s26702_s5 + $0xd0] sm:$0xff]  ;;  %v7246_v44 = vld [vmem:[%s26702_s5 + $0xd8] sm:$0xff] }
 0x808   :  { %v5371_v6 = vpop.f32.mrb[218].mxu1 }
 0x809   :  { %18211 = vmatmul.mubr.msk.f32.vlgmr.msra.gmra.mrb[84].mxu0 %vm4598_vm2, %v5361_v48  ;;  %v18205_v7 = vpop.f32.mrb[219].mxu1 }
 0x80a   :  { %18213 = vmatprep.mubr.msk.f32.mxu0 %vm21660_vm0, %v21661_v4  ;;  %20674 = vmatpush3.bf16.msra.mxu0 %v20673_v3 }
 0x80b   :  { %20684 = vmatprep.subr.bf16.mxu0 %v21659_v0 }
 0x80d   :  { %18214 = vmatmul.mubr.msk.f32.gmra.mrb[86].mxu0 %vm4598_vm2, %v5366_v59 }
 0x80e   :  { %18216 = vmatprep.mubr.msk.f32.mxu0 %vm21660_vm0, %v21661_v4  ;;  %v5548_v9 = vpop.f32.mrb[220].mxu1 }
 0x80f   :  { %v18235_v10 = vpop.f32.mrb[221].mxu1 }
 0x811   :  { %18217 = vmatmul.mubr.msk.f32.gmra.mrb[88].mxu0 %vm4598_vm2, %v5371_v6 }
 0x812   :  { %18246 = vmatprep.mubr.msk.f32.mxu0 %vm21660_vm0, %v21661_v4  ;;  %v5553_v16 = vpop.f32.mrb[222].mxu1 }
 0x813   :  { %v18238_v24 = vpop.f32.mrb[223].mxu1 }
 0x815   :  { %18247 = vmatmul.mubr.msk.f32.vlgmr.msra.gmra.mrb[84].mxu0 %vm4598_vm2, %v5548_v9 }
 0x816   :  { %18249 = vmatprep.mubr.msk.f32.mxu0 %vm21660_vm0, %v21661_v4  ;;  %v5558_v19 = vpop.f32.mrb[224].mxu1  ;;  %20686 = vmatpush3.bf16.msra.mxu0 %v20685_v28 }
 0x817   :  { %v18241_v22 = vpop.f32.mrb[225].mxu1  ;;  %20696 = vmatprep.subr.bf16.mxu0 %v21659_v0 }
 0x819   :  { %18250 = vmatmul.mubr.msk.f32.gmra.mrb[86].mxu0 %vm4598_vm2, %v5553_v16 }
 0x81a   :  { %18252 = vmatprep.mubr.msk.f32.mxu0 %vm21660_vm0, %v21661_v4 }
 0x81c   :  { %v5735_v23 = vpop.f32.mrb[226].mxu1 }
 0x81d   :  { %18253 = vmatmul.mubr.msk.f32.gmra.mrb[88].mxu0 %vm4598_vm2, %v5558_v19  ;;  %v18271_v21 = vpop.f32.mrb[227].mxu1 }
 0x81e   :  { %18282 = vmatprep.mubr.msk.f32.mxu0 %vm21660_vm0, %v21661_v4 }
 0x820   :  { %v5740_v54 = vpop.f32.mrb[228].mxu1 }
 0x821   :  { %18283 = vmatmul.mubr.msk.f32.vlgmr.msra.gmra.mrb[84].mxu0 %vm4598_vm2, %v5735_v23  ;;  %v18274_v2 = vpop.f32.mrb[229].mxu1 }
 0x822   :  { %18285 = vmatprep.mubr.msk.f32.mxu0 %vm21660_vm0, %v21661_v4  ;;  %20698 = vmatpush3.bf16.msra.mxu0 %v20697_v17 }
 0x823   :  { %20708 = vmatprep.subr.bf16.mxu0 %v21659_v0 }
 0x824   :  { %v5745_v14 = vpop.f32.mrb[230].mxu1 }
 0x825   :  { %18286 = vmatmul.mubr.msk.f32.gmra.mrb[86].mxu0 %vm4598_vm2, %v5740_v54  ;;  %v18277_v25 = vpop.f32.mrb[231].mxu1 }
 0x826   :  { %18288 = vmatprep.mubr.msk.f32.mxu0 %vm21660_vm0, %v21661_v4 }
 0x829   :  { %18289 = vmatmul.mubr.msk.f32.gmra.mrb[88].mxu0 %vm4598_vm2, %v5745_v14 }
 0x82a   :  { %v5922_v42 = vpop.f32.mrb[232].mxu1  ;;  %18318 = vmatprep.mubr.msk.f32.mxu0 %vm21660_vm0, %v21661_v4 }
 0x82b   :  { %v18307_v27 = vpop.f32.mrb[233].mxu1 }
 0x82d   :  { %18319 = vmatmul.mubr.msk.f32.vlgmr.msra.gmra.mrb[84].mxu0 %vm4598_vm2, %v5922_v42 }
 0x82e   :  { %v5927_v40 = vpop.f32.mrb[234].mxu1  ;;  %18321 = vmatprep.mubr.msk.f32.mxu0 %vm21660_vm0, %v21661_v4  ;;  %20710 = vmatpush3.bf16.msra.mxu0 %v20709_v45 }
 0x82f   :  { %v18310_v56 = vpop.f32.mrb[235].mxu1  ;;  %20720 = vmatprep.subr.bf16.mxu0 %v21659_v0 }
 0x831   :  { %18322 = vmatmul.mubr.msk.f32.gmra.mrb[86].mxu0 %vm4598_vm2, %v5927_v40 }
 0x832   :  { %v5932_v5 = vpop.f32.mrb[236].mxu1  ;;  %18324 = vmatprep.mubr.msk.f32.mxu0 %vm21660_vm0, %v21661_v4 }
 0x833   :  { %v18313_v29 = vpop.f32.mrb[237].mxu1 }
 0x835   :  { %18325 = vmatmul.mubr.msk.f32.gmra.mrb[88].mxu0 %vm4598_vm2, %v5932_v5 }
 0x836   :  { %18354 = vmatprep.mubr.msk.f32.mxu0 %vm21660_vm0, %v21661_v4 }
 0x838   :  { %v6109_v43 = vpop.f32.mrb[238].mxu1 }
 0x839   :  { %18355 = vmatmul.mubr.msk.f32.vlgmr.msra.gmra.mrb[84].mxu0 %vm4598_vm2, %v6109_v43  ;;  %v18343_v47 = vpop.f32.mrb[239].mxu1 }
 0x83a   :  { %18357 = vmatprep.mubr.msk.f32.mxu0 %vm21660_vm0, %v21661_v4  ;;  %20722 = vmatpush3.bf16.msra.mxu0 %v20721_v41  ;;  %v20745_v41 = vpack.c.bf16 %v6685_v33, %v6684_v32 }
 0x83b   :  { %20723 = vmatprep.subr.bf16.mxu0 %v21659_v0 }
 0x83c   :  { %v6114_v49 = vpop.f32.mrb[240].mxu1 }
 0x83d   :  { %18358 = vmatmul.mubr.msk.f32.gmra.mrb[86].mxu0 %vm4598_vm2, %v6114_v49  ;;  %v18346_v52 = vpop.f32.mrb[241].mxu1 }
 0x83e   :  { %18360 = vmatprep.mubr.msk.f32.mxu0 %vm21660_vm0, %v21661_v4 }
 0x840   :  { %v6119_v55 = vpop.f32.mrb[242].mxu1 }
 0x841   :  { %18361 = vmatmul.mubr.msk.f32.gmra.mrb[88].mxu0 %vm4598_vm2, %v6119_v55  ;;  %v18349_v58 = vpop.f32.mrb[243].mxu1  ;;  %v6871_v55 = vld [vmem:[%s26702_s5 + $0xb0] sm:$0xff] }
 0x842   :  { %18390 = vmatprep.mubr.msk.f32.mxu0 %vm21660_vm0, %v21661_v4  ;;  %v6872_v58 = vld [vmem:[%s26702_s5 + $0xb8] sm:$0xff] }
 0x846   :  { %v6296_v61 = vpop.f32.mrb[244].mxu1 }
 0x847   :  { %18391 = vmatmul.mubr.msk.f32.vlgmr.msra.gmra.mrb[84].mxu0 %vm4598_vm2, %v6296_v61  ;;  %v18379_v8 = vpop.f32.mrb[245].mxu1 }
 0x848   :  { %20725 = vmatpush3.bf16.msra.mxu0 %v23688_v51  ;;  %18393 = vmatprep.mubr.msk.f32.mxu0 %vm21660_vm0, %v21661_v4 }
 0x849   :  { %20726 = vmatprep.subr.bf16.mxu0 %v21659_v0 }
 0x84a   :  { %v6301_v18 = vpop.f32.mrb[246].mxu1 }
 0x84b   :  { %18394 = vmatmul.mubr.msk.f32.gmra.mrb[86].mxu0 %vm4598_vm2, %v6301_v18  ;;  %v18382_v31 = vpop.f32.mrb[247].mxu1  ;;  %v20757_v18 = vpack.c.bf16 %v6872_v58, %v6871_v55  ;;  %v16055_v55 = vld [vmem:[%s26699_s10 + $0x10] sm:$0xff] }
 0x84c   :  { %20728 = vmatpush3.bf16.msra.mxu0 %v23690_v13  ;;  %18396 = vmatprep.mubr.msk.f32.mxu0 %vm21660_vm0, %v21661_v4  ;;  %v15992_v13 = vld [vmem:[%s26701_s4 + $0xd8] sm:$0xff]  ;;  %v7058_v31 = vld [vmem:[%s26702_s5 + $0xc0] sm:$0xff]  ;;  %v7760_v58 = vrot.slane %v16055_v55, %v23678_v60 }
 0x84d   :  { %20729 = vmatprep.subr.bf16.mxu0 %v21659_v0 }
 0x84e   :  { %v6306_v34 = vpop.f32.mrb[248].mxu1 }
 0x84f   :  { %18397 = vmatmul.mubr.msk.f32.gmra.mrb[88].mxu0 %vm4598_vm2, %v6306_v34  ;;  %v18385_v51 = vpop.f32.mrb[249].mxu1  ;;  %v7059_v34 = vld [vmem:[%s26702_s5 + $0xc8] sm:$0xff] }
 0x850   :  { %20731 = vmatpush3.bf16.msra.mxu0 %v23692_v26  ;;  %18413 = vmatprep.mubr.msk.f32.mxu0 %vm21660_vm0, %v21661_v4  ;;  %v15993_v26 = vld [vmem:[%s26701_s4 + $0xe0] sm:$0xff]  ;;  %v20769_v51 = vpack.c.bf16 %v7059_v34, %v7058_v31  ;;  %v7767_v34 = vrot.slane %v16055_v55, %v23684_v1  ;;  %v16091_v55 = vld [vmem:[%s26703_s6 + $0x78] sm:$0xff] }
 0x851   :  { %18411 = vmatprep.subr.mxu0 %v21661_v4 }
 0x854   :  { %18412 = vmatpush3.msra.mxu0 %v23703_v30  ;;  %v15994_v30 = vld [vmem:[%s26701_s4 + $0xe8] sm:$0xff]  ;;  %v6670_v48 = vpop.f32.mrb[250].mxu1 }
 0x855   :  { %18414 = vmatmul.mubr.msk.f32.vlgmr.msra.gmra.mrb[90].mxu0 %vm4730_vm7, %v15992_v13  ;;  %20732 = vmatprep.subr.bf16.mxu0 %v21659_v0  ;;  %v18451_v50 = vpop.f32.mrb[251].mxu1  ;;  %v20781_v13 = vpack.c.bf16 %v7246_v44, %v7245_v35 }
 0x856   :  { %18416 = vmatprep.mubr.msk.f32.mxu0 %vm21660_vm0, %v21661_v4  ;;  %20734 = vmatpush3.bf16.msra.mxu0 %v20733_v46  ;;  %v7432_v46 = vld [vmem:[%s26702_s5 + $0xe0] sm:$0xff]  ;;  %v7620_v50 = vld [vmem:[%s26702_s5 + $0xf8] sm:$0xff] }
 0x857   :  { %20744 = vmatprep.subr.bf16.mxu0 %v21659_v0 }
 0x858   :  { %v6675_v53 = vpop.f32.mrb[252].mxu1 }
 0x859   :  { %18417 = vmatmul.mubr.msk.f32.gmra.mrb[92].mxu0 %vm4730_vm7, %v15993_v26  ;;  %v18454_v57 = vpop.f32.mrb[253].mxu1  ;;  %v7433_v26 = vld [vmem:[%s26702_s5 + $0xe8] sm:$0xff] }
 0x85a   :  { %18419 = vmatprep.mubr.msk.f32.mxu0 %vm21660_vm0, %v21661_v4  ;;  %v7780_v57 = vld [vmem:[%s26703_s6] sm:$0xff] }
 0x85b   :  { %18657 = vmatprep.mubr.msk.f32.mxu1 %vm7784_vm8, %v7780_v57 }
 0x85c   :  { %v6680_v59 = vpop.f32.mrb[254].mxu1 }
 0x85d   :  { %18420 = vmatmul.mubr.msk.f32.gmra.mrb[94].mxu0 %vm4730_vm7, %v15994_v30  ;;  %v18457_v62 = vpop.f32.mrb[255].mxu1  ;;  %v20793_v30 = vpack.c.bf16 %v7433_v26, %v7432_v46 }
 0x85e   :  { %18426 = vmatprep.mubr.msk.f32.mxu0 %vm21660_vm0, %v21661_v4 }
 0x862   :  { %v6857_v3 = vpop.f32.mrb[0].mxu1 }
 0x863   :  { %v18487_v6 = vpop.f32.mrb[1].mxu1 }
 0x866   :  { %v24260_v7 = vpop.f32.mrb[2].mxu1 }
 0x867   :  { %v18490_v9 = vpop.f32.mrb[3].mxu1 }
 0x86a   :  { %v24262_v10 = vpop.f32.mrb[4].mxu1 }
 0x86b   :  { %v18493_v12 = vpop.f32.mrb[5].mxu1 }
 0x870   :  { %v24264_v15 = vpop.f32.mrb[6].mxu1 }
 0x871   :  { %v18523_v16 = vpop.f32.mrb[7].mxu1 }
 0x874   :  { %v24266_v28 = vpop.f32.mrb[8].mxu1 }
 0x875   :  { %v18526_v24 = vpop.f32.mrb[9].mxu1 }
 0x878   :  { %v24268_v19 = vpop.f32.mrb[10].mxu1 }
 0x879   :  { %v18529_v22 = vpop.f32.mrb[11].mxu1 }
 0x87e   :  { %v24270_v20 = vpop.f32.mrb[12].mxu1 }
 0x87f   :  { %v18559_v11 = vpop.f32.mrb[13].mxu1 }
 0x882   :  { %v24272_v23 = vpop.f32.mrb[14].mxu1 }
 0x883   :  { %v18562_v21 = vpop.f32.mrb[15].mxu1 }
 0x886   :  { %v24274_v17 = vpop.f32.mrb[16].mxu1 }
 0x887   :  { %v18565_v54 = vpop.f32.mrb[17].mxu1 }
 0x88c   :  { %v24276_v2 = vpop.f32.mrb[18].mxu1 }
 0x88d   :  { %v18595_v14 = vpop.f32.mrb[19].mxu1 }
 0x890   :  { %v24278_v25 = vpop.f32.mrb[20].mxu1 }
 0x891   :  { %v18598_v39 = vpop.f32.mrb[21].mxu1 }
 0x894   :  { %v24280_v63 = vpop.f32.mrb[22].mxu1 }
 0x895   :  { %v18601_v42 = vpop.f32.mrb[23].mxu1 }
 0x89a   :  { %v24282_v45 = vpop.f32.mrb[24].mxu1 }
 0x89b   :  { %v18631_v27 = vpop.f32.mrb[25].mxu1 }
 0x89e   :  { %v24284_v40 = vpop.f32.mrb[26].mxu1 }
 0x89f   :  { %v18634_v56 = vpop.f32.mrb[27].mxu1 }
 0x8a2   :  { %v24286_v5 = vpop.f32.mrb[28].mxu1 }
 0x8a3   :  { %v18637_v29 = vpop.f32.mrb[29].mxu1 }
 0x928   :  { %v6483_v43 = vpop.f32.mrb[90].mxu0 }
 0x929   :  { %18427 = vmatmul.mubr.msk.f32.vlgmr.msra.gmra.mrb[84].mxu0 %vm4598_vm2, %v6483_v43  ;;  %v18415_v47 = vpop.f32.mrb[91].mxu0 }
 0x92a   :  { %18429 = vmatprep.mubr.msk.f32.mxu0 %vm21660_vm0, %v21661_v4  ;;  %20746 = vmatpush3.bf16.msra.mxu0 %v20745_v41 }
 0x92b   :  { %20756 = vmatprep.subr.bf16.mxu0 %v21659_v0 }
 0x92c   :  { %v6488_v49 = vpop.f32.mrb[92].mxu0 }
 0x92d   :  { %18430 = vmatmul.mubr.msk.f32.gmra.mrb[86].mxu0 %vm4598_vm2, %v6488_v49  ;;  %v18418_v52 = vpop.f32.mrb[93].mxu0 }
 0x92e   :  { %18432 = vmatprep.mubr.msk.f32.mxu0 %vm21660_vm0, %v21661_v4 }
 0x930   :  { %v6493_v61 = vpop.f32.mrb[94].mxu0 }
 0x931   :  { %18433 = vmatmul.mubr.msk.f32.gmra.mrb[88].mxu0 %vm4598_vm2, %v6493_v61  ;;  %v18421_v8 = vpop.f32.mrb[95].mxu0 }
 0x932   :  { %18462 = vmatprep.mubr.msk.f32.mxu0 %vm21660_vm0, %v21661_v4 }
 0x935   :  { %18463 = vmatmul.mubr.msk.f32.vlgmr.msra.gmra.mrb[84].mxu0 %vm4598_vm2, %v6670_v48  ;;  %v7619_v48 = vld [vmem:[%s26702_s5 + $0xf0] sm:$0xff] }
 0x936   :  { %18465 = vmatprep.mubr.msk.f32.mxu0 %vm21660_vm0, %v21661_v4  ;;  %20758 = vmatpush3.bf16.msra.mxu0 %v20757_v18 }
 0x937   :  { %20768 = vmatprep.subr.bf16.mxu0 %v21659_v0 }
 0x939   :  { %18466 = vmatmul.mubr.msk.f32.gmra.mrb[86].mxu0 %vm4598_vm2, %v6675_v53  ;;  %v20805_v53 = vpack.c.bf16 %v7620_v50, %v7619_v48 }
 0x93a   :  { %18468 = vmatprep.mubr.msk.f32.mxu0 %vm21660_vm0, %v21661_v4 }
 0x93d   :  { %18469 = vmatmul.mubr.msk.f32.gmra.mrb[88].mxu0 %vm4598_vm2, %v6680_v59 }
 0x93e   :  { %18498 = vmatprep.mubr.msk.f32.mxu0 %vm21660_vm0, %v21661_v4 }
 0x941   :  { %18499 = vmatmul.mubr.msk.f32.vlgmr.msra.gmra.mrb[84].mxu0 %vm4598_vm2, %v6857_v3 }
 0x942   :  { %18501 = vmatprep.mubr.msk.f32.mxu0 %vm21660_vm0, %v21661_v4  ;;  %20770 = vmatpush3.bf16.msra.mxu0 %v20769_v51 }
 0x943   :  { %20780 = vmatprep.subr.bf16.mxu0 %v21659_v0 }
 0x945   :  { %18502 = vmatmul.mubr.msk.f32.gmra.mrb[86].mxu0 %vm4598_vm2, %v24260_v7 }
 0x946   :  { %18504 = vmatprep.mubr.msk.f32.mxu0 %vm21660_vm0, %v21661_v4 }
 0x949   :  { %18505 = vmatmul.mubr.msk.f32.gmra.mrb[88].mxu0 %vm4598_vm2, %v24262_v10 }
 0x94a   :  { %18534 = vmatprep.mubr.msk.f32.mxu0 %vm21660_vm0, %v21661_v4 }
 0x94d   :  { %18535 = vmatmul.mubr.msk.f32.vlgmr.msra.gmra.mrb[84].mxu0 %vm4598_vm2, %v24264_v15 }
 0x94e   :  { %18537 = vmatprep.mubr.msk.f32.mxu0 %vm21660_vm0, %v21661_v4  ;;  %20782 = vmatpush3.bf16.msra.mxu0 %v20781_v13 }
 0x94f   :  { %20792 = vmatprep.subr.bf16.mxu0 %v21659_v0 }
 0x951   :  { %18538 = vmatmul.mubr.msk.f32.gmra.mrb[86].mxu0 %vm4598_vm2, %v24266_v28 }
 0x952   :  { %18540 = vmatprep.mubr.msk.f32.mxu0 %vm21660_vm0, %v21661_v4 }
 0x955   :  { %18541 = vmatmul.mubr.msk.f32.gmra.mrb[88].mxu0 %vm4598_vm2, %v24268_v19 }
 0x956   :  { %18570 = vmatprep.mubr.msk.f32.mxu0 %vm21660_vm0, %v21661_v4 }
 0x959   :  { %18571 = vmatmul.mubr.msk.f32.vlgmr.msra.gmra.mrb[84].mxu0 %vm4598_vm2, %v24270_v20 }
 0x95a   :  { %18573 = vmatprep.mubr.msk.f32.mxu0 %vm21660_vm0, %v21661_v4  ;;  %20794 = vmatpush3.bf16.msra.mxu0 %v20793_v30 }
 0x95b   :  { %20804 = vmatprep.subr.bf16.mxu0 %v21659_v0 }
 0x95d   :  { %18574 = vmatmul.mubr.msk.f32.gmra.mrb[86].mxu0 %vm4598_vm2, %v24272_v23  ;;  %v4629_v23 = vadd.s32 16, %v21886_v37 }
 0x95e   :  { %18576 = vmatprep.mubr.msk.f32.mxu0 %vm21660_vm0, %v21661_v4 }
 0x95f   :  { %vm7733_vm10 = vcmp.lt.s32.totalorder %v4629_v23, 18  ;;  %v7883_v23 = vld [vmem:[%s26704_s7 + $0x8] sm:$0xff] }
 0x961   :  { %18577 = vmatmul.mubr.msk.f32.gmra.mrb[88].mxu0 %vm4598_vm2, %v24274_v17 }
 0x962   :  { %18606 = vmatprep.mubr.msk.f32.mxu0 %vm21660_vm0, %v21661_v4 }
 0x965   :  { %18607 = vmatmul.mubr.msk.f32.vlgmr.msra.gmra.mrb[84].mxu0 %vm4598_vm2, %v24276_v2 }
 0x966   :  { %18609 = vmatprep.mubr.msk.f32.mxu0 %vm21660_vm0, %v21661_v4  ;;  %20806 = vmatpush3.bf16.msra.mxu0 %v20805_v53 }
 0x969   :  { %18610 = vmatmul.mubr.msk.f32.gmra.mrb[86].mxu0 %vm4598_vm2, %v24278_v25 }
 0x96a   :  { %18612 = vmatprep.mubr.msk.f32.mxu0 %vm21660_vm0, %v21661_v4 }
 0x96d   :  { %18613 = vmatmul.mubr.msk.f32.gmra.mrb[88].mxu0 %vm4598_vm2, %v24280_v63 }
 0x96e   :  { %18642 = vmatprep.mubr.msk.f32.mxu0 %vm21660_vm0, %v21661_v4 }
 0x971   :  { %18643 = vmatmul.mubr.msk.f32.vlgmr.msra.gmra.mrb[84].mxu0 %vm4598_vm2, %v24282_v45 }
 0x972   :  { %18645 = vmatprep.mubr.msk.f32.mxu0 %vm21660_vm0, %v21661_v4 }
 0x975   :  { %18646 = vmatmul.mubr.msk.f32.gmra.mrb[86].mxu0 %vm4598_vm2, %v24284_v40 }
 0x976   :  { %18648 = vmatprep.mubr.msk.f32.mxu0 %vm21660_vm0, %v21661_v4 }
 0x979   :  { %18649 = vmatmul.mubr.msk.f32.gmra.mrb[88].mxu0 %vm4598_vm2, %v24286_v5 }
 0xa44   :  { %v7696_v59 = vpop.f32.mrb[84].mxu0 }
 0xa45   :  { %v18644_v62 = vpop.f32.mrb[85].mxu0  ;;  %v7716_v6 = vsel %vm7715_vm9, %v7696_v59, 0.0 }
 0xa48   :  { %v7701_v3 = vpop.f32.mrb[86].mxu0 }
 0xa49   :  { %v7717_v7 = vsel %vm7715_vm9, %v7701_v3, 0.0  ;;  %v18647_v9 = vpop.f32.mrb[87].mxu0 }
 0xa4a   :  { %v7718_v10 = vadd.f32 %v7717_v7, %v7716_v6  ;;  %v7782_v6 = vld [vmem:[%s26703_s6 + $0x10] sm:$0xff]  ;;  %v7988_v7 = vld [vmem:[%s26704_s7 + $0x20] sm:$0xff]  ;;  %v7989_v9 = vld [vmem:[%s26704_s7 + $0x28] sm:$0xff] }
 0xa4c   :  { %v7706_v12 = vpop.f32.mrb[88].mxu0 }
 0xa4d   :  { %v7719_v15 = vsel %vm7715_vm9, %v7706_v12, 0.0  ;;  %v18650_v16 = vpop.f32.mrb[89].mxu0 }
 0xa4e   :  { %v7720_v28 = vadd.f32 %v7719_v15, %v7718_v10  ;;  %v7783_v10 = vld [vmem:[%s26703_s6 + $0x18] sm:$0xff]  ;;  %v20815_v15 = vpack.c.bf16 %v7989_v9, %v7988_v7  ;;  %v7990_v16 = vld [vmem:[%s26704_s7 + $0x30] sm:$0xff]  ;;  %v16160_v9 = vld [vmem:[%s26703_s6 + $0x120] sm:$0xff] }
 0xa4f   :  { %v16151_v7 = vld [vmem:[%s26703_s6 + $0x118] sm:$0xff] }
 0xa50   :  { %v7721_v24 = vrot.slane %v7720_v28, 4 }
 0xa52   :  { %v7722_v19 = vadd.f32 %v7721_v24, %v7720_v28  ;;  %v7991_v28 = vld [vmem:[%s26704_s7 + $0x38] sm:$0xff]  ;;  %v16061_v24 = vld [vmem:[%s26703_s6 + $0x28] sm:$0xff] }
 0xa54   :  { %v7723_v22 = vrot.slane %v7722_v19, 2 }
 0xa56   :  { %v7724_v20 = vadd.f32 %v7723_v22, %v7722_v19  ;;  %v16062_v19 = vld [vmem:[%s26703_s6 + $0x30] sm:$0xff]  ;;  %v20819_v22 = vpack.c.bf16 %v7991_v28, %v7990_v16  ;;  %v16172_v16 = vld [vmem:[%s26703_s6 + $0x140] sm:$0xff]  ;;  %v16173_v28 = vld [vmem:[%s26703_s6 + $0x148] sm:$0xff] }
 0xa58   :  { %v7725_v11 = vrot.slane %v7724_v20, 1 }
 0xa5a   :  { %v7726_v21 = vadd.f32 %v7725_v11, %v7724_v20  ;;  %v16063_v20 = vld [vmem:[%s26703_s6 + $0x38] sm:$0xff]  ;;  %v7882_v11 = vld [vmem:[%s26704_s7] sm:$0xff] }
 0xa5c   :  { %v7727_v17 = vmul.f32 0.055555556, %v7726_v21  ;;  %v20823_v21 = vpack.c.bf16 %v7883_v23, %v7882_v11  ;;  %v16186_v11 = vld [vmem:[%s26703_s6 + $0x170] sm:$0xff]  ;;  %v16187_v23 = vld [vmem:[%s26703_s6 + $0x178] sm:$0xff] }
 0xa5e   :  { %v7728_v54 = vsub.f32 %v7696_v59, %v7727_v17  ;;  %v7729_v2 = vsub.f32 %v7701_v3, %v7727_v17  ;;  %v7730_v14 = vsub.f32 %v7706_v12, %v7727_v17  ;;  %v7781_v3 = vld [vmem:[%s26703_s6 + $0x8] sm:$0xff]  ;;  %v16060_v12 = vld [vmem:[%s26703_s6 + $0x20] sm:$0xff]  ;;  %20824 = vmatprep.subr.bf16.mxu0 %v20823_v21  ;;  %v7884_v17 = vld [vmem:[%s26704_s7 + $0x10] sm:$0xff] }
 0xa5f   :  { %20826 = vmatpush3.bf16.msra.mxu0 %v20823_v21  ;;  %v16196_v21 = vld [vmem:[%s26703_s6 + $0x180] sm:$0xff] }
 0xa60   :  { %v7736_v25 = vsel %vm7733_vm10, %v7730_v14, 0.0  ;;  %v7737_v39 = vmul.f32 %v7728_v54, %v7728_v54  ;;  %v7738_v63 = vmul.f32 %v7729_v2, %v7729_v2 }
 0xa61   :  { %v7739_v42 = vmul.f32 %v7736_v25, %v7736_v25  ;;  %v8289_v25 = vld [vmem:[%s26704_s7 + $0x48] sm:$0xff] }
 0xa62   :  { %v7740_v45 = vsel %vm7715_vm9, %v7737_v39, 0.0  ;;  %v7741_v27 = vsel %vm7715_vm9, %v7738_v63, 0.0 }
 0xa63   :  { %v7742_v40 = vadd.f32 %v7741_v27, %v7740_v45  ;;  %v7743_v56 = vsel %vm7715_vm9, %v7739_v42, 0.0 }
 0xa65   :  { %v7744_v5 = vadd.f32 %v7743_v56, %v7742_v40 }
 0xa67   :  { %v7745_v29 = vrot.slane %v7744_v5, 4 }
 0xa69   :  { %v7746_v32 = vadd.f32 %v7745_v29, %v7744_v5 }
 0xa6b   :  { %v7747_v33 = vrot.slane %v7746_v32, 2 }
 0xa6d   :  { %v7748_v41 = vadd.f32 %v7747_v33, %v7746_v32  ;;  %v16076_v32 = vld [vmem:[%s26703_s6 + $0x40] sm:$0xff]  ;;  %v16077_v33 = vld [vmem:[%s26703_s6 + $0x48] sm:$0xff] }
 0xa6f   :  { %v7749_v43 = vrot.slane %v7748_v41, 1 }
 0xa71   :  { %v7750_v47 = vadd.f32 %v7749_v43, %v7748_v41  ;;  %v16078_v41 = vld [vmem:[%s26703_s6 + $0x50] sm:$0xff]  ;;  %v16079_v43 = vld [vmem:[%s26703_s6 + $0x58] sm:$0xff] }
 0xa73   :  { %v7751_v49 = vmul.f32 0.055555556, %v7750_v47  ;;  %v16088_v47 = vld [vmem:[%s26703_s6 + $0x60] sm:$0xff] }
 0xa75   :  { %v7752_v52 = vadd.f32 1e-05, %v7751_v49  ;;  %v16089_v49 = vld [vmem:[%s26703_s6 + $0x68] sm:$0xff] }
 0xa77   :  { %21655 = vrsqrt.f32 %v7752_v52  ;;  %v16090_v52 = vld [vmem:[%s26703_s6 + $0x70] sm:$0xff] }
 0xa81   :  { %v21656_v61 = vpop.eup %21655 }
 0xa82   :  { %v7754_v8 = vmul.f32 %v21656_v61, %v7728_v54  ;;  %v7755_v18 = vmul.f32 %v21656_v61, %v7729_v2  ;;  %v7756_v31 = vmul.f32 %v21656_v61, %v7730_v14  ;;  %v7885_v54 = vld [vmem:[%s26704_s7 + $0x18] sm:$0xff]  ;;  %v8288_v14 = vld [vmem:[%s26704_s7 + $0x40] sm:$0xff]  ;;  %v16101_v61 = vld [vmem:[%s26703_s6 + $0x88] sm:$0xff] }
 0xa83   :  { %v20827_v2 = vpack.c.bf16 %v7885_v54, %v7884_v17  ;;  %v20835_v63 = vpack.c.bf16 %v8289_v25, %v8288_v14  ;;  %v16197_v17 = vld [vmem:[%s26703_s6 + $0x188] sm:$0xff]  ;;  %v16198_v54 = vld [vmem:[%s26703_s6 + $0x190] sm:$0xff]  ;;  %v8291_v14 = vld [vmem:[%s26704_s7 + $0x58] sm:$0xff] }
 0xa84   :  { %v7761_v51 = vmul.f32 %v7760_v58, %v7754_v8  ;;  %v7762_v35 = vmul.f32 %v7760_v58, %v7755_v18  ;;  %v7763_v44 = vmul.f32 %v7760_v58, %v7756_v31  ;;  %v16100_v58 = vld [vmem:[%s26703_s6 + $0x80] sm:$0xff]  ;;  %v16102_v8 = vld [vmem:[%s26703_s6 + $0x90] sm:$0xff]  ;;  %v16103_v18 = vld [vmem:[%s26703_s6 + $0x98] sm:$0xff] }
 0xa85   :  { %20828 = vmatprep.subr.bf16.mxu0 %v20827_v2  ;;  %v16112_v31 = vld [vmem:[%s26703_s6 + $0xa0] sm:$0xff]  ;;  %v16199_v25 = vld [vmem:[%s26703_s6 + $0x198] sm:$0xff] }
 0xa86   :  { %v7768_v13 = vadd.f32 %v7767_v34, %v7761_v51  ;;  %v7769_v46 = vadd.f32 %v7767_v34, %v7762_v35  ;;  %v7770_v26 = vadd.f32 %v7767_v34, %v7763_v44  ;;  %20830 = vmatpush3.bf16.msra.mxu0 %v20827_v2  ;;  %v16113_v34 = vld [vmem:[%s26703_s6 + $0xa8] sm:$0xff]  ;;  %v16114_v51 = vld [vmem:[%s26703_s6 + $0xb0] sm:$0xff]  ;;  %v16115_v35 = vld [vmem:[%s26703_s6 + $0xb8] sm:$0xff] }
 0xa87   :  { %20836 = vmatprep.subr.bf16.mxu0 %v20835_v63  ;;  %v16124_v44 = vld [vmem:[%s26703_s6 + $0xc0] sm:$0xff]  ;;  %v8290_v2 = vld [vmem:[%s26704_s7 + $0x50] sm:$0xff] }
 0xa88   :  { %vm7771_vm11 = vcmp.ge.f32.partialorder %v7768_v13, 0.0  ;;  %vm7772_vm2 = vcmp.ge.f32.partialorder %v7769_v46, 0.0  ;;  %v7774_v30 = vmul.f32 0.2, %v7768_v13  ;;  %v7775_v48 = vmul.f32 0.2, %v7769_v46 }
 0xa89   :  { %v7776_v53 = vmul.f32 0.2, %v7770_v26  ;;  %vm7773_vm12 = vcmp.ge.f32.partialorder %v7770_v26, 0.0 }
 0xa8a   :  { %v7777_v50 = vsel %vm7771_vm11, %v7768_v13, %v7774_v30  ;;  %v7778_v57 = vsel %vm7772_vm2, %v7769_v46, %v7775_v48  ;;  %v16125_v13 = vld [vmem:[%s26703_s6 + $0xc8] sm:$0xff]  ;;  %v16126_v46 = vld [vmem:[%s26703_s6 + $0xd0] sm:$0xff]  ;;  %v16136_v30 = vld [vmem:[%s26703_s6 + $0xe0] sm:$0xff] }
 0xa8b   :  { %v24420_v59 = vpack.c.bf16 %v7778_v57, %v7777_v50  ;;  %v24423_v62 = vsel %vm7773_vm12, %v7770_v26, %v7776_v53  ;;  %v16127_v26 = vld [vmem:[%s26703_s6 + $0xd8] sm:$0xff]  ;;  %v16137_v48 = vld [vmem:[%s26703_s6 + $0xe8] sm:$0xff]  ;;  %v16138_v50 = vld [vmem:[%s26703_s6 + $0xf0] sm:$0xff] }
 0xa8c   :  { %v16139_v53 = vld [vmem:[%s26703_s6 + $0xf8] sm:$0xff]  ;;  %v16148_v57 = vld [vmem:[%s26703_s6 + $0x100] sm:$0xff] }
 0xa8d   :  { %20808 = vmatprep.subr.bf16.mxu1 %v24420_v59 }
 0xa8e   :  { %20810 = vmatpush3.bf16.msra.mxu1 %v24420_v59 }
 0xa8f   :  { %18655 = vmatprep.subr.mxu1 %v24423_v62 }
 0xa92   :  { %18656 = vmatpush3.msra.mxu1 %v24423_v62 }
 0xa93   :  { %18658 = vmatmul.mubr.msk.f32.vlgmr.msra.gmra.mrb[30].mxu1 %vm7784_vm8, %v7781_v3  ;;  %20812 = vmatprep.subr.bf16.mxu1 %v24420_v59  ;;  %v16149_v3 = vld [vmem:[%s26703_s6 + $0x108] sm:$0xff] }
 0xa94   :  { %20814 = vmatpush3.bf16.msra.mxu1 %v24420_v59  ;;  %18660 = vmatprep.mubr.msk.f32.mxu1 %vm7784_vm8, %v7782_v6  ;;  %v16150_v6 = vld [vmem:[%s26703_s6 + $0x110] sm:$0xff] }
 0xa95   :  { %18667 = vmatprep.subr.mxu1 %v24423_v62 }
 0xa97   :  { %18661 = vmatmul.mubr.msk.f32.gmra.mrb[32].mxu1 %vm7784_vm8, %v7783_v10  ;;  %v16161_v10 = vld [vmem:[%s26703_s6 + $0x128] sm:$0xff] }
 0xa98   :  { %18668 = vmatpush3.msra.mxu1 %v24423_v62  ;;  %18669 = vmatprep.mubr.msk.f32.mxu1 %vm7784_vm8, %v16060_v12  ;;  %v16162_v12 = vld [vmem:[%s26703_s6 + $0x130] sm:$0xff] }
 0xa99   :  { %20816 = vmatprep.subr.bf16.mxu1 %v20815_v15 }
 0xa9b   :  { %18670 = vmatmul.mubr.msk.f32.vlgmr.msra.gmra.mrb[34].mxu1 %vm7784_vm8, %v16061_v24  ;;  %v16174_v24 = vld [vmem:[%s26703_s6 + $0x150] sm:$0xff] }
 0xa9c   :  { %20818 = vmatpush3.bf16.msra.mxu1 %v20815_v15  ;;  %18672 = vmatprep.mubr.msk.f32.mxu1 %vm7784_vm8, %v16062_v19  ;;  %v16163_v15 = vld [vmem:[%s26703_s6 + $0x138] sm:$0xff] }
 0xa9d   :  { %20820 = vmatprep.subr.bf16.mxu1 %v20819_v22  ;;  %v16175_v19 = vld [vmem:[%s26703_s6 + $0x158] sm:$0xff] }
 0xa9f   :  { %18673 = vmatmul.mubr.msk.f32.gmra.mrb[36].mxu1 %vm7784_vm8, %v16063_v20  ;;  %v16185_v20 = vld [vmem:[%s26703_s6 + $0x168] sm:$0xff] }
 0xaa0   :  { %20822 = vmatpush3.bf16.msra.mxu1 %v20819_v22  ;;  %v16184_v22 = vld [vmem:[%s26703_s6 + $0x160] sm:$0xff] }
 0xaa1   :  { %20832 = vmatprep.subr.bf16.mxu1 %v24420_v59 }
 0xb66   :  { %v18659_v39 = vpop.f32.mrb[30].mxu1 }
 0xb67   :  { %v7863_v42 = vpop.f32.mrb[31].mxu1 }
 0xb68   :  { %18697 = vmatprep.mubr.msk.f32.mxu0 %vm7715_vm9, %v7863_v42  ;;  %v8495_v42 = vld [vmem:[%s26704_s7 + $0x60] sm:$0xff] }
 0xb69   :  { %18698 = vmatmul.mubr.msk.f32.vlgmr.msra.gmra.mrb[96].mxu0 %vm7715_vm9, %v18659_v39  ;;  %v20839_v39 = vpack.c.bf16 %v8291_v14, %v8290_v2  ;;  %v9323_v14 = vld [vmem:[%s26704_s7 + $0xe0] sm:$0xff] }
 0xb6a   :  { %v18662_v45 = vpop.f32.mrb[32].mxu1  ;;  %20838 = vmatpush3.bf16.msra.mxu0 %v20835_v63  ;;  %v16208_v63 = vld [vmem:[%s26703_s6 + $0x1a0] sm:$0xff] }
 0xb6b   :  { %v7873_v27 = vpop.f32.mrb[33].mxu1  ;;  %20840 = vmatprep.subr.bf16.mxu0 %v20839_v39 }
 0xb6c   :  { %18700 = vmatprep.mubr.msk.f32.mxu0 %vm7715_vm9, %v7873_v27  ;;  %v16209_v27 = vld [vmem:[%s26703_s6 + $0x1a8] sm:$0xff] }
 0xb6d   :  { %18701 = vmatmul.mubr.msk.f32.gmra.mrb[98].mxu0 %vm7715_vm9, %v18662_v45  ;;  %v8496_v45 = vld [vmem:[%s26704_s7 + $0x68] sm:$0xff] }
 0xb6e   :  { %v18671_v40 = vpop.f32.mrb[34].mxu1  ;;  %20842 = vmatpush3.bf16.msra.mxu0 %v20839_v39 }
 0xb6f   :  { %v7969_v56 = vpop.f32.mrb[35].mxu1 }
 0xb70   :  { %18683 = vmatprep.mubr.msk.f32.mxu1 %vm7715_vm9, %v7969_v56  ;;  %v16210_v56 = vld [vmem:[%s26703_s6 + $0x1b0] sm:$0xff] }
 0xb71   :  { %18684 = vmatmul.mubr.msk.f32.vlgmr.msra.gmra.mrb[38].mxu1 %vm7715_vm9, %v18671_v40  ;;  %v20847_v40 = vpack.c.bf16 %v8496_v45, %v8495_v42  ;;  %v9325_v45 = vld [vmem:[%s26704_s7 + $0xf0] sm:$0xff] }
 0xb72   :  { %20834 = vmatpush3.bf16.msra.mxu1 %v24420_v59  ;;  %v18674_v5 = vpop.f32.mrb[36].mxu1 }
 0xb73   :  { %18707 = vmatprep.subr.mxu1 %v24423_v62  ;;  %v7979_v29 = vpop.f32.mrb[37].mxu1  ;;  %20848 = vmatprep.subr.bf16.mxu0 %v20847_v40 }
 0xb74   :  { %18686 = vmatprep.mubr.msk.f32.mxu1 %vm7715_vm9, %v7979_v29  ;;  %v16220_v29 = vld [vmem:[%s26703_s6 + $0x1c0] sm:$0xff] }
 0xb75   :  { %18687 = vmatmul.mubr.msk.f32.gmra.mrb[40].mxu1 %vm7715_vm9, %v18674_v5  ;;  %v16211_v5 = vld [vmem:[%s26703_s6 + $0x1b8] sm:$0xff] }
 0xb76   :  { %18708 = vmatpush3.msra.mxu1 %v24423_v62  ;;  %18709 = vmatprep.mubr.msk.f32.mxu1 %vm7784_vm8, %v16076_v32  ;;  %v16221_v32 = vld [vmem:[%s26703_s6 + $0x1c8] sm:$0xff] }
 0xb77   :  { %20844 = vmatprep.subr.bf16.mxu1 %v24420_v59 }
 0xb79   :  { %18710 = vmatmul.mubr.msk.f32.vlgmr.msra.gmra.mrb[42].mxu1 %vm7784_vm8, %v16077_v33  ;;  %v16222_v33 = vld [vmem:[%s26703_s6 + $0x1d0] sm:$0xff] }
 0xb7a   :  { %20846 = vmatpush3.bf16.msra.mxu1 %v24420_v59  ;;  %18712 = vmatprep.mubr.msk.f32.mxu1 %vm7784_vm8, %v16078_v41  ;;  %v16223_v41 = vld [vmem:[%s26703_s6 + $0x1d8] sm:$0xff] }
 0xb7b   :  { %18733 = vmatprep.subr.mxu1 %v24423_v62 }
 0xb7d   :  { %18713 = vmatmul.mubr.msk.f32.gmra.mrb[44].mxu1 %vm7784_vm8, %v16079_v43  ;;  %v16232_v43 = vld [vmem:[%s26703_s6 + $0x1e0] sm:$0xff] }
 0xb7e   :  { %18734 = vmatpush3.msra.mxu1 %v24423_v62  ;;  %18735 = vmatprep.mubr.msk.f32.mxu1 %vm7784_vm8, %v16088_v47  ;;  %v16234_v47 = vld [vmem:[%s26703_s6 + $0x1f0] sm:$0xff] }
 0xb7f   :  { %20856 = vmatprep.subr.bf16.mxu1 %v24420_v59 }
 0xb81   :  { %18736 = vmatmul.mubr.msk.f32.vlgmr.msra.gmra.mrb[46].mxu1 %vm7784_vm8, %v16089_v49 }
 0xb82   :  { %20858 = vmatpush3.bf16.msra.mxu1 %v24420_v59  ;;  %18738 = vmatprep.mubr.msk.f32.mxu1 %vm7784_vm8, %v16090_v52 }
 0xb83   :  { %18759 = vmatprep.subr.mxu1 %v24423_v62 }
 0xb85   :  { %18739 = vmatmul.mubr.msk.f32.gmra.mrb[48].mxu1 %vm7784_vm8, %v16091_v55 }
 0xb86   :  { %18760 = vmatpush3.msra.mxu1 %v24423_v62  ;;  %18761 = vmatprep.mubr.msk.f32.mxu1 %vm7784_vm8, %v16100_v58 }
 0xb87   :  { %20868 = vmatprep.subr.bf16.mxu1 %v24420_v59 }
 0xb89   :  { %18762 = vmatmul.mubr.msk.f32.vlgmr.msra.gmra.mrb[50].mxu1 %vm7784_vm8, %v16101_v61  ;;  %v8497_v61 = vld [vmem:[%s26704_s7 + $0x70] sm:$0xff] }
 0xb8a   :  { %20870 = vmatpush3.bf16.msra.mxu1 %v24420_v59  ;;  %18764 = vmatprep.mubr.msk.f32.mxu1 %vm7784_vm8, %v16102_v8  ;;  %v8498_v8 = vld [vmem:[%s26704_s7 + $0x78] sm:$0xff] }
 0xb8b   :  { %18785 = vmatprep.subr.mxu1 %v24423_v62 }
 0xb8d   :  { %18765 = vmatmul.mubr.msk.f32.gmra.mrb[52].mxu1 %vm7784_vm8, %v16103_v18 }
 0xb8e   :  { %18786 = vmatpush3.msra.mxu1 %v24423_v62  ;;  %18787 = vmatprep.mubr.msk.f32.mxu1 %vm7784_vm8, %v16112_v31 }
 0xb8f   :  { %20880 = vmatprep.subr.bf16.mxu1 %v24420_v59 }
 0xb91   :  { %18788 = vmatmul.mubr.msk.f32.vlgmr.msra.gmra.mrb[54].mxu1 %vm7784_vm8, %v16113_v34  ;;  %v20851_v34 = vpack.c.bf16 %v8498_v8, %v8497_v61 }
 0xb92   :  { %20882 = vmatpush3.bf16.msra.mxu1 %v24420_v59  ;;  %18790 = vmatprep.mubr.msk.f32.mxu1 %vm7784_vm8, %v16114_v51  ;;  %v8702_v51 = vld [vmem:[%s26704_s7 + $0x80] sm:$0xff] }
 0xb93   :  { %18811 = vmatprep.subr.mxu1 %v24423_v62 }
 0xb95   :  { %18791 = vmatmul.mubr.msk.f32.gmra.mrb[56].mxu1 %vm7784_vm8, %v16115_v35  ;;  %v8703_v35 = vld [vmem:[%s26704_s7 + $0x88] sm:$0xff] }
 0xb96   :  { %18812 = vmatpush3.msra.mxu1 %v24423_v62  ;;  %18813 = vmatprep.mubr.msk.f32.mxu1 %vm7784_vm8, %v16124_v44 }
 0xb97   :  { %20892 = vmatprep.subr.bf16.mxu1 %v24420_v59 }
 0xb99   :  { %18814 = vmatmul.mubr.msk.f32.vlgmr.msra.gmra.mrb[58].mxu1 %vm7784_vm8, %v16125_v13 }
 0xb9a   :  { %20894 = vmatpush3.bf16.msra.mxu1 %v24420_v59  ;;  %18816 = vmatprep.mubr.msk.f32.mxu1 %vm7784_vm8, %v16126_v46  ;;  %v20859_v46 = vpack.c.bf16 %v8703_v35, %v8702_v51 }
 0xb9b   :  { %18837 = vmatprep.subr.mxu1 %v24423_v62 }
 0xb9d   :  { %18817 = vmatmul.mubr.msk.f32.gmra.mrb[60].mxu1 %vm7784_vm8, %v16127_v26  ;;  %v8704_v26 = vld [vmem:[%s26704_s7 + $0x90] sm:$0xff] }
 0xb9e   :  { %18838 = vmatpush3.msra.mxu1 %v24423_v62  ;;  %18839 = vmatprep.mubr.msk.f32.mxu1 %vm7784_vm8, %v16136_v30  ;;  %v8705_v30 = vld [vmem:[%s26704_s7 + $0x98] sm:$0xff] }
 0xb9f   :  { %20904 = vmatprep.subr.bf16.mxu1 %v24420_v59 }
 0xba1   :  { %18840 = vmatmul.mubr.msk.f32.vlgmr.msra.gmra.mrb[62].mxu1 %vm7784_vm8, %v16137_v48 }
 0xba2   :  { %20906 = vmatpush3.bf16.msra.mxu1 %v24420_v59  ;;  %18842 = vmatprep.mubr.msk.f32.mxu1 %vm7784_vm8, %v16138_v50 }
 0xba3   :  { %18863 = vmatprep.subr.mxu1 %v24423_v62 }
 0xba5   :  { %18843 = vmatmul.mubr.msk.f32.gmra.mrb[64].mxu1 %vm7784_vm8, %v16139_v53  ;;  %v20863_v53 = vpack.c.bf16 %v8705_v30, %v8704_v26 }
 0xba6   :  { %18864 = vmatpush3.msra.mxu1 %v24423_v62  ;;  %18865 = vmatprep.mubr.msk.f32.mxu1 %vm7784_vm8, %v16148_v57  ;;  %v8909_v57 = vld [vmem:[%s26704_s7 + $0xa0] sm:$0xff] }
 0xba7   :  { %20916 = vmatprep.subr.bf16.mxu1 %v24420_v59 }
 0xba9   :  { %18866 = vmatmul.mubr.msk.f32.vlgmr.msra.gmra.mrb[66].mxu1 %vm7784_vm8, %v16149_v3  ;;  %v8910_v3 = vld [vmem:[%s26704_s7 + $0xa8] sm:$0xff] }
 0xbaa   :  { %20918 = vmatpush3.bf16.msra.mxu1 %v24420_v59  ;;  %18868 = vmatprep.mubr.msk.f32.mxu1 %vm7784_vm8, %v16150_v6 }
 0xbab   :  { %18889 = vmatprep.subr.mxu1 %v24423_v62 }
 0xbad   :  { %18869 = vmatmul.mubr.msk.f32.gmra.mrb[68].mxu1 %vm7784_vm8, %v16151_v7 }
 0xbae   :  { %18890 = vmatpush3.msra.mxu1 %v24423_v62  ;;  %18891 = vmatprep.mubr.msk.f32.mxu1 %vm7784_vm8, %v16160_v9  ;;  %v20871_v9 = vpack.c.bf16 %v8910_v3, %v8909_v57 }
 0xbaf   :  { %20928 = vmatprep.subr.bf16.mxu1 %v24420_v59 }
 0xbb1   :  { %18892 = vmatmul.mubr.msk.f32.vlgmr.msra.gmra.mrb[70].mxu1 %vm7784_vm8, %v16161_v10  ;;  %v8911_v10 = vld [vmem:[%s26704_s7 + $0xb0] sm:$0xff] }
 0xbb2   :  { %20930 = vmatpush3.bf16.msra.mxu1 %v24420_v59  ;;  %18894 = vmatprep.mubr.msk.f32.mxu1 %vm7784_vm8, %v16162_v12  ;;  %v8912_v12 = vld [vmem:[%s26704_s7 + $0xb8] sm:$0xff] }
 0xbb3   :  { %18915 = vmatprep.subr.mxu1 %v24423_v62 }
 0xbb5   :  { %18895 = vmatmul.mubr.msk.f32.gmra.mrb[72].mxu1 %vm7784_vm8, %v16163_v15 }
 0xbb6   :  { %18916 = vmatpush3.msra.mxu1 %v24423_v62  ;;  %18917 = vmatprep.mubr.msk.f32.mxu1 %vm7784_vm8, %v16172_v16 }
 0xbb7   :  { %20940 = vmatprep.subr.bf16.mxu1 %v24420_v59 }
 0xbb9   :  { %18918 = vmatmul.mubr.msk.f32.vlgmr.msra.gmra.mrb[74].mxu1 %vm7784_vm8, %v16173_v28  ;;  %v20875_v28 = vpack.c.bf16 %v8912_v12, %v8911_v10 }
 0xbba   :  { %20942 = vmatpush3.bf16.msra.mxu1 %v24420_v59  ;;  %18920 = vmatprep.mubr.msk.f32.mxu1 %vm7784_vm8, %v16174_v24  ;;  %v9116_v24 = vld [vmem:[%s26704_s7 + $0xc0] sm:$0xff] }
 0xbbb   :  { %18941 = vmatprep.subr.mxu1 %v24423_v62 }
 0xbbd   :  { %18921 = vmatmul.mubr.msk.f32.gmra.mrb[76].mxu1 %vm7784_vm8, %v16175_v19  ;;  %v9117_v19 = vld [vmem:[%s26704_s7 + $0xc8] sm:$0xff] }
 0xbbe   :  { %18942 = vmatpush3.msra.mxu1 %v24423_v62  ;;  %18943 = vmatprep.mubr.msk.f32.mxu1 %vm7784_vm8, %v16184_v22 }
 0xbbf   :  { %20952 = vmatprep.subr.bf16.mxu1 %v24420_v59 }
 0xbc1   :  { %18944 = vmatmul.mubr.msk.f32.vlgmr.msra.gmra.mrb[78].mxu1 %vm7784_vm8, %v16185_v20 }
 0xbc2   :  { %20954 = vmatpush3.bf16.msra.mxu1 %v24420_v59  ;;  %18946 = vmatprep.mubr.msk.f32.mxu1 %vm7784_vm8, %v16186_v11  ;;  %v20883_v11 = vpack.c.bf16 %v9117_v19, %v9116_v24 }
 0xbc3   :  { %18967 = vmatprep.subr.mxu1 %v24423_v62 }
 0xbc5   :  { %18947 = vmatmul.mubr.msk.f32.gmra.mrb[80].mxu1 %vm7784_vm8, %v16187_v23  ;;  %v9118_v23 = vld [vmem:[%s26704_s7 + $0xd0] sm:$0xff] }
 0xbc6   :  { %18968 = vmatpush3.msra.mxu1 %v24423_v62  ;;  %18969 = vmatprep.mubr.msk.f32.mxu1 %vm7784_vm8, %v16196_v21  ;;  %v9119_v21 = vld [vmem:[%s26704_s7 + $0xd8] sm:$0xff] }
 0xbc7   :  { %20964 = vmatprep.subr.bf16.mxu1 %v24420_v59  ;;  %v20887_v2 = vpack.c.bf16 %v9119_v21, %v9118_v23 }
 0xbc9   :  { %18970 = vmatmul.mubr.msk.f32.vlgmr.msra.gmra.mrb[82].mxu1 %vm7784_vm8, %v16197_v17 }
 0xbca   :  { %20966 = vmatpush3.bf16.msra.mxu1 %v24420_v59  ;;  %18972 = vmatprep.mubr.msk.f32.mxu1 %vm7784_vm8, %v16198_v54 }
 0xbcb   :  { %18993 = vmatprep.subr.mxu1 %v24423_v62 }
 0xbcd   :  { %18973 = vmatmul.mubr.msk.f32.gmra.mrb[84].mxu1 %vm7784_vm8, %v16199_v25  ;;  %v9324_v25 = vld [vmem:[%s26704_s7 + $0xe8] sm:$0xff] }
 0xbce   :  { %18994 = vmatpush3.msra.mxu1 %v24423_v62  ;;  %18995 = vmatprep.mubr.msk.f32.mxu1 %vm7784_vm8, %v16208_v63  ;;  %v20895_v42 = vpack.c.bf16 %v9324_v25, %v9323_v14 }
 0xbcf   :  { %20976 = vmatprep.subr.bf16.mxu1 %v24420_v59 }
 0xbd1   :  { %18996 = vmatmul.mubr.msk.f32.vlgmr.msra.gmra.mrb[86].mxu1 %vm7784_vm8, %v16209_v27  ;;  %v9326_v27 = vld [vmem:[%s26704_s7 + $0xf8] sm:$0xff] }
 0xbd2   :  { %20978 = vmatpush3.bf16.msra.mxu1 %v24420_v59  ;;  %18998 = vmatprep.mubr.msk.f32.mxu1 %vm7784_vm8, %v16210_v56 }
 0xbd3   :  { %19019 = vmatprep.subr.mxu1 %v24423_v62 }
 0xbd5   :  { %18999 = vmatmul.mubr.msk.f32.gmra.mrb[88].mxu1 %vm7784_vm8, %v16211_v5  ;;  %v20899_v5 = vpack.c.bf16 %v9326_v27, %v9325_v45 }
 0xbd6   :  { %19020 = vmatpush3.msra.mxu1 %v24423_v62  ;;  %19021 = vmatprep.mubr.msk.f32.mxu1 %vm7784_vm8, %v16220_v29  ;;  %v9530_v29 = vld [vmem:[%s26704_s7 + $0x100] sm:$0xff] }
 0xbd7   :  { %20988 = vmatprep.subr.bf16.mxu1 %v24420_v59 }
 0xbd9   :  { %19022 = vmatmul.mubr.msk.f32.vlgmr.msra.gmra.mrb[90].mxu1 %vm7784_vm8, %v16221_v32  ;;  %v9531_v32 = vld [vmem:[%s26704_s7 + $0x108] sm:$0xff] }
 0xbda   :  { %20990 = vmatpush3.bf16.msra.mxu1 %v24420_v59  ;;  %19024 = vmatprep.mubr.msk.f32.mxu1 %vm7784_vm8, %v16222_v33  ;;  %v16233_v59 = vld [vmem:[%s26703_s6 + $0x1e8] sm:$0xff] }
 0xbdb   :  { %19045 = vmatprep.subr.mxu1 %v24423_v62 }
 0xbdd   :  { %19025 = vmatmul.mubr.msk.f32.gmra.mrb[92].mxu1 %vm7784_vm8, %v16223_v41 }
 0xbde   :  { %19046 = vmatpush3.msra.mxu1 %v24423_v62  ;;  %19047 = vmatprep.mubr.msk.f32.mxu1 %vm7784_vm8, %v16232_v43  ;;  %v16235_v62 = vld [vmem:[%s26703_s6 + $0x1f8] sm:$0xff]  ;;  %v20907_v43 = vpack.c.bf16 %v9531_v32, %v9530_v29 }
 0xbdf   :  { %20999 = vmatprep.subr.bf16.mxu1 %v21659_v0 }
 0xbe1   :  { %19048 = vmatmul.mubr.msk.f32.vlgmr.msra.gmra.mrb[94].mxu1 %vm7784_vm8, %v16233_v59  ;;  %v9532_v59 = vld [vmem:[%s26704_s7 + $0x110] sm:$0xff] }
 0xbe2   :  { %19050 = vmatprep.mubr.msk.f32.mxu1 %vm7784_vm8, %v16234_v47  ;;  %v9533_v47 = vld [vmem:[%s26704_s7 + $0x118] sm:$0xff] }
 0xbe3   :  { %v20911_v8 = vpack.c.bf16 %v9533_v47, %v9532_v59 }
 0xbe5   :  { %19051 = vmatmul.mubr.msk.f32.gmra.mrb[96].mxu1 %vm7784_vm8, %v16235_v62 }
 0xbe6   :  { %19075 = vmatprep.mubr.msk.f32.mxu1 %vm21660_vm0, %v21661_v4 }
 0xc44   :  { %v24793_v49 = vpop.f32.mrb[38].mxu1 }
 0xc45   :  { %v24795_v52 = vpop.f32.mrb[39].mxu1 }
 0xc48   :  { %v24797_v55 = vpop.f32.mrb[40].mxu1 }
 0xc49   :  { %v24799_v58 = vpop.f32.mrb[41].mxu1 }
 0xc4c   :  { %v18711_v18 = vpop.f32.mrb[42].mxu1 }
 0xc4d   :  { %v8269_v31 = vpop.f32.mrb[43].mxu1 }
 0xc4e   :  { %18723 = vmatprep.mubr.msk.f32.mxu0 %vm7715_vm9, %v8269_v31  ;;  %v9738_v31 = vld [vmem:[%s26704_s7 + $0x128] sm:$0xff] }
 0xc4f   :  { %18724 = vmatmul.mubr.msk.f32.vlgmr.msra.gmra.mrb[96].mxu0 %vm7715_vm9, %v18711_v18  ;;  %v9737_v18 = vld [vmem:[%s26704_s7 + $0x120] sm:$0xff] }
 0xc50   :  { %v18714_v44 = vpop.f32.mrb[44].mxu1  ;;  %20850 = vmatpush3.bf16.msra.mxu0 %v20847_v40  ;;  %v20919_v35 = vpack.c.bf16 %v9738_v31, %v9737_v18 }
 0xc51   :  { %v8279_v13 = vpop.f32.mrb[45].mxu1  ;;  %20852 = vmatprep.subr.bf16.mxu0 %v20851_v34 }
 0xc52   :  { %18726 = vmatprep.mubr.msk.f32.mxu0 %vm7715_vm9, %v8279_v13  ;;  %v9740_v13 = vld [vmem:[%s26704_s7 + $0x138] sm:$0xff] }
 0xc53   :  { %18727 = vmatmul.mubr.msk.f32.gmra.mrb[98].mxu0 %vm7715_vm9, %v18714_v44  ;;  %v9739_v44 = vld [vmem:[%s26704_s7 + $0x130] sm:$0xff] }
 0xc54   :  { %v18737_v48 = vpop.f32.mrb[46].mxu1  ;;  %20854 = vmatpush3.bf16.msra.mxu0 %v20851_v34  ;;  %v20923_v30 = vpack.c.bf16 %v9740_v13, %v9739_v44 }
 0xc55   :  { %v8476_v50 = vpop.f32.mrb[47].mxu1  ;;  %20860 = vmatprep.subr.bf16.mxu0 %v20859_v46 }
 0xc56   :  { %18749 = vmatprep.mubr.msk.f32.mxu0 %vm7715_vm9, %v8476_v50  ;;  %v9945_v50 = vld [vmem:[%s26704_s7 + $0x148] sm:$0xff] }
 0xc57   :  { %18750 = vmatmul.mubr.msk.f32.vlgmr.msra.gmra.mrb[96].mxu0 %vm7715_vm9, %v18737_v48  ;;  %v9944_v48 = vld [vmem:[%s26704_s7 + $0x140] sm:$0xff] }
 0xc58   :  { %v18740_v6 = vpop.f32.mrb[48].mxu1  ;;  %20862 = vmatpush3.bf16.msra.mxu0 %v20859_v46  ;;  %v20931_v3 = vpack.c.bf16 %v9945_v50, %v9944_v48 }
 0xc59   :  { %v8486_v7 = vpop.f32.mrb[49].mxu1  ;;  %20864 = vmatprep.subr.bf16.mxu0 %v20863_v53 }
 0xc5a   :  { %18752 = vmatprep.mubr.msk.f32.mxu0 %vm7715_vm9, %v8486_v7  ;;  %v9947_v7 = vld [vmem:[%s26704_s7 + $0x158] sm:$0xff] }
 0xc5b   :  { %18753 = vmatmul.mubr.msk.f32.gmra.mrb[98].mxu0 %vm7715_vm9, %v18740_v6  ;;  %v9946_v6 = vld [vmem:[%s26704_s7 + $0x150] sm:$0xff] }
 0xc5c   :  { %v18763_v15 = vpop.f32.mrb[50].mxu1  ;;  %20866 = vmatpush3.bf16.msra.mxu0 %v20863_v53  ;;  %v20935_v12 = vpack.c.bf16 %v9947_v7, %v9946_v6 }
 0xc5d   :  { %v8683_v16 = vpop.f32.mrb[51].mxu1  ;;  %20872 = vmatprep.subr.bf16.mxu0 %v20871_v9 }
 0xc5e   :  { %18775 = vmatprep.mubr.msk.f32.mxu0 %vm7715_vm9, %v8683_v16  ;;  %v10152_v16 = vld [vmem:[%s26704_s7 + $0x168] sm:$0xff] }
 0xc5f   :  { %18776 = vmatmul.mubr.msk.f32.vlgmr.msra.gmra.mrb[96].mxu0 %vm7715_vm9, %v18763_v15  ;;  %v10151_v15 = vld [vmem:[%s26704_s7 + $0x160] sm:$0xff] }
 0xc60   :  { %v18766_v22 = vpop.f32.mrb[52].mxu1  ;;  %20874 = vmatpush3.bf16.msra.mxu0 %v20871_v9  ;;  %v20943_v19 = vpack.c.bf16 %v10152_v16, %v10151_v15 }
 0xc61   :  { %v8693_v20 = vpop.f32.mrb[53].mxu1  ;;  %20876 = vmatprep.subr.bf16.mxu0 %v20875_v28 }
 0xc62   :  { %18778 = vmatprep.mubr.msk.f32.mxu0 %vm7715_vm9, %v8693_v20  ;;  %v10154_v20 = vld [vmem:[%s26704_s7 + $0x178] sm:$0xff] }
 0xc63   :  { %18779 = vmatmul.mubr.msk.f32.gmra.mrb[98].mxu0 %vm7715_vm9, %v18766_v22  ;;  %v10153_v22 = vld [vmem:[%s26704_s7 + $0x170] sm:$0xff] }
 0xc64   :  { %v18789_v17 = vpop.f32.mrb[54].mxu1  ;;  %20878 = vmatpush3.bf16.msra.mxu0 %v20875_v28  ;;  %v20947_v21 = vpack.c.bf16 %v10154_v20, %v10153_v22 }
 0xc65   :  { %v8890_v54 = vpop.f32.mrb[55].mxu1  ;;  %20884 = vmatprep.subr.bf16.mxu0 %v20883_v11 }
 0xc66   :  { %18801 = vmatprep.mubr.msk.f32.mxu0 %vm7715_vm9, %v8890_v54  ;;  %v10359_v54 = vld [vmem:[%s26704_s7 + $0x188] sm:$0xff] }
 0xc67   :  { %18802 = vmatmul.mubr.msk.f32.vlgmr.msra.gmra.mrb[96].mxu0 %vm7715_vm9, %v18789_v17  ;;  %v10358_v17 = vld [vmem:[%s26704_s7 + $0x180] sm:$0xff] }
 0xc68   :  { %v18792_v39 = vpop.f32.mrb[56].mxu1  ;;  %20886 = vmatpush3.bf16.msra.mxu0 %v20883_v11  ;;  %v20955_v25 = vpack.c.bf16 %v10359_v54, %v10358_v17 }
 0xc69   :  { %v8900_v63 = vpop.f32.mrb[57].mxu1  ;;  %20888 = vmatprep.subr.bf16.mxu0 %v20887_v2 }
 0xc6a   :  { %18804 = vmatprep.mubr.msk.f32.mxu0 %vm7715_vm9, %v8900_v63  ;;  %v10361_v63 = vld [vmem:[%s26704_s7 + $0x198] sm:$0xff] }
 0xc6b   :  { %18805 = vmatmul.mubr.msk.f32.gmra.mrb[98].mxu0 %vm7715_vm9, %v18792_v39  ;;  %v10360_v39 = vld [vmem:[%s26704_s7 + $0x190] sm:$0xff] }
 0xc6c   :  { %v18815_v40 = vpop.f32.mrb[58].mxu1  ;;  %20890 = vmatpush3.bf16.msra.mxu0 %v20887_v2  ;;  %v20959_v27 = vpack.c.bf16 %v10361_v63, %v10360_v39 }
 0xc6d   :  { %v9097_v56 = vpop.f32.mrb[59].mxu1  ;;  %20896 = vmatprep.subr.bf16.mxu0 %v20895_v42 }
 0xc6e   :  { %18827 = vmatprep.mubr.msk.f32.mxu0 %vm7715_vm9, %v9097_v56  ;;  %v10566_v56 = vld [vmem:[%s26704_s7 + $0x1a8] sm:$0xff] }
 0xc6f   :  { %18828 = vmatmul.mubr.msk.f32.vlgmr.msra.gmra.mrb[96].mxu0 %vm7715_vm9, %v18815_v40  ;;  %v10565_v40 = vld [vmem:[%s26704_s7 + $0x1a0] sm:$0xff] }
 0xc70   :  { %v18818_v33 = vpop.f32.mrb[60].mxu1  ;;  %20898 = vmatpush3.bf16.msra.mxu0 %v20895_v42  ;;  %v20967_v32 = vpack.c.bf16 %v10566_v56, %v10565_v40 }
 0xc71   :  { %v9107_v41 = vpop.f32.mrb[61].mxu1  ;;  %20900 = vmatprep.subr.bf16.mxu0 %v20899_v5 }
 0xc72   :  { %18830 = vmatprep.mubr.msk.f32.mxu0 %vm7715_vm9, %v9107_v41  ;;  %v10568_v41 = vld [vmem:[%s26704_s7 + $0x1b8] sm:$0xff] }
 0xc73   :  { %18831 = vmatmul.mubr.msk.f32.gmra.mrb[98].mxu0 %vm7715_vm9, %v18818_v33  ;;  %v10567_v33 = vld [vmem:[%s26704_s7 + $0x1b0] sm:$0xff] }
 0xc74   :  { %v18841_v62 = vpop.f32.mrb[62].mxu1  ;;  %20902 = vmatpush3.bf16.msra.mxu0 %v20899_v5  ;;  %v20971_v47 = vpack.c.bf16 %v10568_v41, %v10567_v33 }
 0xc75   :  { %v9304_v61 = vpop.f32.mrb[63].mxu1  ;;  %20908 = vmatprep.subr.bf16.mxu0 %v20907_v43 }
 0xc76   :  { %18853 = vmatprep.mubr.msk.f32.mxu0 %vm7715_vm9, %v9304_v61  ;;  %v10773_v61 = vld [vmem:[%s26704_s7 + $0x1c8] sm:$0xff] }
 0xc77   :  { %18854 = vmatmul.mubr.msk.f32.vlgmr.msra.gmra.mrb[96].mxu0 %vm7715_vm9, %v18841_v62  ;;  %v10772_v62 = vld [vmem:[%s26704_s7 + $0x1c0] sm:$0xff] }
 0xc78   :  { %v18844_v34 = vpop.f32.mrb[64].mxu1  ;;  %20910 = vmatpush3.bf16.msra.mxu0 %v20907_v43  ;;  %v20979_v31 = vpack.c.bf16 %v10773_v61, %v10772_v62 }
 0xc79   :  { %v9314_v51 = vpop.f32.mrb[65].mxu1  ;;  %20912 = vmatprep.subr.bf16.mxu0 %v20911_v8 }
 0xc7a   :  { %18856 = vmatprep.mubr.msk.f32.mxu0 %vm7715_vm9, %v9314_v51  ;;  %v10775_v51 = vld [vmem:[%s26704_s7 + $0x1d8] sm:$0xff] }
 0xc7b   :  { %18857 = vmatmul.mubr.msk.f32.gmra.mrb[98].mxu0 %vm7715_vm9, %v18844_v34  ;;  %v10774_v34 = vld [vmem:[%s26704_s7 + $0x1d0] sm:$0xff] }
 0xc7c   :  { %v18867_v46 = vpop.f32.mrb[66].mxu1  ;;  %20914 = vmatpush3.bf16.msra.mxu0 %v20911_v8  ;;  %v20983_v13 = vpack.c.bf16 %v10775_v51, %v10774_v34 }
 0xc7d   :  { %v9511_v26 = vpop.f32.mrb[67].mxu1  ;;  %20920 = vmatprep.subr.bf16.mxu0 %v20919_v35 }
 0xc7e   :  { %18879 = vmatprep.mubr.msk.f32.mxu0 %vm7715_vm9, %v9511_v26  ;;  %v10980_v26 = vld [vmem:[%s26704_s7 + $0x1e8] sm:$0xff] }
 0xc7f   :  { %18880 = vmatmul.mubr.msk.f32.vlgmr.msra.gmra.mrb[96].mxu0 %vm7715_vm9, %v18867_v46  ;;  %v10979_v46 = vld [vmem:[%s26704_s7 + $0x1e0] sm:$0xff] }
 0xc80   :  { %v18870_v53 = vpop.f32.mrb[68].mxu1  ;;  %20922 = vmatpush3.bf16.msra.mxu0 %v20919_v35  ;;  %v20991_v50 = vpack.c.bf16 %v10980_v26, %v10979_v46 }
 0xc81   :  { %v9521_v57 = vpop.f32.mrb[69].mxu1  ;;  %20924 = vmatprep.subr.bf16.mxu0 %v20923_v30 }
 0xc82   :  { %18882 = vmatprep.mubr.msk.f32.mxu0 %vm7715_vm9, %v9521_v57  ;;  %v10982_v57 = vld [vmem:[%s26704_s7 + $0x1f8] sm:$0xff] }
 0xc83   :  { %18883 = vmatmul.mubr.msk.f32.gmra.mrb[98].mxu0 %vm7715_vm9, %v18870_v53  ;;  %v10981_v53 = vld [vmem:[%s26704_s7 + $0x1f0] sm:$0xff] }
 0xc84   :  { %v18893_v9 = vpop.f32.mrb[70].mxu1  ;;  %20926 = vmatpush3.bf16.msra.mxu0 %v20923_v30  ;;  %v20995_v7 = vpack.c.bf16 %v10982_v57, %v10981_v53 }
 0xc85   :  { %v9718_v10 = vpop.f32.mrb[71].mxu1  ;;  %20932 = vmatprep.subr.bf16.mxu0 %v20931_v3 }
 0xc86   :  { %18905 = vmatprep.mubr.msk.f32.mxu0 %vm7715_vm9, %v9718_v10 }
 0xc87   :  { %18906 = vmatmul.mubr.msk.f32.vlgmr.msra.gmra.mrb[96].mxu0 %vm7715_vm9, %v18893_v9 }
 0xc88   :  { %v18896_v28 = vpop.f32.mrb[72].mxu1  ;;  %20934 = vmatpush3.bf16.msra.mxu0 %v20931_v3 }
 0xc89   :  { %v9728_v24 = vpop.f32.mrb[73].mxu1  ;;  %20936 = vmatprep.subr.bf16.mxu0 %v20935_v12 }
 0xc8a   :  { %18908 = vmatprep.mubr.msk.f32.mxu0 %vm7715_vm9, %v9728_v24 }
 0xc8b   :  { %18909 = vmatmul.mubr.msk.f32.gmra.mrb[98].mxu0 %vm7715_vm9, %v18896_v28 }
 0xc8c   :  { %v18919_v11 = vpop.f32.mrb[74].mxu1  ;;  %20938 = vmatpush3.bf16.msra.mxu0 %v20935_v12 }
 0xc8d   :  { %v9925_v23 = vpop.f32.mrb[75].mxu1  ;;  %20944 = vmatprep.subr.bf16.mxu0 %v20943_v19 }
 0xc8e   :  { %18931 = vmatprep.mubr.msk.f32.mxu0 %vm7715_vm9, %v9925_v23 }
 0xc8f   :  { %18932 = vmatmul.mubr.msk.f32.vlgmr.msra.gmra.mrb[96].mxu0 %vm7715_vm9, %v18919_v11 }
 0xc90   :  { %v18922_v2 = vpop.f32.mrb[76].mxu1  ;;  %20946 = vmatpush3.bf16.msra.mxu0 %v20943_v19 }
 0xc91   :  { %v9935_v14 = vpop.f32.mrb[77].mxu1  ;;  %20948 = vmatprep.subr.bf16.mxu0 %v20947_v21 }
 0xc92   :  { %18934 = vmatprep.mubr.msk.f32.mxu0 %vm7715_vm9, %v9935_v14 }
 0xc93   :  { %18935 = vmatmul.mubr.msk.f32.gmra.mrb[98].mxu0 %vm7715_vm9, %v18922_v2 }
 0xc94   :  { %v18945_v42 = vpop.f32.mrb[78].mxu1  ;;  %20950 = vmatpush3.bf16.msra.mxu0 %v20947_v21 }
 0xc95   :  { %v10132_v45 = vpop.f32.mrb[79].mxu1  ;;  %20956 = vmatprep.subr.bf16.mxu0 %v20955_v25 }
 0xc96   :  { %18957 = vmatprep.mubr.msk.f32.mxu0 %vm7715_vm9, %v10132_v45 }
 0xc97   :  { %18958 = vmatmul.mubr.msk.f32.vlgmr.msra.gmra.mrb[96].mxu0 %vm7715_vm9, %v18945_v42 }
 0xc98   :  { %v18948_v5 = vpop.f32.mrb[80].mxu1  ;;  %20958 = vmatpush3.bf16.msra.mxu0 %v20955_v25 }
 0xc99   :  { %v10142_v29 = vpop.f32.mrb[81].mxu1  ;;  %20960 = vmatprep.subr.bf16.mxu0 %v20959_v27 }
 0xc9a   :  { %18960 = vmatprep.mubr.msk.f32.mxu0 %vm7715_vm9, %v10142_v29 }
 0xc9b   :  { %18961 = vmatmul.mubr.msk.f32.gmra.mrb[98].mxu0 %vm7715_vm9, %v18948_v5 }
 0xc9c   :  { %v18971_v43 = vpop.f32.mrb[82].mxu1  ;;  %20962 = vmatpush3.bf16.msra.mxu0 %v20959_v27 }
 0xc9d   :  { %v10339_v59 = vpop.f32.mrb[83].mxu1  ;;  %20968 = vmatprep.subr.bf16.mxu0 %v20967_v32 }
 0xc9e   :  { %18983 = vmatprep.mubr.msk.f32.mxu0 %vm7715_vm9, %v10339_v59 }
 0xc9f   :  { %18984 = vmatmul.mubr.msk.f32.vlgmr.msra.gmra.mrb[96].mxu0 %vm7715_vm9, %v18971_v43 }
 0xca0   :  { %v18974_v8 = vpop.f32.mrb[84].mxu1  ;;  %20970 = vmatpush3.bf16.msra.mxu0 %v20967_v32 }
 0xca1   :  { %v10349_v18 = vpop.f32.mrb[85].mxu1  ;;  %20972 = vmatprep.subr.bf16.mxu0 %v20971_v47 }
 0xca2   :  { %18986 = vmatprep.mubr.msk.f32.mxu0 %vm7715_vm9, %v10349_v18 }
 0xca3   :  { %18987 = vmatmul.mubr.msk.f32.gmra.mrb[98].mxu0 %vm7715_vm9, %v18974_v8 }
 0xca4   :  { %v18997_v35 = vpop.f32.mrb[86].mxu1  ;;  %20974 = vmatpush3.bf16.msra.mxu0 %v20971_v47 }
 0xca5   :  { %v10546_v44 = vpop.f32.mrb[87].mxu1  ;;  %20980 = vmatprep.subr.bf16.mxu0 %v20979_v31 }
 0xca6   :  { %19009 = vmatprep.mubr.msk.f32.mxu0 %vm7715_vm9, %v10546_v44 }
 0xca7   :  { %19010 = vmatmul.mubr.msk.f32.vlgmr.msra.gmra.mrb[96].mxu0 %vm7715_vm9, %v18997_v35 }
 0xca8   :  { %v19000_v30 = vpop.f32.mrb[88].mxu1  ;;  %20982 = vmatpush3.bf16.msra.mxu0 %v20979_v31 }
 0xca9   :  { %v10556_v48 = vpop.f32.mrb[89].mxu1  ;;  %20984 = vmatprep.subr.bf16.mxu0 %v20983_v13 }
 0xcaa   :  { %19012 = vmatprep.mubr.msk.f32.mxu0 %vm7715_vm9, %v10556_v48 }
 0xcab   :  { %19013 = vmatmul.mubr.msk.f32.gmra.mrb[98].mxu0 %vm7715_vm9, %v19000_v30 }
 0xcac   :  { %v19023_v3 = vpop.f32.mrb[90].mxu1  ;;  %20986 = vmatpush3.bf16.msra.mxu0 %v20983_v13 }
 0xcad   :  { %v10753_v6 = vpop.f32.mrb[91].mxu1  ;;  %20992 = vmatprep.subr.bf16.mxu0 %v20991_v50 }
 0xcae   :  { %19035 = vmatprep.mubr.msk.f32.mxu0 %vm7715_vm9, %v10753_v6 }
 0xcaf   :  { %19036 = vmatmul.mubr.msk.f32.vlgmr.msra.gmra.mrb[96].mxu0 %vm7715_vm9, %v19023_v3 }
 0xcb0   :  { %v19026_v9 = vpop.f32.mrb[92].mxu1  ;;  %20994 = vmatpush3.bf16.msra.mxu0 %v20991_v50  ;;  %v16244_v50 = vld [vmem:[%s26699_s10 + $0x18] sm:$0xff] }
 0xcb1   :  { %v10763_v10 = vpop.f32.mrb[93].mxu1  ;;  %20996 = vmatprep.subr.bf16.mxu0 %v20995_v7  ;;  %v11139_v53 = vrot.slane %v16244_v50, %v23678_v60  ;;  %v11147_v3 = vrot.slane %v16244_v50, %v23684_v1  ;;  %v11297_v50 = vld [vmem:[%s26705_s9 + $0x28] sm:$0xff] }
 0xcb2   :  { %19038 = vmatprep.mubr.msk.f32.mxu0 %vm7715_vm9, %v10763_v10 }
 0xcb3   :  { %19039 = vmatmul.mubr.msk.f32.gmra.mrb[98].mxu0 %vm7715_vm9, %v19026_v9 }
 0xcb4   :  { %v19049_v12 = vpop.f32.mrb[94].mxu1  ;;  %20998 = vmatpush3.bf16.msra.mxu0 %v20995_v7 }
 0xcb5   :  { %v10960_v15 = vpop.f32.mrb[95].mxu1  ;;  %21005 = vmatprep.subr.bf16.mxu0 %v21659_v0 }
 0xcb6   :  { %19061 = vmatprep.mubr.msk.f32.mxu0 %vm7715_vm9, %v10960_v15 }
 0xcb7   :  { %19062 = vmatmul.mubr.msk.f32.vlgmr.msra.gmra.mrb[96].mxu0 %vm7715_vm9, %v19049_v12 }
 0xcb8   :  { %v19052_v16 = vpop.f32.mrb[96].mxu1 }
 0xcb9   :  { %v10970_v28 = vpop.f32.mrb[97].mxu1 }
 0xcba   :  { %19064 = vmatprep.mubr.msk.f32.mxu0 %vm7715_vm9, %v10970_v28 }
 0xcbb   :  { %19065 = vmatmul.mubr.msk.f32.gmra.mrb[98].mxu0 %vm7715_vm9, %v19052_v16 }
 0xcbc   :  { %19104 = vmatprep.mubr.msk.f32.mxu0 %vm21660_vm0, %v21661_v4 }
 0xd8a   :  { %v19063_v24 = vpop.f32.mrb[96].mxu0 }
 0xd8b   :  { %v21287_v19 = vadd.f32 %v19063_v24, %v24793_v49  ;;  %v11061_v22 = vpop.f32.mrb[97].mxu0 }
 0xd8c   :  { %v21288_v20 = vadd.f32 %v11061_v22, %v24795_v52 }
 0xd8d   :  { %v11087_v11 = vsel %vm72_vm1, %v21287_v19, 0.0 }
 0xd8e   :  { %v11086_v23 = vsel %vm72_vm1, %v21288_v20, 0.0  ;;  %v19066_v21 = vpop.f32.mrb[98].mxu0 }
 0xd8f   :  { %v11088_v17 = vadd.f32 %v11087_v11, %v11086_v23  ;;  %v21289_v54 = vadd.f32 %v19066_v21, %v24797_v55  ;;  %v11071_v2 = vpop.f32.mrb[99].mxu0 }
 0xd90   :  { %v21290_v14 = vadd.f32 %v11071_v2, %v24799_v58 }
 0xd91   :  { %v11091_v63 = vsel %vm72_vm1, %v21289_v54, 0.0 }
 0xd92   :  { %v11089_v25 = vsel %vm72_vm1, %v21290_v14, 0.0 }
 0xd93   :  { %v11090_v39 = vadd.f32 %v11089_v25, %v11088_v17 }
 0xd95   :  { %v11092_v49 = vadd.f32 %v11091_v63, %v11090_v39  ;;  %v11429_v39 = vld [vmem:[%s26705_s9 + $0x40] sm:$0xff]  ;;  %v11430_v63 = vld [vmem:[%s26705_s9 + $0x48] sm:$0xff] }
 0xd97   :  { %v11093_v42 = vrot.slane %v11092_v49, 4 }
 0xd99   :  { %v11094_v45 = vadd.f32 %v11093_v42, %v11092_v49  ;;  %v16252_v49 = vld [vmem:[%s26706_s8 + $0x38] sm:$0xff]  ;;  %v11164_v42 = vld [vmem:[%s26706_s8] sm:$0xff] }
 0xd9b   :  { %v11095_v52 = vrot.slane %v11094_v45, 2 }
 0xd9d   :  { %v11096_v27 = vadd.f32 %v11095_v52, %v11094_v45  ;;  %v21012_v45 = vpack.c.bf16 %v11430_v63, %v11429_v39  ;;  %v11431_v52 = vld [vmem:[%s26705_s9 + $0x50] sm:$0xff] }
 0xd9f   :  { %v11097_v40 = vrot.slane %v11096_v27, 1 }
 0xda1   :  { %v11098_v56 = vadd.f32 %v11097_v40, %v11096_v27  ;;  %v11432_v27 = vld [vmem:[%s26705_s9 + $0x58] sm:$0xff]  ;;  %v16253_v40 = vld [vmem:[%s26706_s8 + $0x40] sm:$0xff] }
 0xda3   :  { %v11099_v5 = vmul.f32 0.03125, %v11098_v56  ;;  %v11165_v56 = vld [vmem:[%s26706_s8 + $0x8] sm:$0xff] }
 0xda5   :  { %v11100_v29 = vsub.f32 %v21288_v20, %v11099_v5  ;;  %v11101_v32 = vsub.f32 %v21287_v19, %v11099_v5  ;;  %v11102_v33 = vsub.f32 %v21290_v14, %v11099_v5  ;;  %v11103_v55 = vsub.f32 %v21289_v54, %v11099_v5 }
 0xda6   :  { %v21015_v5 = vpack.c.bf16 %v11432_v27, %v11431_v52 }
 0xda7   :  { %v11112_v41 = vmul.f32 %v11100_v29, %v11100_v29  ;;  %v11113_v43 = vmul.f32 %v11101_v32, %v11101_v32  ;;  %v11114_v58 = vmul.f32 %v11102_v33, %v11102_v33  ;;  %v11115_v59 = vmul.f32 %v11103_v55, %v11103_v55 }
 0xda9   :  { %v11116_v47 = vsel %vm72_vm1, %v11112_v41, 0.0  ;;  %v11117_v62 = vsel %vm72_vm1, %v11113_v43, 0.0  ;;  %v11119_v8 = vsel %vm72_vm1, %v11114_v58, 0.0  ;;  %v11121_v31 = vsel %vm72_vm1, %v11115_v59, 0.0  ;;  %v11435_v43 = vld [vmem:[%s26705_s9 + $0x70] sm:$0xff]  ;;  %v11436_v58 = vld [vmem:[%s26705_s9 + $0x78] sm:$0xff] }
 0xdaa   :  { %v11118_v61 = vadd.f32 %v11117_v62, %v11116_v47  ;;  %v16255_v59 = vld [vmem:[%s26706_s8 + $0x50] sm:$0xff]  ;;  %v11167_v47 = vld [vmem:[%s26706_s8 + $0x18] sm:$0xff]  ;;  %v21021_v62 = vpack.c.bf16 %v11436_v58, %v11435_v43  ;;  %v16286_v43 = vld [vmem:[%s26706_s8 + $0xa0] sm:$0xff] }
 0xdab   :  { %v16301_v58 = vld [vmem:[%s26706_s8 + $0xa8] sm:$0xff] }
 0xdac   :  { %v11120_v18 = vadd.f32 %v11119_v8, %v11118_v61  ;;  %v16256_v61 = vld [vmem:[%s26706_s8 + $0x58] sm:$0xff]  ;;  %v11168_v8 = vld [vmem:[%s26706_s8 + $0x20] sm:$0xff] }
 0xdae   :  { %v11122_v34 = vadd.f32 %v11121_v31, %v11120_v18  ;;  %v16257_v18 = vld [vmem:[%s26706_s8 + $0x60] sm:$0xff]  ;;  %v11169_v31 = vld [vmem:[%s26706_s8 + $0x28] sm:$0xff] }
 0xdb0   :  { %v11123_v51 = vrot.slane %v11122_v34, 4 }
 0xdb2   :  { %v11124_v35 = vadd.f32 %v11123_v51, %v11122_v34  ;;  %v16258_v34 = vld [vmem:[%s26706_s8 + $0x68] sm:$0xff]  ;;  %v11170_v51 = vld [vmem:[%s26706_s8 + $0x30] sm:$0xff] }
 0xdb4   :  { %v11125_v44 = vrot.slane %v11124_v35, 2 }
 0xdb6   :  { %v11126_v13 = vadd.f32 %v11125_v44, %v11124_v35  ;;  %v11292_v35 = vld [vmem:[%s26705_s9] sm:$0xff]  ;;  %v11293_v44 = vld [vmem:[%s26705_s9 + $0x8] sm:$0xff] }
 0xdb8   :  { %v11127_v46 = vrot.slane %v11126_v13, 1 }
 0xdba   :  { %v11128_v26 = vadd.f32 %v11127_v46, %v11126_v13  ;;  %v21024_v13 = vpack.c.bf16 %v11293_v44, %v11292_v35  ;;  %v11294_v46 = vld [vmem:[%s26705_s9 + $0x10] sm:$0xff]  ;;  %v16325_v35 = vld [vmem:[%s26706_s8 + $0xf8] sm:$0xff]  ;;  %v11808_v44 = vld [vmem:[%s26705_s9 + $0x80] sm:$0xff] }
 0xdbc   :  { %v11129_v30 = vmul.f32 0.03125, %v11128_v26  ;;  %v11295_v26 = vld [vmem:[%s26705_s9 + $0x18] sm:$0xff] }
 0xdbe   :  { %v11130_v48 = vadd.f32 1e-05, %v11129_v30  ;;  %v21027_v30 = vpack.c.bf16 %v11295_v26, %v11294_v46  ;;  %v16326_v26 = vld [vmem:[%s26706_s8 + $0x100] sm:$0xff] }
 0xdc0   :  { %21657 = vrsqrt.f32 %v11130_v48  ;;  %v11296_v48 = vld [vmem:[%s26705_s9 + $0x20] sm:$0xff] }
 0xdca   :  { %v21658_v57 = vpop.eup %21657 }
 0xdcb   :  { %v11132_v6 = vmul.f32 %v21658_v57, %v11100_v29  ;;  %v11133_v7 = vmul.f32 %v21658_v57, %v11101_v32  ;;  %v11134_v9 = vmul.f32 %v21658_v57, %v11102_v33  ;;  %v11135_v10 = vmul.f32 %v21658_v57, %v11103_v55  ;;  %v11433_v29 = vld [vmem:[%s26705_s9 + $0x60] sm:$0xff]  ;;  %v11434_v32 = vld [vmem:[%s26705_s9 + $0x68] sm:$0xff]  ;;  %v11166_v55 = vld [vmem:[%s26706_s8 + $0x10] sm:$0xff] }
 0xdcc   :  { %v16254_v33 = vld [vmem:[%s26706_s8 + $0x48] sm:$0xff]  ;;  %v21018_v41 = vpack.c.bf16 %v11434_v32, %v11433_v29  ;;  %v11298_v57 = vld [vmem:[%s26705_s9 + $0x30] sm:$0xff]  ;;  %v16281_v29 = vld [vmem:[%s26706_s8 + $0x78] sm:$0xff] }
 0xdcd   :  { %v11140_v12 = vmul.f32 %v11139_v53, %v11132_v6  ;;  %v11141_v15 = vmul.f32 %v11139_v53, %v11133_v7  ;;  %v11142_v16 = vmul.f32 %v11139_v53, %v11134_v9  ;;  %v11143_v28 = vmul.f32 %v11139_v53, %v11135_v10  ;;  %v16282_v32 = vld [vmem:[%s26706_s8 + $0x80] sm:$0xff] }
 0xdce   :  { %v21030_v53 = vpack.c.bf16 %v11297_v50, %v11296_v48  ;;  %v11811_v48 = vld [vmem:[%s26705_s9 + $0x98] sm:$0xff] }
 0xdcf   :  { %v11148_v24 = vadd.f32 %v11147_v3, %v11140_v12  ;;  %v11149_v19 = vadd.f32 %v11147_v3, %v11141_v15  ;;  %v11150_v22 = vadd.f32 %v11147_v3, %v11142_v16  ;;  %v11151_v20 = vadd.f32 %v11147_v3, %v11143_v28  ;;  %v11299_v3 = vld [vmem:[%s26705_s9 + $0x38] sm:$0xff] }
 0xdd0   :  { %v21033_v6 = vpack.c.bf16 %v11299_v3, %v11298_v57  ;;  %v11812_v57 = vld [vmem:[%s26705_s9 + $0xa0] sm:$0xff]  ;;  %v11813_v3 = vld [vmem:[%s26705_s9 + $0xa8] sm:$0xff] }
 0xdd1   :  { %vm11152_vm13 = vcmp.ge.f32.partialorder %v11148_v24, 0.0  ;;  %vm11153_vm14 = vcmp.ge.f32.partialorder %v11149_v19, 0.0  ;;  %vm11154_vm15 = vcmp.ge.f32.partialorder %v11150_v22, 0.0  ;;  %vm11155_vm3 = vcmp.ge.f32.partialorder %v11151_v20, 0.0 }
 0xdd2   :  { %v11156_v60 = vmul.f32 0.2, %v11148_v24  ;;  %v11157_v11 = vmul.f32 0.2, %v11149_v19  ;;  %v11158_v23 = vmul.f32 0.2, %v11150_v22 }
 0xdd3   :  { %v11159_v1 = vmul.f32 0.2, %v11151_v20 }
 0xdd4   :  { %v11160_v21 = vsel %vm11152_vm13, %v11148_v24, %v11156_v60  ;;  %v11161_v17 = vsel %vm11153_vm14, %v11149_v19, %v11157_v11  ;;  %v11162_v54 = vsel %vm11154_vm15, %v11150_v22, %v11158_v23 }
 0xdd5   :  { %v11163_v2 = vsel %vm11155_vm3, %v11151_v20, %v11159_v1  ;;  %v25027_v14 = vpack.c.bf16 %v11161_v17, %v11160_v21 }
 0xdd6   :  { %v25029_v25 = vpack.c.bf16 %v11163_v2, %v11162_v54 }
 0xdd7   :  { %21001 = vmatpush3.bf16.msra.mxu1 %v25027_v14  ;;  %21007 = vmatpush3.bf16.msra.mxu0 %v25027_v14 }
 0xdd8   :  { %21002 = vmatprep.subr.bf16.mxu1 %v21659_v0  ;;  %21008 = vmatprep.subr.bf16.mxu0 %v21659_v0 }
 0xddb   :  { %21004 = vmatpush3.bf16.msra.mxu1 %v25029_v25  ;;  %21010 = vmatpush3.bf16.msra.mxu0 %v25029_v25 }
 0xddc   :  { %21011 = vmatprep.subr.bf16.mxu1 %v21659_v0  ;;  %21023 = vmatprep.subr.bf16.mxu0 %v21659_v0 }
 0xdde   :  { %19105 = vmatmul.mubr.msk.f32.vlgmr.msra.gmra.mrb[100].mxu0 %vm7715_vm9, %v16252_v49  ;;  %19076 = vmatmul.mubr.msk.f32.vlgmr.msra.gmra.mrb[98].mxu1 %vm7715_vm9, %v11164_v42 }
 0xddf   :  { %19107 = vmatprep.mubr.msk.f32.mxu0 %vm21660_vm0, %v21661_v4  ;;  %19078 = vmatprep.mubr.msk.f32.mxu1 %vm21660_vm0, %v21661_v4 }
 0xde0   :  { %21013 = vmatpush3.bf16.msra.mxu1 %v21012_v45  ;;  %21025 = vmatpush3.bf16.msra.mxu0 %v21024_v13  ;;  %v11809_v13 = vld [vmem:[%s26705_s9 + $0x88] sm:$0xff] }
 0xde1   :  { %21014 = vmatprep.subr.bf16.mxu1 %v21659_v0  ;;  %21026 = vmatprep.subr.bf16.mxu0 %v21659_v0  ;;  %v21042_v46 = vpack.c.bf16 %v11809_v13, %v11808_v44  ;;  %v16427_v13 = vld [vmem:[%s26706_s8 + $0x1f8] sm:$0xff] }
 0xde2   :  { %19108 = vmatmul.mubr.msk.f32.gmra.mrb[102].mxu0 %vm7715_vm9, %v16253_v40  ;;  %19079 = vmatmul.mubr.msk.f32.gmra.mrb[100].mxu1 %vm7715_vm9, %v11165_v56 }
 0xde3   :  { %19110 = vmatprep.mubr.msk.f32.mxu0 %vm21660_vm0, %v21661_v4  ;;  %19081 = vmatprep.mubr.msk.f32.mxu1 %vm21660_vm0, %v21661_v4 }
 0xde4   :  { %21016 = vmatpush3.bf16.msra.mxu1 %v21015_v5  ;;  %21028 = vmatpush3.bf16.msra.mxu0 %v21027_v30  ;;  %v16280_v5 = vld [vmem:[%s26706_s8 + $0x70] sm:$0xff] }
 0xde5   :  { %21017 = vmatprep.subr.bf16.mxu1 %v21659_v0  ;;  %21029 = vmatprep.subr.bf16.mxu0 %v21659_v0  ;;  %v11810_v30 = vld [vmem:[%s26705_s9 + $0x90] sm:$0xff] }
 0xde6   :  { %19111 = vmatmul.mubr.msk.f32.gmra.mrb[104].mxu0 %vm7715_vm9, %v16254_v33  ;;  %19082 = vmatmul.mubr.msk.f32.gmra.mrb[102].mxu1 %vm7715_vm9, %v11166_v55  ;;  %v16283_v33 = vld [vmem:[%s26706_s8 + $0x88] sm:$0xff]  ;;  %v16284_v55 = vld [vmem:[%s26706_s8 + $0x90] sm:$0xff]  ;;  %v21045_v50 = vpack.c.bf16 %v11811_v48, %v11810_v30 }
 0xde7   :  { %19113 = vmatprep.mubr.msk.f32.mxu0 %vm21660_vm0, %v21661_v4  ;;  %19084 = vmatprep.mubr.msk.f32.mxu1 %vm21660_vm0, %v21661_v4 }
 0xde8   :  { %21019 = vmatpush3.bf16.msra.mxu1 %v21018_v41  ;;  %21031 = vmatpush3.bf16.msra.mxu0 %v21030_v53  ;;  %v16285_v41 = vld [vmem:[%s26706_s8 + $0x98] sm:$0xff]  ;;  %v16327_v53 = vld [vmem:[%s26706_s8 + $0x108] sm:$0xff] }
 0xde9   :  { %21020 = vmatprep.subr.bf16.mxu1 %v21659_v0  ;;  %21032 = vmatprep.subr.bf16.mxu0 %v21659_v0 }
 0xdea   :  { %19114 = vmatmul.mubr.msk.f32.gmra.mrb[106].mxu0 %vm7715_vm9, %v16255_v59  ;;  %19085 = vmatmul.mubr.msk.f32.gmra.mrb[104].mxu1 %vm7715_vm9, %v11167_v47  ;;  %v16302_v59 = vld [vmem:[%s26706_s8 + $0xb0] sm:$0xff]  ;;  %v16303_v47 = vld [vmem:[%s26706_s8 + $0xb8] sm:$0xff] }
 0xdeb   :  { %19116 = vmatprep.mubr.msk.f32.mxu0 %vm21660_vm0, %v21661_v4  ;;  %19087 = vmatprep.mubr.msk.f32.mxu1 %vm21660_vm0, %v21661_v4 }
 0xdec   :  { %21022 = vmatpush3.bf16.msra.mxu1 %v21021_v62  ;;  %21034 = vmatpush3.bf16.msra.mxu0 %v21033_v6  ;;  %v16304_v62 = vld [vmem:[%s26706_s8 + $0xc0] sm:$0xff]  ;;  %v21048_v6 = vpack.c.bf16 %v11813_v3, %v11812_v57 }
 0xded   :  { %21035 = vmatprep.subr.bf16.mxu1 %v21659_v0  ;;  %21041 = vmatprep.subr.bf16.mxu0 %v21659_v0 }
 0xdee   :  { %19117 = vmatmul.mubr.msk.f32.gmra.mrb[108].mxu0 %vm7715_vm9, %v16256_v61  ;;  %19088 = vmatmul.mubr.msk.f32.gmra.mrb[106].mxu1 %vm7715_vm9, %v11168_v8  ;;  %v16305_v61 = vld [vmem:[%s26706_s8 + $0xc8] sm:$0xff]  ;;  %v16306_v8 = vld [vmem:[%s26706_s8 + $0xd0] sm:$0xff] }
 0xdef   :  { %19119 = vmatprep.mubr.msk.f32.mxu0 %vm21660_vm0, %v21661_v4  ;;  %19090 = vmatprep.mubr.msk.f32.mxu1 %vm21660_vm0, %v21661_v4 }
 0xdf2   :  { %19120 = vmatmul.mubr.msk.f32.gmra.mrb[110].mxu0 %vm7715_vm9, %v16257_v18  ;;  %19091 = vmatmul.mubr.msk.f32.gmra.mrb[108].mxu1 %vm7715_vm9, %v11169_v31  ;;  %v16307_v18 = vld [vmem:[%s26706_s8 + $0xd8] sm:$0xff]  ;;  %v16322_v31 = vld [vmem:[%s26706_s8 + $0xe0] sm:$0xff] }
 0xdf3   :  { %19122 = vmatprep.mubr.msk.f32.mxu0 %vm21660_vm0, %v21661_v4  ;;  %19093 = vmatprep.mubr.msk.f32.mxu1 %vm21660_vm0, %v21661_v4 }
 0xdf6   :  { %19123 = vmatmul.mubr.msk.f32.gmra.mrb[112].mxu0 %vm7715_vm9, %v16258_v34  ;;  %19094 = vmatmul.mubr.msk.f32.gmra.mrb[110].mxu1 %vm7715_vm9, %v11170_v51  ;;  %v16323_v34 = vld [vmem:[%s26706_s8 + $0xe8] sm:$0xff]  ;;  %v16324_v51 = vld [vmem:[%s26706_s8 + $0xf0] sm:$0xff] }
 0xdf7   :  { %19141 = vmatprep.mubr.msk.f32.mxu1 %vm21660_vm0, %v21661_v4  ;;  %19178 = vmatprep.mubr.msk.f32.mxu0 %vm21660_vm0, %v21661_v4 }
 0xeb1   :  { %v11395_v7 = vpop.f32.mrb[100].mxu0  ;;  %v11258_v9 = vpop.f32.mrb[98].mxu1 }
 0xeb2   :  { %19142 = vmatmul.mubr.msk.f32.vlgmr.msra.gmra.mrb[112].mxu1 %vm72_vm1, %v11395_v7  ;;  %v19106_v10 = vpop.f32.mrb[101].mxu0  ;;  %19179 = vmatmul.mubr.msk.f32.vlgmr.msra.gmra.mrb[114].mxu0 %vm72_vm1, %v11258_v9  ;;  %v19077_v12 = vpop.f32.mrb[99].mxu1  ;;  %v16328_v7 = vld [vmem:[%s26706_s8 + $0x110] sm:$0xff] }
 0xeb3   :  { %21037 = vmatpush3.bf16.msra.mxu1 %v25027_v14  ;;  %19144 = vmatprep.mubr.msk.f32.mxu1 %vm21660_vm0, %v21661_v4  ;;  %v11814_v9 = vld [vmem:[%s26705_s9 + $0xb0] sm:$0xff]  ;;  %v11815_v10 = vld [vmem:[%s26705_s9 + $0xb8] sm:$0xff] }
 0xeb4   :  { %21038 = vmatprep.subr.bf16.mxu1 %v21659_v0  ;;  %19181 = vmatprep.mubr.msk.f32.mxu0 %vm21660_vm0, %v21661_v4  ;;  %v21051_v12 = vpack.c.bf16 %v11815_v10, %v11814_v9  ;;  %v16429_v10 = vld [vmem:[%s26706_s8 + $0x208] sm:$0xff] }
 0xeb5   :  { %v11400_v15 = vpop.f32.mrb[102].mxu0  ;;  %v11263_v16 = vpop.f32.mrb[100].mxu1  ;;  %21043 = vmatpush3.bf16.msra.mxu0 %v21042_v46 }
 0xeb6   :  { %19145 = vmatmul.mubr.msk.f32.gmra.mrb[114].mxu1 %vm72_vm1, %v11400_v15  ;;  %v19109_v28 = vpop.f32.mrb[103].mxu0  ;;  %19182 = vmatmul.mubr.msk.f32.gmra.mrb[116].mxu0 %vm72_vm1, %v11263_v16  ;;  %v19080_v24 = vpop.f32.mrb[101].mxu1  ;;  %v16343_v15 = vld [vmem:[%s26706_s8 + $0x118] sm:$0xff]  ;;  %v16344_v16 = vld [vmem:[%s26706_s8 + $0x120] sm:$0xff] }
 0xeb7   :  { %21040 = vmatpush3.bf16.msra.mxu1 %v25029_v25  ;;  %19147 = vmatprep.mubr.msk.f32.mxu1 %vm21660_vm0, %v21661_v4  ;;  %v16345_v28 = vld [vmem:[%s26706_s8 + $0x128] sm:$0xff]  ;;  %v16346_v24 = vld [vmem:[%s26706_s8 + $0x130] sm:$0xff] }
 0xeb8   :  { %19184 = vmatprep.mubr.msk.f32.mxu0 %vm21660_vm0, %v21661_v4  ;;  %21053 = vmatprep.subr.bf16.mxu1 %v21659_v0 }
 0xeb9   :  { %v11405_v19 = vpop.f32.mrb[104].mxu0  ;;  %v11268_v22 = vpop.f32.mrb[102].mxu1  ;;  %21044 = vmatprep.subr.bf16.mxu0 %v21659_v0 }
 0xeba   :  { %19148 = vmatmul.mubr.msk.f32.gmra.mrb[116].mxu1 %vm72_vm1, %v11405_v19  ;;  %v19112_v20 = vpop.f32.mrb[105].mxu0  ;;  %19185 = vmatmul.mubr.msk.f32.gmra.mrb[118].mxu0 %vm72_vm1, %v11268_v22  ;;  %v19083_v60 = vpop.f32.mrb[103].mxu1  ;;  %v16347_v19 = vld [vmem:[%s26706_s8 + $0x138] sm:$0xff]  ;;  %v16348_v22 = vld [vmem:[%s26706_s8 + $0x140] sm:$0xff] }
 0xebb   :  { %19150 = vmatprep.mubr.msk.f32.mxu1 %vm21660_vm0, %v21661_v4  ;;  %19187 = vmatprep.mubr.msk.f32.mxu0 %vm21660_vm0, %v21661_v4  ;;  %v16349_v20 = vld [vmem:[%s26706_s8 + $0x148] sm:$0xff]  ;;  %v16364_v60 = vld [vmem:[%s26706_s8 + $0x150] sm:$0xff] }
 0xebc   :  { %21046 = vmatpush3.bf16.msra.mxu0 %v21045_v50 }
 0xebd   :  { %v11410_v11 = vpop.f32.mrb[106].mxu0  ;;  %v11273_v23 = vpop.f32.mrb[104].mxu1  ;;  %21047 = vmatprep.subr.bf16.mxu0 %v21659_v0 }
 0xebe   :  { %19151 = vmatmul.mubr.msk.f32.gmra.mrb[118].mxu1 %vm72_vm1, %v11410_v11  ;;  %v19115_v1 = vpop.f32.mrb[107].mxu0  ;;  %19188 = vmatmul.mubr.msk.f32.gmra.mrb[120].mxu0 %vm72_vm1, %v11273_v23  ;;  %v19086_v21 = vpop.f32.mrb[105].mxu1  ;;  %v16365_v11 = vld [vmem:[%s26706_s8 + $0x158] sm:$0xff]  ;;  %v16366_v23 = vld [vmem:[%s26706_s8 + $0x160] sm:$0xff] }
 0xebf   :  { %19153 = vmatprep.mubr.msk.f32.mxu1 %vm21660_vm0, %v21661_v4  ;;  %19190 = vmatprep.mubr.msk.f32.mxu0 %vm21660_vm0, %v21661_v4  ;;  %v16367_v1 = vld [vmem:[%s26706_s8 + $0x168] sm:$0xff]  ;;  %v16368_v21 = vld [vmem:[%s26706_s8 + $0x170] sm:$0xff] }
 0xec0   :  { %21049 = vmatpush3.bf16.msra.mxu0 %v21048_v6 }
 0xec1   :  { %v11415_v17 = vpop.f32.mrb[108].mxu0  ;;  %v11278_v54 = vpop.f32.mrb[106].mxu1  ;;  %21050 = vmatprep.subr.bf16.mxu0 %v21659_v0 }
 0xec2   :  { %19154 = vmatmul.mubr.msk.f32.gmra.mrb[120].mxu1 %vm72_vm1, %v11415_v17  ;;  %v19118_v2 = vpop.f32.mrb[109].mxu0  ;;  %19191 = vmatmul.mubr.msk.f32.gmra.mrb[122].mxu0 %vm72_vm1, %v11278_v54  ;;  %v19089_v39 = vpop.f32.mrb[107].mxu1  ;;  %v16369_v17 = vld [vmem:[%s26706_s8 + $0x178] sm:$0xff]  ;;  %v16370_v54 = vld [vmem:[%s26706_s8 + $0x180] sm:$0xff] }
 0xec3   :  { %19156 = vmatprep.mubr.msk.f32.mxu1 %vm21660_vm0, %v21661_v4  ;;  %19193 = vmatprep.mubr.msk.f32.mxu0 %vm21660_vm0, %v21661_v4  ;;  %v16385_v2 = vld [vmem:[%s26706_s8 + $0x188] sm:$0xff]  ;;  %v16386_v39 = vld [vmem:[%s26706_s8 + $0x190] sm:$0xff] }
 0xec4   :  { %21052 = vmatpush3.bf16.msra.mxu0 %v21051_v12 }
 0xec5   :  { %v11420_v63 = vpop.f32.mrb[110].mxu0  ;;  %v11283_v49 = vpop.f32.mrb[108].mxu1  ;;  %21059 = vmatprep.subr.bf16.mxu0 %v21659_v0 }
 0xec6   :  { %19157 = vmatmul.mubr.msk.f32.gmra.mrb[122].mxu1 %vm72_vm1, %v11420_v63  ;;  %v19121_v42 = vpop.f32.mrb[111].mxu0  ;;  %19194 = vmatmul.mubr.msk.f32.gmra.mrb[124].mxu0 %vm72_vm1, %v11283_v49  ;;  %v19092_v45 = vpop.f32.mrb[109].mxu1  ;;  %v16387_v63 = vld [vmem:[%s26706_s8 + $0x198] sm:$0xff]  ;;  %v16388_v49 = vld [vmem:[%s26706_s8 + $0x1a0] sm:$0xff] }
 0xec7   :  { %19159 = vmatprep.mubr.msk.f32.mxu1 %vm21660_vm0, %v21661_v4  ;;  %19196 = vmatprep.mubr.msk.f32.mxu0 %vm21660_vm0, %v21661_v4  ;;  %v16389_v42 = vld [vmem:[%s26706_s8 + $0x1a8] sm:$0xff]  ;;  %v16390_v45 = vld [vmem:[%s26706_s8 + $0x1b0] sm:$0xff] }
 0xec9   :  { %v11425_v52 = vpop.f32.mrb[112].mxu0  ;;  %v11288_v27 = vpop.f32.mrb[110].mxu1 }
 0xeca   :  { %19160 = vmatmul.mubr.msk.f32.gmra.mrb[124].mxu1 %vm72_vm1, %v11425_v52  ;;  %v19124_v40 = vpop.f32.mrb[113].mxu0  ;;  %19197 = vmatmul.mubr.msk.f32.gmra.mrb[126].mxu0 %vm72_vm1, %v11288_v27  ;;  %v19095_v56 = vpop.f32.mrb[111].mxu1  ;;  %v16391_v52 = vld [vmem:[%s26706_s8 + $0x1b8] sm:$0xff]  ;;  %v16406_v27 = vld [vmem:[%s26706_s8 + $0x1c0] sm:$0xff] }
 0xecb   :  { %19207 = vmatprep.mubr.msk.f32.mxu1 %vm21660_vm0, %v21661_v4  ;;  %19244 = vmatprep.mubr.msk.f32.mxu0 %vm21660_vm0, %v21661_v4  ;;  %v16407_v40 = vld [vmem:[%s26706_s8 + $0x1c8] sm:$0xff]  ;;  %v16408_v56 = vld [vmem:[%s26706_s8 + $0x1d0] sm:$0xff] }
 0xece   :  { %19208 = vmatmul.mubr.msk.f32.vlgmr.msra.gmra.mrb[126].mxu1 %vm7715_vm9, %v16280_v5  ;;  %v16409_v5 = vld [vmem:[%s26706_s8 + $0x1d8] sm:$0xff] }
 0xecf   :  { %21055 = vmatpush3.bf16.msra.mxu1 %v25027_v14  ;;  %19210 = vmatprep.mubr.msk.f32.mxu1 %vm21660_vm0, %v21661_v4 }
 0xed0   :  { %21056 = vmatprep.subr.bf16.mxu1 %v21659_v0 }
 0xed2   :  { %19211 = vmatmul.mubr.msk.f32.gmra.mrb[128].mxu1 %vm7715_vm9, %v16281_v29  ;;  %v16410_v29 = vld [vmem:[%s26706_s8 + $0x1e0] sm:$0xff] }
 0xed3   :  { %21058 = vmatpush3.bf16.msra.mxu1 %v25029_v25  ;;  %19213 = vmatprep.mubr.msk.f32.mxu1 %vm21660_vm0, %v21661_v4 }
 0xed4   :  { %21071 = vmatprep.subr.bf16.mxu1 %v21659_v0 }
 0xed6   :  { %19214 = vmatmul.mubr.msk.f32.gmra.mrb[130].mxu1 %vm7715_vm9, %v16282_v32 }
 0xed7   :  { %19216 = vmatprep.mubr.msk.f32.mxu1 %vm21660_vm0, %v21661_v4 }
 0xeda   :  { %19217 = vmatmul.mubr.msk.f32.gmra.mrb[132].mxu1 %vm7715_vm9, %v16283_v33 }
 0xedb   :  { %19219 = vmatprep.mubr.msk.f32.mxu1 %vm21660_vm0, %v21661_v4 }
 0xede   :  { %19220 = vmatmul.mubr.msk.f32.gmra.mrb[134].mxu1 %vm7715_vm9, %v16284_v55 }
 0xedf   :  { %19222 = vmatprep.mubr.msk.f32.mxu1 %vm21660_vm0, %v21661_v4 }
 0xee2   :  { %19223 = vmatmul.mubr.msk.f32.gmra.mrb[136].mxu1 %vm7715_vm9, %v16285_v41 }
 0xee3   :  { %19225 = vmatprep.mubr.msk.f32.mxu1 %vm21660_vm0, %v21661_v4 }
 0xee6   :  { %19226 = vmatmul.mubr.msk.f32.gmra.mrb[138].mxu1 %vm7715_vm9, %v16286_v43 }
 0xee7   :  { %19273 = vmatprep.mubr.msk.f32.mxu1 %vm21660_vm0, %v21661_v4 }
 0xeea   :  { %19274 = vmatmul.mubr.msk.f32.vlgmr.msra.gmra.mrb[140].mxu1 %vm7715_vm9, %v16301_v58  ;;  %v16411_v58 = vld [vmem:[%s26706_s8 + $0x1e8] sm:$0xff] }
 0xeeb   :  { %21073 = vmatpush3.bf16.msra.mxu1 %v25027_v14  ;;  %19276 = vmatprep.mubr.msk.f32.mxu1 %vm21660_vm0, %v21661_v4 }
 0xeec   :  { %21074 = vmatprep.subr.bf16.mxu1 %v21659_v0 }
 0xeee   :  { %19277 = vmatmul.mubr.msk.f32.gmra.mrb[142].mxu1 %vm7715_vm9, %v16302_v59 }
 0xeef   :  { %21076 = vmatpush3.bf16.msra.mxu1 %v25029_v25  ;;  %19279 = vmatprep.mubr.msk.f32.mxu1 %vm21660_vm0, %v21661_v4 }
 0xef0   :  { %21089 = vmatprep.subr.bf16.mxu1 %v21659_v0 }
 0xef2   :  { %19280 = vmatmul.mubr.msk.f32.gmra.mrb[144].mxu1 %vm7715_vm9, %v16303_v47 }
 0xef3   :  { %19282 = vmatprep.mubr.msk.f32.mxu1 %vm21660_vm0, %v21661_v4 }
 0xef6   :  { %19283 = vmatmul.mubr.msk.f32.gmra.mrb[146].mxu1 %vm7715_vm9, %v16304_v62 }
 0xef7   :  { %19285 = vmatprep.mubr.msk.f32.mxu1 %vm21660_vm0, %v21661_v4 }
 0xefa   :  { %19286 = vmatmul.mubr.msk.f32.gmra.mrb[148].mxu1 %vm7715_vm9, %v16305_v61 }
 0xefb   :  { %19288 = vmatprep.mubr.msk.f32.mxu1 %vm21660_vm0, %v21661_v4 }
 0xefe   :  { %19289 = vmatmul.mubr.msk.f32.gmra.mrb[150].mxu1 %vm7715_vm9, %v16306_v8 }
 0xeff   :  { %19291 = vmatprep.mubr.msk.f32.mxu1 %vm21660_vm0, %v21661_v4 }
 0xf02   :  { %19292 = vmatmul.mubr.msk.f32.gmra.mrb[152].mxu1 %vm7715_vm9, %v16307_v18  ;;  %v16412_v18 = vld [vmem:[%s26706_s8 + $0x1f0] sm:$0xff] }
 0xf03   :  { %19339 = vmatprep.mubr.msk.f32.mxu1 %vm21660_vm0, %v21661_v4 }
 0xf06   :  { %19340 = vmatmul.mubr.msk.f32.vlgmr.msra.gmra.mrb[154].mxu1 %vm7715_vm9, %v16322_v31 }
 0xf07   :  { %21091 = vmatpush3.bf16.msra.mxu1 %v25027_v14  ;;  %19342 = vmatprep.mubr.msk.f32.mxu1 %vm21660_vm0, %v21661_v4 }
 0xf08   :  { %21092 = vmatprep.subr.bf16.mxu1 %v21659_v0 }
 0xf0a   :  { %19343 = vmatmul.mubr.msk.f32.gmra.mrb[156].mxu1 %vm7715_vm9, %v16323_v34 }
 0xf0b   :  { %21094 = vmatpush3.bf16.msra.mxu1 %v25029_v25  ;;  %19345 = vmatprep.mubr.msk.f32.mxu1 %vm21660_vm0, %v21661_v4 }
 0xf0c   :  { %21107 = vmatprep.subr.bf16.mxu1 %v21659_v0 }
 0xf0e   :  { %19346 = vmatmul.mubr.msk.f32.gmra.mrb[158].mxu1 %vm7715_vm9, %v16324_v51 }
 0xf0f   :  { %19348 = vmatprep.mubr.msk.f32.mxu1 %vm21660_vm0, %v21661_v4 }
 0xf12   :  { %19349 = vmatmul.mubr.msk.f32.gmra.mrb[160].mxu1 %vm7715_vm9, %v16325_v35 }
 0xf13   :  { %19351 = vmatprep.mubr.msk.f32.mxu1 %vm21660_vm0, %v21661_v4 }
 0xf16   :  { %19352 = vmatmul.mubr.msk.f32.gmra.mrb[162].mxu1 %vm7715_vm9, %v16326_v26 }
 0xf17   :  { %19354 = vmatprep.mubr.msk.f32.mxu1 %vm21660_vm0, %v21661_v4 }
 0xf1a   :  { %19355 = vmatmul.mubr.msk.f32.gmra.mrb[164].mxu1 %vm7715_vm9, %v16327_v53  ;;  %v16428_v53 = vld [vmem:[%s26706_s8 + $0x200] sm:$0xff] }
 0xf1b   :  { %19357 = vmatprep.mubr.msk.f32.mxu1 %vm21660_vm0, %v21661_v4 }
 0xf1e   :  { %19358 = vmatmul.mubr.msk.f32.gmra.mrb[166].mxu1 %vm7715_vm9, %v16328_v7 }
 0xf1f   :  { %19405 = vmatprep.mubr.msk.f32.mxu1 %vm21660_vm0, %v21661_v4 }
 0xf22   :  { %19406 = vmatmul.mubr.msk.f32.vlgmr.msra.gmra.mrb[168].mxu1 %vm7715_vm9, %v16343_v15 }
 0xf23   :  { %21109 = vmatpush3.bf16.msra.mxu1 %v25027_v14  ;;  %19408 = vmatprep.mubr.msk.f32.mxu1 %vm21660_vm0, %v21661_v4 }
 0xf24   :  { %21110 = vmatprep.subr.bf16.mxu1 %v21659_v0 }
 0xf26   :  { %19409 = vmatmul.mubr.msk.f32.gmra.mrb[170].mxu1 %vm7715_vm9, %v16344_v16 }
 0xf27   :  { %21112 = vmatpush3.bf16.msra.mxu1 %v25029_v25  ;;  %19411 = vmatprep.mubr.msk.f32.mxu1 %vm21660_vm0, %v21661_v4 }
 0xf28   :  { %21125 = vmatprep.subr.bf16.mxu1 %v21659_v0 }
 0xf2a   :  { %19412 = vmatmul.mubr.msk.f32.gmra.mrb[172].mxu1 %vm7715_vm9, %v16345_v28 }
 0xf2b   :  { %19414 = vmatprep.mubr.msk.f32.mxu1 %vm21660_vm0, %v21661_v4 }
 0xf2e   :  { %19415 = vmatmul.mubr.msk.f32.gmra.mrb[174].mxu1 %vm7715_vm9, %v16346_v24 }
 0xf2f   :  { %19417 = vmatprep.mubr.msk.f32.mxu1 %vm21660_vm0, %v21661_v4 }
 0xf32   :  { %19418 = vmatmul.mubr.msk.f32.gmra.mrb[176].mxu1 %vm7715_vm9, %v16347_v19  ;;  %v16430_v19 = vld [vmem:[%s26706_s8 + $0x210] sm:$0xff] }
 0xf33   :  { %19420 = vmatprep.mubr.msk.f32.mxu1 %vm21660_vm0, %v21661_v4 }
 0xf36   :  { %19421 = vmatmul.mubr.msk.f32.gmra.mrb[178].mxu1 %vm7715_vm9, %v16348_v22 }
 0xf37   :  { %19423 = vmatprep.mubr.msk.f32.mxu1 %vm21660_vm0, %v21661_v4 }
 0xf3a   :  { %19424 = vmatmul.mubr.msk.f32.gmra.mrb[180].mxu1 %vm7715_vm9, %v16349_v20 }
 0xf3b   :  { %19471 = vmatprep.mubr.msk.f32.mxu1 %vm21660_vm0, %v21661_v4 }
 0xf3e   :  { %19472 = vmatmul.mubr.msk.f32.vlgmr.msra.gmra.mrb[182].mxu1 %vm7715_vm9, %v16364_v60  ;;  %v12073_v60 = vld [vmem:[%s26705_s9 + $0xc0] sm:$0xff] }
 0xf3f   :  { %21127 = vmatpush3.bf16.msra.mxu1 %v25027_v14  ;;  %19474 = vmatprep.mubr.msk.f32.mxu1 %vm21660_vm0, %v21661_v4 }
 0xf40   :  { %21128 = vmatprep.subr.bf16.mxu1 %v21659_v0 }
 0xf42   :  { %19475 = vmatmul.mubr.msk.f32.gmra.mrb[184].mxu1 %vm7715_vm9, %v16365_v11  ;;  %v12074_v11 = vld [vmem:[%s26705_s9 + $0xc8] sm:$0xff] }
 0xf43   :  { %21130 = vmatpush3.bf16.msra.mxu1 %v25029_v25  ;;  %19477 = vmatprep.mubr.msk.f32.mxu1 %vm21660_vm0, %v21661_v4 }
 0xf44   :  { %21143 = vmatprep.subr.bf16.mxu1 %v21659_v0 }
 0xf46   :  { %19478 = vmatmul.mubr.msk.f32.gmra.mrb[186].mxu1 %vm7715_vm9, %v16366_v23 }
 0xf47   :  { %19480 = vmatprep.mubr.msk.f32.mxu1 %vm21660_vm0, %v21661_v4 }
 0xf4a   :  { %19481 = vmatmul.mubr.msk.f32.gmra.mrb[188].mxu1 %vm7715_vm9, %v16367_v1 }
 0xf4b   :  { %19483 = vmatprep.mubr.msk.f32.mxu1 %vm21660_vm0, %v21661_v4 }
 0xf4e   :  { %19484 = vmatmul.mubr.msk.f32.gmra.mrb[190].mxu1 %vm7715_vm9, %v16368_v21 }
 0xf4f   :  { %19486 = vmatprep.mubr.msk.f32.mxu1 %vm21660_vm0, %v21661_v4 }
 0xf52   :  { %19487 = vmatmul.mubr.msk.f32.gmra.mrb[192].mxu1 %vm7715_vm9, %v16369_v17  ;;  %v16431_v17 = vld [vmem:[%s26706_s8 + $0x218] sm:$0xff] }
 0xf53   :  { %19489 = vmatprep.mubr.msk.f32.mxu1 %vm21660_vm0, %v21661_v4 }
 0xf56   :  { %19490 = vmatmul.mubr.msk.f32.gmra.mrb[194].mxu1 %vm7715_vm9, %v16370_v54  ;;  %v21060_v54 = vpack.c.bf16 %v12074_v11, %v12073_v60 }
 0xf57   :  { %19537 = vmatprep.mubr.msk.f32.mxu1 %vm21660_vm0, %v21661_v4 }
 0xf5a   :  { %19538 = vmatmul.mubr.msk.f32.vlgmr.msra.gmra.mrb[196].mxu1 %vm7715_vm9, %v16385_v2 }
 0xf5b   :  { %21145 = vmatpush3.bf16.msra.mxu1 %v25027_v14  ;;  %19540 = vmatprep.mubr.msk.f32.mxu1 %vm21660_vm0, %v21661_v4 }
 0xf5c   :  { %21146 = vmatprep.subr.bf16.mxu1 %v21659_v0 }
 0xf5e   :  { %19541 = vmatmul.mubr.msk.f32.gmra.mrb[198].mxu1 %vm7715_vm9, %v16386_v39  ;;  %v12075_v39 = vld [vmem:[%s26705_s9 + $0xd0] sm:$0xff] }
 0xf5f   :  { %21148 = vmatpush3.bf16.msra.mxu1 %v25029_v25  ;;  %19543 = vmatprep.mubr.msk.f32.mxu1 %vm21660_vm0, %v21661_v4 }
 0xf60   :  { %21161 = vmatprep.subr.bf16.mxu1 %v21659_v0 }
 0xf62   :  { %19544 = vmatmul.mubr.msk.f32.gmra.mrb[200].mxu1 %vm7715_vm9, %v16387_v63  ;;  %v12076_v63 = vld [vmem:[%s26705_s9 + $0xd8] sm:$0xff] }
 0xf63   :  { %19546 = vmatprep.mubr.msk.f32.mxu1 %vm21660_vm0, %v21661_v4 }
 0xf66   :  { %19547 = vmatmul.mubr.msk.f32.gmra.mrb[202].mxu1 %vm7715_vm9, %v16388_v49 }
 0xf67   :  { %19549 = vmatprep.mubr.msk.f32.mxu1 %vm21660_vm0, %v21661_v4 }
 0xf6a   :  { %19550 = vmatmul.mubr.msk.f32.gmra.mrb[204].mxu1 %vm7715_vm9, %v16389_v42  ;;  %v16432_v42 = vld [vmem:[%s26706_s8 + $0x220] sm:$0xff] }
 0xf6b   :  { %19552 = vmatprep.mubr.msk.f32.mxu1 %vm21660_vm0, %v21661_v4 }
 0xf6e   :  { %19553 = vmatmul.mubr.msk.f32.gmra.mrb[206].mxu1 %vm7715_vm9, %v16390_v45  ;;  %v21063_v45 = vpack.c.bf16 %v12076_v63, %v12075_v39 }
 0xf6f   :  { %19555 = vmatprep.mubr.msk.f32.mxu1 %vm21660_vm0, %v21661_v4 }
 0xf72   :  { %19556 = vmatmul.mubr.msk.f32.gmra.mrb[208].mxu1 %vm7715_vm9, %v16391_v52 }
 0xf73   :  { %19603 = vmatprep.mubr.msk.f32.mxu1 %vm21660_vm0, %v21661_v4 }
 0xf76   :  { %19604 = vmatmul.mubr.msk.f32.vlgmr.msra.gmra.mrb[210].mxu1 %vm7715_vm9, %v16406_v27  ;;  %v12077_v27 = vld [vmem:[%s26705_s9 + $0xe0] sm:$0xff] }
 0xf77   :  { %21163 = vmatpush3.bf16.msra.mxu1 %v25027_v14  ;;  %19606 = vmatprep.mubr.msk.f32.mxu1 %vm21660_vm0, %v21661_v4 }
 0xf78   :  { %21164 = vmatprep.subr.bf16.mxu1 %v21659_v0 }
 0xf7a   :  { %19607 = vmatmul.mubr.msk.f32.gmra.mrb[212].mxu1 %vm7715_vm9, %v16407_v40  ;;  %v12078_v40 = vld [vmem:[%s26705_s9 + $0xe8] sm:$0xff] }
 0xf7b   :  { %21166 = vmatpush3.bf16.msra.mxu1 %v25029_v25  ;;  %19609 = vmatprep.mubr.msk.f32.mxu1 %vm21660_vm0, %v21661_v4 }
 0xf7c   :  { %21179 = vmatprep.subr.bf16.mxu1 %v21659_v0 }
 0xf7e   :  { %19610 = vmatmul.mubr.msk.f32.gmra.mrb[214].mxu1 %vm7715_vm9, %v16408_v56 }
 0xf7f   :  { %19612 = vmatprep.mubr.msk.f32.mxu1 %vm21660_vm0, %v21661_v4 }
 0xf82   :  { %19613 = vmatmul.mubr.msk.f32.gmra.mrb[216].mxu1 %vm7715_vm9, %v16409_v5  ;;  %v16433_v5 = vld [vmem:[%s26706_s8 + $0x228] sm:$0xff] }
 0xf83   :  { %19615 = vmatprep.mubr.msk.f32.mxu1 %vm21660_vm0, %v21661_v4 }
 0xf85   :  { %v11524_v32 = vpop.f32.mrb[112].mxu1  ;;  %v11645_v33 = vpop.f32.mrb[114].mxu0 }
 0xf86   :  { %19616 = vmatmul.mubr.msk.f32.gmra.mrb[218].mxu1 %vm7715_vm9, %v16410_v29  ;;  %v19143_v55 = vpop.f32.mrb[113].mxu1  ;;  %v25561_v41 = vadd.f32 %v11645_v33, %v11524_v32  ;;  %v19180_v43 = vpop.f32.mrb[115].mxu0  ;;  %v21066_v29 = vpack.c.bf16 %v12078_v40, %v12077_v27 }
 0xf87   :  { %19618 = vmatprep.mubr.msk.f32.mxu1 %vm21660_vm0, %v21661_v4  ;;  %v12079_v55 = vld [vmem:[%s26705_s9 + $0xf0] sm:$0xff]  ;;  %v12080_v43 = vld [vmem:[%s26705_s9 + $0xf8] sm:$0xff] }
 0xf89   :  { %v11529_v59 = vpop.f32.mrb[114].mxu1  ;;  %v11650_v47 = vpop.f32.mrb[116].mxu0 }
 0xf8a   :  { %19619 = vmatmul.mubr.msk.f32.gmra.mrb[220].mxu1 %vm7715_vm9, %v16411_v58  ;;  %v19146_v62 = vpop.f32.mrb[115].mxu1  ;;  %v25569_v61 = vadd.f32 %v11650_v47, %v11529_v59  ;;  %v19183_v8 = vpop.f32.mrb[117].mxu0  ;;  %v16448_v58 = vld [vmem:[%s26706_s8 + $0x230] sm:$0xff]  ;;  %v21069_v47 = vpack.c.bf16 %v12080_v43, %v12079_v55  ;;  %v16473_v55 = vld [vmem:[%s26706_s8 + $0x288] sm:$0xff] }
 0xf8b   :  { %19621 = vmatprep.mubr.msk.f32.mxu1 %vm21660_vm0, %v21661_v4  ;;  %v16449_v8 = vld [vmem:[%s26706_s8 + $0x238] sm:$0xff] }
 0xf8d   :  { %v11534_v31 = vpop.f32.mrb[116].mxu1  ;;  %v11655_v34 = vpop.f32.mrb[118].mxu0 }
 0xf8e   :  { %19622 = vmatmul.mubr.msk.f32.gmra.mrb[222].mxu1 %vm7715_vm9, %v16412_v18  ;;  %v19149_v51 = vpop.f32.mrb[117].mxu1  ;;  %v25577_v35 = vadd.f32 %v11655_v34, %v11534_v31  ;;  %v19186_v44 = vpop.f32.mrb[119].mxu0  ;;  %v16450_v34 = vld [vmem:[%s26706_s8 + $0x240] sm:$0xff] }
 0xf8f   :  { %19669 = vmatprep.mubr.msk.f32.mxu1 %vm21660_vm0, %v21661_v4 }
 0xf91   :  { %v11539_v46 = vpop.f32.mrb[118].mxu1  ;;  %v11660_v26 = vpop.f32.mrb[120].mxu0 }
 0xf92   :  { %19670 = vmatmul.mubr.msk.f32.vlgmr.msra.gmra.mrb[224].mxu1 %vm7715_vm9, %v16427_v13  ;;  %v19152_v30 = vpop.f32.mrb[119].mxu1  ;;  %v25585_v48 = vadd.f32 %v11660_v26, %v11539_v46  ;;  %v19189_v50 = vpop.f32.mrb[121].mxu0  ;;  %v16451_v13 = vld [vmem:[%s26706_s8 + $0x248] sm:$0xff]  ;;  %v12338_v26 = vld [vmem:[%s26705_s9 + $0x100] sm:$0xff] }
 0xf93   :  { %21181 = vmatpush3.bf16.msra.mxu1 %v25027_v14  ;;  %19672 = vmatprep.mubr.msk.f32.mxu1 %vm21660_vm0, %v21661_v4  ;;  %v12339_v30 = vld [vmem:[%s26705_s9 + $0x108] sm:$0xff] }
 0xf94   :  { %21182 = vmatprep.subr.bf16.mxu1 %v21659_v0 }
 0xf95   :  { %v11544_v57 = vpop.f32.mrb[120].mxu1  ;;  %v11665_v3 = vpop.f32.mrb[122].mxu0 }
 0xf96   :  { %19673 = vmatmul.mubr.msk.f32.gmra.mrb[226].mxu1 %vm7715_vm9, %v16428_v53  ;;  %v19155_v6 = vpop.f32.mrb[121].mxu1  ;;  %v25595_v7 = vadd.f32 %v11665_v3, %v11544_v57  ;;  %v19192_v9 = vpop.f32.mrb[123].mxu0  ;;  %v16452_v53 = vld [vmem:[%s26706_s8 + $0x250] sm:$0xff]  ;;  %v21078_v57 = vpack.c.bf16 %v12339_v30, %v12338_v26 }
 0xf97   :  { %21184 = vmatpush3.bf16.msra.mxu1 %v25029_v25  ;;  %19675 = vmatprep.mubr.msk.f32.mxu1 %vm21660_vm0, %v21661_v4  ;;  %v12340_v6 = vld [vmem:[%s26705_s9 + $0x110] sm:$0xff]  ;;  %v12341_v9 = vld [vmem:[%s26705_s9 + $0x118] sm:$0xff] }
 0xf98   :  { %21197 = vmatprep.subr.bf16.mxu1 %v21659_v0 }
 0xf99   :  { %v11549_v12 = vpop.f32.mrb[122].mxu1  ;;  %v11670_v15 = vpop.f32.mrb[124].mxu0 }
 0xf9a   :  { %19676 = vmatmul.mubr.msk.f32.gmra.mrb[228].mxu1 %vm7715_vm9, %v16429_v10  ;;  %v19158_v16 = vpop.f32.mrb[123].mxu1  ;;  %v25605_v28 = vadd.f32 %v11670_v15, %v11549_v12  ;;  %v19195_v24 = vpop.f32.mrb[125].mxu0  ;;  %v16453_v12 = vld [vmem:[%s26706_s8 + $0x258] sm:$0xff]  ;;  %v21081_v15 = vpack.c.bf16 %v12341_v9, %v12340_v6 }
 0xf9b   :  { %19678 = vmatprep.mubr.msk.f32.mxu1 %vm21660_vm0, %v21661_v4  ;;  %v12342_v24 = vld [vmem:[%s26705_s9 + $0x120] sm:$0xff] }
 0xf9d   :  { %v11554_v22 = vpop.f32.mrb[124].mxu1  ;;  %v11675_v20 = vpop.f32.mrb[126].mxu0 }
 0xf9e   :  { %19679 = vmatmul.mubr.msk.f32.gmra.mrb[230].mxu1 %vm7715_vm9, %v16430_v19  ;;  %v19161_v23 = vpop.f32.mrb[125].mxu1  ;;  %v25619_v1 = vadd.f32 %v11675_v20, %v11554_v22  ;;  %v19198_v21 = vpop.f32.mrb[127].mxu0  ;;  %v12343_v19 = vld [vmem:[%s26705_s9 + $0x128] sm:$0xff]  ;;  %v16454_v20 = vld [vmem:[%s26706_s8 + $0x260] sm:$0xff] }
 0xf9f   :  { %19681 = vmatprep.mubr.msk.f32.mxu1 %vm21660_vm0, %v21661_v4  ;;  %v21084_v60 = vpack.c.bf16 %v12343_v19, %v12342_v24  ;;  %v12344_v21 = vld [vmem:[%s26705_s9 + $0x130] sm:$0xff] }
 0xfa1   :  { %v11774_v2 = vpop.f32.mrb[126].mxu1 }
 0xfa2   :  { %19245 = vmatmul.mubr.msk.f32.vlgmr.msra.gmra.mrb[128].mxu0 %vm72_vm1, %v11774_v2  ;;  %19682 = vmatmul.mubr.msk.f32.gmra.mrb[232].mxu1 %vm7715_vm9, %v16431_v17  ;;  %v19209_v49 = vpop.f32.mrb[127].mxu1  ;;  %v12345_v17 = vld [vmem:[%s26705_s9 + $0x138] sm:$0xff] }
 0xfa3   :  { %19247 = vmatprep.mubr.msk.f32.mxu0 %vm21660_vm0, %v21661_v4  ;;  %19684 = vmatprep.mubr.msk.f32.mxu1 %vm21660_vm0, %v21661_v4  ;;  %v21087_v39 = vpack.c.bf16 %v12345_v17, %v12344_v21  ;;  %v16470_v49 = vld [vmem:[%s26706_s8 + $0x270] sm:$0xff]  ;;  %v16494_v21 = vld [vmem:[%s26706_s8 + $0x2c0] sm:$0xff] }
 0xfa4   :  { %21061 = vmatpush3.bf16.msra.mxu0 %v21060_v54  ;;  %v16469_v54 = vld [vmem:[%s26706_s8 + $0x268] sm:$0xff] }
 0xfa5   :  { %v11779_v52 = vpop.f32.mrb[128].mxu1  ;;  %21062 = vmatprep.subr.bf16.mxu0 %v21659_v0 }
 0xfa6   :  { %19248 = vmatmul.mubr.msk.f32.gmra.mrb[130].mxu0 %vm72_vm1, %v11779_v52  ;;  %19685 = vmatmul.mubr.msk.f32.gmra.mrb[234].mxu1 %vm7715_vm9, %v16432_v42  ;;  %v19212_v56 = vpop.f32.mrb[129].mxu1  ;;  %v16471_v52 = vld [vmem:[%s26706_s8 + $0x278] sm:$0xff] }
 0xfa7   :  { %19250 = vmatprep.mubr.msk.f32.mxu0 %vm21660_vm0, %v21661_v4  ;;  %19687 = vmatprep.mubr.msk.f32.mxu1 %vm21660_vm0, %v21661_v4  ;;  %v16472_v56 = vld [vmem:[%s26706_s8 + $0x280] sm:$0xff] }
 0xfa8   :  { %21064 = vmatpush3.bf16.msra.mxu0 %v21063_v45 }
 0xfa9   :  { %v11784_v32 = vpop.f32.mrb[130].mxu1  ;;  %21065 = vmatprep.subr.bf16.mxu0 %v21659_v0 }
 0xfaa   :  { %19251 = vmatmul.mubr.msk.f32.gmra.mrb[132].mxu0 %vm72_vm1, %v11784_v32  ;;  %19688 = vmatmul.mubr.msk.f32.gmra.mrb[236].mxu1 %vm7715_vm9, %v16433_v5  ;;  %v19215_v33 = vpop.f32.mrb[131].mxu1  ;;  %v12604_v32 = vld [vmem:[%s26705_s9 + $0x148] sm:$0xff] }
 0xfab   :  { %19253 = vmatprep.mubr.msk.f32.mxu0 %vm21660_vm0, %v21661_v4  ;;  %19735 = vmatprep.mubr.msk.f32.mxu1 %vm21660_vm0, %v21661_v4 }
 0xfac   :  { %21067 = vmatpush3.bf16.msra.mxu0 %v21066_v29  ;;  %v12603_v29 = vld [vmem:[%s26705_s9 + $0x140] sm:$0xff] }
 0xfad   :  { %v11789_v59 = vpop.f32.mrb[132].mxu1  ;;  %21068 = vmatprep.subr.bf16.mxu0 %v21659_v0  ;;  %v21096_v43 = vpack.c.bf16 %v12604_v32, %v12603_v29 }
 0xfae   :  { %19254 = vmatmul.mubr.msk.f32.gmra.mrb[134].mxu0 %vm72_vm1, %v11789_v59  ;;  %19736 = vmatmul.mubr.msk.f32.vlgmr.msra.gmra.mrb[238].mxu1 %vm7715_vm9, %v16448_v58  ;;  %v19218_v62 = vpop.f32.mrb[133].mxu1  ;;  %v12605_v59 = vld [vmem:[%s26705_s9 + $0x150] sm:$0xff] }
 0xfaf   :  { %21199 = vmatpush3.bf16.msra.mxu1 %v25027_v14  ;;  %19256 = vmatprep.mubr.msk.f32.mxu0 %vm21660_vm0, %v21661_v4 }
 0xfb0   :  { %19738 = vmatprep.mubr.msk.f32.mxu1 %vm21660_vm0, %v21661_v4  ;;  %21200 = vmatprep.subr.bf16.mxu1 %v21659_v0 }
 0xfb1   :  { %v11794_v18 = vpop.f32.mrb[134].mxu1  ;;  %21070 = vmatpush3.bf16.msra.mxu0 %v21069_v47  ;;  %v12606_v47 = vld [vmem:[%s26705_s9 + $0x158] sm:$0xff] }
 0xfb2   :  { %19257 = vmatmul.mubr.msk.f32.gmra.mrb[136].mxu0 %vm72_vm1, %v11794_v18  ;;  %19739 = vmatmul.mubr.msk.f32.gmra.mrb[240].mxu1 %vm7715_vm9, %v16449_v8  ;;  %v19221_v31 = vpop.f32.mrb[135].mxu1  ;;  %v16474_v8 = vld [vmem:[%s26706_s8 + $0x290] sm:$0xff]  ;;  %v21099_v18 = vpack.c.bf16 %v12606_v47, %v12605_v59 }
 0xfb3   :  { %21202 = vmatpush3.bf16.msra.mxu1 %v25029_v25  ;;  %19259 = vmatprep.mubr.msk.f32.mxu0 %vm21660_vm0, %v21661_v4 }
 0xfb4   :  { %19741 = vmatprep.mubr.msk.f32.mxu1 %vm21660_vm0, %v21661_v4  ;;  %21215 = vmatprep.subr.bf16.mxu1 %v21659_v0 }
 0xfb5   :  { %v11799_v51 = vpop.f32.mrb[136].mxu1  ;;  %21077 = vmatprep.subr.bf16.mxu0 %v21659_v0 }
 0xfb6   :  { %19260 = vmatmul.mubr.msk.f32.gmra.mrb[138].mxu0 %vm72_vm1, %v11799_v51  ;;  %19742 = vmatmul.mubr.msk.f32.gmra.mrb[242].mxu1 %vm7715_vm9, %v16450_v34  ;;  %v19224_v44 = vpop.f32.mrb[137].mxu1  ;;  %v12607_v34 = vld [vmem:[%s26705_s9 + $0x160] sm:$0xff]  ;;  %v12608_v51 = vld [vmem:[%s26705_s9 + $0x168] sm:$0xff] }
 0xfb7   :  { %19262 = vmatprep.mubr.msk.f32.mxu0 %vm21660_vm0, %v21661_v4  ;;  %19744 = vmatprep.mubr.msk.f32.mxu1 %vm21660_vm0, %v21661_v4 }
 0xfb9   :  { %v11804_v46 = vpop.f32.mrb[138].mxu1 }
 0xfba   :  { %19263 = vmatmul.mubr.msk.f32.gmra.mrb[140].mxu0 %vm72_vm1, %v11804_v46  ;;  %19745 = vmatmul.mubr.msk.f32.gmra.mrb[244].mxu1 %vm7715_vm9, %v16451_v13  ;;  %v19227_v50 = vpop.f32.mrb[139].mxu1  ;;  %v16475_v13 = vld [vmem:[%s26706_s8 + $0x298] sm:$0xff]  ;;  %v21102_v46 = vpack.c.bf16 %v12608_v51, %v12607_v34 }
 0xfbb   :  { %19310 = vmatprep.mubr.msk.f32.mxu0 %vm21660_vm0, %v21661_v4  ;;  %19747 = vmatprep.mubr.msk.f32.mxu1 %vm21660_vm0, %v21661_v4  ;;  %v12609_v50 = vld [vmem:[%s26705_s9 + $0x170] sm:$0xff] }
 0xfbd   :  { %v12039_v3 = vpop.f32.mrb[140].mxu1 }
 0xfbe   :  { %19311 = vmatmul.mubr.msk.f32.vlgmr.msra.gmra.mrb[142].mxu0 %vm72_vm1, %v12039_v3  ;;  %19748 = vmatmul.mubr.msk.f32.gmra.mrb[246].mxu1 %vm7715_vm9, %v16452_v53  ;;  %v19275_v10 = vpop.f32.mrb[141].mxu1  ;;  %v12610_v53 = vld [vmem:[%s26705_s9 + $0x178] sm:$0xff] }
 0xfbf   :  { %19313 = vmatprep.mubr.msk.f32.mxu0 %vm21660_vm0, %v21661_v4  ;;  %19750 = vmatprep.mubr.msk.f32.mxu1 %vm21660_vm0, %v21661_v4  ;;  %v21105_v6 = vpack.c.bf16 %v12610_v53, %v12609_v50  ;;  %v16491_v10 = vld [vmem:[%s26706_s8 + $0x2a8] sm:$0xff]  ;;  %v16515_v50 = vld [vmem:[%s26706_s8 + $0x2f8] sm:$0xff] }
 0xfc0   :  { %21079 = vmatpush3.bf16.msra.mxu0 %v21078_v57  ;;  %v16490_v57 = vld [vmem:[%s26706_s8 + $0x2a0] sm:$0xff] }
 0xfc1   :  { %v12044_v16 = vpop.f32.mrb[142].mxu1  ;;  %21080 = vmatprep.subr.bf16.mxu0 %v21659_v0 }
 0xfc2   :  { %19314 = vmatmul.mubr.msk.f32.gmra.mrb[144].mxu0 %vm72_vm1, %v12044_v16  ;;  %19751 = vmatmul.mubr.msk.f32.gmra.mrb[248].mxu1 %vm7715_vm9, %v16453_v12  ;;  %v19278_v22 = vpop.f32.mrb[143].mxu1  ;;  %v16492_v16 = vld [vmem:[%s26706_s8 + $0x2b0] sm:$0xff] }
 0xfc3   :  { %19316 = vmatprep.mubr.msk.f32.mxu0 %vm21660_vm0, %v21661_v4  ;;  %19753 = vmatprep.mubr.msk.f32.mxu1 %vm21660_vm0, %v21661_v4  ;;  %v16493_v22 = vld [vmem:[%s26706_s8 + $0x2b8] sm:$0xff] }
 0xfc4   :  { %21082 = vmatpush3.bf16.msra.mxu0 %v21081_v15 }
 0xfc5   :  { %v12049_v11 = vpop.f32.mrb[144].mxu1  ;;  %21083 = vmatprep.subr.bf16.mxu0 %v21659_v0 }
 0xfc6   :  { %19317 = vmatmul.mubr.msk.f32.gmra.mrb[146].mxu0 %vm72_vm1, %v12049_v11  ;;  %19754 = vmatmul.mubr.msk.f32.gmra.mrb[250].mxu1 %vm7715_vm9, %v16454_v20  ;;  %v19281_v23 = vpop.f32.mrb[145].mxu1  ;;  %v12869_v11 = vld [vmem:[%s26705_s9 + $0x188] sm:$0xff] }
 0xfc7   :  { %19319 = vmatprep.mubr.msk.f32.mxu0 %vm21660_vm0, %v21661_v4  ;;  %19801 = vmatprep.mubr.msk.f32.mxu1 %vm21660_vm0, %v21661_v4 }
 0xfc8   :  { %21085 = vmatpush3.bf16.msra.mxu0 %v21084_v60  ;;  %v12868_v60 = vld [vmem:[%s26705_s9 + $0x180] sm:$0xff] }
 0xfc9   :  { %v12054_v2 = vpop.f32.mrb[146].mxu1  ;;  %21086 = vmatprep.subr.bf16.mxu0 %v21659_v0  ;;  %v21114_v17 = vpack.c.bf16 %v12869_v11, %v12868_v60 }
 0xfca   :  { %19320 = vmatmul.mubr.msk.f32.gmra.mrb[148].mxu0 %vm72_vm1, %v12054_v2  ;;  %19802 = vmatmul.mubr.msk.f32.vlgmr.msra.gmra.mrb[252].mxu1 %vm7715_vm9, %v16469_v54  ;;  %v19284_v63 = vpop.f32.mrb[147].mxu1  ;;  %v12870_v2 = vld [vmem:[%s26705_s9 + $0x190] sm:$0xff] }
 0xfcb   :  { %21217 = vmatpush3.bf16.msra.mxu1 %v25027_v14  ;;  %19322 = vmatprep.mubr.msk.f32.mxu0 %vm21660_vm0, %v21661_v4 }
 0xfcc   :  { %19804 = vmatprep.mubr.msk.f32.mxu1 %vm21660_vm0, %v21661_v4  ;;  %21218 = vmatprep.subr.bf16.mxu1 %v21659_v0 }
 0xfcd   :  { %v12059_v42 = vpop.f32.mrb[148].mxu1  ;;  %21088 = vmatpush3.bf16.msra.mxu0 %v21087_v39  ;;  %v12871_v39 = vld [vmem:[%s26705_s9 + $0x198] sm:$0xff] }
 0xfce   :  { %19323 = vmatmul.mubr.msk.f32.gmra.mrb[150].mxu0 %vm72_vm1, %v12059_v42  ;;  %19805 = vmatmul.mubr.msk.f32.gmra.mrb[254].mxu1 %vm7715_vm9, %v16470_v49  ;;  %v19287_v45 = vpop.f32.mrb[149].mxu1  ;;  %v16495_v49 = vld [vmem:[%s26706_s8 + $0x2c8] sm:$0xff]  ;;  %v21117_v42 = vpack.c.bf16 %v12871_v39, %v12870_v2 }
 0xfcf   :  { %21220 = vmatpush3.bf16.msra.mxu1 %v25029_v25  ;;  %19325 = vmatprep.mubr.msk.f32.mxu0 %vm21660_vm0, %v21661_v4 }
 0xfd0   :  { %19807 = vmatprep.mubr.msk.f32.mxu1 %vm21660_vm0, %v21661_v4  ;;  %21233 = vmatprep.subr.bf16.mxu1 %v21659_v0 }
 0xfd1   :  { %v12064_v27 = vpop.f32.mrb[150].mxu1  ;;  %21095 = vmatprep.subr.bf16.mxu0 %v21659_v0 }
 0xfd2   :  { %19326 = vmatmul.mubr.msk.f32.gmra.mrb[152].mxu0 %vm72_vm1, %v12064_v27  ;;  %19808 = vmatmul.mubr.msk.f32.gmra.mrb[0].mxu1 %vm7715_vm9, %v16471_v52  ;;  %v19290_v40 = vpop.f32.mrb[151].mxu1  ;;  %v12872_v52 = vld [vmem:[%s26705_s9 + $0x1a0] sm:$0xff]  ;;  %v12873_v27 = vld [vmem:[%s26705_s9 + $0x1a8] sm:$0xff] }
 0xfd3   :  { %19328 = vmatprep.mubr.msk.f32.mxu0 %vm21660_vm0, %v21661_v4  ;;  %19810 = vmatprep.mubr.msk.f32.mxu1 %vm21660_vm0, %v21661_v4 }
 0xfd5   :  { %v12069_v5 = vpop.f32.mrb[152].mxu1 }
 0xfd6   :  { %19329 = vmatmul.mubr.msk.f32.gmra.mrb[154].mxu0 %vm72_vm1, %v12069_v5  ;;  %19811 = vmatmul.mubr.msk.f32.gmra.mrb[2].mxu1 %vm7715_vm9, %v16472_v56  ;;  %v19293_v33 = vpop.f32.mrb[153].mxu1  ;;  %v16496_v56 = vld [vmem:[%s26706_s8 + $0x2d0] sm:$0xff]  ;;  %v21120_v5 = vpack.c.bf16 %v12873_v27, %v12872_v52 }
 0xfd7   :  { %19376 = vmatprep.mubr.msk.f32.mxu0 %vm21660_vm0, %v21661_v4  ;;  %19813 = vmatprep.mubr.msk.f32.mxu1 %vm21660_vm0, %v21661_v4  ;;  %v12874_v33 = vld [vmem:[%s26705_s9 + $0x1b0] sm:$0xff] }
 0xfd9   :  { %v12304_v58 = vpop.f32.mrb[154].mxu1 }
 0xfda   :  { %19377 = vmatmul.mubr.msk.f32.vlgmr.msra.gmra.mrb[156].mxu0 %vm72_vm1, %v12304_v58  ;;  %19814 = vmatmul.mubr.msk.f32.gmra.mrb[4].mxu1 %vm7715_vm9, %v16473_v55  ;;  %v19341_v62 = vpop.f32.mrb[155].mxu1  ;;  %v12875_v55 = vld [vmem:[%s26705_s9 + $0x1b8] sm:$0xff] }
 0xfdb   :  { %19379 = vmatprep.mubr.msk.f32.mxu0 %vm21660_vm0, %v21661_v4  ;;  %19816 = vmatprep.mubr.msk.f32.mxu1 %vm21660_vm0, %v21661_v4  ;;  %v21123_v59 = vpack.c.bf16 %v12875_v55, %v12874_v33  ;;  %v16512_v62 = vld [vmem:[%s26706_s8 + $0x2e0] sm:$0xff]  ;;  %v13400_v55 = vld [vmem:[%s26705_s9 + $0x210] sm:$0xff] }
 0xfdc   :  { %21097 = vmatpush3.bf16.msra.mxu0 %v21096_v43  ;;  %v16511_v43 = vld [vmem:[%s26706_s8 + $0x2d8] sm:$0xff] }
 0xfdd   :  { %v12309_v31 = vpop.f32.mrb[156].mxu1  ;;  %21098 = vmatprep.subr.bf16.mxu0 %v21659_v0 }
 0xfde   :  { %19380 = vmatmul.mubr.msk.f32.gmra.mrb[158].mxu0 %vm72_vm1, %v12309_v31  ;;  %19817 = vmatmul.mubr.msk.f32.gmra.mrb[6].mxu1 %vm7715_vm9, %v16474_v8  ;;  %v19344_v44 = vpop.f32.mrb[157].mxu1  ;;  %v16513_v31 = vld [vmem:[%s26706_s8 + $0x2e8] sm:$0xff] }
 0xfdf   :  { %19382 = vmatprep.mubr.msk.f32.mxu0 %vm21660_vm0, %v21661_v4  ;;  %19819 = vmatprep.mubr.msk.f32.mxu1 %vm21660_vm0, %v21661_v4  ;;  %v16514_v44 = vld [vmem:[%s26706_s8 + $0x2f0] sm:$0xff] }
 0xfe0   :  { %21100 = vmatpush3.bf16.msra.mxu0 %v21099_v18 }
 0xfe1   :  { %v12314_v26 = vpop.f32.mrb[158].mxu1  ;;  %21101 = vmatprep.subr.bf16.mxu0 %v21659_v0 }
 0xfe2   :  { %19383 = vmatmul.mubr.msk.f32.gmra.mrb[160].mxu0 %vm72_vm1, %v12314_v26  ;;  %19820 = vmatmul.mubr.msk.f32.gmra.mrb[8].mxu1 %vm7715_vm9, %v16475_v13  ;;  %v19347_v30 = vpop.f32.mrb[159].mxu1  ;;  %v13134_v26 = vld [vmem:[%s26705_s9 + $0x1c8] sm:$0xff] }
 0xfe3   :  { %19385 = vmatprep.mubr.msk.f32.mxu0 %vm21660_vm0, %v21661_v4  ;;  %19867 = vmatprep.mubr.msk.f32.mxu1 %vm21660_vm0, %v21661_v4 }
 0xfe4   :  { %21103 = vmatpush3.bf16.msra.mxu0 %v21102_v46  ;;  %v13133_v46 = vld [vmem:[%s26705_s9 + $0x1c0] sm:$0xff] }
 0xfe5   :  { %v12319_v3 = vpop.f32.mrb[160].mxu1  ;;  %21104 = vmatprep.subr.bf16.mxu0 %v21659_v0  ;;  %v21132_v53 = vpack.c.bf16 %v13134_v26, %v13133_v46  ;;  %v13405_v46 = vld [vmem:[%s26705_s9 + $0x238] sm:$0xff] }
 0xfe6   :  { %19386 = vmatmul.mubr.msk.f32.gmra.mrb[162].mxu0 %vm72_vm1, %v12319_v3  ;;  %19868 = vmatmul.mubr.msk.f32.vlgmr.msra.gmra.mrb[10].mxu1 %vm7715_vm9, %v16490_v57  ;;  %v19350_v9 = vpop.f32.mrb[161].mxu1  ;;  %v13135_v3 = vld [vmem:[%s26705_s9 + $0x1d0] sm:$0xff] }
 0xfe7   :  { %21235 = vmatpush3.bf16.msra.mxu1 %v25027_v14  ;;  %19388 = vmatprep.mubr.msk.f32.mxu0 %vm21660_vm0, %v21661_v4 }
 0xfe8   :  { %19870 = vmatprep.mubr.msk.f32.mxu1 %vm21660_vm0, %v21661_v4  ;;  %21236 = vmatprep.subr.bf16.mxu1 %v21659_v0 }
 0xfe9   :  { %v12324_v12 = vpop.f32.mrb[162].mxu1  ;;  %21106 = vmatpush3.bf16.msra.mxu0 %v21105_v6  ;;  %v13136_v6 = vld [vmem:[%s26705_s9 + $0x1d8] sm:$0xff] }
 0xfea   :  { %19389 = vmatmul.mubr.msk.f32.gmra.mrb[164].mxu0 %vm72_vm1, %v12324_v12  ;;  %19871 = vmatmul.mubr.msk.f32.gmra.mrb[12].mxu1 %vm7715_vm9, %v16491_v10  ;;  %v19353_v15 = vpop.f32.mrb[163].mxu1  ;;  %v16516_v10 = vld [vmem:[%s26706_s8 + $0x300] sm:$0xff]  ;;  %v21135_v12 = vpack.c.bf16 %v13136_v6, %v13135_v3  ;;  %v16554_v3 = vld [vmem:[%s26706_s8 + $0x350] sm:$0xff] }
 0xfeb   :  { %21238 = vmatpush3.bf16.msra.mxu1 %v25029_v25  ;;  %19391 = vmatprep.mubr.msk.f32.mxu0 %vm21660_vm0, %v21661_v4 }
 0xfec   :  { %19873 = vmatprep.mubr.msk.f32.mxu1 %vm21660_vm0, %v21661_v4  ;;  %21251 = vmatprep.subr.bf16.mxu1 %v21659_v0 }
 0xfed   :  { %v12329_v24 = vpop.f32.mrb[164].mxu1  ;;  %21113 = vmatprep.subr.bf16.mxu0 %v21659_v0 }
 0xfee   :  { %19392 = vmatmul.mubr.msk.f32.gmra.mrb[166].mxu0 %vm72_vm1, %v12329_v24  ;;  %19874 = vmatmul.mubr.msk.f32.gmra.mrb[14].mxu1 %vm7715_vm9, %v16492_v16  ;;  %v19356_v19 = vpop.f32.mrb[165].mxu1  ;;  %v13137_v16 = vld [vmem:[%s26705_s9 + $0x1e0] sm:$0xff]  ;;  %v13138_v24 = vld [vmem:[%s26705_s9 + $0x1e8] sm:$0xff] }
 0xfef   :  { %19394 = vmatprep.mubr.msk.f32.mxu0 %vm21660_vm0, %v21661_v4  ;;  %19876 = vmatprep.mubr.msk.f32.mxu1 %vm21660_vm0, %v21661_v4 }
 0xff1   :  { %v12334_v20 = vpop.f32.mrb[166].mxu1 }
 0xff2   :  { %19395 = vmatmul.mubr.msk.f32.gmra.mrb[168].mxu0 %vm72_vm1, %v12334_v20  ;;  %19877 = vmatmul.mubr.msk.f32.gmra.mrb[16].mxu1 %vm7715_vm9, %v16493_v22  ;;  %v19359_v23 = vpop.f32.mrb[167].mxu1  ;;  %v16517_v22 = vld [vmem:[%s26706_s8 + $0x308] sm:$0xff]  ;;  %v21138_v20 = vpack.c.bf16 %v13138_v24, %v13137_v16  ;;  %v16556_v16 = vld [vmem:[%s26706_s8 + $0x360] sm:$0xff] }
 0xff3   :  { %19442 = vmatprep.mubr.msk.f32.mxu0 %vm21660_vm0, %v21661_v4  ;;  %19879 = vmatprep.mubr.msk.f32.mxu1 %vm21660_vm0, %v21661_v4  ;;  %v13139_v23 = vld [vmem:[%s26705_s9 + $0x1f0] sm:$0xff] }
 0xff5   :  { %v12569_v54 = vpop.f32.mrb[168].mxu1 }
 0xff6   :  { %19443 = vmatmul.mubr.msk.f32.vlgmr.msra.gmra.mrb[170].mxu0 %vm72_vm1, %v12569_v54  ;;  %19880 = vmatmul.mubr.msk.f32.gmra.mrb[18].mxu1 %vm7715_vm9, %v16494_v21  ;;  %v19407_v63 = vpop.f32.mrb[169].mxu1  ;;  %v13140_v21 = vld [vmem:[%s26705_s9 + $0x1f8] sm:$0xff] }
 0xff7   :  { %19445 = vmatprep.mubr.msk.f32.mxu0 %vm21660_vm0, %v21661_v4  ;;  %19882 = vmatprep.mubr.msk.f32.mxu1 %vm21660_vm0, %v21661_v4  ;;  %v21141_v2 = vpack.c.bf16 %v13140_v21, %v13139_v23  ;;  %v16533_v63 = vld [vmem:[%s26706_s8 + $0x318] sm:$0xff]  ;;  %v13665_v21 = vld [vmem:[%s26705_s9 + $0x250] sm:$0xff] }
 0xff8   :  { %21115 = vmatpush3.bf16.msra.mxu0 %v21114_v17  ;;  %v16532_v17 = vld [vmem:[%s26706_s8 + $0x310] sm:$0xff] }
 0xff9   :  { %v12574_v45 = vpop.f32.mrb[170].mxu1  ;;  %21116 = vmatprep.subr.bf16.mxu0 %v21659_v0 }
 0xffa   :  { %19446 = vmatmul.mubr.msk.f32.gmra.mrb[172].mxu0 %vm72_vm1, %v12574_v45  ;;  %19883 = vmatmul.mubr.msk.f32.gmra.mrb[20].mxu1 %vm7715_vm9, %v16495_v49  ;;  %v19410_v40 = vpop.f32.mrb[171].mxu1 }
 0xffb   :  { %19448 = vmatprep.mubr.msk.f32.mxu0 %vm21660_vm0, %v21661_v4  ;;  %19885 = vmatprep.mubr.msk.f32.mxu1 %vm21660_vm0, %v21661_v4  ;;  %v13398_v40 = vld [vmem:[%s26705_s9 + $0x200] sm:$0xff] }
 0xffc   :  { %21118 = vmatpush3.bf16.msra.mxu0 %v21117_v42 }
 0xffd   :  { %v12579_v29 = vpop.f32.mrb[172].mxu1  ;;  %21119 = vmatprep.subr.bf16.mxu0 %v21659_v0 }
 0xffe   :  { %19449 = vmatmul.mubr.msk.f32.gmra.mrb[174].mxu0 %vm72_vm1, %v12579_v29  ;;  %19886 = vmatmul.mubr.msk.f32.gmra.mrb[22].mxu1 %vm7715_vm9, %v16496_v56  ;;  %v19413_v32 = vpop.f32.mrb[173].mxu1  ;;  %v13399_v56 = vld [vmem:[%s26705_s9 + $0x208] sm:$0xff]  ;;  %v16536_v29 = vld [vmem:[%s26706_s8 + $0x330] sm:$0xff] }
 0xfff   :  { %19451 = vmatprep.mubr.msk.f32.mxu0 %vm21660_vm0, %v21661_v4  ;;  %19933 = vmatprep.mubr.msk.f32.mxu1 %vm21660_vm0, %v21661_v4  ;;  %v21150_v32 = vpack.c.bf16 %v13399_v56, %v13398_v40  ;;  %v13670_v40 = vld [vmem:[%s26705_s9 + $0x278] sm:$0xff] }
0x1000   :  { %21121 = vmatpush3.bf16.msra.mxu0 %v21120_v5 }
0x1001   :  { %v12584_v58 = vpop.f32.mrb[174].mxu1  ;;  %21122 = vmatprep.subr.bf16.mxu0 %v21659_v0 }
0x1002   :  { %19452 = vmatmul.mubr.msk.f32.gmra.mrb[176].mxu0 %vm72_vm1, %v12584_v58  ;;  %19934 = vmatmul.mubr.msk.f32.vlgmr.msra.gmra.mrb[24].mxu1 %vm7715_vm9, %v16511_v43  ;;  %v19416_v47 = vpop.f32.mrb[175].mxu1  ;;  %v13401_v43 = vld [vmem:[%s26705_s9 + $0x218] sm:$0xff] }
0x1003   :  { %21253 = vmatpush3.bf16.msra.mxu1 %v25027_v14  ;;  %19454 = vmatprep.mubr.msk.f32.mxu0 %vm21660_vm0, %v21661_v4  ;;  %v21153_v47 = vpack.c.bf16 %v13401_v43, %v13400_v55 }
0x1004   :  { %19936 = vmatprep.mubr.msk.f32.mxu1 %vm21660_vm0, %v21661_v4  ;;  %21254 = vmatprep.subr.bf16.mxu1 %v21659_v0 }
0x1005   :  { %v12589_v8 = vpop.f32.mrb[176].mxu1  ;;  %21124 = vmatpush3.bf16.msra.mxu0 %v21123_v59  ;;  %v16537_v59 = vld [vmem:[%s26706_s8 + $0x338] sm:$0xff] }
0x1006   :  { %19455 = vmatmul.mubr.msk.f32.gmra.mrb[178].mxu0 %vm72_vm1, %v12589_v8  ;;  %19937 = vmatmul.mubr.msk.f32.gmra.mrb[26].mxu1 %vm7715_vm9, %v16512_v62  ;;  %v19419_v18 = vpop.f32.mrb[177].mxu1  ;;  %v13402_v8 = vld [vmem:[%s26705_s9 + $0x220] sm:$0xff] }
0x1007   :  { %21256 = vmatpush3.bf16.msra.mxu1 %v25029_v25  ;;  %19457 = vmatprep.mubr.msk.f32.mxu0 %vm21660_vm0, %v21661_v4  ;;  %v13403_v18 = vld [vmem:[%s26705_s9 + $0x228] sm:$0xff] }
0x1008   :  { %19939 = vmatprep.mubr.msk.f32.mxu1 %vm21660_vm0, %v21661_v4  ;;  %21269 = vmatprep.subr.bf16.mxu1 %v21659_v0 }
0x1009   :  { %v12594_v34 = vpop.f32.mrb[178].mxu1  ;;  %21131 = vmatprep.subr.bf16.mxu0 %v21659_v0 }
0x100a   :  { %19458 = vmatmul.mubr.msk.f32.gmra.mrb[180].mxu0 %vm72_vm1, %v12594_v34  ;;  %19940 = vmatmul.mubr.msk.f32.gmra.mrb[28].mxu1 %vm7715_vm9, %v16513_v31  ;;  %v19422_v51 = vpop.f32.mrb[179].mxu1  ;;  %v16538_v34 = vld [vmem:[%s26706_s8 + $0x340] sm:$0xff] }
0x100b   :  { %19460 = vmatprep.mubr.msk.f32.mxu0 %vm21660_vm0, %v21661_v4  ;;  %19942 = vmatprep.mubr.msk.f32.mxu1 %vm21660_vm0, %v21661_v4  ;;  %v21156_v51 = vpack.c.bf16 %v13403_v18, %v13402_v8 }
0x100d   :  { %v12599_v13 = vpop.f32.mrb[180].mxu1 }
0x100e   :  { %19461 = vmatmul.mubr.msk.f32.gmra.mrb[182].mxu0 %vm72_vm1, %v12599_v13  ;;  %19943 = vmatmul.mubr.msk.f32.gmra.mrb[30].mxu1 %vm7715_vm9, %v16514_v44  ;;  %v19425_v30 = vpop.f32.mrb[181].mxu1  ;;  %v13404_v13 = vld [vmem:[%s26705_s9 + $0x230] sm:$0xff] }
0x100f   :  { %19508 = vmatprep.mubr.msk.f32.mxu0 %vm21660_vm0, %v21661_v4  ;;  %19945 = vmatprep.mubr.msk.f32.mxu1 %vm21660_vm0, %v21661_v4  ;;  %v16553_v30 = vld [vmem:[%s26706_s8 + $0x348] sm:$0xff] }
0x1011   :  { %v12834_v57 = vpop.f32.mrb[182].mxu1 }
0x1012   :  { %19509 = vmatmul.mubr.msk.f32.vlgmr.msra.gmra.mrb[184].mxu0 %vm72_vm1, %v12834_v57  ;;  %19946 = vmatmul.mubr.msk.f32.gmra.mrb[32].mxu1 %vm7715_vm9, %v16515_v50  ;;  %v19473_v9 = vpop.f32.mrb[183].mxu1  ;;  %v21159_v50 = vpack.c.bf16 %v13405_v46, %v13404_v13  ;;  %v13932_v46 = vld [vmem:[%s26705_s9 + $0x2a0] sm:$0xff] }
0x1013   :  { %19511 = vmatprep.mubr.msk.f32.mxu0 %vm21660_vm0, %v21661_v4  ;;  %19948 = vmatprep.mubr.msk.f32.mxu1 %vm21660_vm0, %v21661_v4 }
0x1014   :  { %21133 = vmatpush3.bf16.msra.mxu0 %v21132_v53 }
0x1015   :  { %v12839_v15 = vpop.f32.mrb[184].mxu1  ;;  %21134 = vmatprep.subr.bf16.mxu0 %v21659_v0 }
0x1016   :  { %19512 = vmatmul.mubr.msk.f32.gmra.mrb[186].mxu0 %vm72_vm1, %v12839_v15  ;;  %19949 = vmatmul.mubr.msk.f32.gmra.mrb[34].mxu1 %vm7715_vm9, %v16516_v10  ;;  %v19476_v19 = vpop.f32.mrb[185].mxu1  ;;  %v16555_v10 = vld [vmem:[%s26706_s8 + $0x358] sm:$0xff] }
0x1017   :  { %19514 = vmatprep.mubr.msk.f32.mxu0 %vm21660_vm0, %v21661_v4  ;;  %19951 = vmatprep.mubr.msk.f32.mxu1 %vm21660_vm0, %v21661_v4  ;;  %v13663_v19 = vld [vmem:[%s26705_s9 + $0x240] sm:$0xff] }
0x1018   :  { %21136 = vmatpush3.bf16.msra.mxu0 %v21135_v12 }
0x1019   :  { %v12844_v60 = vpop.f32.mrb[186].mxu1  ;;  %21137 = vmatprep.subr.bf16.mxu0 %v21659_v0 }
0x101a   :  { %19515 = vmatmul.mubr.msk.f32.gmra.mrb[188].mxu0 %vm72_vm1, %v12844_v60  ;;  %19952 = vmatmul.mubr.msk.f32.gmra.mrb[36].mxu1 %vm7715_vm9, %v16517_v22  ;;  %v19479_v11 = vpop.f32.mrb[187].mxu1  ;;  %v13664_v22 = vld [vmem:[%s26705_s9 + $0x248] sm:$0xff] }
0x101b   :  { %19517 = vmatprep.mubr.msk.f32.mxu0 %vm21660_vm0, %v21661_v4  ;;  %19999 = vmatprep.mubr.msk.f32.mxu1 %vm21660_vm0, %v21661_v4  ;;  %v16557_v60 = vld [vmem:[%s26706_s8 + $0x368] sm:$0xff]  ;;  %v21168_v11 = vpack.c.bf16 %v13664_v22, %v13663_v19 }
0x101c   :  { %21139 = vmatpush3.bf16.msra.mxu0 %v21138_v20 }
0x101d   :  { %v12849_v54 = vpop.f32.mrb[188].mxu1  ;;  %21140 = vmatprep.subr.bf16.mxu0 %v21659_v0 }
0x101e   :  { %19518 = vmatmul.mubr.msk.f32.gmra.mrb[190].mxu0 %vm72_vm1, %v12849_v54  ;;  %20000 = vmatmul.mubr.msk.f32.vlgmr.msra.gmra.mrb[38].mxu1 %vm7715_vm9, %v16532_v17  ;;  %v19482_v39 = vpop.f32.mrb[189].mxu1  ;;  %v13666_v17 = vld [vmem:[%s26705_s9 + $0x258] sm:$0xff] }
0x101f   :  { %21271 = vmatpush3.bf16.msra.mxu1 %v25027_v14  ;;  %19520 = vmatprep.mubr.msk.f32.mxu0 %vm21660_vm0, %v21661_v4  ;;  %v16534_v14 = vld [vmem:[%s26706_s8 + $0x320] sm:$0xff]  ;;  %v21171_v39 = vpack.c.bf16 %v13666_v17, %v13665_v21 }
0x1020   :  { %20002 = vmatprep.mubr.msk.f32.mxu1 %vm21660_vm0, %v21661_v4  ;;  %21272 = vmatprep.subr.bf16.mxu1 %v21659_v0 }
0x1021   :  { %v12854_v49 = vpop.f32.mrb[190].mxu1  ;;  %21142 = vmatpush3.bf16.msra.mxu0 %v21141_v2  ;;  %v16558_v2 = vld [vmem:[%s26706_s8 + $0x370] sm:$0xff] }
0x1022   :  { %19521 = vmatmul.mubr.msk.f32.gmra.mrb[192].mxu0 %vm72_vm1, %v12854_v49  ;;  %20003 = vmatmul.mubr.msk.f32.gmra.mrb[40].mxu1 %vm7715_vm9, %v16533_v63  ;;  %v19485_v42 = vpop.f32.mrb[191].mxu1  ;;  %v13667_v49 = vld [vmem:[%s26705_s9 + $0x260] sm:$0xff] }
0x1023   :  { %21274 = vmatpush3.bf16.msra.mxu1 %v25029_v25  ;;  %19523 = vmatprep.mubr.msk.f32.mxu0 %vm21660_vm0, %v21661_v4  ;;  %v16535_v25 = vld [vmem:[%s26706_s8 + $0x328] sm:$0xff] }
0x1024   :  { %20005 = vmatprep.mubr.msk.f32.mxu1 %vm21660_vm0, %v21661_v4  ;;  %21149 = vmatprep.subr.bf16.mxu0 %v21659_v0  ;;  %v13668_v42 = vld [vmem:[%s26705_s9 + $0x268] sm:$0xff] }
0x1025   :  { %v12859_v45 = vpop.f32.mrb[192].mxu1 }
0x1026   :  { %19524 = vmatmul.mubr.msk.f32.gmra.mrb[194].mxu0 %vm72_vm1, %v12859_v45  ;;  %20006 = vmatmul.mubr.msk.f32.gmra.mrb[42].mxu1 %vm7715_vm9, %v16534_v14  ;;  %v19488_v52 = vpop.f32.mrb[193].mxu1  ;;  %v16559_v45 = vld [vmem:[%s26706_s8 + $0x378] sm:$0xff] }
0x1027   :  { %19526 = vmatprep.mubr.msk.f32.mxu0 %vm21660_vm0, %v21661_v4  ;;  %20008 = vmatprep.mubr.msk.f32.mxu1 %vm21660_vm0, %v21661_v4  ;;  %v21174_v52 = vpack.c.bf16 %v13668_v42, %v13667_v49 }
0x1029   :  { %v12864_v27 = vpop.f32.mrb[194].mxu1 }
0x102a   :  { %19527 = vmatmul.mubr.msk.f32.gmra.mrb[196].mxu0 %vm72_vm1, %v12864_v27  ;;  %20009 = vmatmul.mubr.msk.f32.gmra.mrb[44].mxu1 %vm7715_vm9, %v16535_v25  ;;  %v19491_v5 = vpop.f32.mrb[195].mxu1  ;;  %v13669_v27 = vld [vmem:[%s26705_s9 + $0x270] sm:$0xff] }
0x102b   :  { %19574 = vmatprep.mubr.msk.f32.mxu0 %vm21660_vm0, %v21661_v4  ;;  %20011 = vmatprep.mubr.msk.f32.mxu1 %vm21660_vm0, %v21661_v4  ;;  %v21177_v5 = vpack.c.bf16 %v13670_v40, %v13669_v27 }
0x102d   :  { %v13099_v33 = vpop.f32.mrb[196].mxu1 }
0x102e   :  { %19575 = vmatmul.mubr.msk.f32.vlgmr.msra.gmra.mrb[198].mxu0 %vm72_vm1, %v13099_v33  ;;  %20012 = vmatmul.mubr.msk.f32.gmra.mrb[46].mxu1 %vm7715_vm9, %v16536_v29  ;;  %v19539_v58 = vpop.f32.mrb[197].mxu1 }
0x102f   :  { %19577 = vmatprep.mubr.msk.f32.mxu0 %vm21660_vm0, %v21661_v4  ;;  %20014 = vmatprep.mubr.msk.f32.mxu1 %vm21660_vm0, %v21661_v4 }
0x1030   :  { %21151 = vmatpush3.bf16.msra.mxu0 %v21150_v32 }
0x1031   :  { %v13104_v62 = vpop.f32.mrb[198].mxu1  ;;  %21152 = vmatprep.subr.bf16.mxu0 %v21659_v0 }
0x1032   :  { %19578 = vmatmul.mubr.msk.f32.gmra.mrb[200].mxu0 %vm72_vm1, %v13104_v62  ;;  %20015 = vmatmul.mubr.msk.f32.gmra.mrb[48].mxu1 %vm7715_vm9, %v16537_v59  ;;  %v19542_v31 = vpop.f32.mrb[199].mxu1  ;;  %v13928_v59 = vld [vmem:[%s26705_s9 + $0x280] sm:$0xff] }
0x1033   :  { %19580 = vmatprep.mubr.msk.f32.mxu0 %vm21660_vm0, %v21661_v4  ;;  %20017 = vmatprep.mubr.msk.f32.mxu1 %vm21660_vm0, %v21661_v4  ;;  %v13930_v31 = vld [vmem:[%s26705_s9 + $0x290] sm:$0xff] }
0x1034   :  { %21154 = vmatpush3.bf16.msra.mxu0 %v21153_v47  ;;  %v13929_v47 = vld [vmem:[%s26705_s9 + $0x288] sm:$0xff] }
0x1035   :  { %v13109_v44 = vpop.f32.mrb[200].mxu1  ;;  %21155 = vmatprep.subr.bf16.mxu0 %v21659_v0  ;;  %v21186_v18 = vpack.c.bf16 %v13929_v47, %v13928_v59  ;;  %v14199_v59 = vld [vmem:[%s26705_s9 + $0x2f0] sm:$0xff] }
0x1036   :  { %19581 = vmatmul.mubr.msk.f32.gmra.mrb[202].mxu0 %vm72_vm1, %v13109_v44  ;;  %20018 = vmatmul.mubr.msk.f32.gmra.mrb[50].mxu1 %vm7715_vm9, %v16538_v34  ;;  %v19545_v26 = vpop.f32.mrb[201].mxu1  ;;  %v13931_v34 = vld [vmem:[%s26705_s9 + $0x298] sm:$0xff] }
0x1037   :  { %19583 = vmatprep.mubr.msk.f32.mxu0 %vm21660_vm0, %v21661_v4  ;;  %20065 = vmatprep.mubr.msk.f32.mxu1 %vm21660_vm0, %v21661_v4  ;;  %v21189_v13 = vpack.c.bf16 %v13931_v34, %v13930_v31  ;;  %v13933_v26 = vld [vmem:[%s26705_s9 + $0x2a8] sm:$0xff] }
0x1038   :  { %21157 = vmatpush3.bf16.msra.mxu0 %v21156_v51 }
0x1039   :  { %v13114_v53 = vpop.f32.mrb[202].mxu1  ;;  %21158 = vmatprep.subr.bf16.mxu0 %v21659_v0 }
0x103a   :  { %19584 = vmatmul.mubr.msk.f32.gmra.mrb[204].mxu0 %vm72_vm1, %v13114_v53  ;;  %20066 = vmatmul.mubr.msk.f32.vlgmr.msra.gmra.mrb[52].mxu1 %vm7715_vm9, %v16553_v30  ;;  %v19548_v57 = vpop.f32.mrb[203].mxu1  ;;  %v21192_v53 = vpack.c.bf16 %v13933_v26, %v13932_v46 }
0x103b   :  { %19586 = vmatprep.mubr.msk.f32.mxu0 %vm21660_vm0, %v21661_v4  ;;  %20068 = vmatprep.mubr.msk.f32.mxu1 %vm21660_vm0, %v21661_v4  ;;  %v13934_v57 = vld [vmem:[%s26705_s9 + $0x2b0] sm:$0xff] }
0x103c   :  { %21160 = vmatpush3.bf16.msra.mxu0 %v21159_v50 }
0x103d   :  { %v13119_v6 = vpop.f32.mrb[204].mxu1  ;;  %21167 = vmatprep.subr.bf16.mxu0 %v21659_v0 }
0x103e   :  { %19587 = vmatmul.mubr.msk.f32.gmra.mrb[206].mxu0 %vm72_vm1, %v13119_v6  ;;  %20069 = vmatmul.mubr.msk.f32.gmra.mrb[54].mxu1 %vm7715_vm9, %v16554_v3  ;;  %v19551_v9 = vpop.f32.mrb[205].mxu1  ;;  %v13935_v3 = vld [vmem:[%s26705_s9 + $0x2b8] sm:$0xff] }
0x103f   :  { %19589 = vmatprep.mubr.msk.f32.mxu0 %vm21660_vm0, %v21661_v4  ;;  %20071 = vmatprep.mubr.msk.f32.mxu1 %vm21660_vm0, %v21661_v4 }
0x1041   :  { %v13124_v12 = vpop.f32.mrb[206].mxu1 }
0x1042   :  { %19590 = vmatmul.mubr.msk.f32.gmra.mrb[208].mxu0 %vm72_vm1, %v13124_v12  ;;  %20072 = vmatmul.mubr.msk.f32.gmra.mrb[56].mxu1 %vm7715_vm9, %v16555_v10  ;;  %v19554_v15 = vpop.f32.mrb[207].mxu1  ;;  %v21195_v10 = vpack.c.bf16 %v13935_v3, %v13934_v57 }
0x1043   :  { %19592 = vmatprep.mubr.msk.f32.mxu0 %vm21660_vm0, %v21661_v4  ;;  %20074 = vmatprep.mubr.msk.f32.mxu1 %vm21660_vm0, %v21661_v4 }
0x1045   :  { %v13129_v24 = vpop.f32.mrb[208].mxu1 }
0x1046   :  { %19593 = vmatmul.mubr.msk.f32.gmra.mrb[210].mxu0 %vm72_vm1, %v13129_v24  ;;  %20075 = vmatmul.mubr.msk.f32.gmra.mrb[58].mxu1 %vm7715_vm9, %v16556_v16  ;;  %v19557_v20 = vpop.f32.mrb[209].mxu1 }
0x1047   :  { %19640 = vmatprep.mubr.msk.f32.mxu0 %vm21660_vm0, %v21661_v4  ;;  %20077 = vmatprep.mubr.msk.f32.mxu1 %vm21660_vm0, %v21661_v4 }
0x1049   :  { %v13364_v23 = vpop.f32.mrb[210].mxu1 }
0x104a   :  { %19641 = vmatmul.mubr.msk.f32.vlgmr.msra.gmra.mrb[212].mxu0 %vm72_vm1, %v13364_v23  ;;  %20078 = vmatmul.mubr.msk.f32.gmra.mrb[60].mxu1 %vm7715_vm9, %v16557_v60  ;;  %v19605_v54 = vpop.f32.mrb[211].mxu1 }
0x104b   :  { %19643 = vmatprep.mubr.msk.f32.mxu0 %vm21660_vm0, %v21661_v4  ;;  %20080 = vmatprep.mubr.msk.f32.mxu1 %vm21660_vm0, %v21661_v4  ;;  %v14194_v54 = vld [vmem:[%s26705_s9 + $0x2c8] sm:$0xff] }
0x104c   :  { %21169 = vmatpush3.bf16.msra.mxu0 %v21168_v11 }
0x104d   :  { %v13369_v63 = vpop.f32.mrb[212].mxu1  ;;  %21170 = vmatprep.subr.bf16.mxu0 %v21659_v0 }
0x104e   :  { %19644 = vmatmul.mubr.msk.f32.gmra.mrb[214].mxu0 %vm72_vm1, %v13369_v63  ;;  %20081 = vmatmul.mubr.msk.f32.gmra.mrb[62].mxu1 %vm7715_vm9, %v16558_v2  ;;  %v19608_v14 = vpop.f32.mrb[213].mxu1 }
0x104f   :  { %19646 = vmatprep.mubr.msk.f32.mxu0 %vm21660_vm0, %v21661_v4  ;;  %20083 = vmatprep.mubr.msk.f32.mxu1 %vm21660_vm0, %v21661_v4  ;;  %v14195_v14 = vld [vmem:[%s26705_s9 + $0x2d0] sm:$0xff] }
0x1050   :  { %21172 = vmatpush3.bf16.msra.mxu0 %v21171_v39 }
0x1051   :  { %v13374_v25 = vpop.f32.mrb[214].mxu1  ;;  %21173 = vmatprep.subr.bf16.mxu0 %v21659_v0 }
0x1052   :  { %19647 = vmatmul.mubr.msk.f32.gmra.mrb[216].mxu0 %vm72_vm1, %v13374_v25  ;;  %20084 = vmatmul.mubr.msk.f32.gmra.mrb[64].mxu1 %vm7715_vm9, %v16559_v45  ;;  %v19611_v56 = vpop.f32.mrb[215].mxu1  ;;  %v14196_v45 = vld [vmem:[%s26705_s9 + $0x2d8] sm:$0xff] }
0x1053   :  { %19649 = vmatprep.mubr.msk.f32.mxu0 %vm21660_vm0, %v21661_v4  ;;  %v21207_v56 = vpack.c.bf16 %v14196_v45, %v14195_v14 }
0x1054   :  { %21175 = vmatpush3.bf16.msra.mxu0 %v21174_v52 }
0x1055   :  { %v13379_v29 = vpop.f32.mrb[216].mxu1  ;;  %21176 = vmatprep.subr.bf16.mxu0 %v21659_v0 }
0x1056   :  { %19650 = vmatmul.mubr.msk.f32.gmra.mrb[218].mxu0 %vm72_vm1, %v13379_v29  ;;  %v19614_v32 = vpop.f32.mrb[217].mxu1 }
0x1057   :  { %19652 = vmatprep.mubr.msk.f32.mxu0 %vm21660_vm0, %v21661_v4 }
0x1058   :  { %21178 = vmatpush3.bf16.msra.mxu0 %v21177_v5  ;;  %v14197_v5 = vld [vmem:[%s26705_s9 + $0x2e0] sm:$0xff] }
0x1059   :  { %v13384_v33 = vpop.f32.mrb[218].mxu1  ;;  %21185 = vmatprep.subr.bf16.mxu0 %v21659_v0 }
0x105a   :  { %19653 = vmatmul.mubr.msk.f32.gmra.mrb[220].mxu0 %vm72_vm1, %v13384_v33  ;;  %v19617_v55 = vpop.f32.mrb[219].mxu1 }
0x105b   :  { %19655 = vmatprep.mubr.msk.f32.mxu0 %vm21660_vm0, %v21661_v4 }
0x105d   :  { %v13389_v43 = vpop.f32.mrb[220].mxu1 }
0x105e   :  { %19656 = vmatmul.mubr.msk.f32.gmra.mrb[222].mxu0 %vm72_vm1, %v13389_v43  ;;  %v19620_v58 = vpop.f32.mrb[221].mxu1 }
0x105f   :  { %19658 = vmatprep.mubr.msk.f32.mxu0 %vm21660_vm0, %v21661_v4 }
0x1061   :  { %v13394_v62 = vpop.f32.mrb[222].mxu1 }
0x1062   :  { %19659 = vmatmul.mubr.msk.f32.gmra.mrb[224].mxu0 %vm72_vm1, %v13394_v62  ;;  %v19623_v8 = vpop.f32.mrb[223].mxu1 }
0x1063   :  { %19706 = vmatprep.mubr.msk.f32.mxu0 %vm21660_vm0, %v21661_v4 }
0x1065   :  { %v13629_v51 = vpop.f32.mrb[224].mxu1 }
0x1066   :  { %19707 = vmatmul.mubr.msk.f32.vlgmr.msra.gmra.mrb[226].mxu0 %vm72_vm1, %v13629_v51  ;;  %v19671_v44 = vpop.f32.mrb[225].mxu1 }
0x1067   :  { %19709 = vmatprep.mubr.msk.f32.mxu0 %vm21660_vm0, %v21661_v4  ;;  %21187 = vmatpush3.bf16.msra.mxu0 %v21186_v18 }
0x1068   :  { %21188 = vmatprep.subr.bf16.mxu0 %v21659_v0 }
0x1069   :  { %v13634_v30 = vpop.f32.mrb[226].mxu1 }
0x106a   :  { %19710 = vmatmul.mubr.msk.f32.gmra.mrb[228].mxu0 %vm72_vm1, %v13634_v30  ;;  %v19674_v50 = vpop.f32.mrb[227].mxu1 }
0x106b   :  { %19712 = vmatprep.mubr.msk.f32.mxu0 %vm21660_vm0, %v21661_v4  ;;  %21190 = vmatpush3.bf16.msra.mxu0 %v21189_v13 }
0x106c   :  { %21191 = vmatprep.subr.bf16.mxu0 %v21659_v0 }
0x106d   :  { %v13639_v6 = vpop.f32.mrb[228].mxu1 }
0x106e   :  { %19713 = vmatmul.mubr.msk.f32.gmra.mrb[230].mxu0 %vm72_vm1, %v13639_v6  ;;  %v19677_v9 = vpop.f32.mrb[229].mxu1 }
0x106f   :  { %19715 = vmatprep.mubr.msk.f32.mxu0 %vm21660_vm0, %v21661_v4  ;;  %21193 = vmatpush3.bf16.msra.mxu0 %v21192_v53 }
0x1070   :  { %21194 = vmatprep.subr.bf16.mxu0 %v21659_v0 }
0x1071   :  { %v13644_v12 = vpop.f32.mrb[230].mxu1 }
0x1072   :  { %19716 = vmatmul.mubr.msk.f32.gmra.mrb[232].mxu0 %vm72_vm1, %v13644_v12  ;;  %v19680_v15 = vpop.f32.mrb[231].mxu1  ;;  %v14458_v12 = vld [vmem:[%s26705_s9 + $0x300] sm:$0xff] }
0x1073   :  { %19718 = vmatprep.mubr.msk.f32.mxu0 %vm21660_vm0, %v21661_v4  ;;  %21196 = vmatpush3.bf16.msra.mxu0 %v21195_v10  ;;  %v14459_v15 = vld [vmem:[%s26705_s9 + $0x308] sm:$0xff] }
0x1074   :  { %21203 = vmatprep.subr.bf16.mxu0 %v21659_v0 }
0x1075   :  { %v11903_v16 = vpop.f32.mrb[128].mxu0  ;;  %v13649_v24 = vpop.f32.mrb[232].mxu1 }
0x1076   :  { %v26288_v19 = vadd.f32 %v11903_v16, %v25561_v41  ;;  %19719 = vmatmul.mubr.msk.f32.gmra.mrb[234].mxu0 %vm72_vm1, %v13649_v24  ;;  %v19246_v22 = vpop.f32.mrb[129].mxu0  ;;  %v19683_v20 = vpop.f32.mrb[233].mxu1  ;;  %v14193_v41 = vld [vmem:[%s26705_s9 + $0x2c0] sm:$0xff] }
0x1077   :  { %19721 = vmatprep.mubr.msk.f32.mxu0 %vm21660_vm0, %v21661_v4  ;;  %v21204_v42 = vpack.c.bf16 %v14194_v54, %v14193_v41 }
0x1079   :  { %v11908_v60 = vpop.f32.mrb[130].mxu0  ;;  %v13654_v11 = vpop.f32.mrb[234].mxu1 }
0x107a   :  { %v26294_v23 = vadd.f32 %v11908_v60, %v25569_v61  ;;  %19722 = vmatmul.mubr.msk.f32.gmra.mrb[236].mxu0 %vm72_vm1, %v13654_v11  ;;  %v19249_v21 = vpop.f32.mrb[131].mxu0  ;;  %v19686_v17 = vpop.f32.mrb[235].mxu1  ;;  %v21222_v60 = vpack.c.bf16 %v14459_v15, %v14458_v12  ;;  %v14460_v11 = vld [vmem:[%s26705_s9 + $0x310] sm:$0xff] }
0x107b   :  { %19724 = vmatprep.mubr.msk.f32.mxu0 %vm21660_vm0, %v21661_v4 }
0x107d   :  { %v11913_v2 = vpop.f32.mrb[132].mxu0  ;;  %v13659_v39 = vpop.f32.mrb[236].mxu1 }
0x107e   :  { %v26306_v61 = vadd.f32 %v11913_v2, %v25577_v35  ;;  %19725 = vmatmul.mubr.msk.f32.gmra.mrb[238].mxu0 %vm72_vm1, %v13659_v39  ;;  %v19252_v63 = vpop.f32.mrb[133].mxu0  ;;  %v19689_v49 = vpop.f32.mrb[237].mxu1 }
0x107f   :  { %19772 = vmatprep.mubr.msk.f32.mxu0 %vm21660_vm0, %v21661_v4  ;;  %v14463_v63 = vld [vmem:[%s26705_s9 + $0x328] sm:$0xff] }
0x1081   :  { %v11918_v52 = vpop.f32.mrb[134].mxu0  ;;  %v13894_v25 = vpop.f32.mrb[238].mxu1 }
0x1082   :  { %v26318_v35 = vadd.f32 %v11918_v52, %v25585_v48  ;;  %19773 = vmatmul.mubr.msk.f32.vlgmr.msra.gmra.mrb[240].mxu0 %vm72_vm1, %v13894_v25  ;;  %v19255_v27 = vpop.f32.mrb[135].mxu0  ;;  %v19737_v40 = vpop.f32.mrb[239].mxu1  ;;  %v14198_v48 = vld [vmem:[%s26705_s9 + $0x2e8] sm:$0xff] }
0x1083   :  { %19775 = vmatprep.mubr.msk.f32.mxu0 %vm21660_vm0, %v21661_v4  ;;  %21205 = vmatpush3.bf16.msra.mxu0 %v21204_v42  ;;  %v21210_v58 = vpack.c.bf16 %v14198_v48, %v14197_v5  ;;  %v14465_v27 = vld [vmem:[%s26705_s9 + $0x338] sm:$0xff] }
0x1084   :  { %21206 = vmatprep.subr.bf16.mxu0 %v21659_v0 }
0x1085   :  { %v11923_v29 = vpop.f32.mrb[136].mxu0  ;;  %v13899_v32 = vpop.f32.mrb[240].mxu1 }
0x1086   :  { %v26331_v33 = vadd.f32 %v11923_v29, %v25595_v7  ;;  %19776 = vmatmul.mubr.msk.f32.gmra.mrb[242].mxu0 %vm72_vm1, %v13899_v32  ;;  %v19258_v55 = vpop.f32.mrb[137].mxu0  ;;  %v19740_v43 = vpop.f32.mrb[241].mxu1  ;;  %v14200_v7 = vld [vmem:[%s26705_s9 + $0x2f8] sm:$0xff] }
0x1087   :  { %19778 = vmatprep.mubr.msk.f32.mxu0 %vm21660_vm0, %v21661_v4  ;;  %21208 = vmatpush3.bf16.msra.mxu0 %v21207_v56  ;;  %v21213_v34 = vpack.c.bf16 %v14200_v7, %v14199_v59 }
0x1088   :  { %21209 = vmatprep.subr.bf16.mxu0 %v21659_v0 }
0x1089   :  { %v11928_v47 = vpop.f32.mrb[138].mxu0  ;;  %v13904_v62 = vpop.f32.mrb[242].mxu1 }
0x108a   :  { %v26344_v8 = vadd.f32 %v11928_v47, %v25605_v28  ;;  %19779 = vmatmul.mubr.msk.f32.gmra.mrb[244].mxu0 %vm72_vm1, %v13904_v62  ;;  %v19261_v18 = vpop.f32.mrb[139].mxu0  ;;  %v19743_v31 = vpop.f32.mrb[243].mxu1 }
0x108b   :  { %19781 = vmatprep.mubr.msk.f32.mxu0 %vm21660_vm0, %v21661_v4  ;;  %21211 = vmatpush3.bf16.msra.mxu0 %v21210_v58 }
0x108c   :  { %21212 = vmatprep.subr.bf16.mxu0 %v21659_v0 }
0x108d   :  { %v11933_v51 = vpop.f32.mrb[140].mxu0  ;;  %v13909_v44 = vpop.f32.mrb[244].mxu1 }
0x108e   :  { %v26351_v13 = vadd.f32 %v11933_v51, %v25619_v1  ;;  %19782 = vmatmul.mubr.msk.f32.gmra.mrb[246].mxu0 %vm72_vm1, %v13909_v44  ;;  %v19264_v28 = vpop.f32.mrb[141].mxu0  ;;  %v19746_v46 = vpop.f32.mrb[245].mxu1 }
0x108f   :  { %19784 = vmatprep.mubr.msk.f32.mxu0 %vm21660_vm0, %v21661_v4  ;;  %21214 = vmatpush3.bf16.msra.mxu0 %v21213_v34  ;;  %v14723_v28 = vld [vmem:[%s26705_s9 + $0x340] sm:$0xff]  ;;  %v14724_v46 = vld [vmem:[%s26705_s9 + $0x348] sm:$0xff] }
0x1090   :  { %21221 = vmatprep.subr.bf16.mxu0 %v21659_v0 }
0x1091   :  { %v12168_v26 = vpop.f32.mrb[142].mxu0  ;;  %v13914_v30 = vpop.f32.mrb[246].mxu1 }
0x1092   :  { %v26358_v50 = vadd.f32 %v12168_v26, %v26288_v19  ;;  %19785 = vmatmul.mubr.msk.f32.gmra.mrb[248].mxu0 %vm72_vm1, %v13914_v30  ;;  %v19312_v53 = vpop.f32.mrb[143].mxu0  ;;  %v19749_v1 = vpop.f32.mrb[247].mxu1 }
0x1093   :  { %19787 = vmatprep.mubr.msk.f32.mxu0 %vm21660_vm0, %v21661_v4 }
0x1095   :  { %v12173_v57 = vpop.f32.mrb[144].mxu0  ;;  %v13919_v3 = vpop.f32.mrb[248].mxu1 }
0x1096   :  { %v26364_v6 = vadd.f32 %v12173_v57, %v26294_v23  ;;  %19788 = vmatmul.mubr.msk.f32.gmra.mrb[250].mxu0 %vm72_vm1, %v13919_v3  ;;  %v19315_v9 = vpop.f32.mrb[145].mxu0  ;;  %v19752_v10 = vpop.f32.mrb[249].mxu1  ;;  %v14461_v23 = vld [vmem:[%s26705_s9 + $0x318] sm:$0xff]  ;;  %v21240_v57 = vpack.c.bf16 %v14724_v46, %v14723_v28  ;;  %v14725_v3 = vld [vmem:[%s26705_s9 + $0x350] sm:$0xff] }
0x1097   :  { %19790 = vmatprep.mubr.msk.f32.mxu0 %vm21660_vm0, %v21661_v4  ;;  %v21225_v39 = vpack.c.bf16 %v14461_v23, %v14460_v11 }
0x1099   :  { %v12178_v16 = vpop.f32.mrb[146].mxu0  ;;  %v13924_v24 = vpop.f32.mrb[250].mxu1 }
0x109a   :  { %v26376_v19 = vadd.f32 %v12178_v16, %v26306_v61  ;;  %19791 = vmatmul.mubr.msk.f32.gmra.mrb[252].mxu0 %vm72_vm1, %v13924_v24  ;;  %v19318_v22 = vpop.f32.mrb[147].mxu0  ;;  %v19755_v20 = vpop.f32.mrb[251].mxu1  ;;  %v14462_v61 = vld [vmem:[%s26705_s9 + $0x320] sm:$0xff] }
0x109b   :  { %19838 = vmatprep.mubr.msk.f32.mxu0 %vm21660_vm0, %v21661_v4  ;;  %v21228_v25 = vpack.c.bf16 %v14463_v63, %v14462_v61  ;;  %v14728_v22 = vld [vmem:[%s26705_s9 + $0x368] sm:$0xff] }
0x109d   :  { %v12183_v21 = vpop.f32.mrb[148].mxu0  ;;  %v14159_v17 = vpop.f32.mrb[252].mxu1 }
0x109e   :  { %v26388_v41 = vadd.f32 %v12183_v21, %v26318_v35  ;;  %19839 = vmatmul.mubr.msk.f32.vlgmr.msra.gmra.mrb[254].mxu0 %vm72_vm1, %v14159_v17  ;;  %v19321_v54 = vpop.f32.mrb[149].mxu0  ;;  %v19803_v2 = vpop.f32.mrb[253].mxu1  ;;  %v14464_v35 = vld [vmem:[%s26705_s9 + $0x330] sm:$0xff] }
0x109f   :  { %19841 = vmatprep.mubr.msk.f32.mxu0 %vm21660_vm0, %v21661_v4  ;;  %21223 = vmatpush3.bf16.msra.mxu0 %v21222_v60  ;;  %v21231_v32 = vpack.c.bf16 %v14465_v27, %v14464_v35  ;;  %v14730_v54 = vld [vmem:[%s26705_s9 + $0x378] sm:$0xff] }
0x10a0   :  { %21224 = vmatprep.subr.bf16.mxu0 %v21659_v0 }
0x10a1   :  { %v12188_v49 = vpop.f32.mrb[150].mxu0  ;;  %v14164_v42 = vpop.f32.mrb[254].mxu1 }
0x10a2   :  { %v26401_v14 = vadd.f32 %v12188_v49, %v26331_v33  ;;  %19842 = vmatmul.mubr.msk.f32.gmra.mrb[0].mxu0 %vm72_vm1, %v14164_v42  ;;  %v19324_v45 = vpop.f32.mrb[151].mxu0  ;;  %v19806_v52 = vpop.f32.mrb[255].mxu1 }
0x10a3   :  { %19844 = vmatprep.mubr.msk.f32.mxu0 %vm21660_vm0, %v21661_v4  ;;  %21226 = vmatpush3.bf16.msra.mxu0 %v21225_v39 }
0x10a4   :  { %21227 = vmatprep.subr.bf16.mxu0 %v21659_v0 }
0x10a5   :  { %v12193_v40 = vpop.f32.mrb[152].mxu0  ;;  %v14169_v56 = vpop.f32.mrb[0].mxu1 }
0x10a6   :  { %v26414_v5 = vadd.f32 %v12193_v40, %v26344_v8  ;;  %19845 = vmatmul.mubr.msk.f32.gmra.mrb[2].mxu0 %vm72_vm1, %v14169_v56  ;;  %v19327_v48 = vpop.f32.mrb[153].mxu0  ;;  %v19809_v29 = vpop.f32.mrb[1].mxu1 }
0x10a7   :  { %19847 = vmatprep.mubr.msk.f32.mxu0 %vm21660_vm0, %v21661_v4  ;;  %21229 = vmatpush3.bf16.msra.mxu0 %v21228_v25 }
0x10a8   :  { %21230 = vmatprep.subr.bf16.mxu0 %v21659_v0 }
0x10a9   :  { %v12198_v33 = vpop.f32.mrb[154].mxu0  ;;  %v14174_v55 = vpop.f32.mrb[2].mxu1 }
0x10aa   :  { %v26421_v43 = vadd.f32 %v12198_v33, %v26351_v13  ;;  %19848 = vmatmul.mubr.msk.f32.gmra.mrb[4].mxu0 %vm72_vm1, %v14174_v55  ;;  %v19330_v58 = vpop.f32.mrb[155].mxu0  ;;  %v19812_v59 = vpop.f32.mrb[3].mxu1 }
0x10ab   :  { %19850 = vmatprep.mubr.msk.f32.mxu0 %vm21660_vm0, %v21661_v4  ;;  %21232 = vmatpush3.bf16.msra.mxu0 %v21231_v32  ;;  %v14988_v58 = vld [vmem:[%s26705_s9 + $0x380] sm:$0xff]  ;;  %v14989_v59 = vld [vmem:[%s26705_s9 + $0x388] sm:$0xff] }
0x10ac   :  { %21239 = vmatprep.subr.bf16.mxu0 %v21659_v0 }
0x10ad   :  { %v12433_v7 = vpop.f32.mrb[156].mxu0  ;;  %v14179_v47 = vpop.f32.mrb[4].mxu1 }
0x10ae   :  { %v26428_v62 = vadd.f32 %v12433_v7, %v26358_v50  ;;  %19851 = vmatmul.mubr.msk.f32.gmra.mrb[6].mxu0 %vm72_vm1, %v14179_v47  ;;  %v19378_v8 = vpop.f32.mrb[157].mxu0  ;;  %v19815_v18 = vpop.f32.mrb[5].mxu1 }
0x10af   :  { %19853 = vmatprep.mubr.msk.f32.mxu0 %vm21660_vm0, %v21661_v4 }
0x10b1   :  { %v12438_v31 = vpop.f32.mrb[158].mxu0  ;;  %v14184_v34 = vpop.f32.mrb[6].mxu1 }
0x10b2   :  { %v26434_v51 = vadd.f32 %v12438_v31, %v26364_v6  ;;  %19854 = vmatmul.mubr.msk.f32.gmra.mrb[8].mxu0 %vm72_vm1, %v14184_v34  ;;  %v19381_v44 = vpop.f32.mrb[159].mxu0  ;;  %v19818_v13 = vpop.f32.mrb[7].mxu1  ;;  %v14726_v6 = vld [vmem:[%s26705_s9 + $0x358] sm:$0xff]  ;;  %v21258_v31 = vpack.c.bf16 %v14989_v59, %v14988_v58  ;;  %v14990_v34 = vld [vmem:[%s26705_s9 + $0x390] sm:$0xff] }
0x10b3   :  { %19856 = vmatprep.mubr.msk.f32.mxu0 %vm21660_vm0, %v21661_v4  ;;  %v21243_v24 = vpack.c.bf16 %v14726_v6, %v14725_v3 }
0x10b5   :  { %v12443_v26 = vpop.f32.mrb[160].mxu0  ;;  %v14189_v30 = vpop.f32.mrb[8].mxu1 }
0x10b6   :  { %v26446_v50 = vadd.f32 %v12443_v26, %v26376_v19  ;;  %19857 = vmatmul.mubr.msk.f32.gmra.mrb[10].mxu0 %vm72_vm1, %v14189_v30  ;;  %v19384_v53 = vpop.f32.mrb[161].mxu0  ;;  %v19821_v1 = vpop.f32.mrb[9].mxu1  ;;  %v14727_v19 = vld [vmem:[%s26705_s9 + $0x360] sm:$0xff] }
0x10b7   :  { %19904 = vmatprep.mubr.msk.f32.mxu0 %vm21660_vm0, %v21661_v4  ;;  %v21246_v17 = vpack.c.bf16 %v14728_v22, %v14727_v19  ;;  %v14993_v53 = vld [vmem:[%s26705_s9 + $0x3a8] sm:$0xff] }
0x10b9   :  { %v12448_v9 = vpop.f32.mrb[162].mxu0  ;;  %v14424_v10 = vpop.f32.mrb[10].mxu1 }
0x10ba   :  { %v26458_v12 = vadd.f32 %v12448_v9, %v26388_v41  ;;  %19905 = vmatmul.mubr.msk.f32.vlgmr.msra.gmra.mrb[12].mxu0 %vm72_vm1, %v14424_v10  ;;  %v19387_v15 = vpop.f32.mrb[163].mxu0  ;;  %v19869_v16 = vpop.f32.mrb[11].mxu1  ;;  %v14729_v41 = vld [vmem:[%s26705_s9 + $0x370] sm:$0xff] }
0x10bb   :  { %19907 = vmatprep.mubr.msk.f32.mxu0 %vm21660_vm0, %v21661_v4  ;;  %21241 = vmatpush3.bf16.msra.mxu0 %v21240_v57  ;;  %v21249_v42 = vpack.c.bf16 %v14730_v54, %v14729_v41  ;;  %v14995_v15 = vld [vmem:[%s26705_s9 + $0x3b8] sm:$0xff] }
0x10bc   :  { %21242 = vmatprep.subr.bf16.mxu0 %v21659_v0 }
0x10bd   :  { %v12453_v20 = vpop.f32.mrb[164].mxu0  ;;  %v14429_v60 = vpop.f32.mrb[12].mxu1 }
0x10be   :  { %v26471_v11 = vadd.f32 %v12453_v20, %v26401_v14  ;;  %19908 = vmatmul.mubr.msk.f32.gmra.mrb[14].mxu0 %vm72_vm1, %v14429_v60  ;;  %v19390_v23 = vpop.f32.mrb[165].mxu0  ;;  %v19872_v21 = vpop.f32.mrb[13].mxu1 }
0x10bf   :  { %19910 = vmatprep.mubr.msk.f32.mxu0 %vm21660_vm0, %v21661_v4  ;;  %21244 = vmatpush3.bf16.msra.mxu0 %v21243_v24 }
0x10c0   :  { %21245 = vmatprep.subr.bf16.mxu0 %v21659_v0 }
0x10c1   :  { %v12458_v2 = vpop.f32.mrb[166].mxu0  ;;  %v14434_v39 = vpop.f32.mrb[14].mxu1 }
0x10c2   :  { %v26484_v61 = vadd.f32 %v12458_v2, %v26414_v5  ;;  %19911 = vmatmul.mubr.msk.f32.gmra.mrb[16].mxu0 %vm72_vm1, %v14434_v39  ;;  %v19393_v63 = vpop.f32.mrb[167].mxu0  ;;  %v19875_v49 = vpop.f32.mrb[15].mxu1 }
0x10c3   :  { %19913 = vmatprep.mubr.msk.f32.mxu0 %vm21660_vm0, %v21661_v4  ;;  %21247 = vmatpush3.bf16.msra.mxu0 %v21246_v17 }
0x10c4   :  { %21248 = vmatprep.subr.bf16.mxu0 %v21659_v0 }
0x10c5   :  { %v12463_v14 = vpop.f32.mrb[168].mxu0  ;;  %v14439_v45 = vpop.f32.mrb[16].mxu1 }
0x10c6   :  { %v26491_v52 = vadd.f32 %v12463_v14, %v26421_v43  ;;  %19914 = vmatmul.mubr.msk.f32.gmra.mrb[18].mxu0 %vm72_vm1, %v14439_v45  ;;  %v19396_v25 = vpop.f32.mrb[169].mxu0  ;;  %v19878_v35 = vpop.f32.mrb[17].mxu1 }
0x10c7   :  { %19916 = vmatprep.mubr.msk.f32.mxu0 %vm21660_vm0, %v21661_v4  ;;  %21250 = vmatpush3.bf16.msra.mxu0 %v21249_v42  ;;  %v15253_v25 = vld [vmem:[%s26705_s9 + $0x3c0] sm:$0xff]  ;;  %v15254_v35 = vld [vmem:[%s26705_s9 + $0x3c8] sm:$0xff] }
0x10c8   :  { %21257 = vmatprep.subr.bf16.mxu0 %v21659_v0 }
0x10c9   :  { %v12698_v27 = vpop.f32.mrb[170].mxu0  ;;  %v14444_v40 = vpop.f32.mrb[18].mxu1 }
0x10ca   :  { %v26498_v56 = vadd.f32 %v12698_v27, %v26428_v62  ;;  %19917 = vmatmul.mubr.msk.f32.gmra.mrb[20].mxu0 %vm72_vm1, %v14444_v40  ;;  %v19444_v5 = vpop.f32.mrb[171].mxu0  ;;  %v19881_v48 = vpop.f32.mrb[19].mxu1 }
0x10cb   :  { %19919 = vmatprep.mubr.msk.f32.mxu0 %vm21660_vm0, %v21661_v4 }
0x10cd   :  { %v12703_v29 = vpop.f32.mrb[172].mxu0  ;;  %v14449_v32 = vpop.f32.mrb[20].mxu1 }
0x10ce   :  { %v26504_v33 = vadd.f32 %v12703_v29, %v26434_v51  ;;  %19920 = vmatmul.mubr.msk.f32.gmra.mrb[22].mxu0 %vm72_vm1, %v14449_v32  ;;  %v19447_v55 = vpop.f32.mrb[173].mxu0  ;;  %v19884_v43 = vpop.f32.mrb[21].mxu1  ;;  %v14991_v51 = vld [vmem:[%s26705_s9 + $0x398] sm:$0xff]  ;;  %v21276_v29 = vpack.c.bf16 %v15254_v35, %v15253_v25  ;;  %v15255_v32 = vld [vmem:[%s26705_s9 + $0x3d0] sm:$0xff] }
0x10cf   :  { %19922 = vmatprep.mubr.msk.f32.mxu0 %vm21660_vm0, %v21661_v4  ;;  %v21261_v30 = vpack.c.bf16 %v14991_v51, %v14990_v34 }
0x10d1   :  { %v12708_v7 = vpop.f32.mrb[174].mxu0  ;;  %v14454_v47 = vpop.f32.mrb[22].mxu1 }
0x10d2   :  { %v26516_v62 = vadd.f32 %v12708_v7, %v26446_v50  ;;  %19923 = vmatmul.mubr.msk.f32.gmra.mrb[24].mxu0 %vm72_vm1, %v14454_v47  ;;  %v19450_v8 = vpop.f32.mrb[175].mxu0  ;;  %v19887_v18 = vpop.f32.mrb[23].mxu1  ;;  %v14992_v50 = vld [vmem:[%s26705_s9 + $0x3a0] sm:$0xff] }
0x10d3   :  { %19970 = vmatprep.mubr.msk.f32.mxu0 %vm21660_vm0, %v21661_v4  ;;  %v21264_v10 = vpack.c.bf16 %v14993_v53, %v14992_v50  ;;  %v15258_v8 = vld [vmem:[%s26705_s9 + $0x3e8] sm:$0xff] }
0x10d5   :  { %v12713_v44 = vpop.f32.mrb[176].mxu0  ;;  %v14689_v13 = vpop.f32.mrb[24].mxu1 }
0x10d6   :  { %v26528_v28 = vadd.f32 %v12713_v44, %v26458_v12  ;;  %19971 = vmatmul.mubr.msk.f32.vlgmr.msra.gmra.mrb[26].mxu0 %vm72_vm1, %v14689_v13  ;;  %v19453_v46 = vpop.f32.mrb[177].mxu0  ;;  %v19935_v26 = vpop.f32.mrb[25].mxu1  ;;  %v14994_v12 = vld [vmem:[%s26705_s9 + $0x3b0] sm:$0xff] }
0x10d7   :  { %19973 = vmatprep.mubr.msk.f32.mxu0 %vm21660_vm0, %v21661_v4  ;;  %21259 = vmatpush3.bf16.msra.mxu0 %v21258_v31  ;;  %v21267_v60 = vpack.c.bf16 %v14995_v15, %v14994_v12  ;;  %v15260_v46 = vld [vmem:[%s26705_s9 + $0x3f8] sm:$0xff] }
0x10d8   :  { %21260 = vmatprep.subr.bf16.mxu0 %v21659_v0 }
0x10d9   :  { %v12718_v1 = vpop.f32.mrb[178].mxu0  ;;  %v14694_v57 = vpop.f32.mrb[26].mxu1 }
0x10da   :  { %v26541_v3 = vadd.f32 %v12718_v1, %v26471_v11  ;;  %19974 = vmatmul.mubr.msk.f32.gmra.mrb[28].mxu0 %vm72_vm1, %v14694_v57  ;;  %v19456_v6 = vpop.f32.mrb[179].mxu0  ;;  %v19938_v9 = vpop.f32.mrb[27].mxu1 }
0x10db   :  { %19976 = vmatprep.mubr.msk.f32.mxu0 %vm21660_vm0, %v21661_v4  ;;  %21262 = vmatpush3.bf16.msra.mxu0 %v21261_v30 }
0x10dc   :  { %21263 = vmatprep.subr.bf16.mxu0 %v21659_v0 }
0x10dd   :  { %v12723_v16 = vpop.f32.mrb[180].mxu0  ;;  %v14699_v24 = vpop.f32.mrb[28].mxu1 }
0x10de   :  { %v26554_v19 = vadd.f32 %v12723_v16, %v26484_v61  ;;  %19977 = vmatmul.mubr.msk.f32.gmra.mrb[30].mxu0 %vm72_vm1, %v14699_v24  ;;  %v19459_v22 = vpop.f32.mrb[181].mxu0  ;;  %v19941_v20 = vpop.f32.mrb[29].mxu1 }
0x10df   :  { %19979 = vmatprep.mubr.msk.f32.mxu0 %vm21660_vm0, %v21661_v4  ;;  %21265 = vmatpush3.bf16.msra.mxu0 %v21264_v10 }
0x10e0   :  { %21266 = vmatprep.subr.bf16.mxu0 %v21659_v0 }
0x10e1   :  { %v12728_v11 = vpop.f32.mrb[182].mxu0  ;;  %v14704_v23 = vpop.f32.mrb[30].mxu1 }
0x10e2   :  { %v26561_v21 = vadd.f32 %v12728_v11, %v26491_v52  ;;  %19980 = vmatmul.mubr.msk.f32.gmra.mrb[32].mxu0 %vm72_vm1, %v14704_v23  ;;  %v19462_v17 = vpop.f32.mrb[183].mxu0  ;;  %v19944_v41 = vpop.f32.mrb[31].mxu1 }
0x10e3   :  { %19982 = vmatprep.mubr.msk.f32.mxu0 %vm21660_vm0, %v21661_v4  ;;  %21268 = vmatpush3.bf16.msra.mxu0 %v21267_v60 }
0x10e4   :  { %21275 = vmatprep.subr.bf16.mxu0 %v21659_v0 }
0x10e5   :  { %v12963_v54 = vpop.f32.mrb[184].mxu0  ;;  %v14709_v2 = vpop.f32.mrb[32].mxu1 }
0x10e6   :  { %v26568_v39 = vadd.f32 %v12963_v54, %v26498_v56  ;;  %19983 = vmatmul.mubr.msk.f32.gmra.mrb[34].mxu0 %vm72_vm1, %v14709_v2  ;;  %v19510_v61 = vpop.f32.mrb[185].mxu0  ;;  %v19947_v63 = vpop.f32.mrb[33].mxu1 }
0x10e7   :  { %19985 = vmatprep.mubr.msk.f32.mxu0 %vm21660_vm0, %v21661_v4 }
0x10e9   :  { %v12968_v49 = vpop.f32.mrb[186].mxu0  ;;  %v14714_v42 = vpop.f32.mrb[34].mxu1 }
0x10ea   :  { %v26574_v14 = vadd.f32 %v12968_v49, %v26504_v33  ;;  %19986 = vmatmul.mubr.msk.f32.gmra.mrb[36].mxu0 %vm72_vm1, %v14714_v42  ;;  %v19513_v45 = vpop.f32.mrb[187].mxu0  ;;  %v19950_v52 = vpop.f32.mrb[35].mxu1  ;;  %v15256_v33 = vld [vmem:[%s26705_s9 + $0x3d8] sm:$0xff] }
0x10eb   :  { %19988 = vmatprep.mubr.msk.f32.mxu0 %vm21660_vm0, %v21661_v4  ;;  %v21279_v47 = vpack.c.bf16 %v15256_v33, %v15255_v32 }
0x10ed   :  { %v12973_v27 = vpop.f32.mrb[188].mxu0  ;;  %v14719_v40 = vpop.f32.mrb[36].mxu1 }
0x10ee   :  { %v26586_v56 = vadd.f32 %v12973_v27, %v26516_v62  ;;  %19989 = vmatmul.mubr.msk.f32.gmra.mrb[38].mxu0 %vm72_vm1, %v14719_v40  ;;  %v19516_v5 = vpop.f32.mrb[189].mxu0  ;;  %v19953_v48 = vpop.f32.mrb[37].mxu1  ;;  %v15257_v62 = vld [vmem:[%s26705_s9 + $0x3e0] sm:$0xff] }
0x10ef   :  { %20036 = vmatprep.mubr.msk.f32.mxu0 %vm21660_vm0, %v21661_v4  ;;  %v21282_v13 = vpack.c.bf16 %v15258_v8, %v15257_v62 }
0x10f1   :  { %v12978_v55 = vpop.f32.mrb[190].mxu0  ;;  %v14954_v43 = vpop.f32.mrb[38].mxu1 }
0x10f2   :  { %v26598_v58 = vadd.f32 %v12978_v55, %v26528_v28  ;;  %20037 = vmatmul.mubr.msk.f32.vlgmr.msra.gmra.mrb[40].mxu0 %vm72_vm1, %v14954_v43  ;;  %v19519_v59 = vpop.f32.mrb[191].mxu0  ;;  %v20001_v7 = vpop.f32.mrb[39].mxu1  ;;  %v15259_v28 = vld [vmem:[%s26705_s9 + $0x3f0] sm:$0xff] }
0x10f3   :  { %20039 = vmatprep.mubr.msk.f32.mxu0 %vm21660_vm0, %v21661_v4  ;;  %21277 = vmatpush3.bf16.msra.mxu0 %v21276_v29  ;;  %v21285_v57 = vpack.c.bf16 %v15260_v46, %v15259_v28 }
0x10f4   :  { %21278 = vmatprep.subr.bf16.mxu0 %v21659_v0 }
0x10f5   :  { %v12983_v18 = vpop.f32.mrb[192].mxu0  ;;  %v14959_v31 = vpop.f32.mrb[40].mxu1 }
0x10f6   :  { %v13001_v34 = vadd.f32 %v12983_v18, %v26541_v3  ;;  %20040 = vmatmul.mubr.msk.f32.gmra.mrb[56].mxu0 %vm72_vm1, %v14959_v31  ;;  %v19522_v51 = vpop.f32.mrb[193].mxu0  ;;  %v20004_v44 = vpop.f32.mrb[41].mxu1 }
0x10f7   :  { %20042 = vmatprep.mubr.msk.f32.mxu0 %vm21660_vm0, %v21661_v4  ;;  %21280 = vmatpush3.bf16.msra.mxu0 %v21279_v47 }
0x10f8   :  { %21281 = vmatprep.subr.bf16.mxu0 %v21659_v0 }
0x10f9   :  { %v12988_v26 = vpop.f32.mrb[194].mxu0  ;;  %v14964_v30 = vpop.f32.mrb[42].mxu1 }
0x10fa   :  { %v13002_v50 = vadd.f32 %v12988_v26, %v26554_v19  ;;  %20043 = vmatmul.mubr.msk.f32.gmra.mrb[58].mxu0 %vm72_vm1, %v14964_v30  ;;  %v19525_v53 = vpop.f32.mrb[195].mxu0  ;;  %v20007_v1 = vpop.f32.mrb[43].mxu1 }
0x10fb   :  { %20045 = vmatprep.mubr.msk.f32.mxu0 %vm21660_vm0, %v21661_v4  ;;  %21283 = vmatpush3.bf16.msra.mxu0 %v21282_v13 }
0x10fc   :  { %21284 = vmatprep.subr.bf16.mxu0 %v21659_v0 }
0x10fd   :  { %v12993_v3 = vpop.f32.mrb[196].mxu0  ;;  %v14969_v6 = vpop.f32.mrb[44].mxu1 }
0x10fe   :  { %v13003_v9 = vadd.f32 %v12993_v3, %v26561_v21  ;;  %20046 = vmatmul.mubr.msk.f32.gmra.mrb[60].mxu0 %vm72_vm1, %v14969_v6  ;;  %v19528_v10 = vpop.f32.mrb[197].mxu0  ;;  %v20010_v12 = vpop.f32.mrb[45].mxu1 }
0x10ff   :  { %20048 = vmatprep.mubr.msk.f32.mxu0 %vm21660_vm0, %v21661_v4  ;;  %21286 = vmatpush3.bf16.msra.mxu0 %v21285_v57 }
0x1101   :  { %v13228_v15 = vpop.f32.mrb[198].mxu0  ;;  %v14974_v16 = vpop.f32.mrb[46].mxu1 }
0x1102   :  { %v13262_v24 = vadd.f32 %v13228_v15, %v26568_v39  ;;  %20049 = vmatmul.mubr.msk.f32.gmra.mrb[62].mxu0 %vm72_vm1, %v14974_v16  ;;  %v19576_v19 = vpop.f32.mrb[199].mxu0  ;;  %v20013_v0 = vpop.f32.mrb[47].mxu1 }
0x1103   :  { %20051 = vmatprep.mubr.msk.f32.mxu0 %vm21660_vm0, %v21661_v4 }
0x1105   :  { %v13233_v22 = vpop.f32.mrb[200].mxu0  ;;  %v14979_v20 = vpop.f32.mrb[48].mxu1 }
0x1106   :  { %v13263_v60 = vadd.f32 %v13233_v22, %v26574_v14  ;;  %20052 = vmatmul.mubr.msk.f32.gmra.mrb[64].mxu0 %vm72_vm1, %v14979_v20  ;;  %v19579_v11 = vpop.f32.mrb[201].mxu0  ;;  %v20016_v23 = vpop.f32.mrb[49].mxu1 }
0x1107   :  { %20054 = vmatprep.mubr.msk.f32.mxu0 %vm21660_vm0, %v21661_v4 }
0x1109   :  { %v13238_v21 = vpop.f32.mrb[202].mxu0  ;;  %v14984_v17 = vpop.f32.mrb[50].mxu1 }
0x110a   :  { %v13264_v41 = vadd.f32 %v13238_v21, %v26586_v56  ;;  %20055 = vmatmul.mubr.msk.f32.gmra.mrb[66].mxu0 %vm72_vm1, %v14984_v17  ;;  %v19582_v54 = vpop.f32.mrb[203].mxu0  ;;  %v20019_v2 = vpop.f32.mrb[51].mxu1 }
0x110b   :  { %20102 = vmatprep.mubr.msk.f32.mxu0 %vm21660_vm0, %v21661_v4 }
0x110d   :  { %v13243_v39 = vpop.f32.mrb[204].mxu0  ;;  %v15219_v61 = vpop.f32.mrb[52].mxu1 }
0x110e   :  { %v13265_v63 = vadd.f32 %v13243_v39, %v26598_v58  ;;  %20103 = vmatmul.mubr.msk.f32.vlgmr.msra.gmra.mrb[68].mxu0 %vm72_vm1, %v15219_v61  ;;  %v19585_v49 = vpop.f32.mrb[205].mxu0  ;;  %v20067_v42 = vpop.f32.mrb[53].mxu1 }
0x110f   :  { %20105 = vmatprep.mubr.msk.f32.mxu0 %vm21660_vm0, %v21661_v4 }
0x1111   :  { %v13248_v14 = vpop.f32.mrb[206].mxu0  ;;  %v15224_v45 = vpop.f32.mrb[54].mxu1 }
0x1112   :  { %v13266_v52 = vadd.f32 %v13248_v14, %v13001_v34  ;;  %20106 = vmatmul.mubr.msk.f32.gmra.mrb[70].mxu0 %vm72_vm1, %v15224_v45  ;;  %v19588_v25 = vpop.f32.mrb[207].mxu0  ;;  %v20070_v35 = vpop.f32.mrb[55].mxu1 }
0x1113   :  { %20108 = vmatprep.mubr.msk.f32.mxu0 %vm21660_vm0, %v21661_v4 }
0x1115   :  { %v13253_v27 = vpop.f32.mrb[208].mxu0  ;;  %v15229_v40 = vpop.f32.mrb[56].mxu1 }
0x1116   :  { %v13267_v56 = vadd.f32 %v13253_v27, %v13002_v50  ;;  %20109 = vmatmul.mubr.msk.f32.gmra.mrb[72].mxu0 %vm72_vm1, %v15229_v40  ;;  %v19591_v5 = vpop.f32.mrb[209].mxu0  ;;  %v20073_v48 = vpop.f32.mrb[57].mxu1 }
0x1117   :  { %20111 = vmatprep.mubr.msk.f32.mxu0 %vm21660_vm0, %v21661_v4 }
0x1119   :  { %v13258_v29 = vpop.f32.mrb[210].mxu0  ;;  %v15234_v32 = vpop.f32.mrb[58].mxu1 }
0x111a   :  { %v13268_v33 = vadd.f32 %v13258_v29, %v13003_v9  ;;  %20112 = vmatmul.mubr.msk.f32.gmra.mrb[74].mxu0 %vm72_vm1, %v15234_v32  ;;  %v19594_v55 = vpop.f32.mrb[211].mxu0  ;;  %v20076_v43 = vpop.f32.mrb[59].mxu1 }
0x111b   :  { %20114 = vmatprep.mubr.msk.f32.mxu0 %vm21660_vm0, %v21661_v4  ;;  %v21662_v43 = vmov 0  }
0x111c   :  { %21651 = vset.pattern.permute.xlu0 %v21662_v43  ;;  %21652 = vset.pattern.permute.xlu1 %v21662_v43 }
0x111d   :  { %v13493_v58 = vpop.f32.mrb[212].mxu0  ;;  %v15239_v59 = vpop.f32.mrb[60].mxu1 }
0x111e   :  { %v13527_v7 = vadd.f32 %v13493_v58, %v13262_v24  ;;  %20115 = vmatmul.mubr.msk.f32.gmra.mrb[76].mxu0 %vm72_vm1, %v15239_v59  ;;  %v19642_v47 = vpop.f32.mrb[213].mxu0  ;;  %v20079_v62 = vpop.f32.mrb[61].mxu1 }
0x111f   :  { %20117 = vmatprep.mubr.msk.f32.mxu0 %vm21660_vm0, %v21661_v4 }
0x1121   :  { %v13498_v8 = vpop.f32.mrb[214].mxu0  ;;  %v15244_v18 = vpop.f32.mrb[62].mxu1 }
0x1122   :  { %v13528_v31 = vadd.f32 %v13498_v8, %v13263_v60  ;;  %20118 = vmatmul.mubr.msk.f32.gmra.mrb[78].mxu0 %vm72_vm1, %v15244_v18  ;;  %v19645_v34 = vpop.f32.mrb[215].mxu0  ;;  %v20082_v51 = vpop.f32.mrb[63].mxu1 }
0x1123   :  { %20120 = vmatprep.mubr.msk.f32.mxu0 %vm21660_vm0, %v21661_v4 }
0x1125   :  { %v13503_v44 = vpop.f32.mrb[216].mxu0  ;;  %v15249_v13 = vpop.f32.mrb[64].mxu1 }
0x1126   :  { %v13529_v28 = vadd.f32 %v13503_v44, %v13264_v41  ;;  %20121 = vmatmul.mubr.msk.f32.gmra.mrb[80].mxu0 %vm72_vm1, %v15249_v13  ;;  %v19648_v46 = vpop.f32.mrb[217].mxu0  ;;  %v20085_v26 = vpop.f32.mrb[65].mxu1 }
0x1129   :  { %v13508_v30 = vpop.f32.mrb[218].mxu0 }
0x112a   :  { %v13530_v50 = vadd.f32 %v13508_v30, %v13265_v63  ;;  %v19651_v53 = vpop.f32.mrb[219].mxu0 }
0x112d   :  { %v13513_v1 = vpop.f32.mrb[220].mxu0 }
0x112e   :  { %v13531_v57 = vadd.f32 %v13513_v1, %v13266_v52  ;;  %v19654_v3 = vpop.f32.mrb[221].mxu0 }
0x1131   :  { %v13518_v6 = vpop.f32.mrb[222].mxu0 }
0x1132   :  { %v13532_v9 = vadd.f32 %v13518_v6, %v13267_v56  ;;  %v19657_v10 = vpop.f32.mrb[223].mxu0 }
0x1135   :  { %v13523_v12 = vpop.f32.mrb[224].mxu0 }
0x1136   :  { %v13533_v15 = vadd.f32 %v13523_v12, %v13268_v33  ;;  %v19660_v16 = vpop.f32.mrb[225].mxu0 }
0x1139   :  { %v13758_v4 = vpop.f32.mrb[226].mxu0 }
0x113a   :  { %v13792_v24 = vadd.f32 %v13758_v4, %v13527_v7  ;;  %v19708_v19 = vpop.f32.mrb[227].mxu0 }
0x113d   :  { %v13763_v0 = vpop.f32.mrb[228].mxu0 }
0x113e   :  { %v13793_v22 = vadd.f32 %v13763_v0, %v13528_v31  ;;  %v19711_v20 = vpop.f32.mrb[229].mxu0 }
0x1141   :  { %v13768_v60 = vpop.f32.mrb[230].mxu0 }
0x1142   :  { %v13794_v11 = vadd.f32 %v13768_v60, %v13529_v28  ;;  %v19714_v23 = vpop.f32.mrb[231].mxu0 }
0x1145   :  { %v13773_v21 = vpop.f32.mrb[232].mxu0 }
0x1146   :  { %v13795_v17 = vadd.f32 %v13773_v21, %v13530_v50  ;;  %v19717_v41 = vpop.f32.mrb[233].mxu0 }
0x1149   :  { %v13778_v54 = vpop.f32.mrb[234].mxu0 }
0x114a   :  { %v13796_v2 = vadd.f32 %v13778_v54, %v13531_v57  ;;  %v19720_v39 = vpop.f32.mrb[235].mxu0 }
0x114d   :  { %v13783_v61 = vpop.f32.mrb[236].mxu0 }
0x114e   :  { %v13797_v63 = vadd.f32 %v13783_v61, %v13532_v9  ;;  %v19723_v49 = vpop.f32.mrb[237].mxu0 }
0x1151   :  { %v13788_v42 = vpop.f32.mrb[238].mxu0 }
0x1152   :  { %v13798_v14 = vadd.f32 %v13788_v42, %v13533_v15  ;;  %v19726_v45 = vpop.f32.mrb[239].mxu0 }
0x1155   :  { %v14023_v52 = vpop.f32.mrb[240].mxu0 }
0x1156   :  { %v14057_v25 = vadd.f32 %v14023_v52, %v13792_v24  ;;  %v19774_v35 = vpop.f32.mrb[241].mxu0 }
0x1159   :  { %v14028_v27 = vpop.f32.mrb[242].mxu0 }
0x115a   :  { %v14058_v40 = vadd.f32 %v14028_v27, %v13793_v22  ;;  %v19777_v56 = vpop.f32.mrb[243].mxu0 }
0x115d   :  { %v14033_v5 = vpop.f32.mrb[244].mxu0 }
0x115e   :  { %v14059_v48 = vadd.f32 %v14033_v5, %v13794_v11  ;;  %v19780_v29 = vpop.f32.mrb[245].mxu0 }
0x1161   :  { %v14038_v32 = vpop.f32.mrb[246].mxu0 }
0x1162   :  { %v14060_v33 = vadd.f32 %v14038_v32, %v13795_v17  ;;  %v19783_v55 = vpop.f32.mrb[247].mxu0 }
0x1165   :  { %v14043_v58 = vpop.f32.mrb[248].mxu0 }
0x1166   :  { %v14061_v59 = vadd.f32 %v14043_v58, %v13796_v2  ;;  %v19786_v7 = vpop.f32.mrb[249].mxu0 }
0x1169   :  { %v14048_v47 = vpop.f32.mrb[250].mxu0 }
0x116a   :  { %v14062_v62 = vadd.f32 %v14048_v47, %v13797_v63  ;;  %v19789_v8 = vpop.f32.mrb[251].mxu0 }
0x116d   :  { %v14053_v18 = vpop.f32.mrb[252].mxu0 }
0x116e   :  { %v14063_v31 = vadd.f32 %v14053_v18, %v13798_v14  ;;  %v19792_v34 = vpop.f32.mrb[253].mxu0 }
0x1171   :  { %v14288_v51 = vpop.f32.mrb[254].mxu0 }
0x1172   :  { %v14322_v44 = vadd.f32 %v14288_v51, %v14057_v25  ;;  %v19840_v13 = vpop.f32.mrb[255].mxu0 }
0x1175   :  { %v14293_v28 = vpop.f32.mrb[0].mxu0 }
0x1176   :  { %v14323_v46 = vadd.f32 %v14293_v28, %v14058_v40  ;;  %v19843_v26 = vpop.f32.mrb[1].mxu0 }
0x1179   :  { %v14298_v30 = vpop.f32.mrb[2].mxu0 }
0x117a   :  { %v14324_v50 = vadd.f32 %v14298_v30, %v14059_v48  ;;  %v19846_v53 = vpop.f32.mrb[3].mxu0 }
0x117d   :  { %v14303_v1 = vpop.f32.mrb[4].mxu0 }
0x117e   :  { %v14325_v57 = vadd.f32 %v14303_v1, %v14060_v33  ;;  %v19849_v3 = vpop.f32.mrb[5].mxu0 }
0x1181   :  { %v14308_v6 = vpop.f32.mrb[6].mxu0 }
0x1182   :  { %v14326_v9 = vadd.f32 %v14308_v6, %v14061_v59  ;;  %v19852_v10 = vpop.f32.mrb[7].mxu0 }
0x1185   :  { %v14313_v12 = vpop.f32.mrb[8].mxu0 }
0x1186   :  { %v14327_v15 = vadd.f32 %v14313_v12, %v14062_v62  ;;  %v19855_v16 = vpop.f32.mrb[9].mxu0 }
0x1189   :  { %v14318_v4 = vpop.f32.mrb[10].mxu0 }
0x118a   :  { %v14328_v24 = vadd.f32 %v14318_v4, %v14063_v31  ;;  %v19858_v19 = vpop.f32.mrb[11].mxu0 }
0x118d   :  { %v14553_v0 = vpop.f32.mrb[12].mxu0 }
0x118e   :  { %v14587_v22 = vadd.f32 %v14553_v0, %v14322_v44  ;;  %v19906_v20 = vpop.f32.mrb[13].mxu0  ;;  %v16574_v0 = vld [vmem:[%s26699_s10 + $0x20] sm:$0xff] }
0x1191   :  { %v14558_v60 = vpop.f32.mrb[14].mxu0 }
0x1192   :  { %v14588_v11 = vadd.f32 %v14558_v60, %v14323_v46  ;;  %v19909_v23 = vpop.f32.mrb[15].mxu0  ;;  %v15394_v60 = vrot.slane %v16574_v0, %v70_v38 }
0x1195   :  { %v14563_v21 = vpop.f32.mrb[16].mxu0 }
0x1196   :  { %v14589_v17 = vadd.f32 %v14563_v21, %v14324_v50  ;;  %v19912_v41 = vpop.f32.mrb[17].mxu0 }
0x1199   :  { %v14568_v54 = vpop.f32.mrb[18].mxu0 }
0x119a   :  { %v14590_v2 = vadd.f32 %v14568_v54, %v14325_v57  ;;  %v19915_v39 = vpop.f32.mrb[19].mxu0 }
0x119d   :  { %v14573_v61 = vpop.f32.mrb[20].mxu0 }
0x119e   :  { %v14591_v63 = vadd.f32 %v14573_v61, %v14326_v9  ;;  %v19918_v49 = vpop.f32.mrb[21].mxu0 }
0x11a1   :  { %v14578_v42 = vpop.f32.mrb[22].mxu0 }
0x11a2   :  { %v14592_v14 = vadd.f32 %v14578_v42, %v14327_v15  ;;  %v19921_v45 = vpop.f32.mrb[23].mxu0 }
0x11a5   :  { %v14583_v52 = vpop.f32.mrb[24].mxu0 }
0x11a6   :  { %v14593_v25 = vadd.f32 %v14583_v52, %v14328_v24  ;;  %v19924_v35 = vpop.f32.mrb[25].mxu0 }
0x11a9   :  { %v14818_v27 = vpop.f32.mrb[26].mxu0 }
0x11aa   :  { %v14852_v40 = vadd.f32 %v14818_v27, %v14587_v22  ;;  %v19972_v56 = vpop.f32.mrb[27].mxu0 }
0x11ad   :  { %v14823_v5 = vpop.f32.mrb[28].mxu0 }
0x11ae   :  { %v14853_v48 = vadd.f32 %v14823_v5, %v14588_v11  ;;  %v19975_v29 = vpop.f32.mrb[29].mxu0 }
0x11b1   :  { %v14828_v32 = vpop.f32.mrb[30].mxu0 }
0x11b2   :  { %v14854_v33 = vadd.f32 %v14828_v32, %v14589_v17  ;;  %v19978_v55 = vpop.f32.mrb[31].mxu0 }
0x11b5   :  { %v14833_v43 = vpop.f32.mrb[32].mxu0 }
0x11b6   :  { %v14855_v58 = vadd.f32 %v14833_v43, %v14590_v2  ;;  %v19981_v59 = vpop.f32.mrb[33].mxu0  ;;  %v15403_v43 = vand.u32 127, %v68_v36 }
0x11b8   :  { %vm15404_vm0 = vcmp.lt.s32.totalorder %v15403_v43, 1 }
0x11b9   :  { %v14838_v7 = vpop.f32.mrb[34].mxu0 }
0x11ba   :  { %v14856_v47 = vadd.f32 %v14838_v7, %v14591_v63  ;;  %v19984_v62 = vpop.f32.mrb[35].mxu0 }
0x11bd   :  { %v14843_v8 = vpop.f32.mrb[36].mxu0 }
0x11be   :  { %v14857_v18 = vadd.f32 %v14843_v8, %v14592_v14  ;;  %v19987_v31 = vpop.f32.mrb[37].mxu0 }
0x11c1   :  { %v14848_v34 = vpop.f32.mrb[38].mxu0 }
0x11c2   :  { %v14858_v51 = vadd.f32 %v14848_v34, %v14593_v25  ;;  %v19990_v44 = vpop.f32.mrb[39].mxu0 }
0x11c5   :  { %v15083_v13 = vpop.f32.mrb[40].mxu0 }
0x11c6   :  { %v15117_v28 = vadd.f32 %v15083_v13, %v14852_v40  ;;  %v20038_v46 = vpop.f32.mrb[41].mxu0 }
0x11c9   :  { %v15088_v26 = vpop.f32.mrb[56].mxu0 }
0x11ca   :  { %v15118_v30 = vadd.f32 %v15088_v26, %v14853_v48  ;;  %v20041_v50 = vpop.f32.mrb[57].mxu0 }
0x11cd   :  { %v15093_v53 = vpop.f32.mrb[58].mxu0 }
0x11ce   :  { %v15119_v1 = vadd.f32 %v15093_v53, %v14854_v33  ;;  %v20044_v57 = vpop.f32.mrb[59].mxu0 }
0x11d1   :  { %v15098_v3 = vpop.f32.mrb[60].mxu0 }
0x11d2   :  { %v15120_v6 = vadd.f32 %v15098_v3, %v14855_v58  ;;  %v20047_v9 = vpop.f32.mrb[61].mxu0 }
0x11d5   :  { %v15103_v10 = vpop.f32.mrb[62].mxu0 }
0x11d6   :  { %v15121_v12 = vadd.f32 %v15103_v10, %v14856_v47  ;;  %v20050_v15 = vpop.f32.mrb[63].mxu0 }
0x11d9   :  { %v15108_v16 = vpop.f32.mrb[64].mxu0 }
0x11da   :  { %v15122_v4 = vadd.f32 %v15108_v16, %v14857_v18  ;;  %v20053_v24 = vpop.f32.mrb[65].mxu0 }
0x11dd   :  { %v15113_v19 = vpop.f32.mrb[66].mxu0 }
0x11de   :  { %v15123_v22 = vadd.f32 %v15113_v19, %v14858_v51  ;;  %v20056_v20 = vpop.f32.mrb[67].mxu0 }
0x11e1   :  { %v15348_v11 = vpop.f32.mrb[68].mxu0 }
0x11e2   :  { %v15382_v23 = vadd.f32 %v15348_v11, %v15117_v28  ;;  %v20104_v21 = vpop.f32.mrb[69].mxu0 }
0x11e4   :  { %v15395_v17 = vadd.f32 %v15394_v60, %v15382_v23 }
0x11e5   :  { %v15353_v41 = vpop.f32.mrb[70].mxu0 }
0x11e6   :  { %v15383_v54 = vadd.f32 %v15353_v41, %v15118_v30  ;;  %15407 = vperm.xlu0 %21651, %v15395_v17   ;;  %v20107_v2 = vpop.f32.mrb[71].mxu0 }
0x11e8   :  { %v15396_v39 = vadd.f32 %v15394_v60, %v15383_v54 }
0x11e9   :  { %v15358_v61 = vpop.f32.mrb[72].mxu0 }
0x11ea   :  { %v15384_v63 = vadd.f32 %v15358_v61, %v15119_v1  ;;  %15412 = vperm.xlu0 %21651, %v15396_v39   ;;  %v20110_v49 = vpop.f32.mrb[73].mxu0 }
0x11ec   :  { %v15397_v42 = vadd.f32 %v15394_v60, %v15384_v63 }
0x11ed   :  { %v15363_v14 = vpop.f32.mrb[74].mxu0 }
0x11ee   :  { %v15385_v45 = vadd.f32 %v15363_v14, %v15120_v6  ;;  %15417 = vperm.xlu1 %21652, %v15397_v42   ;;  %v20113_v52 = vpop.f32.mrb[75].mxu0 }
0x11f0   :  { %v15398_v37 = vadd.f32 %v15394_v60, %v15385_v45 }
0x11f1   :  { %v15368_v38 = vpop.f32.mrb[76].mxu0 }
0x11f2   :  { %v15386_v25 = vadd.f32 %v15368_v38, %v15121_v12  ;;  %15422 = vperm.xlu1 %21652, %v15398_v37   ;;  %v20116_v35 = vpop.f32.mrb[77].mxu0 }
0x11f4   :  { %v15399_v27 = vadd.f32 %v15394_v60, %v15386_v25 }
0x11f5   :  { %v15373_v40 = vpop.f32.mrb[78].mxu0 }
0x11f6   :  { %v15387_v56 = vadd.f32 %v15373_v40, %v15122_v4  ;;  %15427 = vperm.xlu0 %21651, %v15399_v27   ;;  %v20119_v5 = vpop.f32.mrb[79].mxu0 }
0x11f8   :  { %v15400_v48 = vadd.f32 %v15394_v60, %v15387_v56 }
0x11f9   :  { %v15378_v29 = vpop.f32.mrb[80].mxu0 }
0x11fa   :  { %v15388_v32 = vadd.f32 %v15378_v29, %v15123_v22  ;;  %15432 = vperm.xlu1 %21652, %v15400_v48   ;;  %v20122_v33 = vpop.f32.mrb[81].mxu0 }
0x11fc   :  { %v15401_v55 = vadd.f32 %v15394_v60, %v15388_v32 }
0x11fe   :  { %15437 = vperm.xlu0 %21651, %v15401_v55  }
0x1265   :  { %v15408_v58 = vpop.permute.xlu0 %15407 }
0x1266   :  { %v15440_v59 = vsel %vm15404_vm0, %v15408_v58, 0.0 }
0x1267   :  { %15447 = vst [vmem:[%s26707_s11] sm:$0xff] %v15440_v59 }
0x1269   :  { %v15413_v7 = vpop.permute.xlu0 %15412 }
0x126a   :  { %v15441_v47 = vsel %vm15404_vm0, %v15413_v7, 0.0 }
0x126b   :  { %15448 = vst [vmem:[%s26707_s11 + $0x8] sm:$0xff] %v15441_v47 }
0x126d   :  { %v15418_v62 = vpop.permute.xlu1 %15417 }
0x126e   :  { %v15442_v8 = vsel %vm15404_vm0, %v15418_v62, 0.0 }
0x126f   :  { %15449 = vst [vmem:[%s26707_s11 + $0x10] sm:$0xff] %v15442_v8 }
0x1271   :  { %v15423_v36 = vpop.permute.xlu1 %15422 }
0x1272   :  { %v15443_v18 = vsel %vm15404_vm0, %v15423_v36, 0.0 }
0x1273   :  { %15450 = vst [vmem:[%s26707_s11 + $0x18] sm:$0xff] %v15443_v18 }
0x1275   :  { %v15428_v31 = vpop.permute.xlu0 %15427 }
0x1276   :  { %v15444_v34 = vsel %vm15404_vm0, %v15428_v31, 0.0 }
0x1277   :  { %15451 = vst [vmem:[%s26707_s11 + $0x20] sm:$0xff] %v15444_v34 }
0x1279   :  { %v15433_v51 = vpop.permute.xlu1 %15432 }
0x127a   :  { %v15445_v44 = vsel %vm15404_vm0, %v15433_v51, 0.0 }
0x127b   :  { %15452 = vst [vmem:[%s26707_s11 + $0x28] sm:$0xff] %v15445_v44 }
0x127d   :  { %v15438_v13 = vpop.permute.xlu0 %15437 }
0x127e   :  { %v15446_v28 = vsel %vm15404_vm0, %v15438_v13, 0.0 }
0x127f   :  { %15453 = vst [vmem:[%s26707_s11 + $0x30] sm:$0xff] %v15446_v28 }

</bundles_post_ra>
